<compile_context>
chip_gen: v7x
topology: tpu7x:2x2x1
jax: 0.10.0
libtpu: 0.0.40
codegen_flags: <defaults>
</compile_context>

<pallas_src>
import functools

import jax
import jax.numpy as jnp
from jax.experimental import pallas as pl
from jax.experimental.pallas import tpu as pltpu


# ----------------------------------------------------------------------------
# Pallas kernel: fused stride-2 4x4x4 conv (phase-decomposed) + bias + LeakyReLU
# One grid step = one sample x one depth-tile of TD output planes.
# ----------------------------------------------------------------------------
def _conv_s2_lrelu_kernel(xm_ref, xh_ref, w_ref, b_ref, o_ref, *, hw, td, slope):
    # xm_ref: (4, td*hw, C8) bf16   -- 4 H/W phases, cell planes [d0, d0+td)
    # xh_ref: (4, 1, hw, C8) bf16   -- halo cell plane d0+td
    # w_ref : (4, 2, C8, Cout) bf16 -- (hw-phase, depth-phase cd, 8*Cin, Cout)
    # b_ref : (1, Cout) f32
    # o_ref : (td*hw, Cout) f32
    f32 = jnp.float32
    rt = td * hw

    # cd = 0 taps: contribute to every output row of this tile.
    y0 = jnp.dot(xm_ref[0], w_ref[0, 0], preferred_element_type=f32)
    for t in range(1, 4):
        y0 = y0 + jnp.dot(xm_ref[t], w_ref[t, 0], preferred_element_type=f32)

    # cd = 1 taps from the halo plane: contribute to the last output plane.
    yh = jnp.dot(xh_ref[0, 0], w_ref[0, 1], preferred_element_type=f32)
    for t in range(1, 4):
        yh = yh + jnp.dot(xh_ref[t, 0], w_ref[t, 1], preferred_element_type=f32)

    bias = b_ref[...]

    if td > 1:
        # cd = 1 taps from planes [d0+1, d0+td): first td-1 output planes.
        ym = jnp.dot(xm_ref[0, hw:, :], w_ref[0, 1], preferred_element_type=f32)
        for t in range(1, 4):
            ym = ym + jnp.dot(xm_ref[t, hw:, :], w_ref[t, 1],
                              preferred_element_type=f32)
        lo = y0[:rt - hw, :] + ym + bias
        o_ref[:rt - hw, :] = jnp.maximum(lo, slope * lo).astype(o_ref.dtype)

    hi = y0[rt - hw:, :] + yh + bias
    o_ref[rt - hw:, :] = jnp.maximum(hi, slope * hi).astype(o_ref.dtype)


def _conv_s2_lrelu_call(xph, xhalo, wt, b, *, cout, hw, td, do, slope=0.2):
    n = xph.shape[0]
    c8 = xph.shape[-1]
    ndt = do // td
    r = do * hw
    kernel = functools.partial(_conv_s2_lrelu_kernel, hw=hw, td=td, slope=slope)
    return pl.pallas_call(
        kernel,
        out_shape=jax.ShapeDtypeStruct((n, r, cout), jnp.float32),
        grid=(n, ndt),
        in_specs=[
            pl.BlockSpec((None, 4, td * hw, c8), lambda i, j: (i, 0, j, 0)),
            pl.BlockSpec((None, 4, 1, hw, c8), lambda i, j: (i, 0, j, 0, 0)),
            pl.BlockSpec((4, 2, c8, cout), lambda i, j: (0, 0, 0, 0)),
            pl.BlockSpec((1, cout), lambda i, j: (0, 0)),
        ],
        out_specs=pl.BlockSpec((None, td * hw, cout), lambda i, j: (i, j, 0)),
        compiler_params=pltpu.CompilerParams(
            dimension_semantics=("parallel", "parallel"),
            vmem_limit_bytes=48 * 1024 * 1024),
    )(xph, xhalo, wt, b.reshape(1, cout).astype(jnp.float32))


# ----------------------------------------------------------------------------
# Pallas kernel: conv5 (k=4, s=1, p=0) + AdaptiveAvgPool3d((1,1,1)) + bias
# ----------------------------------------------------------------------------
def _conv5_pool_kernel(p_ref, w_ref, b_ref, o_ref, *, inv_r):
    # p_ref: (Ro, K5) bf16; w_ref: (K5, Co) bf16; b_ref/o_ref: (1, Co) f32
    y = jnp.dot(p_ref[...], w_ref[...], preferred_element_type=jnp.float32)
    o_ref[...] = (jnp.sum(y, axis=0, keepdims=True) * inv_r
                  + b_ref[...]).astype(o_ref.dtype)


def _conv5_pool_call(p5, w5m, b5):
    n, ro, k5 = p5.shape
    co = w5m.shape[1]
    kernel = functools.partial(_conv5_pool_kernel, inv_r=1.0 / float(ro))
    out = pl.pallas_call(
        kernel,
        out_shape=jax.ShapeDtypeStruct((n, 1, co), jnp.float32),
        grid=(n,),
        in_specs=[
            pl.BlockSpec((None, ro, k5), lambda i: (i, 0, 0)),
            pl.BlockSpec((k5, co), lambda i: (0, 0)),
            pl.BlockSpec((1, co), lambda i: (0, 0)),
        ],
        out_specs=pl.BlockSpec((None, 1, co), lambda i: (i, 0, 0)),
        compiler_params=pltpu.CompilerParams(
            dimension_semantics=("parallel",),
            vmem_limit_bytes=48 * 1024 * 1024),
    )(p5, w5m, b5.reshape(1, co).astype(jnp.float32))
    return out.reshape(n, co)


# ----------------------------------------------------------------------------
# Wrapper-side data prep (pure layout work in XLA, kept small)
# ----------------------------------------------------------------------------
def _pick_td(do, hw, row_budget):
    """Depth tile: divisor of Do with (td*hw) % 8 == 0, as large as the budget allows."""
    cands = [td for td in range(1, do + 1)
             if do % td == 0 and (td * hw) % 8 == 0]
    # TODO(synk): fall back to whole-sample blocks when no 8-row-aligned depth tile exists.
    assert cands, "no valid depth tile for this shape"
    within = [td for td in cands if td * hw <= row_budget]
    return max(within) if within else min(cands)


def _prep_s2(x, row_budget):
    """x: (N, D, H, W, C) f32 -> phase inputs for a k=4, s=2, p=1 conv."""
    n, d, h, w, c = x.shape
    do, ho, wo = (d - 2) // 2 + 1, (h - 2) // 2 + 1, (w - 2) // 2 + 1
    pd, ph, pw = 2 * do + 1 - d, 2 * ho + 1 - h, 2 * wo + 1 - w
    xp = jnp.pad(x, ((0, 0), (1, pd), (1, ph), (1, pw), (0, 0)))
    dc, hc, wc = (d + 1 + pd) // 2, (h + 1 + ph) // 2, (w + 1 + pw) // 2
    # space-to-depth by 2: cell channels ordered (rd, rh, rw, ci)
    cells = xp.reshape(n, dc, 2, hc, 2, wc, 2, c)
    cells = cells.transpose(0, 1, 3, 5, 2, 4, 6, 7).reshape(n, dc, hc, wc, 8 * c)
    hw = ho * wo
    phases = []
    for ch in (0, 1):
        for cw in (0, 1):
            phases.append(
                cells[:, :, ch:ch + ho, cw:cw + wo, :].reshape(n, dc, hw, 8 * c))
    xf = jnp.stack(phases, axis=1).astype(jnp.bfloat16)   # (N, 4, Dc, HW, 8C)
    td = _pick_td(do, hw, row_budget)
    xph = xf.reshape(n, 4, dc * hw, 8 * c)                 # main, row-flattened
    xhalo = xf[:, :, td::td]                               # (N, 4, Do//td, HW, 8C)
    return xph, xhalo, (do, ho, wo), td


def _w_s2(w):
    """(Cout, Cin, 4,4,4) -> (4 hw-phases, 2 depth-phases, 8*Cin, Cout), bf16."""
    co, ci = w.shape[:2]
    w8 = w.reshape(co, ci, 2, 2, 2, 2, 2, 2)        # (co, ci, cd, rd, ch, rh, cw, rw)
    wt = jnp.transpose(w8, (4, 6, 2, 3, 5, 7, 1, 0))  # (ch, cw, cd, rd, rh, rw, ci, co)
    return wt.reshape(4, 2, 8 * ci, co).astype(jnp.bfloat16)


def _im2col_s1_k4(x):
    """k=4, s=1, p=0 patches for conv5.  x: (N, D, H, W, C) -> (N, Ro, 64*C) bf16."""
    n, d, h, w, c = x.shape
    do, ho, wo = d - 3, h - 3, w - 3
    taps = []
    for kd in range(4):
        for kh in range(4):
            for kw in range(4):
                taps.append(
                    x[:, kd:kd + do, kh:kh + ho, kw:kw + wo, :]
                    .reshape(n, do * ho * wo, c))
    pat = jnp.stack(taps, axis=2)                    # (N, Ro, 64, C)
    return pat.reshape(n, do * ho * wo, 64 * c).astype(jnp.bfloat16)


def _w_to_mat(w):
    """(Cout, Cin, 4,4,4) -> (64*Cin, Cout), bf16, matching _im2col_s1_k4 order."""
    co, ci, kd, kh, kw = w.shape
    return jnp.transpose(w, (2, 3, 4, 1, 0)).reshape(kd * kh * kw * ci,
                                                     co).astype(jnp.bfloat16)


# TODO(synk): SNConv3d's spectral-norm power iteration runs as plain-JAX weight
# preprocessing (same reparameterization as torch), not inside a Pallas kernel.
def _spectral_normalize(w, seed, n_iter=3, eps=1e-12):
    co = w.shape[0]
    wm = w.reshape(co, -1).astype(jnp.float32)
    u = jax.random.normal(jax.random.PRNGKey(seed), (co,), jnp.float32)
    u = u / (jnp.linalg.norm(u) + eps)
    v = wm.T @ u
    v = v / (jnp.linalg.norm(v) + eps)
    for _ in range(n_iter):
        v = wm.T @ u
        v = v / (jnp.linalg.norm(v) + eps)
        u = wm @ v
        u = u / (jnp.linalg.norm(u) + eps)
    sigma = jnp.dot(u, wm @ v)
    return w / sigma


# ----------------------------------------------------------------------------
# Sub_Discriminator forward (matches the PyTorch module semantics)
# ----------------------------------------------------------------------------
def sub_discriminator_forward(h, params, num_class=0, row_budget=2048):
    """h: (N, 1, D, H, W) float32 (NCDHW)."""
    n = h.shape[0]
    x = jnp.transpose(h, (0, 2, 3, 4, 1)).astype(jnp.float32)   # NDHWC

    for name in ("2", "3", "4"):                                 # conv2..conv4
        w = params["w" + name]
        b = params["b" + name]
        cout = w.shape[0]
        xph, xhalo, (do, ho, wo), td = _prep_s2(x, row_budget)
        wt = _w_s2(w)
        y = _conv_s2_lrelu_call(xph, xhalo, wt, b,
                                cout=cout, hw=ho * wo, td=td, do=do)
        x = y.reshape(n, do, ho, wo, cout)

    # conv5 (k=4, s=1, p=0, Cout = 1+num_class) + global average pool
    p5 = _im2col_s1_k4(x)
    w5m = _w_to_mat(params["w5"])
    out = _conv5_pool_call(p5, w5m, params["b5"])                # (N, 1+num_class)

    if num_class == 0:
        return out.reshape(n, 1)
    return out[:, :1], out[:, 1:]


# ----------------------------------------------------------------------------
# Pure-JAX reference for the correctness check
# ----------------------------------------------------------------------------
def _ref_forward(h, params, num_class=0):
    def conv(x, w, b, s, p):
        y = jax.lax.conv_general_dilated(
            x, w, window_strides=(s,) * 3, padding=[(p, p)] * 3,
            dimension_numbers=("NCDHW", "OIDHW", "NCDHW"),
            precision=jax.lax.Precision.HIGHEST)
        return y + b.reshape(1, -1, 1, 1, 1)

    x = jax.nn.leaky_relu(conv(h, params["w2"], params["b2"], 2, 1), 0.2)
    x = jax.nn.leaky_relu(conv(x, params["w3"], params["b3"], 2, 1), 0.2)
    x = jax.nn.leaky_relu(conv(x, params["w4"], params["b4"], 2, 1), 0.2)
    x = conv(x, params["w5"], params["b5"], 1, 0)
    x = jnp.mean(x, axis=(2, 3, 4))            # AdaptiveAvgPool3d((1,1,1))
    if num_class == 0:
        return x.reshape(-1, 1)
    return x[:, :1], x[:, 1:]


# ----------------------------------------------------------------------------
if __name__ == "__main__":
    key = jax.random.PRNGKey(0)
    channel = 16            # PyTorch default is 256; small channels for the test
    num_class = 0
    n, d, h, w = 2, 32, 40, 32   # small volume; conv chain: 32->16->8->4, conv5 -> pool

    ks = jax.random.split(key, 10)

    def w_init(k, shape):
        return 0.1 * jax.random.normal(k, shape, jnp.float32)

    raw = {
        "w2": w_init(ks[0], (channel // 4, 1, 4, 4, 4)),
        "b2": 0.05 * jax.random.normal(ks[1], (channel // 4,), jnp.float32),
        "w3": w_init(ks[2], (channel // 2, channel // 4, 4, 4, 4)),
        "b3": 0.05 * jax.random.normal(ks[3], (channel // 2,), jnp.float32),
        "w4": w_init(ks[4], (channel, channel // 2, 4, 4, 4)),
        "b4": 0.05 * jax.random.normal(ks[5], (channel,), jnp.float32),
        "w5": w_init(ks[6], (1 + num_class, channel, 4, 4, 4)),
        "b5": 0.05 * jax.random.normal(ks[7], (1 + num_class,), jnp.float32),
    }
    # SNConv3d: apply spectral normalization to the conv weights once.
    params = dict(raw)
    for i, name in enumerate(("w2", "w3", "w4", "w5")):
        params[name] = _spectral_normalize(raw[name], seed=100 + i)

    h_in = jax.random.normal(ks[8], (n, 1, d, h, w), jnp.float32)

    fwd = jax.jit(functools.partial(sub_discriminator_forward,
                                    num_class=num_class, row_budget=2048))
    out = jax.block_until_ready(fwd(h_in, params))

    assert out.shape == (n, 1), out.shape
    assert bool(jnp.all(jnp.isfinite(out)))

    ref = _ref_forward(h_in, params, num_class=num_class)
    max_err = float(jnp.max(jnp.abs(out - ref)))
    assert bool(jnp.allclose(out, ref, rtol=2e-2, atol=2e-2)), max_err

    print("KERNEL_OK")
</pallas_src>

<mosaic_0001>
module attributes {stable_mosaic.version = 11 : i64} {
  func.func @_conv_s2_lrelu_kernel(%arg0: i32, %arg1: i32, %arg2: memref<1x4x1280x8xbf16, #tpu.memory_space<vmem>>, %arg3: memref<1x4x1x320x8xbf16, #tpu.memory_space<vmem>>, %arg4: memref<4x2x8x4xbf16, #tpu.memory_space<vmem>>, %arg5: memref<1x4xf32, #tpu.memory_space<vmem>>, %arg6: memref<1x1280x4xf32, #tpu.memory_space<vmem>>) attributes {dimension_semantics = [#tpu.dimension_semantics<parallel>, #tpu.dimension_semantics<parallel>], iteration_bounds = array<i64: 2, 4>, scalar_prefetch = 0 : i64, scratch_operands = 0 : i64, tpu.core_type = #tpu.core_type<tc>, window_params = [{transform_indices = @transform_0, window_bounds = array<i64: 1, 4, 1280, 8>}, {transform_indices = @transform_1, window_bounds = array<i64: 1, 4, 1, 320, 8>}, {pipeline_mode = #tpu.pipeline_mode<synchronous>, transform_indices = @transform_2, window_bounds = array<i64: 4, 2, 8, 4>}, {pipeline_mode = #tpu.pipeline_mode<synchronous>, transform_indices = @transform_3, window_bounds = array<i64: 1, 4>}, {transform_indices = @transform_4, window_bounds = array<i64: 1, 1280, 4>}]} {
    %c0 = arith.constant 0 : index
    %c0_0 = arith.constant 0 : index
    %c0_1 = arith.constant 0 : index
    %c0_2 = arith.constant 0 : index
    %0 = vector.load %arg2[%c0, %c0_0, %c0_1, %c0_2] : memref<1x4x1280x8xbf16, #tpu.memory_space<vmem>>, vector<1x1x1280x8xbf16>
    %1 = vector.shape_cast %0 : vector<1x1x1280x8xbf16> to vector<1280x8xbf16>
    %c0_3 = arith.constant 0 : index
    %c0_4 = arith.constant 0 : index
    %c0_5 = arith.constant 0 : index
    %c0_6 = arith.constant 0 : index
    %2 = vector.load %arg4[%c0_3, %c0_4, %c0_5, %c0_6] : memref<4x2x8x4xbf16, #tpu.memory_space<vmem>>, vector<1x1x8x4xbf16>
    %3 = vector.shape_cast %2 : vector<1x1x8x4xbf16> to vector<8x4xbf16>
    %cst = arith.constant dense<0.000000e+00> : vector<1280x4xf32>
    %4 = tpu.matmul %1, %3, %cst {dimension_numbers = #tpu.dot_dimension_numbers<[1], [0], [0], [1], [0, 0, 1, 1], [], []>} : vector<1280x8xbf16>, vector<8x4xbf16>, vector<1280x4xf32> -> vector<1280x4xf32>
    %c0_7 = arith.constant 0 : index
    %c1 = arith.constant 1 : index
    %c0_8 = arith.constant 0 : index
    %c0_9 = arith.constant 0 : index
    %5 = vector.load %arg2[%c0_7, %c1, %c0_8, %c0_9] : memref<1x4x1280x8xbf16, #tpu.memory_space<vmem>>, vector<1x1x1280x8xbf16>
    %6 = vector.shape_cast %5 : vector<1x1x1280x8xbf16> to vector<1280x8xbf16>
    %c1_10 = arith.constant 1 : index
    %c0_11 = arith.constant 0 : index
    %c0_12 = arith.constant 0 : index
    %c0_13 = arith.constant 0 : index
    %7 = vector.load %arg4[%c1_10, %c0_11, %c0_12, %c0_13] : memref<4x2x8x4xbf16, #tpu.memory_space<vmem>>, vector<1x1x8x4xbf16>
    %8 = vector.shape_cast %7 : vector<1x1x8x4xbf16> to vector<8x4xbf16>
    %cst_14 = arith.constant dense<0.000000e+00> : vector<1280x4xf32>
    %9 = tpu.matmul %6, %8, %cst_14 {dimension_numbers = #tpu.dot_dimension_numbers<[1], [0], [0], [1], [0, 0, 1, 1], [], []>} : vector<1280x8xbf16>, vector<8x4xbf16>, vector<1280x4xf32> -> vector<1280x4xf32>
    %10 = arith.addf %4, %9 : vector<1280x4xf32>
    %c0_15 = arith.constant 0 : index
    %c2 = arith.constant 2 : index
    %c0_16 = arith.constant 0 : index
    %c0_17 = arith.constant 0 : index
    %11 = vector.load %arg2[%c0_15, %c2, %c0_16, %c0_17] : memref<1x4x1280x8xbf16, #tpu.memory_space<vmem>>, vector<1x1x1280x8xbf16>
    %12 = vector.shape_cast %11 : vector<1x1x1280x8xbf16> to vector<1280x8xbf16>
    %c2_18 = arith.constant 2 : index
    %c0_19 = arith.constant 0 : index
    %c0_20 = arith.constant 0 : index
    %c0_21 = arith.constant 0 : index
    %13 = vector.load %arg4[%c2_18, %c0_19, %c0_20, %c0_21] : memref<4x2x8x4xbf16, #tpu.memory_space<vmem>>, vector<1x1x8x4xbf16>
    %14 = vector.shape_cast %13 : vector<1x1x8x4xbf16> to vector<8x4xbf16>
    %cst_22 = arith.constant dense<0.000000e+00> : vector<1280x4xf32>
    %15 = tpu.matmul %12, %14, %cst_22 {dimension_numbers = #tpu.dot_dimension_numbers<[1], [0], [0], [1], [0, 0, 1, 1], [], []>} : vector<1280x8xbf16>, vector<8x4xbf16>, vector<1280x4xf32> -> vector<1280x4xf32>
    %16 = arith.addf %10, %15 : vector<1280x4xf32>
    %c0_23 = arith.constant 0 : index
    %c3 = arith.constant 3 : index
    %c0_24 = arith.constant 0 : index
    %c0_25 = arith.constant 0 : index
    %17 = vector.load %arg2[%c0_23, %c3, %c0_24, %c0_25] : memref<1x4x1280x8xbf16, #tpu.memory_space<vmem>>, vector<1x1x1280x8xbf16>
    %18 = vector.shape_cast %17 : vector<1x1x1280x8xbf16> to vector<1280x8xbf16>
    %c3_26 = arith.constant 3 : index
    %c0_27 = arith.constant 0 : index
    %c0_28 = arith.constant 0 : index
    %c0_29 = arith.constant 0 : index
    %19 = vector.load %arg4[%c3_26, %c0_27, %c0_28, %c0_29] : memref<4x2x8x4xbf16, #tpu.memory_space<vmem>>, vector<1x1x8x4xbf16>
    %20 = vector.shape_cast %19 : vector<1x1x8x4xbf16> to vector<8x4xbf16>
    %cst_30 = arith.constant dense<0.000000e+00> : vector<1280x4xf32>
    %21 = tpu.matmul %18, %20, %cst_30 {dimension_numbers = #tpu.dot_dimension_numbers<[1], [0], [0], [1], [0, 0, 1, 1], [], []>} : vector<1280x8xbf16>, vector<8x4xbf16>, vector<1280x4xf32> -> vector<1280x4xf32>
    %22 = arith.addf %16, %21 : vector<1280x4xf32>
    %c0_31 = arith.constant 0 : index
    %c0_32 = arith.constant 0 : index
    %c0_33 = arith.constant 0 : index
    %c0_34 = arith.constant 0 : index
    %c0_35 = arith.constant 0 : index
    %23 = vector.load %arg3[%c0_31, %c0_32, %c0_33, %c0_34, %c0_35] : memref<1x4x1x320x8xbf16, #tpu.memory_space<vmem>>, vector<1x1x1x320x8xbf16>
    %24 = vector.shape_cast %23 : vector<1x1x1x320x8xbf16> to vector<320x8xbf16>
    %c0_36 = arith.constant 0 : index
    %c1_37 = arith.constant 1 : index
    %c0_38 = arith.constant 0 : index
    %c0_39 = arith.constant 0 : index
    %25 = vector.load %arg4[%c0_36, %c1_37, %c0_38, %c0_39] : memref<4x2x8x4xbf16, #tpu.memory_space<vmem>>, vector<1x1x8x4xbf16>
    %26 = vector.shape_cast %25 : vector<1x1x8x4xbf16> to vector<8x4xbf16>
    %cst_40 = arith.constant dense<0.000000e+00> : vector<320x4xf32>
    %27 = tpu.matmul %24, %26, %cst_40 {dimension_numbers = #tpu.dot_dimension_numbers<[1], [0], [0], [1], [0, 0, 1, 1], [], []>} : vector<320x8xbf16>, vector<8x4xbf16>, vector<320x4xf32> -> vector<320x4xf32>
    %c0_41 = arith.constant 0 : index
    %c1_42 = arith.constant 1 : index
    %c0_43 = arith.constant 0 : index
    %c0_44 = arith.constant 0 : index
    %c0_45 = arith.constant 0 : index
    %28 = vector.load %arg3[%c0_41, %c1_42, %c0_43, %c0_44, %c0_45] : memref<1x4x1x320x8xbf16, #tpu.memory_space<vmem>>, vector<1x1x1x320x8xbf16>
    %29 = vector.shape_cast %28 : vector<1x1x1x320x8xbf16> to vector<320x8xbf16>
    %c1_46 = arith.constant 1 : index
    %c1_47 = arith.constant 1 : index
    %c0_48 = arith.constant 0 : index
    %c0_49 = arith.constant 0 : index
    %30 = vector.load %arg4[%c1_46, %c1_47, %c0_48, %c0_49] : memref<4x2x8x4xbf16, #tpu.memory_space<vmem>>, vector<1x1x8x4xbf16>
    %31 = vector.shape_cast %30 : vector<1x1x8x4xbf16> to vector<8x4xbf16>
    %cst_50 = arith.constant dense<0.000000e+00> : vector<320x4xf32>
    %32 = tpu.matmul %29, %31, %cst_50 {dimension_numbers = #tpu.dot_dimension_numbers<[1], [0], [0], [1], [0, 0, 1, 1], [], []>} : vector<320x8xbf16>, vector<8x4xbf16>, vector<320x4xf32> -> vector<320x4xf32>
    %33 = arith.addf %27, %32 : vector<320x4xf32>
    %c0_51 = arith.constant 0 : index
    %c2_52 = arith.constant 2 : index
    %c0_53 = arith.constant 0 : index
    %c0_54 = arith.constant 0 : index
    %c0_55 = arith.constant 0 : index
    %34 = vector.load %arg3[%c0_51, %c2_52, %c0_53, %c0_54, %c0_55] : memref<1x4x1x320x8xbf16, #tpu.memory_space<vmem>>, vector<1x1x1x320x8xbf16>
    %35 = vector.shape_cast %34 : vector<1x1x1x320x8xbf16> to vector<320x8xbf16>
    %c2_56 = arith.constant 2 : index
    %c1_57 = arith.constant 1 : index
    %c0_58 = arith.constant 0 : index
    %c0_59 = arith.constant 0 : index
    %36 = vector.load %arg4[%c2_56, %c1_57, %c0_58, %c0_59] : memref<4x2x8x4xbf16, #tpu.memory_space<vmem>>, vector<1x1x8x4xbf16>
    %37 = vector.shape_cast %36 : vector<1x1x8x4xbf16> to vector<8x4xbf16>
    %cst_60 = arith.constant dense<0.000000e+00> : vector<320x4xf32>
    %38 = tpu.matmul %35, %37, %cst_60 {dimension_numbers = #tpu.dot_dimension_numbers<[1], [0], [0], [1], [0, 0, 1, 1], [], []>} : vector<320x8xbf16>, vector<8x4xbf16>, vector<320x4xf32> -> vector<320x4xf32>
    %39 = arith.addf %33, %38 : vector<320x4xf32>
    %c0_61 = arith.constant 0 : index
    %c3_62 = arith.constant 3 : index
    %c0_63 = arith.constant 0 : index
    %c0_64 = arith.constant 0 : index
    %c0_65 = arith.constant 0 : index
    %40 = vector.load %arg3[%c0_61, %c3_62, %c0_63, %c0_64, %c0_65] : memref<1x4x1x320x8xbf16, #tpu.memory_space<vmem>>, vector<1x1x1x320x8xbf16>
    %41 = vector.shape_cast %40 : vector<1x1x1x320x8xbf16> to vector<320x8xbf16>
    %c3_66 = arith.constant 3 : index
    %c1_67 = arith.constant 1 : index
    %c0_68 = arith.constant 0 : index
    %c0_69 = arith.constant 0 : index
    %42 = vector.load %arg4[%c3_66, %c1_67, %c0_68, %c0_69] : memref<4x2x8x4xbf16, #tpu.memory_space<vmem>>, vector<1x1x8x4xbf16>
    %43 = vector.shape_cast %42 : vector<1x1x8x4xbf16> to vector<8x4xbf16>
    %cst_70 = arith.constant dense<0.000000e+00> : vector<320x4xf32>
    %44 = tpu.matmul %41, %43, %cst_70 {dimension_numbers = #tpu.dot_dimension_numbers<[1], [0], [0], [1], [0, 0, 1, 1], [], []>} : vector<320x8xbf16>, vector<8x4xbf16>, vector<320x4xf32> -> vector<320x4xf32>
    %45 = arith.addf %39, %44 : vector<320x4xf32>
    %c0_71 = arith.constant 0 : index
    %c0_72 = arith.constant 0 : index
    %46 = vector.load %arg5[%c0_71, %c0_72] : memref<1x4xf32, #tpu.memory_space<vmem>>, vector<1x4xf32>
    %c0_73 = arith.constant 0 : index
    %c0_74 = arith.constant 0 : index
    %c320 = arith.constant 320 : index
    %c0_75 = arith.constant 0 : index
    %47 = vector.load %arg2[%c0_73, %c0_74, %c320, %c0_75] : memref<1x4x1280x8xbf16, #tpu.memory_space<vmem>>, vector<1x1x960x8xbf16>
    %48 = vector.shape_cast %47 : vector<1x1x960x8xbf16> to vector<960x8xbf16>
    %c0_76 = arith.constant 0 : index
    %c1_77 = arith.constant 1 : index
    %c0_78 = arith.constant 0 : index
    %c0_79 = arith.constant 0 : index
    %49 = vector.load %arg4[%c0_76, %c1_77, %c0_78, %c0_79] : memref<4x2x8x4xbf16, #tpu.memory_space<vmem>>, vector<1x1x8x4xbf16>
    %50 = vector.shape_cast %49 : vector<1x1x8x4xbf16> to vector<8x4xbf16>
    %cst_80 = arith.constant dense<0.000000e+00> : vector<960x4xf32>
    %51 = tpu.matmul %48, %50, %cst_80 {dimension_numbers = #tpu.dot_dimension_numbers<[1], [0], [0], [1], [0, 0, 1, 1], [], []>} : vector<960x8xbf16>, vector<8x4xbf16>, vector<960x4xf32> -> vector<960x4xf32>
    %c0_81 = arith.constant 0 : index
    %c1_82 = arith.constant 1 : index
    %c320_83 = arith.constant 320 : index
    %c0_84 = arith.constant 0 : index
    %52 = vector.load %arg2[%c0_81, %c1_82, %c320_83, %c0_84] : memref<1x4x1280x8xbf16, #tpu.memory_space<vmem>>, vector<1x1x960x8xbf16>
    %53 = vector.shape_cast %52 : vector<1x1x960x8xbf16> to vector<960x8xbf16>
    %c1_85 = arith.constant 1 : index
    %c1_86 = arith.constant 1 : index
    %c0_87 = arith.constant 0 : index
    %c0_88 = arith.constant 0 : index
    %54 = vector.load %arg4[%c1_85, %c1_86, %c0_87, %c0_88] : memref<4x2x8x4xbf16, #tpu.memory_space<vmem>>, vector<1x1x8x4xbf16>
    %55 = vector.shape_cast %54 : vector<1x1x8x4xbf16> to vector<8x4xbf16>
    %cst_89 = arith.constant dense<0.000000e+00> : vector<960x4xf32>
    %56 = tpu.matmul %53, %55, %cst_89 {dimension_numbers = #tpu.dot_dimension_numbers<[1], [0], [0], [1], [0, 0, 1, 1], [], []>} : vector<960x8xbf16>, vector<8x4xbf16>, vector<960x4xf32> -> vector<960x4xf32>
    %57 = arith.addf %51, %56 : vector<960x4xf32>
    %c0_90 = arith.constant 0 : index
    %c2_91 = arith.constant 2 : index
    %c320_92 = arith.constant 320 : index
    %c0_93 = arith.constant 0 : index
    %58 = vector.load %arg2[%c0_90, %c2_91, %c320_92, %c0_93] : memref<1x4x1280x8xbf16, #tpu.memory_space<vmem>>, vector<1x1x960x8xbf16>
    %59 = vector.shape_cast %58 : vector<1x1x960x8xbf16> to vector<960x8xbf16>
    %c2_94 = arith.constant 2 : index
    %c1_95 = arith.constant 1 : index
    %c0_96 = arith.constant 0 : index
    %c0_97 = arith.constant 0 : index
    %60 = vector.load %arg4[%c2_94, %c1_95, %c0_96, %c0_97] : memref<4x2x8x4xbf16, #tpu.memory_space<vmem>>, vector<1x1x8x4xbf16>
    %61 = vector.shape_cast %60 : vector<1x1x8x4xbf16> to vector<8x4xbf16>
    %cst_98 = arith.constant dense<0.000000e+00> : vector<960x4xf32>
    %62 = tpu.matmul %59, %61, %cst_98 {dimension_numbers = #tpu.dot_dimension_numbers<[1], [0], [0], [1], [0, 0, 1, 1], [], []>} : vector<960x8xbf16>, vector<8x4xbf16>, vector<960x4xf32> -> vector<960x4xf32>
    %63 = arith.addf %57, %62 : vector<960x4xf32>
    %c0_99 = arith.constant 0 : index
    %c3_100 = arith.constant 3 : index
    %c320_101 = arith.constant 320 : index
    %c0_102 = arith.constant 0 : index
    %64 = vector.load %arg2[%c0_99, %c3_100, %c320_101, %c0_102] : memref<1x4x1280x8xbf16, #tpu.memory_space<vmem>>, vector<1x1x960x8xbf16>
    %65 = vector.shape_cast %64 : vector<1x1x960x8xbf16> to vector<960x8xbf16>
    %c3_103 = arith.constant 3 : index
    %c1_104 = arith.constant 1 : index
    %c0_105 = arith.constant 0 : index
    %c0_106 = arith.constant 0 : index
    %66 = vector.load %arg4[%c3_103, %c1_104, %c0_105, %c0_106] : memref<4x2x8x4xbf16, #tpu.memory_space<vmem>>, vector<1x1x8x4xbf16>
    %67 = vector.shape_cast %66 : vector<1x1x8x4xbf16> to vector<8x4xbf16>
    %cst_107 = arith.constant dense<0.000000e+00> : vector<960x4xf32>
    %68 = tpu.matmul %65, %67, %cst_107 {dimension_numbers = #tpu.dot_dimension_numbers<[1], [0], [0], [1], [0, 0, 1, 1], [], []>} : vector<960x8xbf16>, vector<8x4xbf16>, vector<960x4xf32> -> vector<960x4xf32>
    %69 = arith.addf %63, %68 : vector<960x4xf32>
    %70 = vector.extract_strided_slice %22 {offsets = [0, 0], sizes = [960, 4], strides = [1, 1]} : vector<1280x4xf32> to vector<960x4xf32>
    %71 = arith.addf %70, %69 : vector<960x4xf32>
    %72 = vector.broadcast %46 : vector<1x4xf32> to vector<960x4xf32>
    %73 = arith.addf %71, %72 : vector<960x4xf32>
    %cst_108 = arith.constant 2.000000e-01 : f32
    %74 = vector.broadcast %cst_108 : f32 to vector<960x4xf32>
    %75 = arith.mulf %74, %73 : vector<960x4xf32>
    %76 = arith.maximumf %73, %75 : vector<960x4xf32>
    %c0_109 = arith.constant 0 : index
    %c0_110 = arith.constant 0 : index
    %c0_111 = arith.constant 0 : index
    %77 = vector.load %arg6[%c0_109, %c0_110, %c0_111] : memref<1x1280x4xf32, #tpu.memory_space<vmem>>, vector<1x960x4xf32>
    %78 = vector.shape_cast %77 : vector<1x960x4xf32> to vector<960x4xf32>
    %79 = vector.shape_cast %76 : vector<960x4xf32> to vector<1x960x4xf32>
    tpu.vector_store %arg6[%c0_109, %c0_110, %c0_111], %79 {strides = array<i32>} : memref<1x1280x4xf32, #tpu.memory_space<vmem>>, vector<1x960x4xf32>,
    %80 = vector.extract_strided_slice %22 {offsets = [960, 0], sizes = [320, 4], strides = [1, 1]} : vector<1280x4xf32> to vector<320x4xf32>
    %81 = arith.addf %80, %45 : vector<320x4xf32>
    %82 = vector.broadcast %46 : vector<1x4xf32> to vector<320x4xf32>
    %83 = arith.addf %81, %82 : vector<320x4xf32>
    %cst_112 = arith.constant 2.000000e-01 : f32
    %84 = vector.broadcast %cst_112 : f32 to vector<320x4xf32>
    %85 = arith.mulf %84, %83 : vector<320x4xf32>
    %86 = arith.maximumf %83, %85 : vector<320x4xf32>
    %c0_113 = arith.constant 0 : index
    %c960 = arith.constant 960 : index
    %c0_114 = arith.constant 0 : index
    %87 = vector.load %arg6[%c0_113, %c960, %c0_114] : memref<1x1280x4xf32, #tpu.memory_space<vmem>>, vector<1x320x4xf32>
    %88 = vector.shape_cast %87 : vector<1x320x4xf32> to vector<320x4xf32>
    %89 = vector.shape_cast %86 : vector<320x4xf32> to vector<1x320x4xf32>
    tpu.vector_store %arg6[%c0_113, %c960, %c0_114], %89 {strides = array<i32>} : memref<1x1280x4xf32, #tpu.memory_space<vmem>>, vector<1x320x4xf32>,
    return
  }
  func.func @transform_0(%arg0: i32, %arg1: i32) -> (i32, i32, i32, i32) {
    %c0_i32 = arith.constant 0 : i32
    %c0_i32_0 = arith.constant 0 : i32
    %c0_i32_1 = arith.constant 0 : i32
    return %arg0, %c0_i32, %arg1, %c0_i32_0 : i32, i32, i32, i32
  }
  func.func @transform_1(%arg0: i32, %arg1: i32) -> (i32, i32, i32, i32, i32) {
    %c0_i32 = arith.constant 0 : i32
    %c0_i32_0 = arith.constant 0 : i32
    %c0_i32_1 = arith.constant 0 : i32
    %c0_i32_2 = arith.constant 0 : i32
    return %arg0, %c0_i32, %arg1, %c0_i32_0, %c0_i32_1 : i32, i32, i32, i32, i32
  }
  func.func @transform_2(%arg0: i32, %arg1: i32) -> (i32, i32, i32, i32) {
    %c0_i32 = arith.constant 0 : i32
    %c0_i32_0 = arith.constant 0 : i32
    %c0_i32_1 = arith.constant 0 : i32
    %c0_i32_2 = arith.constant 0 : i32
    %c0_i32_3 = arith.constant 0 : i32
    return %c0_i32, %c0_i32_0, %c0_i32_1, %c0_i32_2 : i32, i32, i32, i32
  }
  func.func @transform_3(%arg0: i32, %arg1: i32) -> (i32, i32) {
    %c0_i32 = arith.constant 0 : i32
    %c0_i32_0 = arith.constant 0 : i32
    %c0_i32_1 = arith.constant 0 : i32
    return %c0_i32, %c0_i32_0 : i32, i32
  }
  func.func @transform_4(%arg0: i32, %arg1: i32) -> (i32, i32, i32) {
    %c0_i32 = arith.constant 0 : i32
    %c0_i32_0 = arith.constant 0 : i32
    return %arg0, %arg1, %c0_i32 : i32, i32, i32
  }
}

module attributes {stable_mosaic.version = 11 : i64} {
  func.func @_conv_s2_lrelu_kernel(%arg0: i32, %arg1: i32, %arg2: memref<1x4x640x32xbf16, #tpu.memory_space<vmem>>, %arg3: memref<1x4x1x80x32xbf16, #tpu.memory_space<vmem>>, %arg4: memref<4x2x32x8xbf16, #tpu.memory_space<vmem>>, %arg5: memref<1x8xf32, #tpu.memory_space<vmem>>, %arg6: memref<1x640x8xf32, #tpu.memory_space<vmem>>) attributes {dimension_semantics = [#tpu.dimension_semantics<parallel>, #tpu.dimension_semantics<parallel>], iteration_bounds = array<i64: 2, 1>, scalar_prefetch = 0 : i64, scratch_operands = 0 : i64, tpu.core_type = #tpu.core_type<tc>, window_params = [{transform_indices = @transform_0, window_bounds = array<i64: 1, 4, 640, 32>}, {transform_indices = @transform_1, window_bounds = array<i64: 1, 4, 1, 80, 32>}, {pipeline_mode = #tpu.pipeline_mode<synchronous>, transform_indices = @transform_2, window_bounds = array<i64: 4, 2, 32, 8>}, {pipeline_mode = #tpu.pipeline_mode<synchronous>, transform_indices = @transform_3, window_bounds = array<i64: 1, 8>}, {transform_indices = @transform_4, window_bounds = array<i64: 1, 640, 8>}]} {
    %c0 = arith.constant 0 : index
    %c0_0 = arith.constant 0 : index
    %c0_1 = arith.constant 0 : index
    %c0_2 = arith.constant 0 : index
    %0 = vector.load %arg2[%c0, %c0_0, %c0_1, %c0_2] : memref<1x4x640x32xbf16, #tpu.memory_space<vmem>>, vector<1x1x640x32xbf16>
    %1 = vector.shape_cast %0 : vector<1x1x640x32xbf16> to vector<640x32xbf16>
    %c0_3 = arith.constant 0 : index
    %c0_4 = arith.constant 0 : index
    %c0_5 = arith.constant 0 : index
    %c0_6 = arith.constant 0 : index
    %2 = vector.load %arg4[%c0_3, %c0_4, %c0_5, %c0_6] : memref<4x2x32x8xbf16, #tpu.memory_space<vmem>>, vector<1x1x32x8xbf16>
    %3 = vector.shape_cast %2 : vector<1x1x32x8xbf16> to vector<32x8xbf16>
    %cst = arith.constant dense<0.000000e+00> : vector<640x8xf32>
    %4 = tpu.matmul %1, %3, %cst {dimension_numbers = #tpu.dot_dimension_numbers<[1], [0], [0], [1], [0, 0, 1, 1], [], []>} : vector<640x32xbf16>, vector<32x8xbf16>, vector<640x8xf32> -> vector<640x8xf32>
    %c0_7 = arith.constant 0 : index
    %c1 = arith.constant 1 : index
    %c0_8 = arith.constant 0 : index
    %c0_9 = arith.constant 0 : index
    %5 = vector.load %arg2[%c0_7, %c1, %c0_8, %c0_9] : memref<1x4x640x32xbf16, #tpu.memory_space<vmem>>, vector<1x1x640x32xbf16>
    %6 = vector.shape_cast %5 : vector<1x1x640x32xbf16> to vector<640x32xbf16>
    %c1_10 = arith.constant 1 : index
    %c0_11 = arith.constant 0 : index
    %c0_12 = arith.constant 0 : index
    %c0_13 = arith.constant 0 : index
    %7 = vector.load %arg4[%c1_10, %c0_11, %c0_12, %c0_13] : memref<4x2x32x8xbf16, #tpu.memory_space<vmem>>, vector<1x1x32x8xbf16>
    %8 = vector.shape_cast %7 : vector<1x1x32x8xbf16> to vector<32x8xbf16>
    %cst_14 = arith.constant dense<0.000000e+00> : vector<640x8xf32>
    %9 = tpu.matmul %6, %8, %cst_14 {dimension_numbers = #tpu.dot_dimension_numbers<[1], [0], [0], [1], [0, 0, 1, 1], [], []>} : vector<640x32xbf16>, vector<32x8xbf16>, vector<640x8xf32> -> vector<640x8xf32>
    %10 = arith.addf %4, %9 : vector<640x8xf32>
    %c0_15 = arith.constant 0 : index
    %c2 = arith.constant 2 : index
    %c0_16 = arith.constant 0 : index
    %c0_17 = arith.constant 0 : index
    %11 = vector.load %arg2[%c0_15, %c2, %c0_16, %c0_17] : memref<1x4x640x32xbf16, #tpu.memory_space<vmem>>, vector<1x1x640x32xbf16>
    %12 = vector.shape_cast %11 : vector<1x1x640x32xbf16> to vector<640x32xbf16>
    %c2_18 = arith.constant 2 : index
    %c0_19 = arith.constant 0 : index
    %c0_20 = arith.constant 0 : index
    %c0_21 = arith.constant 0 : index
    %13 = vector.load %arg4[%c2_18, %c0_19, %c0_20, %c0_21] : memref<4x2x32x8xbf16, #tpu.memory_space<vmem>>, vector<1x1x32x8xbf16>
    %14 = vector.shape_cast %13 : vector<1x1x32x8xbf16> to vector<32x8xbf16>
    %cst_22 = arith.constant dense<0.000000e+00> : vector<640x8xf32>
    %15 = tpu.matmul %12, %14, %cst_22 {dimension_numbers = #tpu.dot_dimension_numbers<[1], [0], [0], [1], [0, 0, 1, 1], [], []>} : vector<640x32xbf16>, vector<32x8xbf16>, vector<640x8xf32> -> vector<640x8xf32>
    %16 = arith.addf %10, %15 : vector<640x8xf32>
    %c0_23 = arith.constant 0 : index
    %c3 = arith.constant 3 : index
    %c0_24 = arith.constant 0 : index
    %c0_25 = arith.constant 0 : index
    %17 = vector.load %arg2[%c0_23, %c3, %c0_24, %c0_25] : memref<1x4x640x32xbf16, #tpu.memory_space<vmem>>, vector<1x1x640x32xbf16>
    %18 = vector.shape_cast %17 : vector<1x1x640x32xbf16> to vector<640x32xbf16>
    %c3_26 = arith.constant 3 : index
    %c0_27 = arith.constant 0 : index
    %c0_28 = arith.constant 0 : index
    %c0_29 = arith.constant 0 : index
    %19 = vector.load %arg4[%c3_26, %c0_27, %c0_28, %c0_29] : memref<4x2x32x8xbf16, #tpu.memory_space<vmem>>, vector<1x1x32x8xbf16>
    %20 = vector.shape_cast %19 : vector<1x1x32x8xbf16> to vector<32x8xbf16>
    %cst_30 = arith.constant dense<0.000000e+00> : vector<640x8xf32>
    %21 = tpu.matmul %18, %20, %cst_30 {dimension_numbers = #tpu.dot_dimension_numbers<[1], [0], [0], [1], [0, 0, 1, 1], [], []>} : vector<640x32xbf16>, vector<32x8xbf16>, vector<640x8xf32> -> vector<640x8xf32>
    %22 = arith.addf %16, %21 : vector<640x8xf32>
    %c0_31 = arith.constant 0 : index
    %c0_32 = arith.constant 0 : index
    %c0_33 = arith.constant 0 : index
    %c0_34 = arith.constant 0 : index
    %c0_35 = arith.constant 0 : index
    %23 = vector.load %arg3[%c0_31, %c0_32, %c0_33, %c0_34, %c0_35] : memref<1x4x1x80x32xbf16, #tpu.memory_space<vmem>>, vector<1x1x1x80x32xbf16>
    %24 = vector.shape_cast %23 : vector<1x1x1x80x32xbf16> to vector<80x32xbf16>
    %c0_36 = arith.constant 0 : index
    %c1_37 = arith.constant 1 : index
    %c0_38 = arith.constant 0 : index
    %c0_39 = arith.constant 0 : index
    %25 = vector.load %arg4[%c0_36, %c1_37, %c0_38, %c0_39] : memref<4x2x32x8xbf16, #tpu.memory_space<vmem>>, vector<1x1x32x8xbf16>
    %26 = vector.shape_cast %25 : vector<1x1x32x8xbf16> to vector<32x8xbf16>
    %cst_40 = arith.constant dense<0.000000e+00> : vector<80x8xf32>
    %27 = tpu.matmul %24, %26, %cst_40 {dimension_numbers = #tpu.dot_dimension_numbers<[1], [0], [0], [1], [0, 0, 1, 1], [], []>} : vector<80x32xbf16>, vector<32x8xbf16>, vector<80x8xf32> -> vector<80x8xf32>
    %c0_41 = arith.constant 0 : index
    %c1_42 = arith.constant 1 : index
    %c0_43 = arith.constant 0 : index
    %c0_44 = arith.constant 0 : index
    %c0_45 = arith.constant 0 : index
    %28 = vector.load %arg3[%c0_41, %c1_42, %c0_43, %c0_44, %c0_45] : memref<1x4x1x80x32xbf16, #tpu.memory_space<vmem>>, vector<1x1x1x80x32xbf16>
    %29 = vector.shape_cast %28 : vector<1x1x1x80x32xbf16> to vector<80x32xbf16>
    %c1_46 = arith.constant 1 : index
    %c1_47 = arith.constant 1 : index
    %c0_48 = arith.constant 0 : index
    %c0_49 = arith.constant 0 : index
    %30 = vector.load %arg4[%c1_46, %c1_47, %c0_48, %c0_49] : memref<4x2x32x8xbf16, #tpu.memory_space<vmem>>, vector<1x1x32x8xbf16>
    %31 = vector.shape_cast %30 : vector<1x1x32x8xbf16> to vector<32x8xbf16>
    %cst_50 = arith.constant dense<0.000000e+00> : vector<80x8xf32>
    %32 = tpu.matmul %29, %31, %cst_50 {dimension_numbers = #tpu.dot_dimension_numbers<[1], [0], [0], [1], [0, 0, 1, 1], [], []>} : vector<80x32xbf16>, vector<32x8xbf16>, vector<80x8xf32> -> vector<80x8xf32>
    %33 = arith.addf %27, %32 : vector<80x8xf32>
    %c0_51 = arith.constant 0 : index
    %c2_52 = arith.constant 2 : index
    %c0_53 = arith.constant 0 : index
    %c0_54 = arith.constant 0 : index
    %c0_55 = arith.constant 0 : index
    %34 = vector.load %arg3[%c0_51, %c2_52, %c0_53, %c0_54, %c0_55] : memref<1x4x1x80x32xbf16, #tpu.memory_space<vmem>>, vector<1x1x1x80x32xbf16>
    %35 = vector.shape_cast %34 : vector<1x1x1x80x32xbf16> to vector<80x32xbf16>
    %c2_56 = arith.constant 2 : index
    %c1_57 = arith.constant 1 : index
    %c0_58 = arith.constant 0 : index
    %c0_59 = arith.constant 0 : index
    %36 = vector.load %arg4[%c2_56, %c1_57, %c0_58, %c0_59] : memref<4x2x32x8xbf16, #tpu.memory_space<vmem>>, vector<1x1x32x8xbf16>
    %37 = vector.shape_cast %36 : vector<1x1x32x8xbf16> to vector<32x8xbf16>
    %cst_60 = arith.constant dense<0.000000e+00> : vector<80x8xf32>
    %38 = tpu.matmul %35, %37, %cst_60 {dimension_numbers = #tpu.dot_dimension_numbers<[1], [0], [0], [1], [0, 0, 1, 1], [], []>} : vector<80x32xbf16>, vector<32x8xbf16>, vector<80x8xf32> -> vector<80x8xf32>
    %39 = arith.addf %33, %38 : vector<80x8xf32>
    %c0_61 = arith.constant 0 : index
    %c3_62 = arith.constant 3 : index
    %c0_63 = arith.constant 0 : index
    %c0_64 = arith.constant 0 : index
    %c0_65 = arith.constant 0 : index
    %40 = vector.load %arg3[%c0_61, %c3_62, %c0_63, %c0_64, %c0_65] : memref<1x4x1x80x32xbf16, #tpu.memory_space<vmem>>, vector<1x1x1x80x32xbf16>
    %41 = vector.shape_cast %40 : vector<1x1x1x80x32xbf16> to vector<80x32xbf16>
    %c3_66 = arith.constant 3 : index
    %c1_67 = arith.constant 1 : index
    %c0_68 = arith.constant 0 : index
    %c0_69 = arith.constant 0 : index
    %42 = vector.load %arg4[%c3_66, %c1_67, %c0_68, %c0_69] : memref<4x2x32x8xbf16, #tpu.memory_space<vmem>>, vector<1x1x32x8xbf16>
    %43 = vector.shape_cast %42 : vector<1x1x32x8xbf16> to vector<32x8xbf16>
    %cst_70 = arith.constant dense<0.000000e+00> : vector<80x8xf32>
    %44 = tpu.matmul %41, %43, %cst_70 {dimension_numbers = #tpu.dot_dimension_numbers<[1], [0], [0], [1], [0, 0, 1, 1], [], []>} : vector<80x32xbf16>, vector<32x8xbf16>, vector<80x8xf32> -> vector<80x8xf32>
    %45 = arith.addf %39, %44 : vector<80x8xf32>
    %c0_71 = arith.constant 0 : index
    %c0_72 = arith.constant 0 : index
    %46 = vector.load %arg5[%c0_71, %c0_72] : memref<1x8xf32, #tpu.memory_space<vmem>>, vector<1x8xf32>
    %c0_73 = arith.constant 0 : index
    %c0_74 = arith.constant 0 : index
    %c80 = arith.constant 80 : index
    %c0_75 = arith.constant 0 : index
    %47 = vector.load %arg2[%c0_73, %c0_74, %c80, %c0_75] : memref<1x4x640x32xbf16, #tpu.memory_space<vmem>>, vector<1x1x560x32xbf16>
    %48 = vector.shape_cast %47 : vector<1x1x560x32xbf16> to vector<560x32xbf16>
    %c0_76 = arith.constant 0 : index
    %c1_77 = arith.constant 1 : index
    %c0_78 = arith.constant 0 : index
    %c0_79 = arith.constant 0 : index
    %49 = vector.load %arg4[%c0_76, %c1_77, %c0_78, %c0_79] : memref<4x2x32x8xbf16, #tpu.memory_space<vmem>>, vector<1x1x32x8xbf16>
    %50 = vector.shape_cast %49 : vector<1x1x32x8xbf16> to vector<32x8xbf16>
    %cst_80 = arith.constant dense<0.000000e+00> : vector<560x8xf32>
    %51 = tpu.matmul %48, %50, %cst_80 {dimension_numbers = #tpu.dot_dimension_numbers<[1], [0], [0], [1], [0, 0, 1, 1], [], []>} : vector<560x32xbf16>, vector<32x8xbf16>, vector<560x8xf32> -> vector<560x8xf32>
    %c0_81 = arith.constant 0 : index
    %c1_82 = arith.constant 1 : index
    %c80_83 = arith.constant 80 : index
    %c0_84 = arith.constant 0 : index
    %52 = vector.load %arg2[%c0_81, %c1_82, %c80_83, %c0_84] : memref<1x4x640x32xbf16, #tpu.memory_space<vmem>>, vector<1x1x560x32xbf16>
    %53 = vector.shape_cast %52 : vector<1x1x560x32xbf16> to vector<560x32xbf16>
    %c1_85 = arith.constant 1 : index
    %c1_86 = arith.constant 1 : index
    %c0_87 = arith.constant 0 : index
    %c0_88 = arith.constant 0 : index
    %54 = vector.load %arg4[%c1_85, %c1_86, %c0_87, %c0_88] : memref<4x2x32x8xbf16, #tpu.memory_space<vmem>>, vector<1x1x32x8xbf16>
    %55 = vector.shape_cast %54 : vector<1x1x32x8xbf16> to vector<32x8xbf16>
    %cst_89 = arith.constant dense<0.000000e+00> : vector<560x8xf32>
    %56 = tpu.matmul %53, %55, %cst_89 {dimension_numbers = #tpu.dot_dimension_numbers<[1], [0], [0], [1], [0, 0, 1, 1], [], []>} : vector<560x32xbf16>, vector<32x8xbf16>, vector<560x8xf32> -> vector<560x8xf32>
    %57 = arith.addf %51, %56 : vector<560x8xf32>
    %c0_90 = arith.constant 0 : index
    %c2_91 = arith.constant 2 : index
    %c80_92 = arith.constant 80 : index
    %c0_93 = arith.constant 0 : index
    %58 = vector.load %arg2[%c0_90, %c2_91, %c80_92, %c0_93] : memref<1x4x640x32xbf16, #tpu.memory_space<vmem>>, vector<1x1x560x32xbf16>
    %59 = vector.shape_cast %58 : vector<1x1x560x32xbf16> to vector<560x32xbf16>
    %c2_94 = arith.constant 2 : index
    %c1_95 = arith.constant 1 : index
    %c0_96 = arith.constant 0 : index
    %c0_97 = arith.constant 0 : index
    %60 = vector.load %arg4[%c2_94, %c1_95, %c0_96, %c0_97] : memref<4x2x32x8xbf16, #tpu.memory_space<vmem>>, vector<1x1x32x8xbf16>
    %61 = vector.shape_cast %60 : vector<1x1x32x8xbf16> to vector<32x8xbf16>
    %cst_98 = arith.constant dense<0.000000e+00> : vector<560x8xf32>
    %62 = tpu.matmul %59, %61, %cst_98 {dimension_numbers = #tpu.dot_dimension_numbers<[1], [0], [0], [1], [0, 0, 1, 1], [], []>} : vector<560x32xbf16>, vector<32x8xbf16>, vector<560x8xf32> -> vector<560x8xf32>
    %63 = arith.addf %57, %62 : vector<560x8xf32>
    %c0_99 = arith.constant 0 : index
    %c3_100 = arith.constant 3 : index
    %c80_101 = arith.constant 80 : index
    %c0_102 = arith.constant 0 : index
    %64 = vector.load %arg2[%c0_99, %c3_100, %c80_101, %c0_102] : memref<1x4x640x32xbf16, #tpu.memory_space<vmem>>, vector<1x1x560x32xbf16>
    %65 = vector.shape_cast %64 : vector<1x1x560x32xbf16> to vector<560x32xbf16>
    %c3_103 = arith.constant 3 : index
    %c1_104 = arith.constant 1 : index
    %c0_105 = arith.constant 0 : index
    %c0_106 = arith.constant 0 : index
    %66 = vector.load %arg4[%c3_103, %c1_104, %c0_105, %c0_106] : memref<4x2x32x8xbf16, #tpu.memory_space<vmem>>, vector<1x1x32x8xbf16>
    %67 = vector.shape_cast %66 : vector<1x1x32x8xbf16> to vector<32x8xbf16>
    %cst_107 = arith.constant dense<0.000000e+00> : vector<560x8xf32>
    %68 = tpu.matmul %65, %67, %cst_107 {dimension_numbers = #tpu.dot_dimension_numbers<[1], [0], [0], [1], [0, 0, 1, 1], [], []>} : vector<560x32xbf16>, vector<32x8xbf16>, vector<560x8xf32> -> vector<560x8xf32>
    %69 = arith.addf %63, %68 : vector<560x8xf32>
    %70 = vector.extract_strided_slice %22 {offsets = [0, 0], sizes = [560, 8], strides = [1, 1]} : vector<640x8xf32> to vector<560x8xf32>
    %71 = arith.addf %70, %69 : vector<560x8xf32>
    %72 = vector.broadcast %46 : vector<1x8xf32> to vector<560x8xf32>
    %73 = arith.addf %71, %72 : vector<560x8xf32>
    %cst_108 = arith.constant 2.000000e-01 : f32
    %74 = vector.broadcast %cst_108 : f32 to vector<560x8xf32>
    %75 = arith.mulf %74, %73 : vector<560x8xf32>
    %76 = arith.maximumf %73, %75 : vector<560x8xf32>
    %c0_109 = arith.constant 0 : index
    %c0_110 = arith.constant 0 : index
    %c0_111 = arith.constant 0 : index
    %77 = vector.load %arg6[%c0_109, %c0_110, %c0_111] : memref<1x640x8xf32, #tpu.memory_space<vmem>>, vector<1x560x8xf32>
    %78 = vector.shape_cast %77 : vector<1x560x8xf32> to vector<560x8xf32>
    %79 = vector.shape_cast %76 : vector<560x8xf32> to vector<1x560x8xf32>
    tpu.vector_store %arg6[%c0_109, %c0_110, %c0_111], %79 {strides = array<i32>} : memref<1x640x8xf32, #tpu.memory_space<vmem>>, vector<1x560x8xf32>,
    %80 = vector.extract_strided_slice %22 {offsets = [560, 0], sizes = [80, 8], strides = [1, 1]} : vector<640x8xf32> to vector<80x8xf32>
    %81 = arith.addf %80, %45 : vector<80x8xf32>
    %82 = vector.broadcast %46 : vector<1x8xf32> to vector<80x8xf32>
    %83 = arith.addf %81, %82 : vector<80x8xf32>
    %cst_112 = arith.constant 2.000000e-01 : f32
    %84 = vector.broadcast %cst_112 : f32 to vector<80x8xf32>
    %85 = arith.mulf %84, %83 : vector<80x8xf32>
    %86 = arith.maximumf %83, %85 : vector<80x8xf32>
    %c0_113 = arith.constant 0 : index
    %c560 = arith.constant 560 : index
    %c0_114 = arith.constant 0 : index
    %87 = vector.load %arg6[%c0_113, %c560, %c0_114] : memref<1x640x8xf32, #tpu.memory_space<vmem>>, vector<1x80x8xf32>
    %88 = vector.shape_cast %87 : vector<1x80x8xf32> to vector<80x8xf32>
    %89 = vector.shape_cast %86 : vector<80x8xf32> to vector<1x80x8xf32>
    tpu.vector_store %arg6[%c0_113, %c560, %c0_114], %89 {strides = array<i32>} : memref<1x640x8xf32, #tpu.memory_space<vmem>>, vector<1x80x8xf32>,
    return
  }
  func.func @transform_0(%arg0: i32, %arg1: i32) -> (i32, i32, i32, i32) {
    %c0_i32 = arith.constant 0 : i32
    %c0_i32_0 = arith.constant 0 : i32
    %c0_i32_1 = arith.constant 0 : i32
    return %arg0, %c0_i32, %arg1, %c0_i32_0 : i32, i32, i32, i32
  }
  func.func @transform_1(%arg0: i32, %arg1: i32) -> (i32, i32, i32, i32, i32) {
    %c0_i32 = arith.constant 0 : i32
    %c0_i32_0 = arith.constant 0 : i32
    %c0_i32_1 = arith.constant 0 : i32
    %c0_i32_2 = arith.constant 0 : i32
    return %arg0, %c0_i32, %arg1, %c0_i32_0, %c0_i32_1 : i32, i32, i32, i32, i32
  }
  func.func @transform_2(%arg0: i32, %arg1: i32) -> (i32, i32, i32, i32) {
    %c0_i32 = arith.constant 0 : i32
    %c0_i32_0 = arith.constant 0 : i32
    %c0_i32_1 = arith.constant 0 : i32
    %c0_i32_2 = arith.constant 0 : i32
    %c0_i32_3 = arith.constant 0 : i32
    return %c0_i32, %c0_i32_0, %c0_i32_1, %c0_i32_2 : i32, i32, i32, i32
  }
  func.func @transform_3(%arg0: i32, %arg1: i32) -> (i32, i32) {
    %c0_i32 = arith.constant 0 : i32
    %c0_i32_0 = arith.constant 0 : i32
    %c0_i32_1 = arith.constant 0 : i32
    return %c0_i32, %c0_i32_0 : i32, i32
  }
  func.func @transform_4(%arg0: i32, %arg1: i32) -> (i32, i32, i32) {
    %c0_i32 = arith.constant 0 : i32
    %c0_i32_0 = arith.constant 0 : i32
    return %arg0, %arg1, %c0_i32 : i32, i32, i32
  }
}

module attributes {stable_mosaic.version = 11 : i64} {
  func.func @_conv_s2_lrelu_kernel(%arg0: i32, %arg1: i32, %arg2: memref<1x4x80x64xbf16, #tpu.memory_space<vmem>>, %arg3: memref<1x4x1x20x64xbf16, #tpu.memory_space<vmem>>, %arg4: memref<4x2x64x16xbf16, #tpu.memory_space<vmem>>, %arg5: memref<1x16xf32, #tpu.memory_space<vmem>>, %arg6: memref<1x80x16xf32, #tpu.memory_space<vmem>>) attributes {dimension_semantics = [#tpu.dimension_semantics<parallel>, #tpu.dimension_semantics<parallel>], iteration_bounds = array<i64: 2, 1>, scalar_prefetch = 0 : i64, scratch_operands = 0 : i64, tpu.core_type = #tpu.core_type<tc>, window_params = [{transform_indices = @transform_0, window_bounds = array<i64: 1, 4, 80, 64>}, {transform_indices = @transform_1, window_bounds = array<i64: 1, 4, 1, 20, 64>}, {pipeline_mode = #tpu.pipeline_mode<synchronous>, transform_indices = @transform_2, window_bounds = array<i64: 4, 2, 64, 16>}, {pipeline_mode = #tpu.pipeline_mode<synchronous>, transform_indices = @transform_3, window_bounds = array<i64: 1, 16>}, {transform_indices = @transform_4, window_bounds = array<i64: 1, 80, 16>}]} {
    %c0 = arith.constant 0 : index
    %c0_0 = arith.constant 0 : index
    %c0_1 = arith.constant 0 : index
    %c0_2 = arith.constant 0 : index
    %0 = vector.load %arg2[%c0, %c0_0, %c0_1, %c0_2] : memref<1x4x80x64xbf16, #tpu.memory_space<vmem>>, vector<1x1x80x64xbf16>
    %1 = vector.shape_cast %0 : vector<1x1x80x64xbf16> to vector<80x64xbf16>
    %c0_3 = arith.constant 0 : index
    %c0_4 = arith.constant 0 : index
    %c0_5 = arith.constant 0 : index
    %c0_6 = arith.constant 0 : index
    %2 = vector.load %arg4[%c0_3, %c0_4, %c0_5, %c0_6] : memref<4x2x64x16xbf16, #tpu.memory_space<vmem>>, vector<1x1x64x16xbf16>
    %3 = vector.shape_cast %2 : vector<1x1x64x16xbf16> to vector<64x16xbf16>
    %cst = arith.constant dense<0.000000e+00> : vector<80x16xf32>
    %4 = tpu.matmul %1, %3, %cst {dimension_numbers = #tpu.dot_dimension_numbers<[1], [0], [0], [1], [0, 0, 1, 1], [], []>} : vector<80x64xbf16>, vector<64x16xbf16>, vector<80x16xf32> -> vector<80x16xf32>
    %c0_7 = arith.constant 0 : index
    %c1 = arith.constant 1 : index
    %c0_8 = arith.constant 0 : index
    %c0_9 = arith.constant 0 : index
    %5 = vector.load %arg2[%c0_7, %c1, %c0_8, %c0_9] : memref<1x4x80x64xbf16, #tpu.memory_space<vmem>>, vector<1x1x80x64xbf16>
    %6 = vector.shape_cast %5 : vector<1x1x80x64xbf16> to vector<80x64xbf16>
    %c1_10 = arith.constant 1 : index
    %c0_11 = arith.constant 0 : index
    %c0_12 = arith.constant 0 : index
    %c0_13 = arith.constant 0 : index
    %7 = vector.load %arg4[%c1_10, %c0_11, %c0_12, %c0_13] : memref<4x2x64x16xbf16, #tpu.memory_space<vmem>>, vector<1x1x64x16xbf16>
    %8 = vector.shape_cast %7 : vector<1x1x64x16xbf16> to vector<64x16xbf16>
    %cst_14 = arith.constant dense<0.000000e+00> : vector<80x16xf32>
    %9 = tpu.matmul %6, %8, %cst_14 {dimension_numbers = #tpu.dot_dimension_numbers<[1], [0], [0], [1], [0, 0, 1, 1], [], []>} : vector<80x64xbf16>, vector<64x16xbf16>, vector<80x16xf32> -> vector<80x16xf32>
    %10 = arith.addf %4, %9 : vector<80x16xf32>
    %c0_15 = arith.constant 0 : index
    %c2 = arith.constant 2 : index
    %c0_16 = arith.constant 0 : index
    %c0_17 = arith.constant 0 : index
    %11 = vector.load %arg2[%c0_15, %c2, %c0_16, %c0_17] : memref<1x4x80x64xbf16, #tpu.memory_space<vmem>>, vector<1x1x80x64xbf16>
    %12 = vector.shape_cast %11 : vector<1x1x80x64xbf16> to vector<80x64xbf16>
    %c2_18 = arith.constant 2 : index
    %c0_19 = arith.constant 0 : index
    %c0_20 = arith.constant 0 : index
    %c0_21 = arith.constant 0 : index
    %13 = vector.load %arg4[%c2_18, %c0_19, %c0_20, %c0_21] : memref<4x2x64x16xbf16, #tpu.memory_space<vmem>>, vector<1x1x64x16xbf16>
    %14 = vector.shape_cast %13 : vector<1x1x64x16xbf16> to vector<64x16xbf16>
    %cst_22 = arith.constant dense<0.000000e+00> : vector<80x16xf32>
    %15 = tpu.matmul %12, %14, %cst_22 {dimension_numbers = #tpu.dot_dimension_numbers<[1], [0], [0], [1], [0, 0, 1, 1], [], []>} : vector<80x64xbf16>, vector<64x16xbf16>, vector<80x16xf32> -> vector<80x16xf32>
    %16 = arith.addf %10, %15 : vector<80x16xf32>
    %c0_23 = arith.constant 0 : index
    %c3 = arith.constant 3 : index
    %c0_24 = arith.constant 0 : index
    %c0_25 = arith.constant 0 : index
    %17 = vector.load %arg2[%c0_23, %c3, %c0_24, %c0_25] : memref<1x4x80x64xbf16, #tpu.memory_space<vmem>>, vector<1x1x80x64xbf16>
    %18 = vector.shape_cast %17 : vector<1x1x80x64xbf16> to vector<80x64xbf16>
    %c3_26 = arith.constant 3 : index
    %c0_27 = arith.constant 0 : index
    %c0_28 = arith.constant 0 : index
    %c0_29 = arith.constant 0 : index
    %19 = vector.load %arg4[%c3_26, %c0_27, %c0_28, %c0_29] : memref<4x2x64x16xbf16, #tpu.memory_space<vmem>>, vector<1x1x64x16xbf16>
    %20 = vector.shape_cast %19 : vector<1x1x64x16xbf16> to vector<64x16xbf16>
    %cst_30 = arith.constant dense<0.000000e+00> : vector<80x16xf32>
    %21 = tpu.matmul %18, %20, %cst_30 {dimension_numbers = #tpu.dot_dimension_numbers<[1], [0], [0], [1], [0, 0, 1, 1], [], []>} : vector<80x64xbf16>, vector<64x16xbf16>, vector<80x16xf32> -> vector<80x16xf32>
    %22 = arith.addf %16, %21 : vector<80x16xf32>
    %c0_31 = arith.constant 0 : index
    %c0_32 = arith.constant 0 : index
    %c0_33 = arith.constant 0 : index
    %c0_34 = arith.constant 0 : index
    %c0_35 = arith.constant 0 : index
    %23 = vector.load %arg3[%c0_31, %c0_32, %c0_33, %c0_34, %c0_35] : memref<1x4x1x20x64xbf16, #tpu.memory_space<vmem>>, vector<1x1x1x20x64xbf16>
    %24 = vector.shape_cast %23 : vector<1x1x1x20x64xbf16> to vector<20x64xbf16>
    %c0_36 = arith.constant 0 : index
    %c1_37 = arith.constant 1 : index
    %c0_38 = arith.constant 0 : index
    %c0_39 = arith.constant 0 : index
    %25 = vector.load %arg4[%c0_36, %c1_37, %c0_38, %c0_39] : memref<4x2x64x16xbf16, #tpu.memory_space<vmem>>, vector<1x1x64x16xbf16>
    %26 = vector.shape_cast %25 : vector<1x1x64x16xbf16> to vector<64x16xbf16>
    %cst_40 = arith.constant dense<0.000000e+00> : vector<20x16xf32>
    %27 = tpu.matmul %24, %26, %cst_40 {dimension_numbers = #tpu.dot_dimension_numbers<[1], [0], [0], [1], [0, 0, 1, 1], [], []>} : vector<20x64xbf16>, vector<64x16xbf16>, vector<20x16xf32> -> vector<20x16xf32>
    %c0_41 = arith.constant 0 : index
    %c1_42 = arith.constant 1 : index
    %c0_43 = arith.constant 0 : index
    %c0_44 = arith.constant 0 : index
    %c0_45 = arith.constant 0 : index
    %28 = vector.load %arg3[%c0_41, %c1_42, %c0_43, %c0_44, %c0_45] : memref<1x4x1x20x64xbf16, #tpu.memory_space<vmem>>, vector<1x1x1x20x64xbf16>
    %29 = vector.shape_cast %28 : vector<1x1x1x20x64xbf16> to vector<20x64xbf16>
    %c1_46 = arith.constant 1 : index
    %c1_47 = arith.constant 1 : index
    %c0_48 = arith.constant 0 : index
    %c0_49 = arith.constant 0 : index
    %30 = vector.load %arg4[%c1_46, %c1_47, %c0_48, %c0_49] : memref<4x2x64x16xbf16, #tpu.memory_space<vmem>>, vector<1x1x64x16xbf16>
    %31 = vector.shape_cast %30 : vector<1x1x64x16xbf16> to vector<64x16xbf16>
    %cst_50 = arith.constant dense<0.000000e+00> : vector<20x16xf32>
    %32 = tpu.matmul %29, %31, %cst_50 {dimension_numbers = #tpu.dot_dimension_numbers<[1], [0], [0], [1], [0, 0, 1, 1], [], []>} : vector<20x64xbf16>, vector<64x16xbf16>, vector<20x16xf32> -> vector<20x16xf32>
    %33 = arith.addf %27, %32 : vector<20x16xf32>
    %c0_51 = arith.constant 0 : index
    %c2_52 = arith.constant 2 : index
    %c0_53 = arith.constant 0 : index
    %c0_54 = arith.constant 0 : index
    %c0_55 = arith.constant 0 : index
    %34 = vector.load %arg3[%c0_51, %c2_52, %c0_53, %c0_54, %c0_55] : memref<1x4x1x20x64xbf16, #tpu.memory_space<vmem>>, vector<1x1x1x20x64xbf16>
    %35 = vector.shape_cast %34 : vector<1x1x1x20x64xbf16> to vector<20x64xbf16>
    %c2_56 = arith.constant 2 : index
    %c1_57 = arith.constant 1 : index
    %c0_58 = arith.constant 0 : index
    %c0_59 = arith.constant 0 : index
    %36 = vector.load %arg4[%c2_56, %c1_57, %c0_58, %c0_59] : memref<4x2x64x16xbf16, #tpu.memory_space<vmem>>, vector<1x1x64x16xbf16>
    %37 = vector.shape_cast %36 : vector<1x1x64x16xbf16> to vector<64x16xbf16>
    %cst_60 = arith.constant dense<0.000000e+00> : vector<20x16xf32>
    %38 = tpu.matmul %35, %37, %cst_60 {dimension_numbers = #tpu.dot_dimension_numbers<[1], [0], [0], [1], [0, 0, 1, 1], [], []>} : vector<20x64xbf16>, vector<64x16xbf16>, vector<20x16xf32> -> vector<20x16xf32>
    %39 = arith.addf %33, %38 : vector<20x16xf32>
    %c0_61 = arith.constant 0 : index
    %c3_62 = arith.constant 3 : index
    %c0_63 = arith.constant 0 : index
    %c0_64 = arith.constant 0 : index
    %c0_65 = arith.constant 0 : index
    %40 = vector.load %arg3[%c0_61, %c3_62, %c0_63, %c0_64, %c0_65] : memref<1x4x1x20x64xbf16, #tpu.memory_space<vmem>>, vector<1x1x1x20x64xbf16>
    %41 = vector.shape_cast %40 : vector<1x1x1x20x64xbf16> to vector<20x64xbf16>
    %c3_66 = arith.constant 3 : index
    %c1_67 = arith.constant 1 : index
    %c0_68 = arith.constant 0 : index
    %c0_69 = arith.constant 0 : index
    %42 = vector.load %arg4[%c3_66, %c1_67, %c0_68, %c0_69] : memref<4x2x64x16xbf16, #tpu.memory_space<vmem>>, vector<1x1x64x16xbf16>
    %43 = vector.shape_cast %42 : vector<1x1x64x16xbf16> to vector<64x16xbf16>
    %cst_70 = arith.constant dense<0.000000e+00> : vector<20x16xf32>
    %44 = tpu.matmul %41, %43, %cst_70 {dimension_numbers = #tpu.dot_dimension_numbers<[1], [0], [0], [1], [0, 0, 1, 1], [], []>} : vector<20x64xbf16>, vector<64x16xbf16>, vector<20x16xf32> -> vector<20x16xf32>
    %45 = arith.addf %39, %44 : vector<20x16xf32>
    %c0_71 = arith.constant 0 : index
    %c0_72 = arith.constant 0 : index
    %46 = vector.load %arg5[%c0_71, %c0_72] : memref<1x16xf32, #tpu.memory_space<vmem>>, vector<1x16xf32>
    %c0_73 = arith.constant 0 : index
    %c0_74 = arith.constant 0 : index
    %c20 = arith.constant 20 : index
    %c0_75 = arith.constant 0 : index
    %47 = vector.load %arg2[%c0_73, %c0_74, %c20, %c0_75] : memref<1x4x80x64xbf16, #tpu.memory_space<vmem>>, vector<1x1x60x64xbf16>
    %48 = vector.shape_cast %47 : vector<1x1x60x64xbf16> to vector<60x64xbf16>
    %c0_76 = arith.constant 0 : index
    %c1_77 = arith.constant 1 : index
    %c0_78 = arith.constant 0 : index
    %c0_79 = arith.constant 0 : index
    %49 = vector.load %arg4[%c0_76, %c1_77, %c0_78, %c0_79] : memref<4x2x64x16xbf16, #tpu.memory_space<vmem>>, vector<1x1x64x16xbf16>
    %50 = vector.shape_cast %49 : vector<1x1x64x16xbf16> to vector<64x16xbf16>
    %cst_80 = arith.constant dense<0.000000e+00> : vector<60x16xf32>
    %51 = tpu.matmul %48, %50, %cst_80 {dimension_numbers = #tpu.dot_dimension_numbers<[1], [0], [0], [1], [0, 0, 1, 1], [], []>} : vector<60x64xbf16>, vector<64x16xbf16>, vector<60x16xf32> -> vector<60x16xf32>
    %c0_81 = arith.constant 0 : index
    %c1_82 = arith.constant 1 : index
    %c20_83 = arith.constant 20 : index
    %c0_84 = arith.constant 0 : index
    %52 = vector.load %arg2[%c0_81, %c1_82, %c20_83, %c0_84] : memref<1x4x80x64xbf16, #tpu.memory_space<vmem>>, vector<1x1x60x64xbf16>
    %53 = vector.shape_cast %52 : vector<1x1x60x64xbf16> to vector<60x64xbf16>
    %c1_85 = arith.constant 1 : index
    %c1_86 = arith.constant 1 : index
    %c0_87 = arith.constant 0 : index
    %c0_88 = arith.constant 0 : index
    %54 = vector.load %arg4[%c1_85, %c1_86, %c0_87, %c0_88] : memref<4x2x64x16xbf16, #tpu.memory_space<vmem>>, vector<1x1x64x16xbf16>
    %55 = vector.shape_cast %54 : vector<1x1x64x16xbf16> to vector<64x16xbf16>
    %cst_89 = arith.constant dense<0.000000e+00> : vector<60x16xf32>
    %56 = tpu.matmul %53, %55, %cst_89 {dimension_numbers = #tpu.dot_dimension_numbers<[1], [0], [0], [1], [0, 0, 1, 1], [], []>} : vector<60x64xbf16>, vector<64x16xbf16>, vector<60x16xf32> -> vector<60x16xf32>
    %57 = arith.addf %51, %56 : vector<60x16xf32>
    %c0_90 = arith.constant 0 : index
    %c2_91 = arith.constant 2 : index
    %c20_92 = arith.constant 20 : index
    %c0_93 = arith.constant 0 : index
    %58 = vector.load %arg2[%c0_90, %c2_91, %c20_92, %c0_93] : memref<1x4x80x64xbf16, #tpu.memory_space<vmem>>, vector<1x1x60x64xbf16>
    %59 = vector.shape_cast %58 : vector<1x1x60x64xbf16> to vector<60x64xbf16>
    %c2_94 = arith.constant 2 : index
    %c1_95 = arith.constant 1 : index
    %c0_96 = arith.constant 0 : index
    %c0_97 = arith.constant 0 : index
    %60 = vector.load %arg4[%c2_94, %c1_95, %c0_96, %c0_97] : memref<4x2x64x16xbf16, #tpu.memory_space<vmem>>, vector<1x1x64x16xbf16>
    %61 = vector.shape_cast %60 : vector<1x1x64x16xbf16> to vector<64x16xbf16>
    %cst_98 = arith.constant dense<0.000000e+00> : vector<60x16xf32>
    %62 = tpu.matmul %59, %61, %cst_98 {dimension_numbers = #tpu.dot_dimension_numbers<[1], [0], [0], [1], [0, 0, 1, 1], [], []>} : vector<60x64xbf16>, vector<64x16xbf16>, vector<60x16xf32> -> vector<60x16xf32>
    %63 = arith.addf %57, %62 : vector<60x16xf32>
    %c0_99 = arith.constant 0 : index
    %c3_100 = arith.constant 3 : index
    %c20_101 = arith.constant 20 : index
    %c0_102 = arith.constant 0 : index
    %64 = vector.load %arg2[%c0_99, %c3_100, %c20_101, %c0_102] : memref<1x4x80x64xbf16, #tpu.memory_space<vmem>>, vector<1x1x60x64xbf16>
    %65 = vector.shape_cast %64 : vector<1x1x60x64xbf16> to vector<60x64xbf16>
    %c3_103 = arith.constant 3 : index
    %c1_104 = arith.constant 1 : index
    %c0_105 = arith.constant 0 : index
    %c0_106 = arith.constant 0 : index
    %66 = vector.load %arg4[%c3_103, %c1_104, %c0_105, %c0_106] : memref<4x2x64x16xbf16, #tpu.memory_space<vmem>>, vector<1x1x64x16xbf16>
    %67 = vector.shape_cast %66 : vector<1x1x64x16xbf16> to vector<64x16xbf16>
    %cst_107 = arith.constant dense<0.000000e+00> : vector<60x16xf32>
    %68 = tpu.matmul %65, %67, %cst_107 {dimension_numbers = #tpu.dot_dimension_numbers<[1], [0], [0], [1], [0, 0, 1, 1], [], []>} : vector<60x64xbf16>, vector<64x16xbf16>, vector<60x16xf32> -> vector<60x16xf32>
    %69 = arith.addf %63, %68 : vector<60x16xf32>
    %70 = vector.extract_strided_slice %22 {offsets = [0, 0], sizes = [60, 16], strides = [1, 1]} : vector<80x16xf32> to vector<60x16xf32>
    %71 = arith.addf %70, %69 : vector<60x16xf32>
    %72 = vector.broadcast %46 : vector<1x16xf32> to vector<60x16xf32>
    %73 = arith.addf %71, %72 : vector<60x16xf32>
    %cst_108 = arith.constant 2.000000e-01 : f32
    %74 = vector.broadcast %cst_108 : f32 to vector<60x16xf32>
    %75 = arith.mulf %74, %73 : vector<60x16xf32>
    %76 = arith.maximumf %73, %75 : vector<60x16xf32>
    %c0_109 = arith.constant 0 : index
    %c0_110 = arith.constant 0 : index
    %c0_111 = arith.constant 0 : index
    %77 = vector.load %arg6[%c0_109, %c0_110, %c0_111] : memref<1x80x16xf32, #tpu.memory_space<vmem>>, vector<1x60x16xf32>
    %78 = vector.shape_cast %77 : vector<1x60x16xf32> to vector<60x16xf32>
    %79 = vector.shape_cast %76 : vector<60x16xf32> to vector<1x60x16xf32>
    tpu.vector_store %arg6[%c0_109, %c0_110, %c0_111], %79 {strides = array<i32>} : memref<1x80x16xf32, #tpu.memory_space<vmem>>, vector<1x60x16xf32>,
    %80 = vector.extract_strided_slice %22 {offsets = [60, 0], sizes = [20, 16], strides = [1, 1]} : vector<80x16xf32> to vector<20x16xf32>
    %81 = arith.addf %80, %45 : vector<20x16xf32>
    %82 = vector.broadcast %46 : vector<1x16xf32> to vector<20x16xf32>
    %83 = arith.addf %81, %82 : vector<20x16xf32>
    %cst_112 = arith.constant 2.000000e-01 : f32
    %84 = vector.broadcast %cst_112 : f32 to vector<20x16xf32>
    %85 = arith.mulf %84, %83 : vector<20x16xf32>
    %86 = arith.maximumf %83, %85 : vector<20x16xf32>
    %c0_113 = arith.constant 0 : index
    %c60 = arith.constant 60 : index
    %c0_114 = arith.constant 0 : index
    %87 = vector.load %arg6[%c0_113, %c60, %c0_114] : memref<1x80x16xf32, #tpu.memory_space<vmem>>, vector<1x20x16xf32>
    %88 = vector.shape_cast %87 : vector<1x20x16xf32> to vector<20x16xf32>
    %89 = vector.shape_cast %86 : vector<20x16xf32> to vector<1x20x16xf32>
    tpu.vector_store %arg6[%c0_113, %c60, %c0_114], %89 {strides = array<i32>} : memref<1x80x16xf32, #tpu.memory_space<vmem>>, vector<1x20x16xf32>,
    return
  }
  func.func @transform_0(%arg0: i32, %arg1: i32) -> (i32, i32, i32, i32) {
    %c0_i32 = arith.constant 0 : i32
    %c0_i32_0 = arith.constant 0 : i32
    %c0_i32_1 = arith.constant 0 : i32
    return %arg0, %c0_i32, %arg1, %c0_i32_0 : i32, i32, i32, i32
  }
  func.func @transform_1(%arg0: i32, %arg1: i32) -> (i32, i32, i32, i32, i32) {
    %c0_i32 = arith.constant 0 : i32
    %c0_i32_0 = arith.constant 0 : i32
    %c0_i32_1 = arith.constant 0 : i32
    %c0_i32_2 = arith.constant 0 : i32
    return %arg0, %c0_i32, %arg1, %c0_i32_0, %c0_i32_1 : i32, i32, i32, i32, i32
  }
  func.func @transform_2(%arg0: i32, %arg1: i32) -> (i32, i32, i32, i32) {
    %c0_i32 = arith.constant 0 : i32
    %c0_i32_0 = arith.constant 0 : i32
    %c0_i32_1 = arith.constant 0 : i32
    %c0_i32_2 = arith.constant 0 : i32
    %c0_i32_3 = arith.constant 0 : i32
    return %c0_i32, %c0_i32_0, %c0_i32_1, %c0_i32_2 : i32, i32, i32, i32
  }
  func.func @transform_3(%arg0: i32, %arg1: i32) -> (i32, i32) {
    %c0_i32 = arith.constant 0 : i32
    %c0_i32_0 = arith.constant 0 : i32
    %c0_i32_1 = arith.constant 0 : i32
    return %c0_i32, %c0_i32_0 : i32, i32
  }
  func.func @transform_4(%arg0: i32, %arg1: i32) -> (i32, i32, i32) {
    %c0_i32 = arith.constant 0 : i32
    %c0_i32_0 = arith.constant 0 : i32
    return %arg0, %arg1, %c0_i32 : i32, i32, i32
  }
}

module attributes {stable_mosaic.version = 11 : i64} {
  func.func @_conv5_pool_kernel(%arg0: i32, %arg1: memref<1x2x1024xbf16, #tpu.memory_space<vmem>>, %arg2: memref<1024x1xbf16, #tpu.memory_space<vmem>>, %arg3: memref<1x1xf32, #tpu.memory_space<vmem>>, %arg4: memref<1x1x1xf32, #tpu.memory_space<vmem>>) attributes {dimension_semantics = [#tpu.dimension_semantics<parallel>], iteration_bounds = array<i64: 2>, scalar_prefetch = 0 : i64, scratch_operands = 0 : i64, tpu.core_type = #tpu.core_type<tc>, window_params = [{transform_indices = @transform_0, window_bounds = array<i64: 1, 2, 1024>}, {pipeline_mode = #tpu.pipeline_mode<synchronous>, transform_indices = @transform_1, window_bounds = array<i64: 1024, 1>}, {pipeline_mode = #tpu.pipeline_mode<synchronous>, transform_indices = @transform_2, window_bounds = array<i64: 1, 1>}, {transform_indices = @transform_3, window_bounds = array<i64: 1, 1, 1>}]} {
    %c0 = arith.constant 0 : index
    %c0_0 = arith.constant 0 : index
    %c0_1 = arith.constant 0 : index
    %0 = vector.load %arg1[%c0, %c0_0, %c0_1] : memref<1x2x1024xbf16, #tpu.memory_space<vmem>>, vector<1x2x1024xbf16>
    %1 = vector.shape_cast %0 : vector<1x2x1024xbf16> to vector<2x1024xbf16>
    %c0_2 = arith.constant 0 : index
    %c0_3 = arith.constant 0 : index
    %2 = vector.load %arg2[%c0_2, %c0_3] : memref<1024x1xbf16, #tpu.memory_space<vmem>>, vector<1024x1xbf16>
    %cst = arith.constant dense<0.000000e+00> : vector<2x1xf32>
    %3 = tpu.matmul %1, %2, %cst {dimension_numbers = #tpu.dot_dimension_numbers<[1], [0], [0], [1], [0, 0, 1, 1], [], []>} : vector<2x1024xbf16>, vector<1024x1xbf16>, vector<2x1xf32> -> vector<2x1xf32>
    %cst_4 = arith.constant dense<0.000000e+00> : vector<1xf32>
    %4 = vector.multi_reduction <add>, %3, %cst_4 [0] : vector<2x1xf32> to vector<1xf32>
    %5 = vector.shape_cast %4 : vector<1xf32> to vector<1x1xf32>
    %cst_5 = arith.constant 5.000000e-01 : f32
    %6 = vector.broadcast %cst_5 : f32 to vector<1x1xf32>
    %7 = arith.mulf %5, %6 : vector<1x1xf32>
    %c0_6 = arith.constant 0 : index
    %c0_7 = arith.constant 0 : index
    %8 = vector.load %arg3[%c0_6, %c0_7] : memref<1x1xf32, #tpu.memory_space<vmem>>, vector<1x1xf32>
    %9 = arith.addf %7, %8 : vector<1x1xf32>
    %c0_8 = arith.constant 0 : index
    %c0_9 = arith.constant 0 : index
    %c0_10 = arith.constant 0 : index
    %10 = vector.load %arg4[%c0_8, %c0_9, %c0_10] : memref<1x1x1xf32, #tpu.memory_space<vmem>>, vector<1x1x1xf32>
    %11 = vector.shape_cast %10 : vector<1x1x1xf32> to vector<1x1xf32>
    %12 = vector.shape_cast %9 : vector<1x1xf32> to vector<1x1x1xf32>
    tpu.vector_store %arg4[%c0_8, %c0_9, %c0_10], %12 {strides = array<i32>} : memref<1x1x1xf32, #tpu.memory_space<vmem>>, vector<1x1x1xf32>,
    return
  }
  func.func @transform_0(%arg0: i32) -> (i32, i32, i32) {
    %c0_i32 = arith.constant 0 : i32
    %c0_i32_0 = arith.constant 0 : i32
    %c0_i32_1 = arith.constant 0 : i32
    return %arg0, %c0_i32, %c0_i32_0 : i32, i32, i32
  }
  func.func @transform_1(%arg0: i32) -> (i32, i32) {
    %c0_i32 = arith.constant 0 : i32
    %c0_i32_0 = arith.constant 0 : i32
    %c0_i32_1 = arith.constant 0 : i32
    return %c0_i32, %c0_i32_0 : i32, i32
  }
  func.func @transform_2(%arg0: i32) -> (i32, i32) {
    %c0_i32 = arith.constant 0 : i32
    %c0_i32_0 = arith.constant 0 : i32
    %c0_i32_1 = arith.constant 0 : i32
    return %c0_i32, %c0_i32_0 : i32, i32
  }
  func.func @transform_3(%arg0: i32) -> (i32, i32, i32) {
    %c0_i32 = arith.constant 0 : i32
    %c0_i32_0 = arith.constant 0 : i32
    %c0_i32_1 = arith.constant 0 : i32
    return %arg0, %c0_i32, %c0_i32_0 : i32, i32, i32
  }
}

</mosaic_0001>

<bundles_post_ra>
// kernel: sub_discriminator_forward.4
= control target key start
LH: loop header
LB: loop body
LE: loop exit
PB: predicated region body
PF: predicated region fallthrough
CT: control target
= control target key end

     0   :  { %s20417_s0 = inlined_call_operand.vmem [shape: bf16[2,4,5440,8], index: 0, kind: input, shape index: {}]   ;;  %s20418_s1 = inlined_call_operand.hbm [shape: bf16[2,4,4,320,8], index: 1, kind: input, shape index: {}]   ;;  %s20419_s2 = inlined_call_operand.vmem [shape: bf16[4,2,8,4], index: 2, kind: input, shape index: {}]   ;;  %s20420_s3 = inlined_call_operand.vmem [shape: f32[1,4], index: 3, kind: input, shape index: {}]   ;;  %s20421_s4 = inlined_call_operand.vmem [shape: f32[2,5120,4], index: 4, kind: output, shape index: {}]  }
   0x1   :  { %20422 = sst [smem:[#allocation46_spill]] %s20417_s0 }
   0x2   :  { %9 = vsyncpa [#allocation4], 0 }
   0x3   :  { %11 = vsyncpa [#allocation4 + $0x1], 0  ;;  %s17411_s15 = smov 0   ;;  %s17413_s16 = smov 0  }
   0x4   :  { %s17415_s17 = smov 0   ;;  %s17417_s18 = smov 0  }
   0x5   :  { %s17419_s19 = smov 0   ;;  %s17421_s20 = smov 0  }
   0x6   :  { %s17423_s21 = smov 0   ;;  %s17425_s22 = smov 0  }
   0x7 LB: > { %s26_s23 = sadd.s32 1, %s17354_s20  ;;  %s29_s24 = sadd.s32 1, %s17358_s21  ;;  %s17362_s22 = sphi %s17425_s22, %s17_s22   ;;  %s17358_s21 = sphi %s17423_s21, %s20509_s21   ;;  %s17354_s20 = sphi %s17421_s20, %s20508_s20   ;;  %s17350_s19 = sphi %s17419_s19, %s20507_s19   ;;  %s17346_s18 = sphi %s17417_s18, %s20506_s18   ;;  %s17342_s17 = sphi %s17415_s17, %s20505_s17   ;;  %s17338_s16 = sphi %s17413_s16, %s20504_s16   ;;  %s17334_s15 = sphi %s17411_s15, %s20503_s15  }
   0x8   : > { %p27_p0 = scmp.ge.s32.totalorder %s26_s23, 4  ;;  %s11902_s25 = sadd.s32 4294967295, %s17362_s22  }
   0x9   : > { %p45_p1 = scmp.ne.s32.totalorder %s17342_s17, %s17338_s16  ;;  %p46_p2 = scmp.eq.s32.totalorder %s17362_s22, 0 }
   0xa   : > { %s20511_s23 = smov (%p27_p0, %s26_s23), 0  ;;  %s20513_s24 = smov (!%p27_p0, %s29_s24), %s17358_s21 }
   0xb   : > { %s34_s26 = ssub.s32 %s17354_s20, %s20511_s23  ;;  %p31_p3 = scmp.ge.s32.totalorder %s20513_s24, 2 }
   0xc   : > { %p79_p4 = scmp.ne.s32.totalorder %s17338_s16, %s17334_s15  ;;  %p17461_p5 = por %p46_p2, %p45_p1 }
   0xd   : > { %p80_p6 = scmp.eq.s32.totalorder %s11902_s25, 0  ;;  %s20515_s24 = smov (%p31_p3, %s20513_s24), 0 }
   0xe   : > { %s33_s29 = ssub.s32 %s17358_s21, %s20515_s24  ;;  %s38_s5 = sadd.s32 1, %s17342_s17 }
   0xf   : > { %p17467_p7 = por %p80_p6, %p79_p4  ;;  %s35_s30 = sor.u32 %s34_s26, %s33_s29 }
  0x10   : > { %p36_p8 = scmp.eq.s32.totalorder %s35_s30, 0  ;;  %p11905_p9 = scmp.ge.s32.totalorder %s17362_s22, 8 }
  0x12   : > { %s17475_s6 = scalar_select %p36_p8, %s17342_s17, %s38_s5  }
  0x13   : > { %175 = sbr.rel (%p11905_p9) target bundleno = 105 (0x69), region = 24 }
  0x1a   : > { %178 = sbr.rel (!%p17461_p5) target bundleno = 89 (0x59), region = 28  ;;  %s180_s7 = sand.u32 (%p17461_p5), 1, %s17342_s17  }
  0x1b   : > { %s183_s8 = smul.u32 (%p17461_p5), 160, %s17354_s20  ;;  %s20425_s0 = sld [smem:[#allocation46_spill]] (%p17461_p5) }
  0x1c   : > { %s17482_s9 = smul.u32 (%p17461_p5), 2560, %s180_s7  ;;  %s17498_s30 = smov (%p17461_p5), 0  }
  0x1d   : > { %s16665_s10 = smul.u32 (%p17461_p5), 2720, %s17358_s21  ;;  %s17500_s5 = smov (%p17461_p5), 0  }
  0x1e   : > { %s182_s25 = scalar_lea.vmem (%p17461_p5), [#allocation2], %s17482_s9  }
  0x1f   : > { %s190_s11 = sadd.s32 (%p17461_p5), %s16665_s10, %s183_s8  ;;  %s20426_s26 = smov (%p17461_p5), %s182_s25 }
  0x20   : > { %s11908_s12 = sshll.u32 (%p17461_p5), %s190_s11, 2 }
  0x21   : > { %s17488_s15 = scalar_lea.vmem %s20425_s0, %s11908_s12  }
  0x22   : > { %s20427_s29 = smov %s17488_s15 }
  0x23 LB: >> { %v211_v0 = vld [vmem:[%s17370_s29] sm:$0xf]  ;;  %v213_v1 = vld [vmem:[%s17370_s29 + $0x4] sm:$0xf]  ;;  %v215_v2 = vld [vmem:[%s17370_s29 + $0x8] sm:$0xf]  ;;  %s17378_s5 = sphi %s17500_s5, %s205_s5   ;;  %s17374_s30 = sphi %s17498_s30, %s20428_s30   ;;  %s17370_s29 = sphi %s20427_s29, %s344_s29   ;;  %s17366_s26 = sphi %s20426_s26, %s345_s26  }
  0x24   : >> { %212 = vst [vmem:[%s17366_s26] sm:$0xf] %v211_v0  ;;  %214 = vst [vmem:[%s17366_s26 + $0x4] sm:$0xf] %v213_v1  ;;  %v217_v3 = vld [vmem:[%s17370_s29 + $0xc] sm:$0xf]  ;;  %s339_s7 = sadd.s32 1, %s17374_s30 }
  0x25   : >> { %216 = vst [vmem:[%s17366_s26 + $0x8] sm:$0xf] %v215_v2  ;;  %v219_v4 = vld [vmem:[%s17370_s29 + $0x10] sm:$0xf]  ;;  %v221_v5 = vld [vmem:[%s17370_s29 + $0x14] sm:$0xf] }
  0x26   : >> { %218 = vst [vmem:[%s17366_s26 + $0xc] sm:$0xf] %v217_v3  ;;  %220 = vst [vmem:[%s17366_s26 + $0x10] sm:$0xf] %v219_v4  ;;  %v223_v6 = vld [vmem:[%s17370_s29 + $0x18] sm:$0xf] }
  0x27   : >> { %222 = vst [vmem:[%s17366_s26 + $0x14] sm:$0xf] %v221_v5  ;;  %v225_v7 = vld [vmem:[%s17370_s29 + $0x1c] sm:$0xf]  ;;  %v227_v8 = vld [vmem:[%s17370_s29 + $0x20] sm:$0xf] }
  0x28   : >> { %224 = vst [vmem:[%s17366_s26 + $0x18] sm:$0xf] %v223_v6  ;;  %226 = vst [vmem:[%s17366_s26 + $0x1c] sm:$0xf] %v225_v7  ;;  %v229_v9 = vld [vmem:[%s17370_s29 + $0x24] sm:$0xf] }
  0x29   : >> { %228 = vst [vmem:[%s17366_s26 + $0x20] sm:$0xf] %v227_v8  ;;  %v231_v10 = vld [vmem:[%s17370_s29 + $0x28] sm:$0xf]  ;;  %v233_v11 = vld [vmem:[%s17370_s29 + $0x2c] sm:$0xf] }
  0x2a   : >> { %230 = vst [vmem:[%s17366_s26 + $0x24] sm:$0xf] %v229_v9  ;;  %232 = vst [vmem:[%s17366_s26 + $0x28] sm:$0xf] %v231_v10  ;;  %v235_v12 = vld [vmem:[%s17370_s29 + $0x30] sm:$0xf] }
  0x2b   : >> { %234 = vst [vmem:[%s17366_s26 + $0x2c] sm:$0xf] %v233_v11  ;;  %v237_v13 = vld [vmem:[%s17370_s29 + $0x34] sm:$0xf]  ;;  %v239_v14 = vld [vmem:[%s17370_s29 + $0x38] sm:$0xf] }
  0x2c   : >> { %236 = vst [vmem:[%s17366_s26 + $0x30] sm:$0xf] %v235_v12  ;;  %238 = vst [vmem:[%s17366_s26 + $0x34] sm:$0xf] %v237_v13  ;;  %v241_v15 = vld [vmem:[%s17370_s29 + $0x3c] sm:$0xf] }
  0x2d   : >> { %240 = vst [vmem:[%s17366_s26 + $0x38] sm:$0xf] %v239_v14  ;;  %v243_v16 = vld [vmem:[%s17370_s29 + $0xaa0] sm:$0xf]  ;;  %v245_v17 = vld [vmem:[%s17370_s29 + $0xaa4] sm:$0xf] }
  0x2e   : >> { %242 = vst [vmem:[%s17366_s26 + $0x3c] sm:$0xf] %v241_v15  ;;  %244 = vst [vmem:[%s17366_s26 + $0x280] sm:$0xf] %v243_v16  ;;  %v247_v18 = vld [vmem:[%s17370_s29 + $0xaa8] sm:$0xf] }
  0x2f   : >> { %246 = vst [vmem:[%s17366_s26 + $0x284] sm:$0xf] %v245_v17  ;;  %v249_v19 = vld [vmem:[%s17370_s29 + $0xaac] sm:$0xf]  ;;  %v251_v20 = vld [vmem:[%s17370_s29 + $0xab0] sm:$0xf] }
  0x30   : >> { %248 = vst [vmem:[%s17366_s26 + $0x288] sm:$0xf] %v247_v18  ;;  %250 = vst [vmem:[%s17366_s26 + $0x28c] sm:$0xf] %v249_v19  ;;  %v253_v21 = vld [vmem:[%s17370_s29 + $0xab4] sm:$0xf] }
  0x31   : >> { %252 = vst [vmem:[%s17366_s26 + $0x290] sm:$0xf] %v251_v20  ;;  %v255_v22 = vld [vmem:[%s17370_s29 + $0xab8] sm:$0xf]  ;;  %v257_v23 = vld [vmem:[%s17370_s29 + $0xabc] sm:$0xf] }
  0x32   : >> { %254 = vst [vmem:[%s17366_s26 + $0x294] sm:$0xf] %v253_v21  ;;  %256 = vst [vmem:[%s17366_s26 + $0x298] sm:$0xf] %v255_v22  ;;  %v259_v24 = vld [vmem:[%s17370_s29 + $0xac0] sm:$0xf] }
  0x33   : >> { %258 = vst [vmem:[%s17366_s26 + $0x29c] sm:$0xf] %v257_v23  ;;  %v261_v25 = vld [vmem:[%s17370_s29 + $0xac4] sm:$0xf]  ;;  %v263_v26 = vld [vmem:[%s17370_s29 + $0xac8] sm:$0xf] }
  0x34   : >> { %260 = vst [vmem:[%s17366_s26 + $0x2a0] sm:$0xf] %v259_v24  ;;  %262 = vst [vmem:[%s17366_s26 + $0x2a4] sm:$0xf] %v261_v25  ;;  %v265_v27 = vld [vmem:[%s17370_s29 + $0xacc] sm:$0xf] }
  0x35   : >> { %264 = vst [vmem:[%s17366_s26 + $0x2a8] sm:$0xf] %v263_v26  ;;  %v267_v28 = vld [vmem:[%s17370_s29 + $0xad0] sm:$0xf]  ;;  %v269_v29 = vld [vmem:[%s17370_s29 + $0xad4] sm:$0xf] }
  0x36   : >> { %266 = vst [vmem:[%s17366_s26 + $0x2ac] sm:$0xf] %v265_v27  ;;  %268 = vst [vmem:[%s17366_s26 + $0x2b0] sm:$0xf] %v267_v28  ;;  %v271_v30 = vld [vmem:[%s17370_s29 + $0xad8] sm:$0xf] }
  0x37   : >> { %270 = vst [vmem:[%s17366_s26 + $0x2b4] sm:$0xf] %v269_v29  ;;  %v273_v31 = vld [vmem:[%s17370_s29 + $0xadc] sm:$0xf]  ;;  %v275_v32 = vld [vmem:[%s17370_s29 + $0x1540] sm:$0xf] }
  0x38   : >> { %272 = vst [vmem:[%s17366_s26 + $0x2b8] sm:$0xf] %v271_v30  ;;  %274 = vst [vmem:[%s17366_s26 + $0x2bc] sm:$0xf] %v273_v31  ;;  %v277_v33 = vld [vmem:[%s17370_s29 + $0x1544] sm:$0xf] }
  0x39   : >> { %276 = vst [vmem:[%s17366_s26 + $0x500] sm:$0xf] %v275_v32  ;;  %v279_v34 = vld [vmem:[%s17370_s29 + $0x1548] sm:$0xf]  ;;  %v281_v35 = vld [vmem:[%s17370_s29 + $0x154c] sm:$0xf] }
  0x3a   : >> { %278 = vst [vmem:[%s17366_s26 + $0x504] sm:$0xf] %v277_v33  ;;  %280 = vst [vmem:[%s17366_s26 + $0x508] sm:$0xf] %v279_v34  ;;  %v283_v36 = vld [vmem:[%s17370_s29 + $0x1550] sm:$0xf] }
  0x3b   : >> { %282 = vst [vmem:[%s17366_s26 + $0x50c] sm:$0xf] %v281_v35  ;;  %v285_v37 = vld [vmem:[%s17370_s29 + $0x1554] sm:$0xf]  ;;  %v287_v38 = vld [vmem:[%s17370_s29 + $0x1558] sm:$0xf] }
  0x3c   : >> { %284 = vst [vmem:[%s17366_s26 + $0x510] sm:$0xf] %v283_v36  ;;  %286 = vst [vmem:[%s17366_s26 + $0x514] sm:$0xf] %v285_v37  ;;  %v289_v39 = vld [vmem:[%s17370_s29 + $0x155c] sm:$0xf] }
  0x3d   : >> { %288 = vst [vmem:[%s17366_s26 + $0x518] sm:$0xf] %v287_v38  ;;  %v291_v40 = vld [vmem:[%s17370_s29 + $0x1560] sm:$0xf]  ;;  %v293_v41 = vld [vmem:[%s17370_s29 + $0x1564] sm:$0xf] }
  0x3e   : >> { %290 = vst [vmem:[%s17366_s26 + $0x51c] sm:$0xf] %v289_v39  ;;  %292 = vst [vmem:[%s17366_s26 + $0x520] sm:$0xf] %v291_v40  ;;  %v295_v42 = vld [vmem:[%s17370_s29 + $0x1568] sm:$0xf] }
  0x3f   : >> { %294 = vst [vmem:[%s17366_s26 + $0x524] sm:$0xf] %v293_v41  ;;  %v297_v43 = vld [vmem:[%s17370_s29 + $0x156c] sm:$0xf]  ;;  %v299_v44 = vld [vmem:[%s17370_s29 + $0x1570] sm:$0xf] }
  0x40   : >> { %296 = vst [vmem:[%s17366_s26 + $0x528] sm:$0xf] %v295_v42  ;;  %298 = vst [vmem:[%s17366_s26 + $0x52c] sm:$0xf] %v297_v43  ;;  %v301_v45 = vld [vmem:[%s17370_s29 + $0x1574] sm:$0xf] }
  0x41   : >> { %300 = vst [vmem:[%s17366_s26 + $0x530] sm:$0xf] %v299_v44  ;;  %v303_v46 = vld [vmem:[%s17370_s29 + $0x1578] sm:$0xf]  ;;  %v305_v47 = vld [vmem:[%s17370_s29 + $0x157c] sm:$0xf] }
  0x42   : >> { %302 = vst [vmem:[%s17366_s26 + $0x534] sm:$0xf] %v301_v45  ;;  %304 = vst [vmem:[%s17366_s26 + $0x538] sm:$0xf] %v303_v46  ;;  %v307_v48 = vld [vmem:[%s17370_s29 + $0x1fe0] sm:$0xf] }
  0x43   : >> { %306 = vst [vmem:[%s17366_s26 + $0x53c] sm:$0xf] %v305_v47  ;;  %v309_v49 = vld [vmem:[%s17370_s29 + $0x1fe4] sm:$0xf]  ;;  %v311_v50 = vld [vmem:[%s17370_s29 + $0x1fe8] sm:$0xf] }
  0x44   : >> { %308 = vst [vmem:[%s17366_s26 + $0x780] sm:$0xf] %v307_v48  ;;  %310 = vst [vmem:[%s17366_s26 + $0x784] sm:$0xf] %v309_v49  ;;  %v313_v51 = vld [vmem:[%s17370_s29 + $0x1fec] sm:$0xf] }
  0x45   : >> { %312 = vst [vmem:[%s17366_s26 + $0x788] sm:$0xf] %v311_v50  ;;  %v315_v52 = vld [vmem:[%s17370_s29 + $0x1ff0] sm:$0xf]  ;;  %v317_v53 = vld [vmem:[%s17370_s29 + $0x1ff4] sm:$0xf] }
  0x46   : >> { %314 = vst [vmem:[%s17366_s26 + $0x78c] sm:$0xf] %v313_v51  ;;  %316 = vst [vmem:[%s17366_s26 + $0x790] sm:$0xf] %v315_v52  ;;  %v319_v54 = vld [vmem:[%s17370_s29 + $0x1ff8] sm:$0xf] }
  0x47   : >> { %318 = vst [vmem:[%s17366_s26 + $0x794] sm:$0xf] %v317_v53  ;;  %v321_v55 = vld [vmem:[%s17370_s29 + $0x1ffc] sm:$0xf]  ;;  %v323_v56 = vld [vmem:[%s17370_s29 + $0x2000] sm:$0xf] }
  0x48   : >> { %320 = vst [vmem:[%s17366_s26 + $0x798] sm:$0xf] %v319_v54  ;;  %322 = vst [vmem:[%s17366_s26 + $0x79c] sm:$0xf] %v321_v55  ;;  %v325_v57 = vld [vmem:[%s17370_s29 + $0x2004] sm:$0xf] }
  0x49   : >> { %324 = vst [vmem:[%s17366_s26 + $0x7a0] sm:$0xf] %v323_v56  ;;  %v327_v58 = vld [vmem:[%s17370_s29 + $0x2008] sm:$0xf]  ;;  %v329_v59 = vld [vmem:[%s17370_s29 + $0x200c] sm:$0xf] }
  0x4a   : >> { %326 = vst [vmem:[%s17366_s26 + $0x7a4] sm:$0xf] %v325_v57  ;;  %328 = vst [vmem:[%s17366_s26 + $0x7a8] sm:$0xf] %v327_v58  ;;  %v331_v60 = vld [vmem:[%s17370_s29 + $0x2010] sm:$0xf] }
  0x4b   : >> { %330 = vst [vmem:[%s17366_s26 + $0x7ac] sm:$0xf] %v329_v59  ;;  %v333_v61 = vld [vmem:[%s17370_s29 + $0x2014] sm:$0xf]  ;;  %v335_v62 = vld [vmem:[%s17370_s29 + $0x2018] sm:$0xf] }
  0x4c   : >> { %332 = vst [vmem:[%s17366_s26 + $0x7b0] sm:$0xf] %v331_v60  ;;  %334 = vst [vmem:[%s17366_s26 + $0x7b4] sm:$0xf] %v333_v61  ;;  %v337_v63 = vld [vmem:[%s17370_s29 + $0x201c] sm:$0xf] }
  0x4d   : >> { %336 = vst [vmem:[%s17366_s26 + $0x7b8] sm:$0xf] %v335_v62  ;;  %338 = vst [vmem:[%s17366_s26 + $0x7bc] sm:$0xf] %v337_v63  ;;  %p340_p10 = scmp.ge.s32.totalorder %s339_s7, 10  ;;  %s205_s5 = sadd.s32 1, %s17378_s5  }
  0x4e   : >> { %p204_p11 = scmp.ge.s32.totalorder %s205_s5, 10 }
  0x4f   : >> { %s20517_s7 = smov (%p340_p10, %s339_s7), 0 }
  0x50   : >> { %s11911_s8 = sshll.u32 %s20517_s7, 6  ;;  %s20428_s30 = smov %s20517_s7 }
  0x51   : >> { %s344_s29 = scalar_lea.vmem %s17488_s15, %s11911_s8   ;;  %s345_s26 = scalar_lea.vmem %s182_s25, %s11911_s8 [#allocation2]  }
  0x52   : > { %207 = sbr.rel (!%p204_p11) target bundleno = 35 (0x23), region = 178 }
  0x59 PF: > { %s600_s10 = sand.u32 1, %s17342_s17   ;;  %s16667_s11 = smul.u32 40, %s17354_s20 }
  0x5a   : > { %s16666_s12 = smul.u32 640, %s600_s10  ;;  %s17380_s14 = smov 10240  }
  0x5b   : > { %s16668_s13 = smul.u32 640, %s17358_s21  ;;  %16673 = sst [smem:[#allocation6]] (%p17461_p5), %s17380_s14 }
  0x5c   : > { %s604_s7 = scalar_lea.vmem [#allocation3], %s16666_s12  ;;  %s17381_s25 = smov 2560  }
  0x5d   : > { %s610_s5 = sadd.s32 %s16668_s13, %s16667_s11  ;;  %s625_s9 = sshll.u32 %s604_s7, 4  ;;  %s626_s9 = int_to_ptr.vmem [resolvable:$true] %s625_s9 }
  0x5e   : > { %s16672_s15 = scalar_select %p17461_p5, [#allocation0], [#allocation7] }
  0x5f   : > { %16674 = sst [smem:[#allocation6 + $0x1]] (%p17461_p5), %s17381_s25  ;;  %s17382_s29 = smov 40  }
  0x60   : > { %s617_s26 = sld [smem:[%s16672_s15]]   ;;  %s11919_s30 = sshll.u32 %s610_s5, 6 }
  0x61   : > { %16675 = sst [smem:[#allocation6 + $0x2]] (%p17461_p5), %s17382_s29  ;;  %s17383_s8 = smov 64  }
  0x62   : > { %16676 = sst [smem:[#allocation6 + $0x3]] (%p17461_p5), %s17383_s8  ;;  %s17384_s11 = smov 4  }
  0x63   : > { %16677 = sst [smem:[#allocation6 + $0x4]] (%p17461_p5), %s17383_s8  ;;  %s612_s14 = scalar_lea.hbm %s20418_s1, %s11919_s30 }
  0x64   : > { %16678 = sst [smem:[#allocation6 + $0x5]] (%p17461_p5), %s17384_s11  ;;  %s601_s15 = scalar_lea.sflag [#allocation4], %s600_s10 }
  0x65   : > { %s17385_s0 = smov [#allocation5]  }
  0x66   : > { %s11920_s7 = sshll.u32 %s617_s26, 26 }
  0x67   : > { %s11921_s25 = sadd.s32 134217728, %s11920_s7 }
  0x68   : > { %16679 = dma.general (%p17461_p5), %s612_s14, 10240, %s626_s9, %s601_s15, %s17385_s0, [#allocation6], %s11921_s25, 0  }
  0x69 PF: > { %p11922_p12 = scmp.ge.s32.totalorder %s17362_s22, 1  ;;  %p646_p13 = scmp.lt.s32.totalorder %s17362_s22, 9 }
  0x6b   : > { %p647_p0 = pnand %p11922_p12, %p646_p13 }
  0x6d   : > { %650 = sbr.rel (%p647_p0) target bundleno = 1628 (0x65c), region = 94 }
  0x74   : > { %s653_s5 = sand.u32 1, %s17338_s16  }
  0x75   : > { %s16669_s29 = smul.u32 2560, %s653_s5  ;;  %s660_s26 = scalar_lea.sflag [#allocation4], %s653_s5 }
  0x76   : > { %s16670_s8 = smul.u32 640, %s653_s5 }
  0x77   : > { %s17680_s11 = scalar_lea.vmem [#allocation2], %s16669_s29 }
  0x78   : > { %s17682_s30 = scalar_lea.vmem [#allocation3], %s16670_s8 }
  0x79   : > { %17325 = dma.done.wait (%p17467_p7), %s660_s26, 10240  }
  0x7a   : > { %17327 = vsyncadd (%p17467_p7), %s660_s26, 4294957056  ;;  %vm1677_vm0 = vcmask 1043456   ;;  %vm1436_vm1 = vcmask 64512   ;;  %v12084_v0 = vld [vmem:[%s20419_s2 + $0x8] sm:$0xf]  ;;  %v16815_v4 = vld [vmem:[%s17680_s11 + $0x280] sm:$0xff]  }
  0x7b   : > { %v13088_v1 = vld [vmem:[%s20419_s2 + $0xc] sm:$0xf]  ;;  %16652 = vmatprep.subr.msk.bf16.mxu1 %vm1677_vm0, %v12084_v0  ;;  %v1679_v2 = vsel %vm1677_vm0, %v12084_v0, 0  ;;  %v16816_v5 = vld [vmem:[%s17682_s30 + $0xa0] sm:$0xff]   ;;  %14230 = vmatprep.mubr.msk.bf16.mxu1 %vm1436_vm1, %v16815_v4  ;;  %v16819_v12 = vld [vmem:[%s17680_s11 + $0x290] sm:$0xff]   ;;  %p702_p1 = scmp.lt.s32.totalorder %s17350_s19, 1 }
  0x7c   : > { %16656 = vmatprep.subr.msk.bf16.mxu0 %vm1677_vm0, %v13088_v1  ;;  %v17698_v3 = vsel %vm1677_vm0, %v13088_v1, 0  ;;  %14229 = vmatpush3.bf16.msra.mxu1 %v1679_v2  ;;  %v16817_v6 = vld [vmem:[%s17680_s11 + $0x288] sm:$0xff]   ;;  %v872_v7 = vld [vmem:[%s20419_s2] sm:$0xf]  ;;  %v13047_v10 = vld [vmem:[%s20419_s2 + $0x4] sm:$0xf] }
  0x7d   : > { %14877 = vmatpush3.bf16.msra.mxu0 %v17698_v3  ;;  %14878 = vmatprep.mubr.msk.bf16.mxu0 %vm1436_vm1, %v16816_v5  ;;  %v16818_v8 = vld [vmem:[%s17682_s30 + $0xa8] sm:$0xff]   ;;  %v2995_v9 = vsel %vm1677_vm0, %v872_v7, 0  ;;  %v17719_v11 = vsel %vm1677_vm0, %v13047_v10, 0  ;;  %v16820_v13 = vld [vmem:[%s17682_s30 + $0xb0] sm:$0xff]   ;;  %v16821_v14 = vld [vmem:[%s17680_s11 + $0x298] sm:$0xff]   ;;  %s701_s7 = smul.u32 160, %s17346_s18 }
  0x7e   : > { %16653 = vmatprep.subr.msk.bf16.mxu1 %vm1677_vm0, %v872_v7  ;;  %16657 = vmatprep.subr.msk.bf16.mxu0 %vm1677_vm0, %v13047_v10  ;;  %v16822_v15 = vld [vmem:[%s17682_s30 + $0xb8] sm:$0xff]   ;;  %v16823_v16 = vld [vmem:[%s17680_s11 + $0x2a0] sm:$0xff]   ;;  %v16825_v18 = vld [vmem:[%s17680_s11 + $0x2a8] sm:$0xff]   ;;  %s20519_s19 = smov (!%p702_p1, %s17350_s19), 1  ;;  %vm11402_vm2 = vcmask 31744  }
  0x7f   : > { %14231 = vmatmul.mubr.msk.bf16.vlgmr.msra.gmra.mrb[0].mxu1 %vm1436_vm1, %v16817_v6  ;;  %v16824_v17 = vld [vmem:[%s17682_s30 + $0xc0] sm:$0xff]   ;;  %v16826_v19 = vld [vmem:[%s17682_s30 + $0xc8] sm:$0xff]   ;;  %v16827_v20 = vld [vmem:[%s17680_s11 + $0x2b0] sm:$0xff]   ;;  %p704_p2 = scmp.lt.s32.totalorder %s701_s7, 639  ;;  %s16671_s18 = smul.u32 640, %s20519_s19 }
  0x80   : > { %14879 = vmatmul.mubr.msk.bf16.vlgmr.msra.gmra.mrb[0].mxu0 %vm1436_vm1, %v16818_v8  ;;  %14391 = vmatpush3.bf16.msra.mxu1 %v2995_v9  ;;  %v16828_v21 = vld [vmem:[%s17682_s30 + $0xd0] sm:$0xff]   ;;  %v16829_v22 = vld [vmem:[%s17680_s11 + $0x2b8] sm:$0xff]   ;;  %v16831_v24 = vld [vmem:[%s17680_s11 + $0x2c0] sm:$0xff]  }
  0x81   : > { %14919 = vmatpush3.bf16.msra.mxu0 %v17719_v11  ;;  %14234 = vmatprep.mubr.msk.bf16.mxu1 %vm1436_vm1, %v16819_v12  ;;  %v16830_v23 = vld [vmem:[%s17682_s30 + $0xd8] sm:$0xff]   ;;  %v16832_v25 = vld [vmem:[%s17682_s30 + $0xe0] sm:$0xff]   ;;  %v16833_v26 = vld [vmem:[%s17680_s11 + $0x2c8] sm:$0xff]   ;;  %s20521_s7 = smov (!%p704_p2, %s701_s7), 639 }
  0x82   : > { %14882 = vmatprep.mubr.msk.bf16.mxu0 %vm1436_vm1, %v16820_v13  ;;  %v16834_v27 = vld [vmem:[%s17682_s30 + $0xe8] sm:$0xff]   ;;  %v16835_v28 = vld [vmem:[%s17680_s11 + $0x2d0] sm:$0xff]   ;;  %v16837_v30 = vld [vmem:[%s17680_s11 + $0x2d8] sm:$0xff]   ;;  %s707_s25 = sadd.s32 %s16671_s18, %s20521_s7 }
  0x83   : > { %v16836_v29 = vld [vmem:[%s17682_s30 + $0xf0] sm:$0xff]   ;;  %v16838_v31 = vld [vmem:[%s17682_s30 + $0xf8] sm:$0xff]   ;;  %v16839_v32 = vld [vmem:[%s17680_s11 + $0x2e0] sm:$0xff]   ;;  %s11923_s19 = sshll.u32 %s707_s25, 3 }
  0x84   : > { %v16840_v33 = vld [vmem:[%s17682_s30 + $0x100] sm:$0xff]   ;;  %v13209_v34 = vld [vmem:[%s20419_s2 + $0x14] sm:$0xf]  ;;  %v16841_v35 = vld [vmem:[%s17680_s11 + $0x2e8] sm:$0xff]   ;;  %s19591_s26 = scalar_lea.vmem %s20421_s4, %s11923_s19 }
  0x85   : > { %16658 = vmatprep.subr.msk.bf16.mxu0 %vm1677_vm0, %v13209_v34  ;;  %v16842_v36 = vld [vmem:[%s17682_s30 + $0x108] sm:$0xff]   ;;  %v16843_v37 = vld [vmem:[%s17680_s11 + $0x2f0] sm:$0xff]   ;;  %v16845_v39 = vld [vmem:[%s17680_s11 + $0x2f8] sm:$0xff]   ;;  %v17807_v55 = vsel %vm1677_vm0, %v13209_v34, 0 }
  0x86   : > { %v16844_v38 = vld [vmem:[%s17682_s30 + $0x110] sm:$0xff]   ;;  %v16846_v40 = vld [vmem:[%s17682_s30 + $0x118] sm:$0xff]   ;;  %v16847_v41 = vld [vmem:[%s17680_s11 + $0x300] sm:$0xff]  }
  0x87   : > { %14235 = vmatmul.mubr.msk.bf16.gmra.mrb[4].mxu1 %vm1436_vm1, %v16821_v14  ;;  %v16848_v42 = vld [vmem:[%s17682_s30 + $0x120] sm:$0xff]   ;;  %v16849_v43 = vld [vmem:[%s17680_s11 + $0x308] sm:$0xff]   ;;  %v16851_v45 = vld [vmem:[%s17680_s11 + $0x310] sm:$0xff]  }
  0x88   : > { %14883 = vmatmul.mubr.msk.bf16.gmra.mrb[4].mxu0 %vm1436_vm1, %v16822_v15  ;;  %14238 = vmatprep.mubr.msk.bf16.mxu1 %vm1436_vm1, %v16823_v16  ;;  %v16850_v44 = vld [vmem:[%s17682_s30 + $0x128] sm:$0xff]   ;;  %v16852_v46 = vld [vmem:[%s17682_s30 + $0x130] sm:$0xff]   ;;  %v16853_v47 = vld [vmem:[%s17680_s11 + $0x318] sm:$0xff]  }
  0x89   : > { %14886 = vmatprep.mubr.msk.bf16.mxu0 %vm1436_vm1, %v16824_v17  ;;  %v16854_v48 = vld [vmem:[%s17682_s30 + $0x138] sm:$0xff]   ;;  %v16855_v49 = vld [vmem:[%s17680_s11 + $0x320] sm:$0xff]   ;;  %v16857_v51 = vld [vmem:[%s17680_s11 + $0x328] sm:$0xff]  }
  0x8a   : > { %v16856_v50 = vld [vmem:[%s17682_s30] sm:$0xff]   ;;  %v16858_v52 = vld [vmem:[%s17682_s30 + $0x8] sm:$0xff]   ;;  %v16859_v53 = vld [vmem:[%s17680_s11 + $0x330] sm:$0xff]  }
  0x8b   : > { %v16860_v54 = vld [vmem:[%s17682_s30 + $0x10] sm:$0xff]   ;;  %v17813_v56 = vld [vmem:[%s20419_s2 + $0x1c] sm:$0xf]  ;;  %v16863_v59 = vld [vmem:[%s17680_s11 + $0x340] sm:$0xff]  }
  0x8c   : > { %v16861_v57 = vld [vmem:[%s17680_s11 + $0x338] sm:$0xff]   ;;  %v16864_v60 = vld [vmem:[%s17682_s30 + $0x20] sm:$0xff]   ;;  %v16865_v61 = vld [vmem:[%s17680_s11 + $0x348] sm:$0xff]  }
  0x8d   : > { %v16862_v58 = vld [vmem:[%s17682_s30 + $0x18] sm:$0xff]   ;;  %v16866_v62 = vld [vmem:[%s17682_s30 + $0x28] sm:$0xff]   ;;  %v16867_v63 = vld [vmem:[%s17680_s11 + $0x350] sm:$0xff]  }
  0x8e   : > { %v16868_v0 = vld [vmem:[%s17682_s30 + $0x30] sm:$0xff]   ;;  %v16869_v1 = vld [vmem:[%s17680_s11 + $0x358] sm:$0xff]   ;;  %v16871_v4 = vld [vmem:[%s17680_s11 + $0x360] sm:$0xff]  }
  0x8f   : > { %14239 = vmatmul.mubr.msk.bf16.gmra.mrb[8].mxu1 %vm1436_vm1, %v16825_v18  ;;  %v16870_v2 = vld [vmem:[%s17682_s30 + $0x38] sm:$0xff]   ;;  %v16872_v5 = vld [vmem:[%s17682_s30 + $0x40] sm:$0xff]   ;;  %v16873_v6 = vld [vmem:[%s17680_s11 + $0x368] sm:$0xff]  }
  0x90   : > { %14887 = vmatmul.mubr.msk.bf16.gmra.mrb[8].mxu0 %vm1436_vm1, %v16826_v19  ;;  %14242 = vmatprep.mubr.msk.bf16.mxu1 %vm1436_vm1, %v16827_v20  ;;  %v16874_v7 = vld [vmem:[%s17682_s30 + $0x48] sm:$0xff]   ;;  %v16875_v8 = vld [vmem:[%s17680_s11 + $0x370] sm:$0xff]   ;;  %v16877_v10 = vld [vmem:[%s17680_s11 + $0x378] sm:$0xff]  }
  0x91   : > { %14890 = vmatprep.mubr.msk.bf16.mxu0 %vm1436_vm1, %v16828_v21  ;;  %v16876_v9 = vld [vmem:[%s17682_s30 + $0x50] sm:$0xff]   ;;  %v16878_v12 = vld [vmem:[%s17682_s30 + $0x58] sm:$0xff]   ;;  %v16879_v13 = vld [vmem:[%s17680_s11 + $0x380] sm:$0xff]  }
  0x92   : > { %v16880_v14 = vld [vmem:[%s17682_s30 + $0x60] sm:$0xff]   ;;  %v16881_v15 = vld [vmem:[%s17680_s11 + $0x388] sm:$0xff]   ;;  %v16883_v17 = vld [vmem:[%s17680_s11 + $0x390] sm:$0xff]  }
  0x93   : > { %v16882_v16 = vld [vmem:[%s17682_s30 + $0x68] sm:$0xff]   ;;  %v16884_v18 = vld [vmem:[%s17682_s30 + $0x70] sm:$0xff]   ;;  %v16885_v19 = vld [vmem:[%s17680_s11 + $0x398] sm:$0xff]  }
  0x94   : > { %v16886_v20 = vld [vmem:[%s17682_s30 + $0x78] sm:$0xff]   ;;  %v16887_v21 = vld [vmem:[%s17680_s11 + $0x3a0] sm:$0xff]   ;;  %v16900_v34 = vld [vmem:[%s17682_s30 + $0x150] sm:$0xff]  }
  0x97   : > { %14243 = vmatmul.mubr.msk.bf16.gmra.mrb[12].mxu1 %vm1436_vm1, %v16829_v22  ;;  %v16888_v22 = vld [vmem:[%s17682_s30 + $0x80] sm:$0xff]  }
  0x98   : > { %14891 = vmatmul.mubr.msk.bf16.gmra.mrb[12].mxu0 %vm1436_vm1, %v16830_v23  ;;  %14246 = vmatprep.mubr.msk.bf16.mxu1 %vm1436_vm1, %v16831_v24  ;;  %v16889_v23 = vld [vmem:[%s17680_s11 + $0x3a8] sm:$0xff]  }
  0x99   : > { %14894 = vmatprep.mubr.msk.bf16.mxu0 %vm1436_vm1, %v16832_v25  ;;  %v16890_v24 = vld [vmem:[%s17682_s30 + $0x88] sm:$0xff]   ;;  %v16891_v25 = vld [vmem:[%s17680_s11 + $0x3b0] sm:$0xff]  }
  0x9f   : > { %14247 = vmatmul.mubr.msk.bf16.gmra.mrb[16].mxu1 %vm1436_vm1, %v16833_v26  ;;  %v16892_v26 = vld [vmem:[%s17682_s30 + $0x90] sm:$0xff]  }
  0xa0   : > { %14895 = vmatmul.mubr.msk.bf16.gmra.mrb[16].mxu0 %vm1436_vm1, %v16834_v27  ;;  %14250 = vmatprep.mubr.msk.bf16.mxu1 %vm1436_vm1, %v16835_v28  ;;  %v16893_v27 = vld [vmem:[%s17680_s11 + $0x3b8] sm:$0xff]  }
  0xa1   : > { %14898 = vmatprep.mubr.msk.bf16.mxu0 %vm1436_vm1, %v16836_v29  ;;  %v16894_v28 = vld [vmem:[%s17682_s30 + $0x98] sm:$0xff]   ;;  %v16895_v29 = vld [vmem:[%s17680_s11 + $0x3c0] sm:$0xff]  }
  0xa7   : > { %14251 = vmatmul.mubr.msk.bf16.gmra.mrb[20].mxu1 %vm1436_vm1, %v16837_v30  ;;  %v16896_v30 = vld [vmem:[%s17682_s30 + $0x140] sm:$0xff]  }
  0xa8   : > { %14899 = vmatmul.mubr.msk.bf16.gmra.mrb[20].mxu0 %vm1436_vm1, %v16838_v31  ;;  %14254 = vmatprep.mubr.msk.bf16.mxu1 %vm1436_vm1, %v16839_v32  ;;  %v16897_v31 = vld [vmem:[%s17680_s11 + $0x3c8] sm:$0xff]  }
  0xa9   : > { %14902 = vmatprep.mubr.msk.bf16.mxu0 %vm1436_vm1, %v16840_v33  ;;  %v16898_v32 = vld [vmem:[%s17682_s30 + $0x148] sm:$0xff]   ;;  %v16899_v33 = vld [vmem:[%s17680_s11 + $0x3d0] sm:$0xff]  }
  0xaf   : > { %14255 = vmatmul.mubr.msk.bf16.gmra.mrb[24].mxu1 %vm1436_vm1, %v16841_v35  ;;  %v17899_v35 = vsel %vm1677_vm0, %v17813_v56, 0 }
  0xb0   : > { %14903 = vmatmul.mubr.msk.bf16.gmra.mrb[24].mxu0 %vm1436_vm1, %v16842_v36  ;;  %14258 = vmatprep.mubr.msk.bf16.mxu1 %vm1436_vm1, %v16843_v37  ;;  %v16901_v36 = vld [vmem:[%s17680_s11 + $0x3d8] sm:$0xff]  }
  0xb1   : > { %14906 = vmatprep.mubr.msk.bf16.mxu0 %vm1436_vm1, %v16844_v38  ;;  %v16902_v37 = vld [vmem:[%s17682_s30 + $0x158] sm:$0xff]   ;;  %v16903_v38 = vld [vmem:[%s17680_s11 + $0x3e0] sm:$0xff]  }
  0xb7   : > { %14259 = vmatmul.mubr.msk.bf16.gmra.mrb[28].mxu1 %vm1436_vm1, %v16845_v39  ;;  %v17215_v39 = vld [vmem:[%s20419_s2 + $0xc] sm:$0xf] }
  0xb8   : > { %14907 = vmatmul.mubr.msk.bf16.gmra.mrb[28].mxu0 %vm1436_vm1, %v16846_v40  ;;  %14262 = vmatprep.mubr.msk.bf16.mxu1 %vm1436_vm1, %v16847_v41  ;;  %v16904_v40 = vld [vmem:[%s17682_s30 + $0x160] sm:$0xff]   ;;  %v16905_v41 = vld [vmem:[%s17680_s11 + $0x3e8] sm:$0xff]  }
  0xb9   : > { %14910 = vmatprep.mubr.msk.bf16.mxu0 %vm1436_vm1, %v16848_v42  ;;  %v16906_v42 = vld [vmem:[%s17682_s30 + $0x168] sm:$0xff]  }
  0xbf   : > { %14263 = vmatmul.mubr.msk.bf16.gmra.mrb[32].mxu1 %vm1436_vm1, %v16849_v43  ;;  %v16907_v43 = vld [vmem:[%s17680_s11 + $0x3f0] sm:$0xff]  }
  0xc0   : > { %14911 = vmatmul.mubr.msk.bf16.gmra.mrb[32].mxu0 %vm1436_vm1, %v16850_v44  ;;  %14266 = vmatprep.mubr.msk.bf16.mxu1 %vm1436_vm1, %v16851_v45  ;;  %v16908_v44 = vld [vmem:[%s17682_s30 + $0x170] sm:$0xff]   ;;  %v16909_v45 = vld [vmem:[%s17680_s11 + $0x3f8] sm:$0xff]  }
  0xc1   : > { %14914 = vmatprep.mubr.msk.bf16.mxu0 %vm1436_vm1, %v16852_v46  ;;  %v16910_v46 = vld [vmem:[%s17682_s30 + $0x178] sm:$0xff]  }
  0xc7   : > { %14267 = vmatmul.mubr.msk.bf16.gmra.mrb[36].mxu1 %vm1436_vm1, %v16853_v47  ;;  %v16911_v47 = vld [vmem:[%s17680_s11 + $0x400] sm:$0xff]  }
  0xc8   : > { %14915 = vmatmul.mubr.msk.bf16.gmra.mrb[36].mxu0 %vm1436_vm1, %v16854_v48  ;;  %14270 = vmatprep.mubr.msk.bf16.mxu1 %vm1436_vm1, %v16855_v49  ;;  %v16912_v48 = vld [vmem:[%s17682_s30 + $0x180] sm:$0xff]   ;;  %v16913_v49 = vld [vmem:[%s17680_s11 + $0x408] sm:$0xff]  }
  0xc9   : > { %14920 = vmatprep.mubr.msk.bf16.mxu0 %vm1436_vm1, %v16856_v50  ;;  %v16914_v50 = vld [vmem:[%s17682_s30 + $0x188] sm:$0xff]  }
  0xcf   : > { %14271 = vmatmul.mubr.msk.bf16.gmra.mrb[40].mxu1 %vm1436_vm1, %v16857_v51  ;;  %v16915_v51 = vld [vmem:[%s17680_s11 + $0x410] sm:$0xff]  }
  0xd0   : > { %14921 = vmatmul.mubr.msk.bf16.vlgmr.msra.gmra.mrb[0].mxu0 %vm1436_vm1, %v16858_v52  ;;  %14274 = vmatprep.mubr.msk.bf16.mxu1 %vm1436_vm1, %v16859_v53  ;;  %v16916_v52 = vld [vmem:[%s17682_s30 + $0x190] sm:$0xff]  }
  0xd1   : > { %14961 = vmatpush3.bf16.msra.mxu0 %v17807_v55  ;;  %14924 = vmatprep.mubr.msk.bf16.mxu0 %vm1436_vm1, %v16860_v54  ;;  %v17942_v53 = vld [vmem:[%s20419_s2 + $0x10] sm:$0xf]  ;;  %v16917_v54 = vld [vmem:[%s17680_s11 + $0x418] sm:$0xff]  }
  0xd2   : > { %16659 = vmatprep.subr.msk.bf16.mxu0 %vm1677_vm0, %v17813_v56  ;;  %16654 = vmatprep.subr.msk.bf16.mxu1 %vm1677_vm0, %v17942_v53  ;;  %v16918_v56 = vld [vmem:[%s17682_s30 + $0x198] sm:$0xff]  }
  0xd7   : > { %14275 = vmatmul.mubr.msk.bf16.gmra.mrb[44].mxu1 %vm1436_vm1, %v16861_v57  ;;  %v16919_v57 = vld [vmem:[%s17680_s11 + $0x420] sm:$0xff]  }
  0xd8   : > { %14925 = vmatmul.mubr.msk.bf16.gmra.mrb[4].mxu0 %vm1436_vm1, %v16862_v58  ;;  %14278 = vmatprep.mubr.msk.bf16.mxu1 %vm1436_vm1, %v16863_v59  ;;  %v16920_v58 = vld [vmem:[%s17682_s30 + $0x1a0] sm:$0xff]   ;;  %v16921_v59 = vld [vmem:[%s17680_s11 + $0x428] sm:$0xff]  }
  0xd9   : > { %14928 = vmatprep.mubr.msk.bf16.mxu0 %vm1436_vm1, %v16864_v60  ;;  %v16922_v60 = vld [vmem:[%s17682_s30 + $0x1a8] sm:$0xff]  }
  0xdf   : > { %14279 = vmatmul.mubr.msk.bf16.gmra.mrb[48].mxu1 %vm1436_vm1, %v16865_v61  ;;  %v16923_v61 = vld [vmem:[%s17680_s11 + $0x430] sm:$0xff]  }
  0xe0   : > { %14929 = vmatmul.mubr.msk.bf16.gmra.mrb[8].mxu0 %vm1436_vm1, %v16866_v62  ;;  %14282 = vmatprep.mubr.msk.bf16.mxu1 %vm1436_vm1, %v16867_v63  ;;  %v16924_v62 = vld [vmem:[%s17682_s30 + $0x1b0] sm:$0xff]   ;;  %v16925_v63 = vld [vmem:[%s17680_s11 + $0x438] sm:$0xff]  }
  0xe1   : > { %14932 = vmatprep.mubr.msk.bf16.mxu0 %vm1436_vm1, %v16868_v0  ;;  %v16926_v0 = vld [vmem:[%s17682_s30 + $0x1b8] sm:$0xff]  }
  0xe7   : > { %14283 = vmatmul.mubr.msk.bf16.gmra.mrb[52].mxu1 %vm1436_vm1, %v16869_v1  ;;  %v16927_v1 = vld [vmem:[%s17680_s11 + $0x440] sm:$0xff]  }
  0xe8   : > { %14933 = vmatmul.mubr.msk.bf16.gmra.mrb[12].mxu0 %vm1436_vm1, %v16870_v2  ;;  %14286 = vmatprep.mubr.msk.bf16.mxu1 %vm1436_vm1, %v16871_v4  ;;  %v16928_v2 = vld [vmem:[%s17682_s30 + $0x1c0] sm:$0xff]   ;;  %v16929_v4 = vld [vmem:[%s17680_s11 + $0x448] sm:$0xff]  }
  0xe9   : > { %14936 = vmatprep.mubr.msk.bf16.mxu0 %vm1436_vm1, %v16872_v5  ;;  %v16930_v5 = vld [vmem:[%s17682_s30 + $0x1c8] sm:$0xff]  }
  0xef   : > { %14287 = vmatmul.mubr.msk.bf16.gmra.mrb[56].mxu1 %vm1436_vm1, %v16873_v6  ;;  %v16931_v6 = vld [vmem:[%s17680_s11 + $0x450] sm:$0xff]  }
  0xf0   : > { %14937 = vmatmul.mubr.msk.bf16.gmra.mrb[16].mxu0 %vm1436_vm1, %v16874_v7  ;;  %14290 = vmatprep.mubr.msk.bf16.mxu1 %vm1436_vm1, %v16875_v8  ;;  %v16932_v7 = vld [vmem:[%s17682_s30 + $0x1d0] sm:$0xff]   ;;  %v17982_v8 = vld [vmem:[%s17680_s11 + $0x458] sm:$0xff]  }
  0xf1   : > { %14940 = vmatprep.mubr.msk.bf16.mxu0 %vm1436_vm1, %v16876_v9  ;;  %v16934_v9 = vld [vmem:[%s17682_s30 + $0x1d8] sm:$0xff]  }
  0xf7   : > { %14291 = vmatmul.mubr.msk.bf16.gmra.mrb[60].mxu1 %vm1436_vm1, %v16877_v10  ;;  %v17986_v10 = vld [vmem:[%s17680_s11 + $0x460] sm:$0xff]  }
  0xf8   : > { %14941 = vmatmul.mubr.msk.bf16.gmra.mrb[20].mxu0 %vm1436_vm1, %v16878_v12  ;;  %14294 = vmatprep.mubr.msk.bf16.mxu1 %vm1436_vm1, %v16879_v13  ;;  %v16936_v12 = vld [vmem:[%s17682_s30 + $0x1e0] sm:$0xff]   ;;  %v17996_v13 = vld [vmem:[%s17680_s11 + $0x468] sm:$0xff]  }
  0xf9   : > { %14944 = vmatprep.mubr.msk.bf16.mxu0 %vm1436_vm1, %v16880_v14  ;;  %v16938_v14 = vld [vmem:[%s17682_s30 + $0x1e8] sm:$0xff]  }
  0xff   : > { %14295 = vmatmul.mubr.msk.bf16.gmra.mrb[64].mxu1 %vm1436_vm1, %v16881_v15  ;;  %v18000_v15 = vld [vmem:[%s17680_s11 + $0x470] sm:$0xff]  }
 0x100   : > { %14945 = vmatmul.mubr.msk.bf16.gmra.mrb[24].mxu0 %vm1436_vm1, %v16882_v16  ;;  %14298 = vmatprep.mubr.msk.bf16.mxu1 %vm1436_vm1, %v16883_v17  ;;  %v16940_v16 = vld [vmem:[%s17682_s30 + $0x1f0] sm:$0xff]   ;;  %v18011_v17 = vld [vmem:[%s17680_s11 + $0x478] sm:$0xff]  }
 0x101   : > { %14948 = vmatprep.mubr.msk.bf16.mxu0 %vm1436_vm1, %v16884_v18  ;;  %v16942_v18 = vld [vmem:[%s17682_s30 + $0x1f8] sm:$0xff]  }
 0x107   : > { %14299 = vmatmul.mubr.msk.bf16.gmra.mrb[68].mxu1 %vm1436_vm1, %v16885_v19  ;;  %v18015_v19 = vld [vmem:[%s17680_s11 + $0x480] sm:$0xff]  }
 0x108   : > { %14949 = vmatmul.mubr.msk.bf16.gmra.mrb[28].mxu0 %vm1436_vm1, %v16886_v20  ;;  %14302 = vmatprep.mubr.msk.bf16.mxu1 %vm1436_vm1, %v16887_v21  ;;  %v17216_v20 = vld [vmem:[%s20419_s2 + $0x4] sm:$0xf] }
 0x109   : > { %14952 = vmatprep.mubr.msk.bf16.mxu0 %vm1436_vm1, %v16888_v22  ;;  %v16944_v21 = vld [vmem:[%s17682_s30 + $0x200] sm:$0xff]   ;;  %v16946_v22 = vld [vmem:[%s17682_s30 + $0x208] sm:$0xff]  }
 0x10f   : > { %14303 = vmatmul.mubr.msk.bf16.gmra.mrb[72].mxu1 %vm1436_vm1, %v16889_v23  ;;  %v18033_v23 = vld [vmem:[%s17680_s11 + $0x490] sm:$0xff]  }
 0x110   : > { %14953 = vmatmul.mubr.msk.bf16.gmra.mrb[32].mxu0 %vm1436_vm1, %v16890_v24  ;;  %14306 = vmatprep.mubr.msk.bf16.mxu1 %vm1436_vm1, %v16891_v25  ;;  %v16948_v24 = vld [vmem:[%s17682_s30 + $0x210] sm:$0xff]   ;;  %v18043_v25 = vld [vmem:[%s17680_s11 + $0x498] sm:$0xff]  }
 0x111   : > { %14956 = vmatprep.mubr.msk.bf16.mxu0 %vm1436_vm1, %v16892_v26  ;;  %v16950_v26 = vld [vmem:[%s17682_s30 + $0x218] sm:$0xff]  }
 0x117   : > { %14307 = vmatmul.mubr.msk.bf16.gmra.mrb[76].mxu1 %vm1436_vm1, %v16893_v27  ;;  %v18047_v27 = vld [vmem:[%s17680_s11 + $0x4a0] sm:$0xff]  }
 0x118   : > { %14957 = vmatmul.mubr.msk.bf16.gmra.mrb[36].mxu0 %vm1436_vm1, %v16894_v28  ;;  %14310 = vmatprep.mubr.msk.bf16.mxu1 %vm1436_vm1, %v16895_v29  ;;  %v16952_v28 = vld [vmem:[%s17682_s30 + $0x220] sm:$0xff]   ;;  %v18057_v29 = vld [vmem:[%s17680_s11 + $0x4a8] sm:$0xff]  }
 0x119   : > { %14962 = vmatprep.mubr.msk.bf16.mxu0 %vm1436_vm1, %v16896_v30  ;;  %v16954_v30 = vld [vmem:[%s17682_s30 + $0x228] sm:$0xff]  }
 0x11f   : > { %14311 = vmatmul.mubr.msk.bf16.gmra.mrb[80].mxu1 %vm1436_vm1, %v16897_v31  ;;  %v18061_v31 = vld [vmem:[%s17680_s11 + $0x4b0] sm:$0xff]  }
 0x120   : > { %14963 = vmatmul.mubr.msk.bf16.vlgmr.msra.gmra.mrb[0].mxu0 %vm1436_vm1, %v16898_v32  ;;  %14314 = vmatprep.mubr.msk.bf16.mxu1 %vm1436_vm1, %v16899_v33  ;;  %v16956_v32 = vld [vmem:[%s17682_s30 + $0x230] sm:$0xff]   ;;  %v18071_v33 = vld [vmem:[%s17680_s11 + $0x4b8] sm:$0xff]  }
 0x121   : > { %15003 = vmatpush3.bf16.msra.mxu0 %v17899_v35  ;;  %14966 = vmatprep.mubr.msk.bf16.mxu0 %vm1436_vm1, %v16900_v34  ;;  %v16958_v34 = vld [vmem:[%s17682_s30 + $0x238] sm:$0xff]  }
 0x122   : > { %16660 = vmatprep.subr.msk.bf16.mxu0 %vm1677_vm0, %v17215_v39  ;;  %v16962_v39 = vld [vmem:[%s17682_s30 + $0x248] sm:$0xff]  }
 0x127   : > { %14315 = vmatmul.mubr.msk.bf16.gmra.mrb[84].mxu1 %vm1436_vm1, %v16901_v36  ;;  %v18075_v36 = vld [vmem:[%s17680_s11 + $0x4c0] sm:$0xff]  }
 0x128   : > { %14967 = vmatmul.mubr.msk.bf16.gmra.mrb[4].mxu0 %vm1436_vm1, %v16902_v37  ;;  %14318 = vmatprep.mubr.msk.bf16.mxu1 %vm1436_vm1, %v16903_v38  ;;  %v16960_v37 = vld [vmem:[%s17682_s30 + $0x240] sm:$0xff]   ;;  %v18085_v38 = vld [vmem:[%s17680_s11 + $0x4c8] sm:$0xff]  }
 0x129   : > { %14970 = vmatprep.mubr.msk.bf16.mxu0 %vm1436_vm1, %v16904_v40  ;;  %v18089_v40 = vld [vmem:[%s17680_s11 + $0x4d0] sm:$0xff]  }
 0x12f   : > { %14319 = vmatmul.mubr.msk.bf16.gmra.mrb[88].mxu1 %vm1436_vm1, %v16905_v41  ;;  %v16964_v41 = vld [vmem:[%s17682_s30 + $0x250] sm:$0xff]  }
 0x130   : > { %14971 = vmatmul.mubr.msk.bf16.gmra.mrb[8].mxu0 %vm1436_vm1, %v16906_v42  ;;  %14322 = vmatprep.mubr.msk.bf16.mxu1 %vm1436_vm1, %v16907_v43  ;;  %v18099_v42 = vld [vmem:[%s17680_s11 + $0x4d8] sm:$0xff]  }
 0x131   : > { %14974 = vmatprep.mubr.msk.bf16.mxu0 %vm1436_vm1, %v16908_v44  ;;  %v16966_v43 = vld [vmem:[%s17682_s30 + $0x258] sm:$0xff]   ;;  %v18103_v44 = vld [vmem:[%s17680_s11 + $0x4e0] sm:$0xff]  }
 0x137   : > { %14323 = vmatmul.mubr.msk.bf16.gmra.mrb[92].mxu1 %vm1436_vm1, %v16909_v45  ;;  %v16968_v45 = vld [vmem:[%s17682_s30 + $0x260] sm:$0xff]  }
 0x138   : > { %14975 = vmatmul.mubr.msk.bf16.gmra.mrb[12].mxu0 %vm1436_vm1, %v16910_v46  ;;  %14326 = vmatprep.mubr.msk.bf16.mxu1 %vm1436_vm1, %v16911_v47  ;;  %v18113_v46 = vld [vmem:[%s17680_s11 + $0x4e8] sm:$0xff]  }
 0x139   : > { %14978 = vmatprep.mubr.msk.bf16.mxu0 %vm1436_vm1, %v16912_v48  ;;  %v16970_v47 = vld [vmem:[%s17682_s30 + $0x268] sm:$0xff]   ;;  %v18117_v48 = vld [vmem:[%s17680_s11 + $0x4f0] sm:$0xff]  }
 0x13f   : > { %14327 = vmatmul.mubr.msk.bf16.gmra.mrb[96].mxu1 %vm1436_vm1, %v16913_v49  ;;  %v16972_v49 = vld [vmem:[%s17682_s30 + $0x270] sm:$0xff]  }
 0x140   : > { %14979 = vmatmul.mubr.msk.bf16.gmra.mrb[16].mxu0 %vm1436_vm1, %v16914_v50  ;;  %14330 = vmatprep.mubr.msk.bf16.mxu1 %vm1436_vm1, %v16915_v51  ;;  %v18127_v50 = vld [vmem:[%s17680_s11 + $0x4f8] sm:$0xff]  }
 0x141   : > { %14982 = vmatprep.mubr.msk.bf16.mxu0 %vm1436_vm1, %v16916_v52  ;;  %v16974_v51 = vld [vmem:[%s17682_s30 + $0x278] sm:$0xff]   ;;  %v16975_v52 = vld [vmem:[%s17680_s11] sm:$0xff]  }
 0x147   : > { %14331 = vmatmul.mubr.msk.bf16.gmra.mrb[100].mxu1 %vm1436_vm1, %v16917_v54  ;;  %v17217_v54 = vld [vmem:[%s17680_s11 + $0x320] sm:$0xff]  }
 0x148   : > { %14983 = vmatmul.mubr.msk.bf16.gmra.mrb[20].mxu0 %vm1436_vm1, %v16918_v56  ;;  %14334 = vmatprep.mubr.msk.bf16.mxu1 %vm1436_vm1, %v16919_v57  ;;  %v16976_v56 = vld [vmem:[%s17680_s11 + $0x8] sm:$0xff]   ;;  %v4474_v57 = vsel %vm1677_vm0, %v17942_v53, 0  ;;  %v16979_v53 = vld [vmem:[%s17680_s11 + $0x20] sm:$0xff]  }
 0x149   : > { %14986 = vmatprep.mubr.msk.bf16.mxu0 %vm1436_vm1, %v16920_v58  ;;  %v16977_v58 = vld [vmem:[%s17680_s11 + $0x10] sm:$0xff]  }
 0x14f   : > { %14335 = vmatmul.mubr.msk.bf16.gmra.mrb[104].mxu1 %vm1436_vm1, %v16921_v59  ;;  %v17218_v59 = vld [vmem:[%s17680_s11 + $0x328] sm:$0xff]  }
 0x150   : > { %14987 = vmatmul.mubr.msk.bf16.gmra.mrb[24].mxu0 %vm1436_vm1, %v16922_v60  ;;  %14338 = vmatprep.mubr.msk.bf16.mxu1 %vm1436_vm1, %v16923_v61  ;;  %v16978_v60 = vld [vmem:[%s17680_s11 + $0x18] sm:$0xff]   ;;  %v17219_v61 = vld [vmem:[%s17680_s11 + $0x330] sm:$0xff]  }
 0x151   : > { %14990 = vmatprep.mubr.msk.bf16.mxu0 %vm1436_vm1, %v16924_v62  ;;  %v17220_v62 = vld [vmem:[%s20419_s2 + $0x14] sm:$0xf] }
 0x157   : > { %14339 = vmatmul.mubr.msk.bf16.gmra.mrb[108].mxu1 %vm1436_vm1, %v16925_v63  ;;  %v17222_v63 = vld [vmem:[%s17680_s11 + $0x340] sm:$0xff]  }
 0x158   : > { %14991 = vmatmul.mubr.msk.bf16.gmra.mrb[28].mxu0 %vm1436_vm1, %v16926_v0  ;;  %14342 = vmatprep.mubr.msk.bf16.mxu1 %vm1436_vm1, %v16927_v1  ;;  %v16980_v0 = vld [vmem:[%s17680_s11 + $0x28] sm:$0xff]   ;;  %v16981_v1 = vld [vmem:[%s17680_s11 + $0x30] sm:$0xff]  }
 0x159   : > { %14994 = vmatprep.mubr.msk.bf16.mxu0 %vm1436_vm1, %v16928_v2  ;;  %v17223_v2 = vld [vmem:[%s17680_s11 + $0x348] sm:$0xff]  }
 0x15f   : > { %14343 = vmatmul.mubr.msk.bf16.gmra.mrb[112].mxu1 %vm1436_vm1, %v16929_v4  ;;  %v17224_v4 = vld [vmem:[%s17680_s11 + $0x350] sm:$0xff]  }
 0x160   : > { %14995 = vmatmul.mubr.msk.bf16.gmra.mrb[32].mxu0 %vm1436_vm1, %v16930_v5  ;;  %14346 = vmatprep.mubr.msk.bf16.mxu1 %vm1436_vm1, %v16931_v6  ;;  %v16982_v5 = vld [vmem:[%s17680_s11 + $0x38] sm:$0xff]   ;;  %v16983_v6 = vld [vmem:[%s17680_s11 + $0x40] sm:$0xff]  }
 0x161   : > { %14998 = vmatprep.mubr.msk.bf16.mxu0 %vm1436_vm1, %v16932_v7  ;;  %v17225_v7 = vld [vmem:[%s17680_s11 + $0x358] sm:$0xff]  }
 0x167   : > { %14347 = vmatmul.mubr.msk.bf16.gmra.mrb[116].mxu1 %vm1436_vm1, %v17982_v8 }
 0x168   : > { %14999 = vmatmul.mubr.msk.bf16.gmra.mrb[36].mxu0 %vm1436_vm1, %v16934_v9  ;;  %14350 = vmatprep.mubr.msk.bf16.mxu1 %vm1436_vm1, %v17986_v10  ;;  %v17226_v9 = vld [vmem:[%s17680_s11 + $0x360] sm:$0xff]  }
 0x169   : > { %15004 = vmatprep.mubr.msk.bf16.mxu0 %vm1436_vm1, %v16936_v12  ;;  %v16984_v12 = vld [vmem:[%s17680_s11 + $0x48] sm:$0xff]  }
 0x16f   : > { %14351 = vmatmul.mubr.msk.bf16.gmra.mrb[120].mxu1 %vm1436_vm1, %v17996_v13 }
 0x170   : > { %15005 = vmatmul.mubr.msk.bf16.vlgmr.msra.gmra.mrb[0].mxu0 %vm1436_vm1, %v16938_v14  ;;  %14354 = vmatprep.mubr.msk.bf16.mxu1 %vm1436_vm1, %v18000_v15  ;;  %v16985_v14 = vld [vmem:[%s17680_s11 + $0x50] sm:$0xff]  }
 0x171   : > { %15045 = vmatpush3.bf16.msra.mxu0 %v17698_v3  ;;  %15008 = vmatprep.mubr.msk.bf16.mxu0 %vm1436_vm1, %v16940_v16  ;;  %v18029_v3 = vld [vmem:[%s17680_s11 + $0x488] sm:$0xff]  }
 0x172   : > { %16661 = vmatprep.subr.msk.bf16.mxu0 %vm1677_vm0, %v17216_v20  ;;  %v17227_v16 = vld [vmem:[%s17680_s11 + $0x368] sm:$0xff]   ;;  %v16986_v20 = vld [vmem:[%s17680_s11 + $0x58] sm:$0xff]  }
 0x177   : > { %14355 = vmatmul.mubr.msk.bf16.gmra.mrb[124].mxu1 %vm1436_vm1, %v18011_v17 }
 0x178   : > { %15009 = vmatmul.mubr.msk.bf16.gmra.mrb[4].mxu0 %vm1436_vm1, %v16942_v18  ;;  %14358 = vmatprep.mubr.msk.bf16.mxu1 %vm1436_vm1, %v18015_v19  ;;  %v17228_v18 = vld [vmem:[%s17680_s11 + $0x370] sm:$0xff]  }
 0x179   : > { %15012 = vmatprep.mubr.msk.bf16.mxu0 %vm1436_vm1, %v16944_v21  ;;  %v16987_v21 = vld [vmem:[%s17680_s11 + $0x60] sm:$0xff]  }
 0x17f   : > { %14359 = vmatmul.mubr.msk.bf16.gmra.mrb[128].mxu1 %vm1436_vm1, %v18029_v3 }
 0x180   : > { %15013 = vmatmul.mubr.msk.bf16.gmra.mrb[8].mxu0 %vm1436_vm1, %v16946_v22  ;;  %14362 = vmatprep.mubr.msk.bf16.mxu1 %vm1436_vm1, %v18033_v23  ;;  %v17229_v22 = vld [vmem:[%s17680_s11 + $0x378] sm:$0xff]  }
 0x181   : > { %15016 = vmatprep.mubr.msk.bf16.mxu0 %vm1436_vm1, %v16948_v24  ;;  %v17230_v24 = vld [vmem:[%s17680_s11 + $0x380] sm:$0xff]  }
 0x187   : > { %14363 = vmatmul.mubr.msk.bf16.gmra.mrb[132].mxu1 %vm1436_vm1, %v18043_v25 }
 0x188   : > { %15017 = vmatmul.mubr.msk.bf16.gmra.mrb[12].mxu0 %vm1436_vm1, %v16950_v26  ;;  %14366 = vmatprep.mubr.msk.bf16.mxu1 %vm1436_vm1, %v18047_v27  ;;  %v16988_v26 = vld [vmem:[%s17680_s11 + $0x68] sm:$0xff]  }
 0x189   : > { %15020 = vmatprep.mubr.msk.bf16.mxu0 %vm1436_vm1, %v16952_v28  ;;  %v16989_v28 = vld [vmem:[%s17680_s11 + $0x70] sm:$0xff]  }
 0x18f   : > { %14367 = vmatmul.mubr.msk.bf16.gmra.mrb[136].mxu1 %vm1436_vm1, %v18057_v29 }
 0x190   : > { %15021 = vmatmul.mubr.msk.bf16.gmra.mrb[16].mxu0 %vm1436_vm1, %v16954_v30  ;;  %14370 = vmatprep.mubr.msk.bf16.mxu1 %vm1436_vm1, %v18061_v31  ;;  %v17231_v30 = vld [vmem:[%s17680_s11 + $0x388] sm:$0xff]  }
 0x191   : > { %15024 = vmatprep.mubr.msk.bf16.mxu0 %vm1436_vm1, %v16956_v32  ;;  %v17232_v32 = vld [vmem:[%s17680_s11 + $0x390] sm:$0xff]  }
 0x197   : > { %14371 = vmatmul.mubr.msk.bf16.gmra.mrb[140].mxu1 %vm1436_vm1, %v18071_v33 }
 0x198   : > { %15025 = vmatmul.mubr.msk.bf16.gmra.mrb[20].mxu0 %vm1436_vm1, %v16958_v34  ;;  %14374 = vmatprep.mubr.msk.bf16.mxu1 %vm1436_vm1, %v18075_v36  ;;  %v16990_v34 = vld [vmem:[%s17680_s11 + $0x78] sm:$0xff]  }
 0x199   : > { %15028 = vmatprep.mubr.msk.bf16.mxu0 %vm1436_vm1, %v16960_v37  ;;  %v16991_v37 = vld [vmem:[%s17680_s11 + $0x80] sm:$0xff]  }
 0x19f   : > { %14375 = vmatmul.mubr.msk.bf16.gmra.mrb[144].mxu1 %vm1436_vm1, %v18085_v38 }
 0x1a0   : > { %15029 = vmatmul.mubr.msk.bf16.gmra.mrb[24].mxu0 %vm1436_vm1, %v16962_v39  ;;  %14378 = vmatprep.mubr.msk.bf16.mxu1 %vm1436_vm1, %v18089_v40  ;;  %v17233_v39 = vld [vmem:[%s17680_s11 + $0x398] sm:$0xff]  }
 0x1a1   : > { %15032 = vmatprep.mubr.msk.bf16.mxu0 %vm1436_vm1, %v16964_v41  ;;  %v17234_v41 = vld [vmem:[%s17680_s11 + $0x3a0] sm:$0xff]  }
 0x1a7   : > { %14379 = vmatmul.mubr.msk.bf16.gmra.mrb[148].mxu1 %vm1436_vm1, %v18099_v42 }
 0x1a8   : > { %15033 = vmatmul.mubr.msk.bf16.gmra.mrb[28].mxu0 %vm1436_vm1, %v16966_v43  ;;  %14382 = vmatprep.mubr.msk.bf16.mxu1 %vm1436_vm1, %v18103_v44  ;;  %v16992_v43 = vld [vmem:[%s17680_s11 + $0x88] sm:$0xff]  }
 0x1a9   : > { %15036 = vmatprep.mubr.msk.bf16.mxu0 %vm1436_vm1, %v16968_v45  ;;  %v16993_v45 = vld [vmem:[%s17680_s11 + $0x90] sm:$0xff]  }
 0x1af   : > { %14383 = vmatmul.mubr.msk.bf16.gmra.mrb[152].mxu1 %vm1436_vm1, %v18113_v46 }
 0x1b0   : > { %15037 = vmatmul.mubr.msk.bf16.gmra.mrb[32].mxu0 %vm1436_vm1, %v16970_v47  ;;  %14386 = vmatprep.mubr.msk.bf16.mxu1 %vm1436_vm1, %v18117_v48  ;;  %v17235_v47 = vld [vmem:[%s17680_s11 + $0x3a8] sm:$0xff]  }
 0x1b1   : > { %15040 = vmatprep.mubr.msk.bf16.mxu0 %vm1436_vm1, %v16972_v49  ;;  %v17236_v49 = vld [vmem:[%s17680_s11 + $0x3b0] sm:$0xff]  }
 0x1b7   : > { %14387 = vmatmul.mubr.msk.bf16.gmra.mrb[156].mxu1 %vm1436_vm1, %v18127_v50 }
 0x1b8   : > { %15041 = vmatmul.mubr.msk.bf16.gmra.mrb[36].mxu0 %vm1436_vm1, %v16974_v51  ;;  %14392 = vmatprep.mubr.msk.bf16.mxu1 %vm1436_vm1, %v16975_v52  ;;  %v16994_v51 = vld [vmem:[%s17680_s11 + $0x98] sm:$0xff]   ;;  %v18218_v52 = vld [vmem:[%s17680_s11 + $0xa0] sm:$0xff]  }
 0x1b9   : > { %15046 = vmatprep.mubr.msk.bf16.mxu0 %vm1436_vm1, %v17217_v54  ;;  %v17237_v54 = vld [vmem:[%s17680_s11 + $0x3b8] sm:$0xff]  }
 0x1bf   : > { %14393 = vmatmul.mubr.msk.bf16.vlgmr.msra.gmra.mrb[0].mxu1 %vm1436_vm1, %v16976_v56  ;;  %v17238_v56 = vld [vmem:[%s17680_s11 + $0x3c0] sm:$0xff]  }
 0x1c0   : > { %15047 = vmatmul.mubr.msk.bf16.vlgmr.msra.gmra.mrb[40].mxu0 %vm1436_vm1, %v17218_v59  ;;  %14553 = vmatpush3.bf16.msra.mxu1 %v4474_v57  ;;  %v18228_v57 = vld [vmem:[%s17680_s11 + $0xa8] sm:$0xff]  }
 0x1c1   : > { %15167 = vmatpush3.bf16.msra.mxu0 %v17719_v11  ;;  %14396 = vmatprep.mubr.msk.bf16.mxu1 %vm1436_vm1, %v16977_v58  ;;  %v17221_v11 = vld [vmem:[%s17680_s11 + $0x338] sm:$0xff]   ;;  %v18231_v58 = vld [vmem:[%s17680_s11 + $0xb0] sm:$0xff]   ;;  %v17239_v59 = vld [vmem:[%s17680_s11 + $0x3c8] sm:$0xff]  }
 0x1c2   : > { %15050 = vmatprep.mubr.msk.bf16.mxu0 %vm1436_vm1, %v17219_v61  ;;  %16662 = vmatprep.subr.msk.bf16.mxu0 %vm1677_vm0, %v17220_v62  ;;  %v18242_v61 = vld [vmem:[%s17680_s11 + $0xb8] sm:$0xff]  }
 0x1c3   : > { %v17241_v62 = vld [vmem:[%s17680_s11 + $0x3d8] sm:$0xff]  }
 0x1c7   : > { %14397 = vmatmul.mubr.msk.bf16.gmra.mrb[4].mxu1 %vm1436_vm1, %v16978_v60  ;;  %v17240_v60 = vld [vmem:[%s17680_s11 + $0x3d0] sm:$0xff]  }
 0x1c8   : > { %15051 = vmatmul.mubr.msk.bf16.gmra.mrb[44].mxu0 %vm1436_vm1, %v17221_v11  ;;  %14400 = vmatprep.mubr.msk.bf16.mxu1 %vm1436_vm1, %v16979_v53  ;;  %v18245_v53 = vld [vmem:[%s17680_s11 + $0xc0] sm:$0xff]  }
 0x1c9   : > { %15054 = vmatprep.mubr.msk.bf16.mxu0 %vm1436_vm1, %v17222_v63  ;;  %v17242_v11 = vld [vmem:[%s17680_s11 + $0x3e0] sm:$0xff]   ;;  %v18256_v63 = vld [vmem:[%s17680_s11 + $0xc8] sm:$0xff]  }
 0x1cf   : > { %14401 = vmatmul.mubr.msk.bf16.gmra.mrb[8].mxu1 %vm1436_vm1, %v16980_v0  ;;  %v18259_v0 = vld [vmem:[%s17680_s11 + $0xd0] sm:$0xff]  }
 0x1d0   : > { %15055 = vmatmul.mubr.msk.bf16.gmra.mrb[48].mxu0 %vm1436_vm1, %v17223_v2  ;;  %14404 = vmatprep.mubr.msk.bf16.mxu1 %vm1436_vm1, %v16981_v1  ;;  %v17243_v1 = vld [vmem:[%s17680_s11 + $0x3e8] sm:$0xff]   ;;  %v17244_v2 = vld [vmem:[%s17680_s11 + $0x3f0] sm:$0xff]  }
 0x1d1   : > { %15058 = vmatprep.mubr.msk.bf16.mxu0 %vm1436_vm1, %v17224_v4  ;;  %v18270_v4 = vld [vmem:[%s17680_s11 + $0xd8] sm:$0xff]  }
 0x1d7   : > { %14405 = vmatmul.mubr.msk.bf16.gmra.mrb[12].mxu1 %vm1436_vm1, %v16982_v5  ;;  %v18273_v5 = vld [vmem:[%s17680_s11 + $0xe0] sm:$0xff]  }
 0x1d8   : > { %15059 = vmatmul.mubr.msk.bf16.gmra.mrb[52].mxu0 %vm1436_vm1, %v17225_v7  ;;  %14408 = vmatprep.mubr.msk.bf16.mxu1 %vm1436_vm1, %v16983_v6  ;;  %v17245_v6 = vld [vmem:[%s17680_s11 + $0x3f8] sm:$0xff]   ;;  %v17246_v7 = vld [vmem:[%s17680_s11 + $0x400] sm:$0xff]  }
 0x1d9   : > { %15062 = vmatprep.mubr.msk.bf16.mxu0 %vm1436_vm1, %v17226_v9  ;;  %v18284_v9 = vld [vmem:[%s17680_s11 + $0xe8] sm:$0xff]  }
 0x1df   : > { %14409 = vmatmul.mubr.msk.bf16.gmra.mrb[16].mxu1 %vm1436_vm1, %v16984_v12  ;;  %v18287_v12 = vld [vmem:[%s17680_s11 + $0xf0] sm:$0xff]  }
 0x1e0   : > { %15063 = vmatmul.mubr.msk.bf16.gmra.mrb[56].mxu0 %vm1436_vm1, %v17227_v16  ;;  %14412 = vmatprep.mubr.msk.bf16.mxu1 %vm1436_vm1, %v16985_v14  ;;  %v17247_v14 = vld [vmem:[%s17680_s11 + $0x408] sm:$0xff]   ;;  %v17248_v16 = vld [vmem:[%s17680_s11 + $0x410] sm:$0xff]  }
 0x1e1   : > { %15066 = vmatprep.mubr.msk.bf16.mxu0 %vm1436_vm1, %v17228_v18  ;;  %v18298_v18 = vld [vmem:[%s17680_s11 + $0xf8] sm:$0xff]  }
 0x1e7   : > { %14413 = vmatmul.mubr.msk.bf16.gmra.mrb[20].mxu1 %vm1436_vm1, %v16986_v20  ;;  %v18301_v20 = vld [vmem:[%s17680_s11 + $0x100] sm:$0xff]  }
 0x1e8   : > { %15067 = vmatmul.mubr.msk.bf16.gmra.mrb[60].mxu0 %vm1436_vm1, %v17229_v22  ;;  %14416 = vmatprep.mubr.msk.bf16.mxu1 %vm1436_vm1, %v16987_v21  ;;  %v17249_v21 = vld [vmem:[%s17680_s11 + $0x418] sm:$0xff]   ;;  %v17250_v22 = vld [vmem:[%s17680_s11 + $0x420] sm:$0xff]  }
 0x1e9   : > { %15070 = vmatprep.mubr.msk.bf16.mxu0 %vm1436_vm1, %v17230_v24  ;;  %v18312_v24 = vld [vmem:[%s17680_s11 + $0x108] sm:$0xff]  }
 0x1ef   : > { %14417 = vmatmul.mubr.msk.bf16.gmra.mrb[24].mxu1 %vm1436_vm1, %v16988_v26  ;;  %v18315_v26 = vld [vmem:[%s17680_s11 + $0x110] sm:$0xff]  }
 0x1f0   : > { %15071 = vmatmul.mubr.msk.bf16.gmra.mrb[64].mxu0 %vm1436_vm1, %v17231_v30  ;;  %14420 = vmatprep.mubr.msk.bf16.mxu1 %vm1436_vm1, %v16989_v28  ;;  %v17251_v28 = vld [vmem:[%s17680_s11 + $0x428] sm:$0xff]   ;;  %v17252_v30 = vld [vmem:[%s17680_s11 + $0x430] sm:$0xff]  }
 0x1f1   : > { %15074 = vmatprep.mubr.msk.bf16.mxu0 %vm1436_vm1, %v17232_v32 }
 0x1f7   : > { %14421 = vmatmul.mubr.msk.bf16.gmra.mrb[28].mxu1 %vm1436_vm1, %v16990_v34  ;;  %v18328_v34 = vld [vmem:[%s17680_s11 + $0x118] sm:$0xff]  }
 0x1f8   : > { %15075 = vmatmul.mubr.msk.bf16.gmra.mrb[68].mxu0 %vm1436_vm1, %v17233_v39  ;;  %14424 = vmatprep.mubr.msk.bf16.mxu1 %vm1436_vm1, %v16991_v37  ;;  %v18333_v39 = vld [vmem:[%s17680_s11 + $0x120] sm:$0xff]  }
 0x1f9   : > { %15078 = vmatprep.mubr.msk.bf16.mxu0 %vm1436_vm1, %v17234_v41 }
 0x1ff   : > { %14425 = vmatmul.mubr.msk.bf16.gmra.mrb[32].mxu1 %vm1436_vm1, %v16992_v43 }
 0x200   : > { %15079 = vmatmul.mubr.msk.bf16.gmra.mrb[72].mxu0 %vm1436_vm1, %v17235_v47  ;;  %14428 = vmatprep.mubr.msk.bf16.mxu1 %vm1436_vm1, %v16993_v45  ;;  %v17253_v45 = vld [vmem:[%s17680_s11 + $0x438] sm:$0xff]   ;;  %v17254_v47 = vld [vmem:[%s17680_s11 + $0x440] sm:$0xff]  }
 0x201   : > { %15082 = vmatprep.mubr.msk.bf16.mxu0 %vm1436_vm1, %v17236_v49 }
 0x207   : > { %14429 = vmatmul.mubr.msk.bf16.gmra.mrb[36].mxu1 %vm1436_vm1, %v16994_v51  ;;  %v18350_v51 = vld [vmem:[%s17680_s11 + $0x128] sm:$0xff]  }
 0x208   : > { %15083 = vmatmul.mubr.msk.bf16.gmra.mrb[76].mxu0 %vm1436_vm1, %v17237_v54  ;;  %14432 = vmatprep.mubr.msk.bf16.mxu1 %vm1436_vm1, %v18218_v52 }
 0x209   : > { %15086 = vmatprep.mubr.msk.bf16.mxu0 %vm1436_vm1, %v17238_v56  ;;  %v18355_v56 = vld [vmem:[%s17680_s11 + $0x130] sm:$0xff]  }
 0x20f   : > { %14433 = vmatmul.mubr.msk.bf16.gmra.mrb[40].mxu1 %vm1436_vm1, %v18228_v57 }
 0x210   : > { %15087 = vmatmul.mubr.msk.bf16.gmra.mrb[80].mxu0 %vm1436_vm1, %v17239_v59  ;;  %14436 = vmatprep.mubr.msk.bf16.mxu1 %vm1436_vm1, %v18231_v58 }
 0x211   : > { %15090 = vmatprep.mubr.msk.bf16.mxu0 %vm1436_vm1, %v17240_v60 }
 0x217   : > { %14437 = vmatmul.mubr.msk.bf16.gmra.mrb[44].mxu1 %vm1436_vm1, %v18242_v61 }
 0x218   : > { %15091 = vmatmul.mubr.msk.bf16.gmra.mrb[84].mxu0 %vm1436_vm1, %v17241_v62  ;;  %14440 = vmatprep.mubr.msk.bf16.mxu1 %vm1436_vm1, %v18245_v53  ;;  %v17255_v62 = vld [vmem:[%s17680_s11 + $0x448] sm:$0xff]  }
 0x219   : > { %15094 = vmatprep.mubr.msk.bf16.mxu0 %vm1436_vm1, %v17242_v11  ;;  %v17256_v11 = vld [vmem:[%s17680_s11 + $0x450] sm:$0xff]  }
 0x21f   : > { %14441 = vmatmul.mubr.msk.bf16.gmra.mrb[48].mxu1 %vm1436_vm1, %v18256_v63 }
 0x220   : > { %15095 = vmatmul.mubr.msk.bf16.gmra.mrb[88].mxu0 %vm1436_vm1, %v17243_v1  ;;  %14444 = vmatprep.mubr.msk.bf16.mxu1 %vm1436_vm1, %v18259_v0 }
 0x221   : > { %15098 = vmatprep.mubr.msk.bf16.mxu0 %vm1436_vm1, %v17244_v2  ;;  %v18372_v2 = vld [vmem:[%s17680_s11 + $0x138] sm:$0xff]  }
 0x227   : > { %14445 = vmatmul.mubr.msk.bf16.gmra.mrb[52].mxu1 %vm1436_vm1, %v18270_v4 }
 0x228   : > { %15099 = vmatmul.mubr.msk.bf16.gmra.mrb[92].mxu0 %vm1436_vm1, %v17245_v6  ;;  %14448 = vmatprep.mubr.msk.bf16.mxu1 %vm1436_vm1, %v18273_v5 }
 0x229   : > { %15102 = vmatprep.mubr.msk.bf16.mxu0 %vm1436_vm1, %v17246_v7  ;;  %v18377_v7 = vld [vmem:[%s17680_s11 + $0x140] sm:$0xff]  }
 0x22f   : > { %14449 = vmatmul.mubr.msk.bf16.gmra.mrb[56].mxu1 %vm1436_vm1, %v18284_v9 }
 0x230   : > { %15103 = vmatmul.mubr.msk.bf16.gmra.mrb[96].mxu0 %vm1436_vm1, %v17247_v14  ;;  %14452 = vmatprep.mubr.msk.bf16.mxu1 %vm1436_vm1, %v18287_v12 }
 0x231   : > { %15106 = vmatprep.mubr.msk.bf16.mxu0 %vm1436_vm1, %v17248_v16 }
 0x237   : > { %14453 = vmatmul.mubr.msk.bf16.gmra.mrb[60].mxu1 %vm1436_vm1, %v18298_v18 }
 0x238   : > { %15107 = vmatmul.mubr.msk.bf16.gmra.mrb[100].mxu0 %vm1436_vm1, %v17249_v21  ;;  %14456 = vmatprep.mubr.msk.bf16.mxu1 %vm1436_vm1, %v18301_v20 }
 0x239   : > { %15110 = vmatprep.mubr.msk.bf16.mxu0 %vm1436_vm1, %v17250_v22  ;;  %v18394_v22 = vld [vmem:[%s17680_s11 + $0x148] sm:$0xff]  }
 0x23f   : > { %14457 = vmatmul.mubr.msk.bf16.gmra.mrb[64].mxu1 %vm1436_vm1, %v18312_v24 }
 0x240   : > { %15111 = vmatmul.mubr.msk.bf16.gmra.mrb[104].mxu0 %vm1436_vm1, %v17251_v28  ;;  %14460 = vmatprep.mubr.msk.bf16.mxu1 %vm1436_vm1, %v18315_v26 }
 0x241   : > { %15114 = vmatprep.mubr.msk.bf16.mxu0 %vm1436_vm1, %v17252_v30  ;;  %v18399_v30 = vld [vmem:[%s17680_s11 + $0x150] sm:$0xff]  }
 0x243   : > { %v18325_v32 = vpop.f32.mrb[0].mxu0 }
 0x244   : > { %v18330_v37 = vpop.f32.mrb[1].mxu0 }
 0x245   : > { %v18335_v41 = vpop.f32.mrb[2].mxu0 }
 0x246   : > { %v18337_v43 = vpop.f32.mrb[3].mxu0 }
 0x247   : > { %20429 = vst [vmem:[#allocation9_spill] sm:$0xff] %v18337_v43  ;;  %14461 = vmatmul.mubr.msk.bf16.gmra.mrb[68].mxu1 %vm1436_vm1, %v18328_v34 }
 0x248   : > { %15115 = vmatmul.mubr.msk.bf16.gmra.mrb[108].mxu0 %vm1436_vm1, %v17253_v45  ;;  %14464 = vmatprep.mubr.msk.bf16.mxu1 %vm1436_vm1, %v18333_v39 }
 0x249   : > { %15118 = vmatprep.mubr.msk.bf16.mxu0 %vm1436_vm1, %v17254_v47 }
 0x24b   : > { %v18347_v49 = vpop.f32.mrb[4].mxu0 }
 0x24c   : > { %20430 = vst [vmem:[#allocation10_spill] sm:$0xff] %v18347_v49  ;;  %v18352_v54 = vpop.f32.mrb[5].mxu0 }
 0x24d   : > { %20431 = vst [vmem:[#allocation11_spill] sm:$0xff] %v18352_v54  ;;  %v18357_v59 = vpop.f32.mrb[6].mxu0 }
 0x24e   : > { %20432 = vst [vmem:[#allocation12_spill] sm:$0xff] %v18357_v59  ;;  %v18359_v60 = vpop.f32.mrb[7].mxu0 }
 0x24f   : > { %20433 = vst [vmem:[#allocation13_spill] sm:$0xff] %v18359_v60  ;;  %14465 = vmatmul.mubr.msk.bf16.gmra.mrb[72].mxu1 %vm1436_vm1, %v18350_v51 }
 0x250   : > { %15119 = vmatmul.mubr.msk.bf16.gmra.mrb[112].mxu0 %vm1436_vm1, %v17255_v62  ;;  %14468 = vmatprep.mubr.msk.bf16.mxu1 %vm1436_vm1, %v18355_v56 }
 0x251   : > { %15122 = vmatprep.mubr.msk.bf16.mxu0 %vm1436_vm1, %v17256_v11  ;;  %v18421_v11 = vld [vmem:[%s17680_s11 + $0x160] sm:$0xff]  }
 0x253   : > { %v18369_v1 = vpop.f32.mrb[8].mxu0 }
 0x254   : > { %20434 = vst [vmem:[#allocation14_spill] sm:$0xff] %v18369_v1  ;;  %v18374_v6 = vpop.f32.mrb[9].mxu0 }
 0x255   : > { %20435 = vst [vmem:[#allocation15_spill] sm:$0xff] %v18374_v6  ;;  %v18379_v14 = vpop.f32.mrb[10].mxu0 }
 0x256   : > { %20436 = vst [vmem:[#allocation16_spill] sm:$0xff] %v18379_v14  ;;  %v18381_v16 = vpop.f32.mrb[11].mxu0 }
 0x257   : > { %20437 = vst [vmem:[#allocation17_spill] sm:$0xff] %v18381_v16  ;;  %14469 = vmatmul.mubr.msk.bf16.gmra.mrb[76].mxu1 %vm1436_vm1, %v18372_v2 }
 0x258   : > { %15123 = vmatmul.mubr.msk.bf16.gmra.mrb[116].mxu0 %vm1436_vm1, %v17982_v8  ;;  %14472 = vmatprep.mubr.msk.bf16.mxu1 %vm1436_vm1, %v18377_v7 }
 0x259   : > { %15126 = vmatprep.mubr.msk.bf16.mxu0 %vm1436_vm1, %v17986_v10  ;;  %v18416_v10 = vld [vmem:[%s17680_s11 + $0x158] sm:$0xff]  }
 0x25b   : > { %v18391_v21 = vpop.f32.mrb[12].mxu0 }
 0x25c   : > { %20438 = vst [vmem:[#allocation18_spill] sm:$0xff] %v18391_v21  ;;  %v18396_v28 = vpop.f32.mrb[13].mxu0 }
 0x25d   : > { %20439 = vst [vmem:[#allocation19_spill] sm:$0xff] %v18396_v28  ;;  %v18401_v45 = vpop.f32.mrb[14].mxu0 }
 0x25e   : > { %20440 = vst [vmem:[#allocation20_spill] sm:$0xff] %v18401_v45  ;;  %v18403_v47 = vpop.f32.mrb[15].mxu0 }
 0x25f   : > { %20441 = vst [vmem:[#allocation21_spill] sm:$0xff] %v18403_v47  ;;  %14473 = vmatmul.mubr.msk.bf16.gmra.mrb[80].mxu1 %vm1436_vm1, %v18394_v22 }
 0x260   : > { %15127 = vmatmul.mubr.msk.bf16.gmra.mrb[120].mxu0 %vm1436_vm1, %v17996_v13  ;;  %14476 = vmatprep.mubr.msk.bf16.mxu1 %vm1436_vm1, %v18399_v30 }
 0x261   : > { %15130 = vmatprep.mubr.msk.bf16.mxu0 %vm1436_vm1, %v18000_v15  ;;  %v18438_v15 = vld [vmem:[%s17680_s11 + $0x168] sm:$0xff]  }
 0x263   : > { %v18413_v8 = vpop.f32.mrb[16].mxu0 }
 0x264   : > { %20442 = vst [vmem:[#allocation22_spill] sm:$0xff] %v18413_v8  ;;  %v18418_v62 = vpop.f32.mrb[17].mxu0 }
 0x265   : > { %20443 = vst [vmem:[#allocation23_spill] sm:$0xff] %v18418_v62  ;;  %v18423_v47 = vpop.f32.mrb[18].mxu0 }
 0x266   : > { %20444 = vst [vmem:[#allocation24_spill] sm:$0xff] %v18423_v47  ;;  %v18425_v45 = vpop.f32.mrb[19].mxu0 }
 0x267   : > { %20445 = vst [vmem:[#allocation25_spill] sm:$0xff] %v18425_v45  ;;  %14477 = vmatmul.mubr.msk.bf16.gmra.mrb[84].mxu1 %vm1436_vm1, %v18416_v10  ;;  %v18443_v45 = vld [vmem:[%s17680_s11 + $0x170] sm:$0xff]  }
 0x268   : > { %15131 = vmatmul.mubr.msk.bf16.gmra.mrb[124].mxu0 %vm1436_vm1, %v18011_v17  ;;  %14480 = vmatprep.mubr.msk.bf16.mxu1 %vm1436_vm1, %v18421_v11 }
 0x269   : > { %15134 = vmatprep.mubr.msk.bf16.mxu0 %vm1436_vm1, %v18015_v19  ;;  %v18460_v19 = vld [vmem:[%s17680_s11 + $0x178] sm:$0xff]  }
 0x26b   : > { %v18435_v13 = vpop.f32.mrb[20].mxu0 }
 0x26c   : > { %20446 = vst [vmem:[#allocation26_spill] sm:$0xff] %v18435_v13  ;;  %v18440_v47 = vpop.f32.mrb[21].mxu0 }
 0x26d   : > { %20447 = vst [vmem:[#allocation27_spill] sm:$0xff] %v18440_v47  ;;  %v18445_v62 = vpop.f32.mrb[22].mxu0 }
 0x26e   : > { %20448 = vst [vmem:[#allocation28_spill] sm:$0xff] %v18445_v62  ;;  %v18447_v8 = vpop.f32.mrb[23].mxu0 }
 0x26f   : > { %20449 = vst [vmem:[#allocation29_spill] sm:$0xff] %v18447_v8  ;;  %14481 = vmatmul.mubr.msk.bf16.gmra.mrb[88].mxu1 %vm1436_vm1, %v18438_v15  ;;  %v18465_v8 = vld [vmem:[%s17680_s11 + $0x180] sm:$0xff]  }
 0x270   : > { %15135 = vmatmul.mubr.msk.bf16.gmra.mrb[128].mxu0 %vm1436_vm1, %v18029_v3  ;;  %14484 = vmatprep.mubr.msk.bf16.mxu1 %vm1436_vm1, %v18443_v45 }
 0x271   : > { %15138 = vmatprep.mubr.msk.bf16.mxu0 %vm1436_vm1, %v18033_v23  ;;  %v18482_v23 = vld [vmem:[%s17680_s11 + $0x188] sm:$0xff]  }
 0x273   : > { %v18457_v17 = vpop.f32.mrb[24].mxu0 }
 0x274   : > { %20450 = vst [vmem:[#allocation30_spill] sm:$0xff] %v18457_v17  ;;  %v18462_v62 = vpop.f32.mrb[25].mxu0 }
 0x275   : > { %20451 = vst [vmem:[#allocation31_spill] sm:$0xff] %v18462_v62  ;;  %v18467_v47 = vpop.f32.mrb[26].mxu0 }
 0x276   : > { %20452 = vst [vmem:[#allocation32_spill] sm:$0xff] %v18467_v47  ;;  %v18469_v13 = vpop.f32.mrb[27].mxu0 }
 0x277   : > { %20453 = vst [vmem:[#allocation33_spill] sm:$0xff] %v18469_v13  ;;  %14485 = vmatmul.mubr.msk.bf16.gmra.mrb[92].mxu1 %vm1436_vm1, %v18460_v19  ;;  %v18487_v13 = vld [vmem:[%s17680_s11 + $0x190] sm:$0xff]  }
 0x278   : > { %15139 = vmatmul.mubr.msk.bf16.gmra.mrb[132].mxu0 %vm1436_vm1, %v18043_v25  ;;  %14488 = vmatprep.mubr.msk.bf16.mxu1 %vm1436_vm1, %v18465_v8  ;;  %v18498_v25 = vld [vmem:[%s20419_s2 + $0x18] sm:$0xf] }
 0x279   : > { %15142 = vmatprep.mubr.msk.bf16.mxu0 %vm1436_vm1, %v18047_v27  ;;  %16655 = vmatprep.subr.msk.bf16.mxu1 %vm1677_vm0, %v18498_v25 }
 0x27b   : > { %v18479_v3 = vpop.f32.mrb[28].mxu0 }
 0x27c   : > { %20454 = vst [vmem:[#allocation34_spill] sm:$0xff] %v18479_v3  ;;  %v18484_v47 = vpop.f32.mrb[29].mxu0 }
 0x27d   : > { %20455 = vst [vmem:[#allocation35_spill] sm:$0xff] %v18484_v47  ;;  %v18489_v62 = vpop.f32.mrb[30].mxu0  ;;  %v18516_v47 = vld [vmem:[%s17680_s11 + $0x1a0] sm:$0xff]  }
 0x27e   : > { %20456 = vst [vmem:[#allocation36_spill] sm:$0xff] %v18489_v62  ;;  %v18491_v17 = vpop.f32.mrb[31].mxu0 }
 0x27f   : > { %20457 = vst [vmem:[#allocation37_spill] sm:$0xff] %v18491_v17  ;;  %14489 = vmatmul.mubr.msk.bf16.gmra.mrb[96].mxu1 %vm1436_vm1, %v18482_v23  ;;  %v18511_v17 = vld [vmem:[%s17680_s11 + $0x198] sm:$0xff]  }
 0x280   : > { %15143 = vmatmul.mubr.msk.bf16.gmra.mrb[136].mxu0 %vm1436_vm1, %v18057_v29  ;;  %14492 = vmatprep.mubr.msk.bf16.mxu1 %vm1436_vm1, %v18487_v13 }
 0x281   : > { %15146 = vmatprep.mubr.msk.bf16.mxu0 %vm1436_vm1, %v18061_v31 }
 0x283   : > { %v18508_v27 = vpop.f32.mrb[32].mxu0 }
 0x284   : > { %20458 = vst [vmem:[#allocation38_spill] sm:$0xff] %v18508_v27  ;;  %v18513_v62 = vpop.f32.mrb[33].mxu0 }
 0x285   : > { %20459 = vst [vmem:[#allocation39_spill] sm:$0xff] %v18513_v62  ;;  %v18518_v3 = vpop.f32.mrb[34].mxu0  ;;  %v18538_v62 = vld [vmem:[%s17680_s11 + $0x1b0] sm:$0xff]  }
 0x286   : > { %20460 = vst [vmem:[#allocation40_spill] sm:$0xff] %v18518_v3  ;;  %v18520_v29 = vpop.f32.mrb[35].mxu0  ;;  %v18533_v3 = vld [vmem:[%s17680_s11 + $0x1a8] sm:$0xff]  }
 0x287   : > { %20461 = vst [vmem:[#allocation41_spill] sm:$0xff] %v18520_v29  ;;  %14493 = vmatmul.mubr.msk.bf16.gmra.mrb[100].mxu1 %vm1436_vm1, %v18511_v17 }
 0x288   : > { %15147 = vmatmul.mubr.msk.bf16.gmra.mrb[140].mxu0 %vm1436_vm1, %v18071_v33  ;;  %14496 = vmatprep.mubr.msk.bf16.mxu1 %vm1436_vm1, %v18516_v47  ;;  %v18553_v33 = vld [vmem:[%s17680_s11 + $0x1b8] sm:$0xff]  }
 0x289   : > { %15150 = vmatprep.mubr.msk.bf16.mxu0 %vm1436_vm1, %v18075_v36  ;;  %v18556_v36 = vld [vmem:[%s17680_s11 + $0x1c0] sm:$0xff]  }
 0x28b   : > { %v18530_v31 = vpop.f32.mrb[36].mxu0 }
 0x28c   : > { %20462 = vst [vmem:[#allocation42_spill] sm:$0xff] %v18530_v31  ;;  %v18535_v29 = vpop.f32.mrb[37].mxu0 }
 0x28d   : > { %20463 = vst [vmem:[#allocation43_spill] sm:$0xff] %v18535_v29  ;;  %v18540_v27 = vpop.f32.mrb[38].mxu0  ;;  %v17211_v29 = vld [vmem:[%s17680_s11 + $0x9e0] sm:$0xff]  }
 0x28e   : > { %20464 = vst [vmem:[#allocation44_spill] sm:$0xff] %v18540_v27  ;;  %v18542_v28 = vpop.f32.mrb[39].mxu0 }
 0x28f   : > { %20465 = vst [vmem:[#allocation45_spill] sm:$0xff] %v18542_v28  ;;  %14497 = vmatmul.mubr.msk.bf16.gmra.mrb[104].mxu1 %vm1436_vm1, %v18533_v3  ;;  %v18617_v28 = vld [vmem:[%s17680_s11 + $0x200] sm:$0xff]  }
 0x290   : > { %15151 = vmatmul.mubr.msk.bf16.gmra.mrb[144].mxu0 %vm1436_vm1, %v18085_v38  ;;  %14500 = vmatprep.mubr.msk.bf16.mxu1 %vm1436_vm1, %v18538_v62  ;;  %v18567_v38 = vld [vmem:[%s17680_s11 + $0x1c8] sm:$0xff]  }
 0x291   : > { %15154 = vmatprep.mubr.msk.bf16.mxu0 %vm1436_vm1, %v18089_v40  ;;  %v18570_v40 = vld [vmem:[%s17680_s11 + $0x1d0] sm:$0xff]  }
 0x297   : > { %14501 = vmatmul.mubr.msk.bf16.gmra.mrb[108].mxu1 %vm1436_vm1, %v18553_v33 }
 0x298   : > { %15155 = vmatmul.mubr.msk.bf16.gmra.mrb[148].mxu0 %vm1436_vm1, %v18099_v42  ;;  %14504 = vmatprep.mubr.msk.bf16.mxu1 %vm1436_vm1, %v18556_v36  ;;  %v18581_v42 = vld [vmem:[%s17680_s11 + $0x1d8] sm:$0xff]  }
 0x299   : > { %15158 = vmatprep.mubr.msk.bf16.mxu0 %vm1436_vm1, %v18103_v44  ;;  %v18584_v44 = vld [vmem:[%s17680_s11 + $0x1e0] sm:$0xff]  }
 0x29f   : > { %14505 = vmatmul.mubr.msk.bf16.gmra.mrb[112].mxu1 %vm1436_vm1, %v18567_v38 }
 0x2a0   : > { %15159 = vmatmul.mubr.msk.bf16.gmra.mrb[152].mxu0 %vm1436_vm1, %v18113_v46  ;;  %14508 = vmatprep.mubr.msk.bf16.mxu1 %vm1436_vm1, %v18570_v40  ;;  %v18595_v46 = vld [vmem:[%s17680_s11 + $0x1e8] sm:$0xff]  }
 0x2a1   : > { %15162 = vmatprep.mubr.msk.bf16.mxu0 %vm1436_vm1, %v18117_v48  ;;  %v18598_v48 = vld [vmem:[%s17680_s11 + $0x1f0] sm:$0xff]  }
 0x2a7   : > { %14509 = vmatmul.mubr.msk.bf16.gmra.mrb[116].mxu1 %vm1436_vm1, %v18581_v42 }
 0x2a8   : > { %15163 = vmatmul.mubr.msk.bf16.gmra.mrb[156].mxu0 %vm1436_vm1, %v18127_v50  ;;  %14512 = vmatprep.mubr.msk.bf16.mxu1 %vm1436_vm1, %v18584_v44  ;;  %v17257_v50 = vld [vmem:[%s20419_s2 + $0x1c] sm:$0xf] }
 0x2a9   : > { %15168 = vmatprep.mubr.msk.bf16.mxu0 %vm1436_vm1, %v18218_v52  ;;  %v18614_v52 = vld [vmem:[%s17680_s11 + $0x1f8] sm:$0xff]  }
 0x2af   : > { %14513 = vmatmul.mubr.msk.bf16.gmra.mrb[120].mxu1 %vm1436_vm1, %v18595_v46 }
 0x2b0   : > { %15169 = vmatmul.mubr.msk.bf16.vlgmr.msra.gmra.mrb[40].mxu0 %vm1436_vm1, %v18228_v57  ;;  %14516 = vmatprep.mubr.msk.bf16.mxu1 %vm1436_vm1, %v18598_v48  ;;  %v18631_v57 = vld [vmem:[%s17680_s11 + $0x210] sm:$0xff]  }
 0x2b1   : > { %15289 = vmatpush3.bf16.msra.mxu0 %v17807_v55  ;;  %15172 = vmatprep.mubr.msk.bf16.mxu0 %vm1436_vm1, %v18231_v58  ;;  %v18628_v55 = vld [vmem:[%s17680_s11 + $0x208] sm:$0xff]   ;;  %v18642_v58 = vld [vmem:[%s17680_s11 + $0x218] sm:$0xff]  }
 0x2b2   : > { %16663 = vmatprep.subr.msk.bf16.mxu0 %vm1677_vm0, %v17257_v50  ;;  %v18878_v50 = vld [vmem:[%s17680_s11 + $0x5e8] sm:$0xff]  }
 0x2b7   : > { %14517 = vmatmul.mubr.msk.bf16.gmra.mrb[124].mxu1 %vm1436_vm1, %v18614_v52 }
 0x2b8   : > { %15173 = vmatmul.mubr.msk.bf16.gmra.mrb[44].mxu0 %vm1436_vm1, %v18242_v61  ;;  %14520 = vmatprep.mubr.msk.bf16.mxu1 %vm1436_vm1, %v18617_v28  ;;  %v18645_v61 = vld [vmem:[%s17680_s11 + $0x220] sm:$0xff]  }
 0x2b9   : > { %15176 = vmatprep.mubr.msk.bf16.mxu0 %vm1436_vm1, %v18245_v53  ;;  %v18656_v53 = vld [vmem:[%s17680_s11 + $0x228] sm:$0xff]  }
 0x2bf   : > { %14521 = vmatmul.mubr.msk.bf16.gmra.mrb[128].mxu1 %vm1436_vm1, %v18628_v55 }
 0x2c0   : > { %15177 = vmatmul.mubr.msk.bf16.gmra.mrb[48].mxu0 %vm1436_vm1, %v18256_v63  ;;  %14524 = vmatprep.mubr.msk.bf16.mxu1 %vm1436_vm1, %v18631_v57  ;;  %v18659_v63 = vld [vmem:[%s17680_s11 + $0x230] sm:$0xff]  }
 0x2c1   : > { %15180 = vmatprep.mubr.msk.bf16.mxu0 %vm1436_vm1, %v18259_v0  ;;  %v18670_v0 = vld [vmem:[%s17680_s11 + $0x238] sm:$0xff]  }
 0x2c7   : > { %14525 = vmatmul.mubr.msk.bf16.gmra.mrb[132].mxu1 %vm1436_vm1, %v18642_v58 }
 0x2c8   : > { %15181 = vmatmul.mubr.msk.bf16.gmra.mrb[52].mxu0 %vm1436_vm1, %v18270_v4  ;;  %14528 = vmatprep.mubr.msk.bf16.mxu1 %vm1436_vm1, %v18645_v61  ;;  %v18673_v4 = vld [vmem:[%s17680_s11 + $0x240] sm:$0xff]  }
 0x2c9   : > { %15184 = vmatprep.mubr.msk.bf16.mxu0 %vm1436_vm1, %v18273_v5  ;;  %v18684_v5 = vld [vmem:[%s17680_s11 + $0x248] sm:$0xff]  }
 0x2cf   : > { %14529 = vmatmul.mubr.msk.bf16.gmra.mrb[136].mxu1 %vm1436_vm1, %v18656_v53 }
 0x2d0   : > { %15185 = vmatmul.mubr.msk.bf16.gmra.mrb[56].mxu0 %vm1436_vm1, %v18284_v9  ;;  %14532 = vmatprep.mubr.msk.bf16.mxu1 %vm1436_vm1, %v18659_v63  ;;  %v18687_v9 = vld [vmem:[%s17680_s11 + $0x250] sm:$0xff]  }
 0x2d1   : > { %15188 = vmatprep.mubr.msk.bf16.mxu0 %vm1436_vm1, %v18287_v12  ;;  %v18698_v12 = vld [vmem:[%s17680_s11 + $0x258] sm:$0xff]  }
 0x2d7   : > { %14533 = vmatmul.mubr.msk.bf16.gmra.mrb[140].mxu1 %vm1436_vm1, %v18670_v0 }
 0x2d8   : > { %15189 = vmatmul.mubr.msk.bf16.gmra.mrb[60].mxu0 %vm1436_vm1, %v18298_v18  ;;  %14536 = vmatprep.mubr.msk.bf16.mxu1 %vm1436_vm1, %v18673_v4  ;;  %v18701_v18 = vld [vmem:[%s17680_s11 + $0x260] sm:$0xff]  }
 0x2d9   : > { %15192 = vmatprep.mubr.msk.bf16.mxu0 %vm1436_vm1, %v18301_v20  ;;  %v18712_v20 = vld [vmem:[%s17680_s11 + $0x268] sm:$0xff]  }
 0x2df   : > { %14537 = vmatmul.mubr.msk.bf16.gmra.mrb[144].mxu1 %vm1436_vm1, %v18684_v5 }
 0x2e0   : > { %15193 = vmatmul.mubr.msk.bf16.gmra.mrb[64].mxu0 %vm1436_vm1, %v18312_v24  ;;  %14540 = vmatprep.mubr.msk.bf16.mxu1 %vm1436_vm1, %v18687_v9  ;;  %v18715_v24 = vld [vmem:[%s17680_s11 + $0x270] sm:$0xff]  }
 0x2e1   : > { %15196 = vmatprep.mubr.msk.bf16.mxu0 %vm1436_vm1, %v18315_v26  ;;  %v18726_v26 = vld [vmem:[%s17680_s11 + $0x278] sm:$0xff]  }
 0x2e7   : > { %14541 = vmatmul.mubr.msk.bf16.gmra.mrb[148].mxu1 %vm1436_vm1, %v18698_v12 }
 0x2e8   : > { %15197 = vmatmul.mubr.msk.bf16.gmra.mrb[68].mxu0 %vm1436_vm1, %v18328_v34  ;;  %14544 = vmatprep.mubr.msk.bf16.mxu1 %vm1436_vm1, %v18701_v18  ;;  %v17055_v34 = vld [vmem:[%s17680_s11 + $0x500] sm:$0xff]  }
 0x2e9   : > { %15200 = vmatprep.mubr.msk.bf16.mxu0 %vm1436_vm1, %v18333_v39  ;;  %v17056_v39 = vld [vmem:[%s17680_s11 + $0x508] sm:$0xff]  }
 0x2ef   : > { %14545 = vmatmul.mubr.msk.bf16.gmra.mrb[152].mxu1 %vm1436_vm1, %v18712_v20 }
 0x2f0   : > { %15201 = vmatmul.mubr.msk.bf16.gmra.mrb[72].mxu0 %vm1436_vm1, %v18350_v51  ;;  %14548 = vmatprep.mubr.msk.bf16.mxu1 %vm1436_vm1, %v18715_v24  ;;  %v6113_v51 = vsel %vm1677_vm0, %v18498_v25, 0  ;;  %v17061_v25 = vld [vmem:[%s17680_s11 + $0x530] sm:$0xff]  }
 0x2f1   : > { %15204 = vmatprep.mubr.msk.bf16.mxu0 %vm1436_vm1, %v18355_v56  ;;  %v17057_v56 = vld [vmem:[%s17680_s11 + $0x510] sm:$0xff]  }
 0x2f7   : > { %14549 = vmatmul.mubr.msk.bf16.gmra.mrb[156].mxu1 %vm1436_vm1, %v18726_v26 }
 0x2f8   : > { %15205 = vmatmul.mubr.msk.bf16.gmra.mrb[76].mxu0 %vm1436_vm1, %v18372_v2  ;;  %14554 = vmatprep.mubr.msk.bf16.mxu1 %vm1436_vm1, %v17055_v34  ;;  %v17058_v2 = vld [vmem:[%s17680_s11 + $0x518] sm:$0xff]  }
 0x2f9   : > { %15208 = vmatprep.mubr.msk.bf16.mxu0 %vm1436_vm1, %v18377_v7  ;;  %v17059_v7 = vld [vmem:[%s17680_s11 + $0x520] sm:$0xff]   ;;  %v19005_v34 = vld [vmem:[%s17680_s11 + $0x678] sm:$0xff]  }
 0x2ff   : > { %14555 = vmatmul.mubr.msk.bf16.vlgmr.msra.gmra.mrb[0].mxu1 %vm1436_vm1, %v17056_v39  ;;  %v19008_v39 = vld [vmem:[%s17680_s11 + $0x680] sm:$0xff]  }
 0x300   : > { %15209 = vmatmul.mubr.msk.bf16.gmra.mrb[80].mxu0 %vm1436_vm1, %v18394_v22  ;;  %14715 = vmatpush3.bf16.msra.mxu1 %v6113_v51  ;;  %v17060_v22 = vld [vmem:[%s17680_s11 + $0x528] sm:$0xff]  }
 0x301   : > { %14558 = vmatprep.mubr.msk.bf16.mxu1 %vm1436_vm1, %v17057_v56  ;;  %15212 = vmatprep.mubr.msk.bf16.mxu0 %vm1436_vm1, %v18399_v30  ;;  %v17062_v30 = vld [vmem:[%s17680_s11 + $0x538] sm:$0xff]   ;;  %v19019_v51 = vld [vmem:[%s17680_s11 + $0x688] sm:$0xff]   ;;  %v19022_v56 = vld [vmem:[%s17680_s11 + $0x690] sm:$0xff]  }
 0x307   : > { %14559 = vmatmul.mubr.msk.bf16.gmra.mrb[4].mxu1 %vm1436_vm1, %v17058_v2  ;;  %v19033_v2 = vld [vmem:[%s17680_s11 + $0x698] sm:$0xff]  }
 0x308   : > { %15213 = vmatmul.mubr.msk.bf16.gmra.mrb[84].mxu0 %vm1436_vm1, %v18416_v10  ;;  %14562 = vmatprep.mubr.msk.bf16.mxu1 %vm1436_vm1, %v17059_v7  ;;  %v17063_v10 = vld [vmem:[%s17680_s11 + $0x540] sm:$0xff]  }
 0x309   : > { %15216 = vmatprep.mubr.msk.bf16.mxu0 %vm1436_vm1, %v18421_v11  ;;  %v17064_v11 = vld [vmem:[%s17680_s11 + $0x548] sm:$0xff]   ;;  %v19036_v7 = vld [vmem:[%s17680_s11 + $0x6a0] sm:$0xff]  }
 0x30f   : > { %14563 = vmatmul.mubr.msk.bf16.gmra.mrb[8].mxu1 %vm1436_vm1, %v17060_v22  ;;  %v19047_v22 = vld [vmem:[%s17680_s11 + $0x6a8] sm:$0xff]  }
 0x310   : > { %15217 = vmatmul.mubr.msk.bf16.gmra.mrb[88].mxu0 %vm1436_vm1, %v18438_v15  ;;  %14566 = vmatprep.mubr.msk.bf16.mxu1 %vm1436_vm1, %v17061_v25  ;;  %v17065_v15 = vld [vmem:[%s17680_s11 + $0x550] sm:$0xff]  }
 0x311   : > { %15220 = vmatprep.mubr.msk.bf16.mxu0 %vm1436_vm1, %v18443_v45  ;;  %v17066_v45 = vld [vmem:[%s17680_s11 + $0x558] sm:$0xff]   ;;  %v19050_v25 = vld [vmem:[%s17680_s11 + $0x6b0] sm:$0xff]  }
 0x317   : > { %14567 = vmatmul.mubr.msk.bf16.gmra.mrb[12].mxu1 %vm1436_vm1, %v17062_v30  ;;  %v19061_v30 = vld [vmem:[%s17680_s11 + $0x6b8] sm:$0xff]  }
 0x318   : > { %15221 = vmatmul.mubr.msk.bf16.gmra.mrb[92].mxu0 %vm1436_vm1, %v18460_v19  ;;  %14570 = vmatprep.mubr.msk.bf16.mxu1 %vm1436_vm1, %v17063_v10  ;;  %v17067_v19 = vld [vmem:[%s17680_s11 + $0x560] sm:$0xff]  }
 0x319   : > { %15224 = vmatprep.mubr.msk.bf16.mxu0 %vm1436_vm1, %v18465_v8  ;;  %v17068_v8 = vld [vmem:[%s17680_s11 + $0x568] sm:$0xff]   ;;  %v19064_v10 = vld [vmem:[%s17680_s11 + $0x6c0] sm:$0xff]  }
 0x31f   : > { %14571 = vmatmul.mubr.msk.bf16.gmra.mrb[16].mxu1 %vm1436_vm1, %v17064_v11  ;;  %v19075_v11 = vld [vmem:[%s17680_s11 + $0x6c8] sm:$0xff]  }
 0x320   : > { %15225 = vmatmul.mubr.msk.bf16.gmra.mrb[96].mxu0 %vm1436_vm1, %v18482_v23  ;;  %14574 = vmatprep.mubr.msk.bf16.mxu1 %vm1436_vm1, %v17065_v15  ;;  %v17069_v23 = vld [vmem:[%s17680_s11 + $0x570] sm:$0xff]  }
 0x321   : > { %15228 = vmatprep.mubr.msk.bf16.mxu0 %vm1436_vm1, %v18487_v13  ;;  %v17070_v13 = vld [vmem:[%s17680_s11 + $0x578] sm:$0xff]   ;;  %v19078_v15 = vld [vmem:[%s17680_s11 + $0x6d0] sm:$0xff]  }
 0x327   : > { %14575 = vmatmul.mubr.msk.bf16.gmra.mrb[20].mxu1 %vm1436_vm1, %v17066_v45  ;;  %v19089_v45 = vld [vmem:[%s17680_s11 + $0x6d8] sm:$0xff]  }
 0x328   : > { %15229 = vmatmul.mubr.msk.bf16.gmra.mrb[100].mxu0 %vm1436_vm1, %v18511_v17  ;;  %14578 = vmatprep.mubr.msk.bf16.mxu1 %vm1436_vm1, %v17067_v19  ;;  %v17071_v17 = vld [vmem:[%s17680_s11 + $0x580] sm:$0xff]  }
 0x329   : > { %15232 = vmatprep.mubr.msk.bf16.mxu0 %vm1436_vm1, %v18516_v47  ;;  %v17072_v47 = vld [vmem:[%s17680_s11 + $0x588] sm:$0xff]   ;;  %v19092_v19 = vld [vmem:[%s17680_s11 + $0x6e0] sm:$0xff]  }
 0x32f   : > { %14579 = vmatmul.mubr.msk.bf16.gmra.mrb[24].mxu1 %vm1436_vm1, %v17068_v8  ;;  %v19103_v8 = vld [vmem:[%s17680_s11 + $0x6e8] sm:$0xff]  }
 0x330   : > { %15233 = vmatmul.mubr.msk.bf16.gmra.mrb[104].mxu0 %vm1436_vm1, %v18533_v3  ;;  %14582 = vmatprep.mubr.msk.bf16.mxu1 %vm1436_vm1, %v17069_v23  ;;  %v17073_v3 = vld [vmem:[%s17680_s11 + $0x590] sm:$0xff]  }
 0x331   : > { %15236 = vmatprep.mubr.msk.bf16.mxu0 %vm1436_vm1, %v18538_v62  ;;  %v17074_v62 = vld [vmem:[%s17680_s11 + $0x598] sm:$0xff]   ;;  %v19106_v23 = vld [vmem:[%s17680_s11 + $0x6f0] sm:$0xff]  }
 0x337   : > { %14583 = vmatmul.mubr.msk.bf16.gmra.mrb[28].mxu1 %vm1436_vm1, %v17070_v13  ;;  %v19117_v13 = vld [vmem:[%s17680_s11 + $0x6f8] sm:$0xff]  }
 0x338   : > { %15237 = vmatmul.mubr.msk.bf16.gmra.mrb[108].mxu0 %vm1436_vm1, %v18553_v33  ;;  %14586 = vmatprep.mubr.msk.bf16.mxu1 %vm1436_vm1, %v17071_v17  ;;  %v18812_v33 = vld [vmem:[%s17680_s11 + $0x5a0] sm:$0xff]  }
 0x339   : > { %15240 = vmatprep.mubr.msk.bf16.mxu0 %vm1436_vm1, %v18556_v36  ;;  %v18822_v36 = vld [vmem:[%s17680_s11 + $0x5a8] sm:$0xff]   ;;  %v19120_v17 = vld [vmem:[%s17680_s11 + $0x700] sm:$0xff]  }
 0x33f   : > { %14587 = vmatmul.mubr.msk.bf16.gmra.mrb[32].mxu1 %vm1436_vm1, %v17072_v47  ;;  %v19131_v47 = vld [vmem:[%s17680_s11 + $0x708] sm:$0xff]  }
 0x340   : > { %15241 = vmatmul.mubr.msk.bf16.gmra.mrb[112].mxu0 %vm1436_vm1, %v18567_v38  ;;  %14590 = vmatprep.mubr.msk.bf16.mxu1 %vm1436_vm1, %v17073_v3  ;;  %v18825_v38 = vld [vmem:[%s17680_s11 + $0x5b0] sm:$0xff]  }
 0x341   : > { %15244 = vmatprep.mubr.msk.bf16.mxu0 %vm1436_vm1, %v18570_v40  ;;  %v18836_v40 = vld [vmem:[%s17680_s11 + $0x5b8] sm:$0xff]   ;;  %v19134_v3 = vld [vmem:[%s17680_s11 + $0x710] sm:$0xff]  }
 0x347   : > { %14591 = vmatmul.mubr.msk.bf16.gmra.mrb[36].mxu1 %vm1436_vm1, %v17074_v62  ;;  %v19145_v62 = vld [vmem:[%s17680_s11 + $0x718] sm:$0xff]  }
 0x348   : > { %15245 = vmatmul.mubr.msk.bf16.gmra.mrb[116].mxu0 %vm1436_vm1, %v18581_v42  ;;  %14594 = vmatprep.mubr.msk.bf16.mxu1 %vm1436_vm1, %v18812_v33  ;;  %v18839_v42 = vld [vmem:[%s17680_s11 + $0x5c0] sm:$0xff]  }
 0x349   : > { %15248 = vmatprep.mubr.msk.bf16.mxu0 %vm1436_vm1, %v18584_v44  ;;  %v18850_v44 = vld [vmem:[%s17680_s11 + $0x5c8] sm:$0xff]  }
 0x34f   : > { %14595 = vmatmul.mubr.msk.bf16.gmra.mrb[40].mxu1 %vm1436_vm1, %v18822_v36 }
 0x350   : > { %15249 = vmatmul.mubr.msk.bf16.gmra.mrb[120].mxu0 %vm1436_vm1, %v18595_v46  ;;  %14598 = vmatprep.mubr.msk.bf16.mxu1 %vm1436_vm1, %v18825_v38  ;;  %v18853_v46 = vld [vmem:[%s17680_s11 + $0x5d0] sm:$0xff]  }
 0x351   : > { %15252 = vmatprep.mubr.msk.bf16.mxu0 %vm1436_vm1, %v18598_v48  ;;  %v18864_v48 = vld [vmem:[%s17680_s11 + $0x5d8] sm:$0xff]  }
 0x357   : > { %14599 = vmatmul.mubr.msk.bf16.gmra.mrb[44].mxu1 %vm1436_vm1, %v18836_v40 }
 0x358   : > { %15253 = vmatmul.mubr.msk.bf16.gmra.mrb[124].mxu0 %vm1436_vm1, %v18614_v52  ;;  %14602 = vmatprep.mubr.msk.bf16.mxu1 %vm1436_vm1, %v18839_v42  ;;  %v18881_v52 = vld [vmem:[%s17680_s11 + $0x5f0] sm:$0xff]  }
 0x359   : > { %15256 = vmatprep.mubr.msk.bf16.mxu0 %vm1436_vm1, %v18617_v28  ;;  %v18867_v28 = vld [vmem:[%s17680_s11 + $0x5e0] sm:$0xff]  }
 0x35f   : > { %14603 = vmatmul.mubr.msk.bf16.gmra.mrb[48].mxu1 %vm1436_vm1, %v18850_v44 }
 0x360   : > { %15257 = vmatmul.mubr.msk.bf16.gmra.mrb[128].mxu0 %vm1436_vm1, %v18628_v55  ;;  %14606 = vmatprep.mubr.msk.bf16.mxu1 %vm1436_vm1, %v18853_v46  ;;  %v18892_v55 = vld [vmem:[%s17680_s11 + $0x5f8] sm:$0xff]  }
 0x361   : > { %15260 = vmatprep.mubr.msk.bf16.mxu0 %vm1436_vm1, %v18631_v57  ;;  %v18895_v57 = vld [vmem:[%s17680_s11 + $0x600] sm:$0xff]  }
 0x367   : > { %14607 = vmatmul.mubr.msk.bf16.gmra.mrb[52].mxu1 %vm1436_vm1, %v18864_v48 }
 0x368   : > { %15261 = vmatmul.mubr.msk.bf16.gmra.mrb[132].mxu0 %vm1436_vm1, %v18642_v58  ;;  %14610 = vmatprep.mubr.msk.bf16.mxu1 %vm1436_vm1, %v18867_v28  ;;  %v18906_v58 = vld [vmem:[%s17680_s11 + $0x608] sm:$0xff]  }
 0x369   : > { %15264 = vmatprep.mubr.msk.bf16.mxu0 %vm1436_vm1, %v18645_v61  ;;  %v18909_v61 = vld [vmem:[%s17680_s11 + $0x610] sm:$0xff]  }
 0x36f   : > { %14611 = vmatmul.mubr.msk.bf16.gmra.mrb[56].mxu1 %vm1436_vm1, %v18878_v50 }
 0x370   : > { %15265 = vmatmul.mubr.msk.bf16.gmra.mrb[136].mxu0 %vm1436_vm1, %v18656_v53  ;;  %14614 = vmatprep.mubr.msk.bf16.mxu1 %vm1436_vm1, %v18881_v52  ;;  %v18920_v53 = vld [vmem:[%s17680_s11 + $0x618] sm:$0xff]  }
 0x371   : > { %15268 = vmatprep.mubr.msk.bf16.mxu0 %vm1436_vm1, %v18659_v63  ;;  %v18923_v63 = vld [vmem:[%s17680_s11 + $0x620] sm:$0xff]  }
 0x377   : > { %14615 = vmatmul.mubr.msk.bf16.gmra.mrb[60].mxu1 %vm1436_vm1, %v18892_v55 }
 0x378   : > { %15269 = vmatmul.mubr.msk.bf16.gmra.mrb[140].mxu0 %vm1436_vm1, %v18670_v0  ;;  %14618 = vmatprep.mubr.msk.bf16.mxu1 %vm1436_vm1, %v18895_v57  ;;  %v18934_v0 = vld [vmem:[%s17680_s11 + $0x628] sm:$0xff]  }
 0x379   : > { %15272 = vmatprep.mubr.msk.bf16.mxu0 %vm1436_vm1, %v18673_v4  ;;  %v18937_v4 = vld [vmem:[%s17680_s11 + $0x630] sm:$0xff]  }
 0x37f   : > { %14619 = vmatmul.mubr.msk.bf16.gmra.mrb[64].mxu1 %vm1436_vm1, %v18906_v58 }
 0x380   : > { %15273 = vmatmul.mubr.msk.bf16.gmra.mrb[144].mxu0 %vm1436_vm1, %v18684_v5  ;;  %14622 = vmatprep.mubr.msk.bf16.mxu1 %vm1436_vm1, %v18909_v61  ;;  %v18948_v5 = vld [vmem:[%s17680_s11 + $0x638] sm:$0xff]  }
 0x381   : > { %15276 = vmatprep.mubr.msk.bf16.mxu0 %vm1436_vm1, %v18687_v9  ;;  %v18951_v9 = vld [vmem:[%s17680_s11 + $0x640] sm:$0xff]  }
 0x387   : > { %14623 = vmatmul.mubr.msk.bf16.gmra.mrb[68].mxu1 %vm1436_vm1, %v18920_v53 }
 0x388   : > { %15277 = vmatmul.mubr.msk.bf16.gmra.mrb[148].mxu0 %vm1436_vm1, %v18698_v12  ;;  %14626 = vmatprep.mubr.msk.bf16.mxu1 %vm1436_vm1, %v18923_v63  ;;  %v18962_v12 = vld [vmem:[%s17680_s11 + $0x648] sm:$0xff]  }
 0x389   : > { %15280 = vmatprep.mubr.msk.bf16.mxu0 %vm1436_vm1, %v18701_v18  ;;  %v18965_v18 = vld [vmem:[%s17680_s11 + $0x650] sm:$0xff]  }
 0x38f   : > { %14627 = vmatmul.mubr.msk.bf16.gmra.mrb[72].mxu1 %vm1436_vm1, %v18934_v0 }
 0x390   : > { %15281 = vmatmul.mubr.msk.bf16.gmra.mrb[152].mxu0 %vm1436_vm1, %v18712_v20  ;;  %14630 = vmatprep.mubr.msk.bf16.mxu1 %vm1436_vm1, %v18937_v4  ;;  %v18977_v20 = vld [vmem:[%s17680_s11 + $0x658] sm:$0xff]  }
 0x391   : > { %15284 = vmatprep.mubr.msk.bf16.mxu0 %vm1436_vm1, %v18715_v24  ;;  %v18980_v24 = vld [vmem:[%s17680_s11 + $0x660] sm:$0xff]  }
 0x397   : > { %14631 = vmatmul.mubr.msk.bf16.gmra.mrb[76].mxu1 %vm1436_vm1, %v18948_v5 }
 0x398   : > { %15285 = vmatmul.mubr.msk.bf16.gmra.mrb[156].mxu0 %vm1436_vm1, %v18726_v26  ;;  %14634 = vmatprep.mubr.msk.bf16.mxu1 %vm1436_vm1, %v18951_v9  ;;  %v18994_v26 = vld [vmem:[%s17680_s11 + $0x670] sm:$0xff]  }
 0x399   : > { %15290 = vmatprep.mubr.msk.bf16.mxu0 %vm1436_vm1, %v18812_v33  ;;  %v19148_v33 = vld [vmem:[%s17680_s11 + $0x720] sm:$0xff]  }
 0x39f   : > { %14635 = vmatmul.mubr.msk.bf16.gmra.mrb[80].mxu1 %vm1436_vm1, %v18962_v12 }
 0x3a0   : > { %15291 = vmatmul.mubr.msk.bf16.vlgmr.msra.gmra.mrb[40].mxu0 %vm1436_vm1, %v18822_v36  ;;  %14638 = vmatprep.mubr.msk.bf16.mxu1 %vm1436_vm1, %v18965_v18  ;;  %v19159_v36 = vld [vmem:[%s17680_s11 + $0x728] sm:$0xff]  }
 0x3a1   : > { %15411 = vmatpush3.bf16.msra.mxu0 %v17899_v35  ;;  %15294 = vmatprep.mubr.msk.bf16.mxu0 %vm1436_vm1, %v18825_v38  ;;  %v18991_v35 = vld [vmem:[%s17680_s11 + $0x668] sm:$0xff]   ;;  %v19162_v38 = vld [vmem:[%s17680_s11 + $0x730] sm:$0xff]  }
 0x3a7   : > { %14639 = vmatmul.mubr.msk.bf16.gmra.mrb[84].mxu1 %vm1436_vm1, %v18977_v20 }
 0x3a8   : > { %15295 = vmatmul.mubr.msk.bf16.gmra.mrb[44].mxu0 %vm1436_vm1, %v18836_v40  ;;  %14642 = vmatprep.mubr.msk.bf16.mxu1 %vm1436_vm1, %v18980_v24  ;;  %v19173_v40 = vld [vmem:[%s17680_s11 + $0x738] sm:$0xff]  }
 0x3a9   : > { %15298 = vmatprep.mubr.msk.bf16.mxu0 %vm1436_vm1, %v18839_v42  ;;  %v19176_v42 = vld [vmem:[%s17680_s11 + $0x740] sm:$0xff]  }
 0x3af   : > { %14643 = vmatmul.mubr.msk.bf16.gmra.mrb[88].mxu1 %vm1436_vm1, %v18991_v35 }
 0x3b0   : > { %15299 = vmatmul.mubr.msk.bf16.gmra.mrb[48].mxu0 %vm1436_vm1, %v18850_v44  ;;  %14646 = vmatprep.mubr.msk.bf16.mxu1 %vm1436_vm1, %v18994_v26  ;;  %v19187_v44 = vld [vmem:[%s17680_s11 + $0x748] sm:$0xff]  }
 0x3b1   : > { %15302 = vmatprep.mubr.msk.bf16.mxu0 %vm1436_vm1, %v18853_v46  ;;  %v19190_v46 = vld [vmem:[%s17680_s11 + $0x750] sm:$0xff]  }
 0x3b7   : > { %14647 = vmatmul.mubr.msk.bf16.gmra.mrb[92].mxu1 %vm1436_vm1, %v19005_v34 }
 0x3b8   : > { %15303 = vmatmul.mubr.msk.bf16.gmra.mrb[52].mxu0 %vm1436_vm1, %v18864_v48  ;;  %14650 = vmatprep.mubr.msk.bf16.mxu1 %vm1436_vm1, %v19008_v39  ;;  %v19201_v48 = vld [vmem:[%s17680_s11 + $0x758] sm:$0xff]  }
 0x3b9   : > { %15306 = vmatprep.mubr.msk.bf16.mxu0 %vm1436_vm1, %v18867_v28  ;;  %v19204_v28 = vld [vmem:[%s17680_s11 + $0x760] sm:$0xff]  }
 0x3bf   : > { %14651 = vmatmul.mubr.msk.bf16.gmra.mrb[96].mxu1 %vm1436_vm1, %v19019_v51 }
 0x3c0   : > { %15307 = vmatmul.mubr.msk.bf16.gmra.mrb[56].mxu0 %vm1436_vm1, %v18878_v50  ;;  %14654 = vmatprep.mubr.msk.bf16.mxu1 %vm1436_vm1, %v19022_v56  ;;  %v19215_v50 = vld [vmem:[%s17680_s11 + $0x768] sm:$0xff]  }
 0x3c1   : > { %15310 = vmatprep.mubr.msk.bf16.mxu0 %vm1436_vm1, %v18881_v52  ;;  %v19218_v52 = vld [vmem:[%s17680_s11 + $0x770] sm:$0xff]  }
 0x3c7   : > { %14655 = vmatmul.mubr.msk.bf16.gmra.mrb[100].mxu1 %vm1436_vm1, %v19033_v2 }
 0x3c8   : > { %15311 = vmatmul.mubr.msk.bf16.gmra.mrb[60].mxu0 %vm1436_vm1, %v18892_v55  ;;  %14658 = vmatprep.mubr.msk.bf16.mxu1 %vm1436_vm1, %v19036_v7  ;;  %v19229_v55 = vld [vmem:[%s17680_s11 + $0x778] sm:$0xff]  }
 0x3c9   : > { %15314 = vmatprep.mubr.msk.bf16.mxu0 %vm1436_vm1, %v18895_v57  ;;  %v17135_v57 = vld [vmem:[%s17680_s11 + $0x780] sm:$0xff]  }
 0x3cf   : > { %14659 = vmatmul.mubr.msk.bf16.gmra.mrb[104].mxu1 %vm1436_vm1, %v19047_v22 }
 0x3d0   : > { %15315 = vmatmul.mubr.msk.bf16.gmra.mrb[64].mxu0 %vm1436_vm1, %v18906_v58  ;;  %14662 = vmatprep.mubr.msk.bf16.mxu1 %vm1436_vm1, %v19050_v25  ;;  %v17136_v58 = vld [vmem:[%s17680_s11 + $0x788] sm:$0xff]  }
 0x3d1   : > { %15318 = vmatprep.mubr.msk.bf16.mxu0 %vm1436_vm1, %v18909_v61  ;;  %v17137_v61 = vld [vmem:[%s17680_s11 + $0x790] sm:$0xff]  }
 0x3d7   : > { %14663 = vmatmul.mubr.msk.bf16.gmra.mrb[108].mxu1 %vm1436_vm1, %v19061_v30 }
 0x3d8   : > { %15319 = vmatmul.mubr.msk.bf16.gmra.mrb[68].mxu0 %vm1436_vm1, %v18920_v53  ;;  %14666 = vmatprep.mubr.msk.bf16.mxu1 %vm1436_vm1, %v19064_v10  ;;  %v17138_v53 = vld [vmem:[%s17680_s11 + $0x798] sm:$0xff]  }
 0x3d9   : > { %15322 = vmatprep.mubr.msk.bf16.mxu0 %vm1436_vm1, %v18923_v63  ;;  %v17139_v63 = vld [vmem:[%s17680_s11 + $0x7a0] sm:$0xff]  }
 0x3df   : > { %14667 = vmatmul.mubr.msk.bf16.gmra.mrb[112].mxu1 %vm1436_vm1, %v19075_v11 }
 0x3e0   : > { %15323 = vmatmul.mubr.msk.bf16.gmra.mrb[72].mxu0 %vm1436_vm1, %v18934_v0  ;;  %14670 = vmatprep.mubr.msk.bf16.mxu1 %vm1436_vm1, %v19078_v15  ;;  %v17140_v0 = vld [vmem:[%s17680_s11 + $0x7a8] sm:$0xff]  }
 0x3e1   : > { %15326 = vmatprep.mubr.msk.bf16.mxu0 %vm1436_vm1, %v18937_v4  ;;  %v17141_v4 = vld [vmem:[%s17680_s11 + $0x7b0] sm:$0xff]  }
 0x3e7   : > { %14671 = vmatmul.mubr.msk.bf16.gmra.mrb[116].mxu1 %vm1436_vm1, %v19089_v45 }
 0x3e8   : > { %15327 = vmatmul.mubr.msk.bf16.gmra.mrb[76].mxu0 %vm1436_vm1, %v18948_v5  ;;  %14674 = vmatprep.mubr.msk.bf16.mxu1 %vm1436_vm1, %v19092_v19  ;;  %v17142_v5 = vld [vmem:[%s17680_s11 + $0x7b8] sm:$0xff]  }
 0x3e9   : > { %15330 = vmatprep.mubr.msk.bf16.mxu0 %vm1436_vm1, %v18951_v9  ;;  %v17143_v9 = vld [vmem:[%s17680_s11 + $0x7c0] sm:$0xff]  }
 0x3ef   : > { %14675 = vmatmul.mubr.msk.bf16.gmra.mrb[120].mxu1 %vm1436_vm1, %v19103_v8 }
 0x3f0   : > { %15331 = vmatmul.mubr.msk.bf16.gmra.mrb[80].mxu0 %vm1436_vm1, %v18962_v12  ;;  %14678 = vmatprep.mubr.msk.bf16.mxu1 %vm1436_vm1, %v19106_v23  ;;  %v17144_v12 = vld [vmem:[%s17680_s11 + $0x7c8] sm:$0xff]  }
 0x3f1   : > { %15334 = vmatprep.mubr.msk.bf16.mxu0 %vm1436_vm1, %v18965_v18  ;;  %v17145_v18 = vld [vmem:[%s17680_s11 + $0x7d0] sm:$0xff]  }
 0x3f7   : > { %14679 = vmatmul.mubr.msk.bf16.gmra.mrb[124].mxu1 %vm1436_vm1, %v19117_v13 }
 0x3f8   : > { %15335 = vmatmul.mubr.msk.bf16.gmra.mrb[84].mxu0 %vm1436_vm1, %v18977_v20  ;;  %14682 = vmatprep.mubr.msk.bf16.mxu1 %vm1436_vm1, %v19120_v17  ;;  %v17146_v20 = vld [vmem:[%s17680_s11 + $0x7d8] sm:$0xff]  }
 0x3f9   : > { %15338 = vmatprep.mubr.msk.bf16.mxu0 %vm1436_vm1, %v18980_v24  ;;  %v17147_v24 = vld [vmem:[%s17680_s11 + $0x7e0] sm:$0xff]  }
 0x3ff   : > { %14683 = vmatmul.mubr.msk.bf16.gmra.mrb[128].mxu1 %vm1436_vm1, %v19131_v47 }
 0x400   : > { %15339 = vmatmul.mubr.msk.bf16.gmra.mrb[88].mxu0 %vm1436_vm1, %v18991_v35  ;;  %14686 = vmatprep.mubr.msk.bf16.mxu1 %vm1436_vm1, %v19134_v3  ;;  %v17148_v35 = vld [vmem:[%s17680_s11 + $0x7e8] sm:$0xff]  }
 0x401   : > { %15342 = vmatprep.mubr.msk.bf16.mxu0 %vm1436_vm1, %v18994_v26  ;;  %v17149_v26 = vld [vmem:[%s17680_s11 + $0x7f0] sm:$0xff]  }
 0x407   : > { %14687 = vmatmul.mubr.msk.bf16.gmra.mrb[132].mxu1 %vm1436_vm1, %v19145_v62 }
 0x408   : > { %15343 = vmatmul.mubr.msk.bf16.gmra.mrb[92].mxu0 %vm1436_vm1, %v19005_v34  ;;  %14690 = vmatprep.mubr.msk.bf16.mxu1 %vm1436_vm1, %v19148_v33  ;;  %v17150_v34 = vld [vmem:[%s17680_s11 + $0x7f8] sm:$0xff]  }
 0x409   : > { %15346 = vmatprep.mubr.msk.bf16.mxu0 %vm1436_vm1, %v19008_v39  ;;  %v17151_v39 = vld [vmem:[%s17680_s11 + $0x800] sm:$0xff]  }
 0x40f   : > { %14691 = vmatmul.mubr.msk.bf16.gmra.mrb[136].mxu1 %vm1436_vm1, %v19159_v36 }
 0x410   : > { %15347 = vmatmul.mubr.msk.bf16.gmra.mrb[96].mxu0 %vm1436_vm1, %v19019_v51  ;;  %14694 = vmatprep.mubr.msk.bf16.mxu1 %vm1436_vm1, %v19162_v38  ;;  %v17152_v51 = vld [vmem:[%s17680_s11 + $0x808] sm:$0xff]  }
 0x411   : > { %15350 = vmatprep.mubr.msk.bf16.mxu0 %vm1436_vm1, %v19022_v56  ;;  %v17153_v56 = vld [vmem:[%s17680_s11 + $0x810] sm:$0xff]  }
 0x417   : > { %14695 = vmatmul.mubr.msk.bf16.gmra.mrb[140].mxu1 %vm1436_vm1, %v19173_v40 }
 0x418   : > { %15351 = vmatmul.mubr.msk.bf16.gmra.mrb[100].mxu0 %vm1436_vm1, %v19033_v2  ;;  %14698 = vmatprep.mubr.msk.bf16.mxu1 %vm1436_vm1, %v19176_v42  ;;  %v17154_v2 = vld [vmem:[%s17680_s11 + $0x818] sm:$0xff]  }
 0x419   : > { %15354 = vmatprep.mubr.msk.bf16.mxu0 %vm1436_vm1, %v19036_v7  ;;  %v17155_v7 = vld [vmem:[%s17680_s11 + $0x820] sm:$0xff]  }
 0x41f   : > { %14699 = vmatmul.mubr.msk.bf16.gmra.mrb[144].mxu1 %vm1436_vm1, %v19187_v44 }
 0x420   : > { %15355 = vmatmul.mubr.msk.bf16.gmra.mrb[104].mxu0 %vm1436_vm1, %v19047_v22  ;;  %14702 = vmatprep.mubr.msk.bf16.mxu1 %vm1436_vm1, %v19190_v46  ;;  %v17156_v22 = vld [vmem:[%s17680_s11 + $0x828] sm:$0xff]  }
 0x421   : > { %15358 = vmatprep.mubr.msk.bf16.mxu0 %vm1436_vm1, %v19050_v25  ;;  %v17157_v25 = vld [vmem:[%s17680_s11 + $0x830] sm:$0xff]  }
 0x427   : > { %14703 = vmatmul.mubr.msk.bf16.gmra.mrb[148].mxu1 %vm1436_vm1, %v19201_v48 }
 0x428   : > { %15359 = vmatmul.mubr.msk.bf16.gmra.mrb[108].mxu0 %vm1436_vm1, %v19061_v30  ;;  %14706 = vmatprep.mubr.msk.bf16.mxu1 %vm1436_vm1, %v19204_v28  ;;  %v17158_v30 = vld [vmem:[%s17680_s11 + $0x838] sm:$0xff]  }
 0x429   : > { %15362 = vmatprep.mubr.msk.bf16.mxu0 %vm1436_vm1, %v19064_v10  ;;  %v17159_v10 = vld [vmem:[%s17680_s11 + $0x840] sm:$0xff]  }
 0x42f   : > { %14707 = vmatmul.mubr.msk.bf16.gmra.mrb[152].mxu1 %vm1436_vm1, %v19215_v50 }
 0x430   : > { %15363 = vmatmul.mubr.msk.bf16.gmra.mrb[112].mxu0 %vm1436_vm1, %v19075_v11  ;;  %14710 = vmatprep.mubr.msk.bf16.mxu1 %vm1436_vm1, %v19218_v52  ;;  %v17160_v11 = vld [vmem:[%s17680_s11 + $0x848] sm:$0xff]  }
 0x431   : > { %15366 = vmatprep.mubr.msk.bf16.mxu0 %vm1436_vm1, %v19078_v15  ;;  %v17161_v15 = vld [vmem:[%s17680_s11 + $0x850] sm:$0xff]  }
 0x437   : > { %14711 = vmatmul.mubr.msk.bf16.gmra.mrb[156].mxu1 %vm1436_vm1, %v19229_v55 }
 0x438   : > { %15367 = vmatmul.mubr.msk.bf16.gmra.mrb[116].mxu0 %vm1436_vm1, %v19089_v45  ;;  %14716 = vmatprep.mubr.msk.bf16.mxu1 %vm1436_vm1, %v17135_v57  ;;  %v17162_v45 = vld [vmem:[%s17680_s11 + $0x858] sm:$0xff]   ;;  %v17183_v57 = vld [vmem:[%s17680_s11 + $0x900] sm:$0xff]  }
 0x439   : > { %15370 = vmatprep.mubr.msk.bf16.mxu0 %vm1436_vm1, %v19092_v19  ;;  %v17163_v19 = vld [vmem:[%s17680_s11 + $0x860] sm:$0xff]  }
 0x43f   : > { %14717 = vmatmul.mubr.msk.bf16.vlgmr.msra.gmra.mrb[0].mxu1 %vm1436_vm1, %v17136_v58  ;;  %v17184_v58 = vld [vmem:[%s17680_s11 + $0x908] sm:$0xff]  }
 0x440   : > { %15371 = vmatmul.mubr.msk.bf16.gmra.mrb[120].mxu0 %vm1436_vm1, %v19103_v8  ;;  %14720 = vmatprep.mubr.msk.bf16.mxu1 %vm1436_vm1, %v17137_v61  ;;  %v17164_v8 = vld [vmem:[%s17680_s11 + $0x868] sm:$0xff]   ;;  %v17185_v61 = vld [vmem:[%s17680_s11 + $0x910] sm:$0xff]  }
 0x441   : > { %15374 = vmatprep.mubr.msk.bf16.mxu0 %vm1436_vm1, %v19106_v23  ;;  %v17165_v23 = vld [vmem:[%s17680_s11 + $0x870] sm:$0xff]  }
 0x447   : > { %14721 = vmatmul.mubr.msk.bf16.gmra.mrb[4].mxu1 %vm1436_vm1, %v17138_v53  ;;  %v17186_v53 = vld [vmem:[%s17680_s11 + $0x918] sm:$0xff]  }
 0x448   : > { %15375 = vmatmul.mubr.msk.bf16.gmra.mrb[124].mxu0 %vm1436_vm1, %v19117_v13  ;;  %14724 = vmatprep.mubr.msk.bf16.mxu1 %vm1436_vm1, %v17139_v63  ;;  %v17166_v13 = vld [vmem:[%s17680_s11 + $0x878] sm:$0xff]   ;;  %v17187_v63 = vld [vmem:[%s17680_s11 + $0x920] sm:$0xff]  }
 0x449   : > { %15378 = vmatprep.mubr.msk.bf16.mxu0 %vm1436_vm1, %v19120_v17  ;;  %v17167_v17 = vld [vmem:[%s17680_s11 + $0x880] sm:$0xff]  }
 0x44f   : > { %14725 = vmatmul.mubr.msk.bf16.gmra.mrb[8].mxu1 %vm1436_vm1, %v17140_v0  ;;  %v17188_v0 = vld [vmem:[%s17680_s11 + $0x928] sm:$0xff]  }
 0x450   : > { %15379 = vmatmul.mubr.msk.bf16.gmra.mrb[128].mxu0 %vm1436_vm1, %v19131_v47  ;;  %14728 = vmatprep.mubr.msk.bf16.mxu1 %vm1436_vm1, %v17141_v4  ;;  %v17168_v47 = vld [vmem:[%s17680_s11 + $0x888] sm:$0xff]   ;;  %v17189_v4 = vld [vmem:[%s17680_s11 + $0x930] sm:$0xff]  }
 0x451   : > { %15382 = vmatprep.mubr.msk.bf16.mxu0 %vm1436_vm1, %v19134_v3  ;;  %v17169_v3 = vld [vmem:[%s17680_s11 + $0x890] sm:$0xff]  }
 0x457   : > { %14729 = vmatmul.mubr.msk.bf16.gmra.mrb[12].mxu1 %vm1436_vm1, %v17142_v5 }
 0x458   : > { %15383 = vmatmul.mubr.msk.bf16.gmra.mrb[132].mxu0 %vm1436_vm1, %v19145_v62  ;;  %14732 = vmatprep.mubr.msk.bf16.mxu1 %vm1436_vm1, %v17143_v9  ;;  %v17170_v62 = vld [vmem:[%s17680_s11 + $0x898] sm:$0xff]  }
 0x459   : > { %15386 = vmatprep.mubr.msk.bf16.mxu0 %vm1436_vm1, %v19148_v33  ;;  %v17171_v33 = vld [vmem:[%s17680_s11 + $0x8a0] sm:$0xff]  }
 0x45f   : > { %14733 = vmatmul.mubr.msk.bf16.gmra.mrb[16].mxu1 %vm1436_vm1, %v17144_v12  ;;  %v17190_v12 = vld [vmem:[%s17680_s11 + $0x938] sm:$0xff]  }
 0x460   : > { %15387 = vmatmul.mubr.msk.bf16.gmra.mrb[136].mxu0 %vm1436_vm1, %v19159_v36  ;;  %14736 = vmatprep.mubr.msk.bf16.mxu1 %vm1436_vm1, %v17145_v18  ;;  %v17172_v36 = vld [vmem:[%s17680_s11 + $0x8a8] sm:$0xff]  }
 0x461   : > { %15390 = vmatprep.mubr.msk.bf16.mxu0 %vm1436_vm1, %v19162_v38  ;;  %v17173_v38 = vld [vmem:[%s17680_s11 + $0x8b0] sm:$0xff]  }
 0x467   : > { %14737 = vmatmul.mubr.msk.bf16.gmra.mrb[20].mxu1 %vm1436_vm1, %v17146_v20  ;;  %v17191_v20 = vld [vmem:[%s17680_s11 + $0x940] sm:$0xff]  }
 0x468   : > { %15391 = vmatmul.mubr.msk.bf16.gmra.mrb[140].mxu0 %vm1436_vm1, %v19173_v40  ;;  %14740 = vmatprep.mubr.msk.bf16.mxu1 %vm1436_vm1, %v17147_v24  ;;  %v17174_v40 = vld [vmem:[%s17680_s11 + $0x8b8] sm:$0xff]  }
 0x469   : > { %15394 = vmatprep.mubr.msk.bf16.mxu0 %vm1436_vm1, %v19176_v42  ;;  %v17175_v42 = vld [vmem:[%s17680_s11 + $0x8c0] sm:$0xff]  }
 0x46f   : > { %14741 = vmatmul.mubr.msk.bf16.gmra.mrb[24].mxu1 %vm1436_vm1, %v17148_v35 }
 0x470   : > { %15395 = vmatmul.mubr.msk.bf16.gmra.mrb[144].mxu0 %vm1436_vm1, %v19187_v44  ;;  %14744 = vmatprep.mubr.msk.bf16.mxu1 %vm1436_vm1, %v17149_v26  ;;  %v17176_v44 = vld [vmem:[%s17680_s11 + $0x8c8] sm:$0xff]  }
 0x471   : > { %15398 = vmatprep.mubr.msk.bf16.mxu0 %vm1436_vm1, %v19190_v46  ;;  %v17177_v46 = vld [vmem:[%s17680_s11 + $0x8d0] sm:$0xff]  }
 0x477   : > { %14745 = vmatmul.mubr.msk.bf16.gmra.mrb[28].mxu1 %vm1436_vm1, %v17150_v34  ;;  %v17192_v34 = vld [vmem:[%s17680_s11 + $0x948] sm:$0xff]  }
 0x478   : > { %15399 = vmatmul.mubr.msk.bf16.gmra.mrb[148].mxu0 %vm1436_vm1, %v19201_v48  ;;  %14748 = vmatprep.mubr.msk.bf16.mxu1 %vm1436_vm1, %v17151_v39  ;;  %v17178_v48 = vld [vmem:[%s17680_s11 + $0x8d8] sm:$0xff]  }
 0x479   : > { %15402 = vmatprep.mubr.msk.bf16.mxu0 %vm1436_vm1, %v19204_v28  ;;  %v17179_v28 = vld [vmem:[%s17680_s11 + $0x8e0] sm:$0xff]  }
 0x47f   : > { %14749 = vmatmul.mubr.msk.bf16.gmra.mrb[32].mxu1 %vm1436_vm1, %v17152_v51  ;;  %v17193_v51 = vld [vmem:[%s17680_s11 + $0x950] sm:$0xff]  }
 0x480   : > { %15403 = vmatmul.mubr.msk.bf16.gmra.mrb[152].mxu0 %vm1436_vm1, %v19215_v50  ;;  %14752 = vmatprep.mubr.msk.bf16.mxu1 %vm1436_vm1, %v17153_v56  ;;  %v17180_v50 = vld [vmem:[%s17680_s11 + $0x8e8] sm:$0xff]  }
 0x481   : > { %15406 = vmatprep.mubr.msk.bf16.mxu0 %vm1436_vm1, %v19218_v52  ;;  %v17181_v52 = vld [vmem:[%s17680_s11 + $0x8f0] sm:$0xff]  }
 0x487   : > { %14753 = vmatmul.mubr.msk.bf16.gmra.mrb[36].mxu1 %vm1436_vm1, %v17154_v2 }
 0x488   : > { %15407 = vmatmul.mubr.msk.bf16.gmra.mrb[156].mxu0 %vm1436_vm1, %v19229_v55  ;;  %14756 = vmatprep.mubr.msk.bf16.mxu1 %vm1436_vm1, %v17155_v7  ;;  %v17182_v55 = vld [vmem:[%s17680_s11 + $0x8f8] sm:$0xff]  }
 0x489   : > { %15412 = vmatprep.mubr.msk.bf16.mxu0 %vm1436_vm1, %v17155_v7 }
 0x48f   : > { %14757 = vmatmul.mubr.msk.bf16.gmra.mrb[40].mxu1 %vm1436_vm1, %v17156_v22 }
 0x490   : > { %15413 = vmatmul.mubr.msk.bf16.vlgmr.msra.gmra.mrb[40].mxu0 %vm1436_vm1, %v17156_v22  ;;  %14760 = vmatprep.mubr.msk.bf16.mxu1 %vm1436_vm1, %v17157_v25  ;;  %v17194_v22 = vld [vmem:[%s17680_s11 + $0x958] sm:$0xff]  }
 0x491   : > { %15416 = vmatprep.mubr.msk.bf16.mxu0 %vm1436_vm1, %v17157_v25 }
 0x497   : > { %14761 = vmatmul.mubr.msk.bf16.gmra.mrb[44].mxu1 %vm1436_vm1, %v17158_v30 }
 0x498   : > { %15417 = vmatmul.mubr.msk.bf16.gmra.mrb[44].mxu0 %vm1436_vm1, %v17158_v30  ;;  %14764 = vmatprep.mubr.msk.bf16.mxu1 %vm1436_vm1, %v17159_v10  ;;  %v17195_v30 = vld [vmem:[%s17680_s11 + $0x960] sm:$0xff]  }
 0x499   : > { %15420 = vmatprep.mubr.msk.bf16.mxu0 %vm1436_vm1, %v17159_v10 }
 0x49f   : > { %14765 = vmatmul.mubr.msk.bf16.gmra.mrb[48].mxu1 %vm1436_vm1, %v17160_v11 }
 0x4a0   : > { %15421 = vmatmul.mubr.msk.bf16.gmra.mrb[48].mxu0 %vm1436_vm1, %v17160_v11  ;;  %14768 = vmatprep.mubr.msk.bf16.mxu1 %vm1436_vm1, %v17161_v15 }
 0x4a1   : > { %15424 = vmatprep.mubr.msk.bf16.mxu0 %vm1436_vm1, %v17161_v15 }
 0x4a7   : > { %14769 = vmatmul.mubr.msk.bf16.gmra.mrb[52].mxu1 %vm1436_vm1, %v17162_v45 }
 0x4a8   : > { %15425 = vmatmul.mubr.msk.bf16.gmra.mrb[52].mxu0 %vm1436_vm1, %v17162_v45  ;;  %14772 = vmatprep.mubr.msk.bf16.mxu1 %vm1436_vm1, %v17163_v19  ;;  %v17196_v45 = vld [vmem:[%s17680_s11 + $0x968] sm:$0xff]  }
 0x4a9   : > { %15428 = vmatprep.mubr.msk.bf16.mxu0 %vm1436_vm1, %v17163_v19 }
 0x4af   : > { %14773 = vmatmul.mubr.msk.bf16.gmra.mrb[56].mxu1 %vm1436_vm1, %v17164_v8 }
 0x4b0   : > { %15429 = vmatmul.mubr.msk.bf16.gmra.mrb[56].mxu0 %vm1436_vm1, %v17164_v8  ;;  %14776 = vmatprep.mubr.msk.bf16.mxu1 %vm1436_vm1, %v17165_v23  ;;  %v17197_v8 = vld [vmem:[%s17680_s11 + $0x970] sm:$0xff]  }
 0x4b1   : > { %15432 = vmatprep.mubr.msk.bf16.mxu0 %vm1436_vm1, %v17165_v23 }
 0x4b7   : > { %14777 = vmatmul.mubr.msk.bf16.gmra.mrb[60].mxu1 %vm1436_vm1, %v17166_v13 }
 0x4b8   : > { %15433 = vmatmul.mubr.msk.bf16.gmra.mrb[60].mxu0 %vm1436_vm1, %v17166_v13  ;;  %14780 = vmatprep.mubr.msk.bf16.mxu1 %vm1436_vm1, %v17167_v17 }
 0x4b9   : > { %15436 = vmatprep.mubr.msk.bf16.mxu0 %vm1436_vm1, %v17167_v17 }
 0x4bf   : > { %14781 = vmatmul.mubr.msk.bf16.gmra.mrb[64].mxu1 %vm1436_vm1, %v17168_v47 }
 0x4c0   : > { %15437 = vmatmul.mubr.msk.bf16.gmra.mrb[64].mxu0 %vm1436_vm1, %v17168_v47  ;;  %14784 = vmatprep.mubr.msk.bf16.mxu1 %vm1436_vm1, %v17169_v3  ;;  %v17198_v47 = vld [vmem:[%s17680_s11 + $0x978] sm:$0xff]  }
 0x4c1   : > { %15440 = vmatprep.mubr.msk.bf16.mxu0 %vm1436_vm1, %v17169_v3 }
 0x4c7   : > { %14785 = vmatmul.mubr.msk.bf16.gmra.mrb[68].mxu1 %vm1436_vm1, %v17170_v62 }
 0x4c8   : > { %15441 = vmatmul.mubr.msk.bf16.gmra.mrb[68].mxu0 %vm1436_vm1, %v17170_v62  ;;  %14788 = vmatprep.mubr.msk.bf16.mxu1 %vm1436_vm1, %v17171_v33  ;;  %v17199_v62 = vld [vmem:[%s17680_s11 + $0x980] sm:$0xff]  }
 0x4c9   : > { %15444 = vmatprep.mubr.msk.bf16.mxu0 %vm1436_vm1, %v17171_v33 }
 0x4cf   : > { %14789 = vmatmul.mubr.msk.bf16.gmra.mrb[72].mxu1 %vm1436_vm1, %v17172_v36 }
 0x4d0   : > { %15445 = vmatmul.mubr.msk.bf16.gmra.mrb[72].mxu0 %vm1436_vm1, %v17172_v36  ;;  %14792 = vmatprep.mubr.msk.bf16.mxu1 %vm1436_vm1, %v17173_v38 }
 0x4d1   : > { %15448 = vmatprep.mubr.msk.bf16.mxu0 %vm1436_vm1, %v17173_v38 }
 0x4d7   : > { %14793 = vmatmul.mubr.msk.bf16.gmra.mrb[76].mxu1 %vm1436_vm1, %v17174_v40 }
 0x4d8   : > { %15449 = vmatmul.mubr.msk.bf16.gmra.mrb[76].mxu0 %vm1436_vm1, %v17174_v40  ;;  %14796 = vmatprep.mubr.msk.bf16.mxu1 %vm1436_vm1, %v17175_v42  ;;  %v17200_v40 = vld [vmem:[%s17680_s11 + $0x988] sm:$0xff]  }
 0x4d9   : > { %15452 = vmatprep.mubr.msk.bf16.mxu0 %vm1436_vm1, %v17175_v42 }
 0x4df   : > { %14797 = vmatmul.mubr.msk.bf16.gmra.mrb[80].mxu1 %vm1436_vm1, %v17176_v44 }
 0x4e0   : > { %15453 = vmatmul.mubr.msk.bf16.gmra.mrb[80].mxu0 %vm1436_vm1, %v17176_v44  ;;  %14800 = vmatprep.mubr.msk.bf16.mxu1 %vm1436_vm1, %v17177_v46  ;;  %v17201_v44 = vld [vmem:[%s17680_s11 + $0x990] sm:$0xff]  }
 0x4e1   : > { %15456 = vmatprep.mubr.msk.bf16.mxu0 %vm1436_vm1, %v17177_v46 }
 0x4e7   : > { %14801 = vmatmul.mubr.msk.bf16.gmra.mrb[84].mxu1 %vm1436_vm1, %v17178_v48 }
 0x4e8   : > { %15457 = vmatmul.mubr.msk.bf16.gmra.mrb[84].mxu0 %vm1436_vm1, %v17178_v48  ;;  %14804 = vmatprep.mubr.msk.bf16.mxu1 %vm1436_vm1, %v17179_v28 }
 0x4e9   : > { %15460 = vmatprep.mubr.msk.bf16.mxu0 %vm1436_vm1, %v17179_v28 }
 0x4ef   : > { %14805 = vmatmul.mubr.msk.bf16.gmra.mrb[88].mxu1 %vm1436_vm1, %v17180_v50 }
 0x4f0   : > { %15461 = vmatmul.mubr.msk.bf16.gmra.mrb[88].mxu0 %vm1436_vm1, %v17180_v50  ;;  %14808 = vmatprep.mubr.msk.bf16.mxu1 %vm1436_vm1, %v17181_v52  ;;  %v17202_v50 = vld [vmem:[%s17680_s11 + $0x998] sm:$0xff]  }
 0x4f1   : > { %15464 = vmatprep.mubr.msk.bf16.mxu0 %vm1436_vm1, %v17181_v52 }
 0x4f7   : > { %14809 = vmatmul.mubr.msk.bf16.gmra.mrb[92].mxu1 %vm1436_vm1, %v17182_v55 }
 0x4f8   : > { %15465 = vmatmul.mubr.msk.bf16.gmra.mrb[92].mxu0 %vm1436_vm1, %v17182_v55  ;;  %14812 = vmatprep.mubr.msk.bf16.mxu1 %vm1436_vm1, %v17183_v57  ;;  %v17203_v55 = vld [vmem:[%s17680_s11 + $0x9a0] sm:$0xff]  }
 0x4f9   : > { %15468 = vmatprep.mubr.msk.bf16.mxu0 %vm1436_vm1, %v17183_v57 }
 0x4ff   : > { %14813 = vmatmul.mubr.msk.bf16.gmra.mrb[96].mxu1 %vm1436_vm1, %v17184_v58 }
 0x500   : > { %15469 = vmatmul.mubr.msk.bf16.gmra.mrb[96].mxu0 %vm1436_vm1, %v17184_v58  ;;  %14816 = vmatprep.mubr.msk.bf16.mxu1 %vm1436_vm1, %v17185_v61 }
 0x501   : > { %15472 = vmatprep.mubr.msk.bf16.mxu0 %vm1436_vm1, %v17185_v61 }
 0x507   : > { %14817 = vmatmul.mubr.msk.bf16.gmra.mrb[100].mxu1 %vm1436_vm1, %v17186_v53 }
 0x508   : > { %15473 = vmatmul.mubr.msk.bf16.gmra.mrb[100].mxu0 %vm1436_vm1, %v17186_v53  ;;  %14820 = vmatprep.mubr.msk.bf16.mxu1 %vm1436_vm1, %v17187_v63  ;;  %v17204_v53 = vld [vmem:[%s17680_s11 + $0x9a8] sm:$0xff]  }
 0x509   : > { %15476 = vmatprep.mubr.msk.bf16.mxu0 %vm1436_vm1, %v17187_v63 }
 0x50f   : > { %14821 = vmatmul.mubr.msk.bf16.gmra.mrb[104].mxu1 %vm1436_vm1, %v17188_v0 }
 0x510   : > { %15477 = vmatmul.mubr.msk.bf16.gmra.mrb[104].mxu0 %vm1436_vm1, %v17188_v0  ;;  %14824 = vmatprep.mubr.msk.bf16.mxu1 %vm1436_vm1, %v17189_v4  ;;  %v17205_v0 = vld [vmem:[%s17680_s11 + $0x9b0] sm:$0xff]  }
 0x511   : > { %15480 = vmatprep.mubr.msk.bf16.mxu0 %vm1436_vm1, %v17189_v4 }
 0x512   : > { %v19420_v5 = vpop.f32.mrb[0].mxu1 }
 0x513   : > { %v19422_v9 = vpop.f32.mrb[1].mxu1 }
 0x514   : > { %v19425_v18 = vpop.f32.mrb[2].mxu1 }
 0x515   : > { %v19428_v24 = vpop.f32.mrb[3].mxu1 }
 0x517   : > { %14825 = vmatmul.mubr.msk.bf16.gmra.mrb[108].mxu1 %vm1436_vm1, %v17190_v12 }
 0x518   : > { %15481 = vmatmul.mubr.msk.bf16.gmra.mrb[108].mxu0 %vm1436_vm1, %v17190_v12  ;;  %14828 = vmatprep.mubr.msk.bf16.mxu1 %vm1436_vm1, %v17191_v20 }
 0x519   : > { %15484 = vmatprep.mubr.msk.bf16.mxu0 %vm1436_vm1, %v17191_v20 }
 0x51a   : > { %v19434_v35 = vpop.f32.mrb[4].mxu1 }
 0x51b   : > { %v19436_v26 = vpop.f32.mrb[5].mxu1 }
 0x51c   : > { %v19439_v39 = vpop.f32.mrb[6].mxu1 }
 0x51d   : > { %v19442_v56 = vpop.f32.mrb[7].mxu1 }
 0x51f   : > { %14829 = vmatmul.mubr.msk.bf16.gmra.mrb[112].mxu1 %vm1436_vm1, %v17192_v34 }
 0x520   : > { %15485 = vmatmul.mubr.msk.bf16.gmra.mrb[112].mxu0 %vm1436_vm1, %v17192_v34  ;;  %14832 = vmatprep.mubr.msk.bf16.mxu1 %vm1436_vm1, %v17193_v51  ;;  %v17206_v34 = vld [vmem:[%s17680_s11 + $0x9b8] sm:$0xff]  }
 0x521   : > { %15488 = vmatprep.mubr.msk.bf16.mxu0 %vm1436_vm1, %v17193_v51 }
 0x522   : > { %v19448_v2 = vpop.f32.mrb[8].mxu1 }
 0x523   : > { %v19450_v7 = vpop.f32.mrb[9].mxu1 }
 0x524   : > { %v19453_v25 = vpop.f32.mrb[10].mxu1 }
 0x525   : > { %v19456_v10 = vpop.f32.mrb[11].mxu1 }
 0x527   : > { %14833 = vmatmul.mubr.msk.bf16.gmra.mrb[116].mxu1 %vm1436_vm1, %v17194_v22 }
 0x528   : > { %15489 = vmatmul.mubr.msk.bf16.gmra.mrb[116].mxu0 %vm1436_vm1, %v17194_v22  ;;  %14836 = vmatprep.mubr.msk.bf16.mxu1 %vm1436_vm1, %v17195_v30  ;;  %v17207_v22 = vld [vmem:[%s17680_s11 + $0x9c0] sm:$0xff]  }
 0x529   : > { %15492 = vmatprep.mubr.msk.bf16.mxu0 %vm1436_vm1, %v17195_v30 }
 0x52a   : > { %v19462_v11 = vpop.f32.mrb[12].mxu1 }
 0x52b   : > { %v19464_v15 = vpop.f32.mrb[13].mxu1 }
 0x52c   : > { %v19467_v19 = vpop.f32.mrb[14].mxu1 }
 0x52d   : > { %v19470_v23 = vpop.f32.mrb[15].mxu1 }
 0x52f   : > { %14837 = vmatmul.mubr.msk.bf16.gmra.mrb[120].mxu1 %vm1436_vm1, %v17196_v45 }
 0x530   : > { %15493 = vmatmul.mubr.msk.bf16.gmra.mrb[120].mxu0 %vm1436_vm1, %v17196_v45  ;;  %14840 = vmatprep.mubr.msk.bf16.mxu1 %vm1436_vm1, %v17197_v8 }
 0x531   : > { %15496 = vmatprep.mubr.msk.bf16.mxu0 %vm1436_vm1, %v17197_v8 }
 0x532   : > { %v19476_v13 = vpop.f32.mrb[16].mxu1 }
 0x533   : > { %v19478_v17 = vpop.f32.mrb[17].mxu1 }
 0x534   : > { %v19481_v3 = vpop.f32.mrb[18].mxu1 }
 0x535   : > { %v19484_v33 = vpop.f32.mrb[19].mxu1 }
 0x537   : > { %14841 = vmatmul.mubr.msk.bf16.gmra.mrb[124].mxu1 %vm1436_vm1, %v17198_v47 }
 0x538   : > { %15497 = vmatmul.mubr.msk.bf16.gmra.mrb[124].mxu0 %vm1436_vm1, %v17198_v47  ;;  %14844 = vmatprep.mubr.msk.bf16.mxu1 %vm1436_vm1, %v17199_v62  ;;  %v17208_v47 = vld [vmem:[%s17680_s11 + $0x9c8] sm:$0xff]  }
 0x539   : > { %15500 = vmatprep.mubr.msk.bf16.mxu0 %vm1436_vm1, %v17199_v62 }
 0x53a   : > { %v19490_v36 = vpop.f32.mrb[20].mxu1 }
 0x53b   : > { %v19492_v38 = vpop.f32.mrb[21].mxu1 }
 0x53c   : > { %v19495_v42 = vpop.f32.mrb[22].mxu1 }
 0x53d   : > { %v19498_v46 = vpop.f32.mrb[23].mxu1 }
 0x53f   : > { %14845 = vmatmul.mubr.msk.bf16.gmra.mrb[128].mxu1 %vm1436_vm1, %v17200_v40 }
 0x540   : > { %15501 = vmatmul.mubr.msk.bf16.gmra.mrb[128].mxu0 %vm1436_vm1, %v17200_v40  ;;  %14848 = vmatprep.mubr.msk.bf16.mxu1 %vm1436_vm1, %v17201_v44  ;;  %v17209_v40 = vld [vmem:[%s17680_s11 + $0x9d0] sm:$0xff]  }
 0x541   : > { %15504 = vmatprep.mubr.msk.bf16.mxu0 %vm1436_vm1, %v17201_v44 }
 0x542   : > { %v19504_v48 = vpop.f32.mrb[24].mxu1 }
 0x543   : > { %v19506_v28 = vpop.f32.mrb[25].mxu1 }
 0x544   : > { %v19509_v52 = vpop.f32.mrb[26].mxu1 }
 0x545   : > { %v19512_v57 = vpop.f32.mrb[27].mxu1 }
 0x547   : > { %14849 = vmatmul.mubr.msk.bf16.gmra.mrb[132].mxu1 %vm1436_vm1, %v17202_v50 }
 0x548   : > { %15505 = vmatmul.mubr.msk.bf16.gmra.mrb[132].mxu0 %vm1436_vm1, %v17202_v50  ;;  %14852 = vmatprep.mubr.msk.bf16.mxu1 %vm1436_vm1, %v17203_v55 }
 0x549   : > { %15508 = vmatprep.mubr.msk.bf16.mxu0 %vm1436_vm1, %v17203_v55  ;;  %v19568_v55 = vld [vmem:[%s20420_s3] ss:$0 sm:$0xff] }
 0x54a   : > { %v19518_v58 = vpop.f32.mrb[28].mxu1 }
 0x54b   : > { %v19520_v61 = vpop.f32.mrb[29].mxu1 }
 0x54c   : > { %v19523_v63 = vpop.f32.mrb[30].mxu1 }
 0x54d   : > { %v19526_v4 = vpop.f32.mrb[31].mxu1 }
 0x54f   : > { %14853 = vmatmul.mubr.msk.bf16.gmra.mrb[136].mxu1 %vm1436_vm1, %v17204_v53 }
 0x550   : > { %15509 = vmatmul.mubr.msk.bf16.gmra.mrb[136].mxu0 %vm1436_vm1, %v17204_v53  ;;  %14856 = vmatprep.mubr.msk.bf16.mxu1 %vm1436_vm1, %v17205_v0 }
 0x551   : > { %15512 = vmatprep.mubr.msk.bf16.mxu0 %vm1436_vm1, %v17205_v0 }
 0x552   : > { %v19532_v12 = vpop.f32.mrb[32].mxu1 }
 0x553   : > { %v19534_v20 = vpop.f32.mrb[33].mxu1 }
 0x554   : > { %v19537_v51 = vpop.f32.mrb[34].mxu1 }
 0x555   : > { %v19540_v30 = vpop.f32.mrb[35].mxu1 }
 0x557   : > { %14857 = vmatmul.mubr.msk.bf16.gmra.mrb[140].mxu1 %vm1436_vm1, %v17206_v34 }
 0x558   : > { %15513 = vmatmul.mubr.msk.bf16.gmra.mrb[140].mxu0 %vm1436_vm1, %v17206_v34  ;;  %14860 = vmatprep.mubr.msk.bf16.mxu1 %vm1436_vm1, %v17207_v22  ;;  %v17210_v34 = vld [vmem:[%s17680_s11 + $0x9d8] sm:$0xff]  }
 0x559   : > { %15516 = vmatprep.mubr.msk.bf16.mxu0 %vm1436_vm1, %v17207_v22 }
 0x55a   : > { %v19548_v45 = vpop.f32.mrb[36].mxu1 }
 0x55b   : > { %v19551_v8 = vpop.f32.mrb[37].mxu1 }
 0x55c   : > { %v19554_v62 = vpop.f32.mrb[38].mxu1 }
 0x55d   : > { %v19557_v44 = vpop.f32.mrb[39].mxu1 }
 0x55f   : > { %14861 = vmatmul.mubr.msk.bf16.gmra.mrb[144].mxu1 %vm1436_vm1, %v17208_v47 }
 0x560   : > { %15517 = vmatmul.mubr.msk.bf16.gmra.mrb[144].mxu0 %vm1436_vm1, %v17208_v47  ;;  %14864 = vmatprep.mubr.msk.bf16.mxu1 %vm1436_vm1, %v17209_v40 }
 0x561   : > { %15520 = vmatprep.mubr.msk.bf16.mxu0 %vm1436_vm1, %v17209_v40 }
 0x562   : > { %v19563_v50 = vpop.f32.mrb[40].mxu1 }
 0x563   : > { %v15414_v53 = vpop.f32.mrb[40].mxu0  ;;  %v19570_v0 = vpop.f32.mrb[41].mxu1 }
 0x564   : > { %v15532_v22 = vadd.f32 %v15414_v53, %v19420_v5  ;;  %v10317_v27 = vpop.f32.mrb[41].mxu0  ;;  %v19574_v47 = vpop.f32.mrb[42].mxu1 }
 0x565   : > { %v15533_v40 = vadd.f32 %v10317_v27, %v19422_v9  ;;  %v15415_v31 = vpop.f32.mrb[42].mxu0  ;;  %v19578_v21 = vpop.f32.mrb[43].mxu1 }
 0x566   : > { %v11044_v16 = vadd.f32 %v15532_v22, %v19568_v55  ;;  %v15534_v14 = vadd.f32 %v15415_v31, %v19425_v18  ;;  %v10320_v6 = vpop.f32.mrb[43].mxu0 }
 0x567   : > { %v11042_v1 = vadd.f32 %v15533_v40, %v19568_v55  ;;  %v15535_v60 = vadd.f32 %v10320_v6, %v19428_v24  ;;  %14865 = vmatmul.mubr.msk.bf16.gmra.mrb[148].mxu1 %vm1436_vm1, %v17210_v34  ;;  %v17212_v40 = vld [vmem:[%s17680_s11 + $0x9e8] sm:$0xff]  }
 0x568   : > { %v11164_v5 = vmul.f32 0.2, %v11044_v16  ;;  %v11045_v53 = vadd.f32 %v15534_v14, %v19568_v55  ;;  %15521 = vmatmul.mubr.msk.bf16.gmra.mrb[148].mxu0 %vm1436_vm1, %v17210_v34  ;;  %14868 = vmatprep.mubr.msk.bf16.mxu1 %vm1436_vm1, %v17211_v29 }
 0x569   : > { %v11162_v27 = vmul.f32 0.2, %v11042_v1  ;;  %v11043_v6 = vadd.f32 %v15535_v60, %v19568_v55  ;;  %15524 = vmatprep.mubr.msk.bf16.mxu0 %vm1436_vm1, %v17211_v29 }
 0x56a   : > { %v11284_v31 = vmax.f32 %v11044_v16, %v11164_v5  ;;  %v11165_v14 = vmul.f32 0.2, %v11045_v53  ;;  %v19595_v9 = vpop.f32.mrb[44].mxu1  ;;  %v17213_v16 = vld [vmem:[%s17680_s11 + $0x9f0] sm:$0xff]  }
 0x56b   : > { %v11282_v18 = vmax.f32 %v11042_v1, %v11162_v27  ;;  %v11163_v24 = vmul.f32 0.2, %v11043_v6  ;;  %v15418_v34 = vpop.f32.mrb[44].mxu0  ;;  %v19597_v22 = vpop.f32.mrb[45].mxu1 }
 0x56c   : > { %11405 = vst.msk [vmem:[%s19591_s26 + $0x10] sm:$0xff] %vm11402_vm2, %v11284_v31  ;;  %v11285_v59 = vmax.f32 %v11045_v53, %v11165_v14  ;;  %v15536_v60 = vadd.f32 %v15418_v34, %v19434_v35  ;;  %v10333_v54 = vpop.f32.mrb[45].mxu0  ;;  %v19603_v49 = vpop.f32.mrb[46].mxu1 }
 0x56d   : > { %11403 = vst.msk [vmem:[%s19591_s26] sm:$0xff] %vm11402_vm2, %v11282_v18  ;;  %v11283_v29 = vmax.f32 %v11043_v6, %v11163_v24  ;;  %v15537_v1 = vadd.f32 %v10333_v54, %v19436_v26  ;;  %v15419_v5 = vpop.f32.mrb[46].mxu0  ;;  %v19609_v27 = vpop.f32.mrb[47].mxu1 }
 0x56e   : > { %11406 = vst.msk [vmem:[%s19591_s26 + $0x18] sm:$0xff] %vm11402_vm2, %v11285_v59  ;;  %v11048_v43 = vadd.f32 %v15536_v60, %v19568_v55  ;;  %v15538_v53 = vadd.f32 %v15419_v5, %v19439_v39  ;;  %v10336_v31 = vpop.f32.mrb[47].mxu0 }
 0x56f   : > { %11404 = vst.msk [vmem:[%s19591_s26 + $0x8] sm:$0xff] %vm11402_vm2, %v11283_v29  ;;  %v11046_v35 = vadd.f32 %v15537_v1, %v19568_v55  ;;  %v15539_v14 = vadd.f32 %v10336_v31, %v19442_v56  ;;  %14869 = vmatmul.mubr.msk.bf16.gmra.mrb[152].mxu1 %vm1436_vm1, %v17212_v40 }
 0x570   : > { %v11168_v54 = vmul.f32 0.2, %v11048_v43  ;;  %v11049_v26 = vadd.f32 %v15538_v53, %v19568_v55  ;;  %15525 = vmatmul.mubr.msk.bf16.gmra.mrb[152].mxu0 %vm1436_vm1, %v17212_v40  ;;  %14872 = vmatprep.mubr.msk.bf16.mxu1 %vm1436_vm1, %v17213_v16  ;;  %v17214_v40 = vld [vmem:[%s17680_s11 + $0x9f8] sm:$0xff]  }
 0x571   : > { %v11166_v59 = vmul.f32 0.2, %v11046_v35  ;;  %v11047_v39 = vadd.f32 %v15539_v14, %v19568_v55  ;;  %15528 = vmatprep.mubr.msk.bf16.mxu0 %vm1436_vm1, %v17213_v16 }
 0x572   : > { %v11288_v6 = vmax.f32 %v11048_v43, %v11168_v54  ;;  %v11169_v18 = vmul.f32 0.2, %v11049_v26  ;;  %v19625_v56 = vpop.f32.mrb[48].mxu1 }
 0x573   : > { %v11286_v24 = vmax.f32 %v11046_v35, %v11166_v59  ;;  %v11167_v34 = vmul.f32 0.2, %v11047_v39  ;;  %v15422_v60 = vpop.f32.mrb[48].mxu0  ;;  %v19627_v29 = vpop.f32.mrb[49].mxu1 }
 0x574   : > { %11409 = vst.msk [vmem:[%s19591_s26 + $0x30] sm:$0xff] %vm11402_vm2, %v11288_v6  ;;  %v11289_v1 = vmax.f32 %v11049_v26, %v11169_v18  ;;  %v15540_v5 = vadd.f32 %v15422_v60, %v19448_v2  ;;  %v10349_v53 = vpop.f32.mrb[49].mxu0  ;;  %v19633_v31 = vpop.f32.mrb[50].mxu1 }
 0x575   : > { %11407 = vst.msk [vmem:[%s19591_s26 + $0x20] sm:$0xff] %vm11402_vm2, %v11286_v24  ;;  %v11287_v43 = vmax.f32 %v11047_v39, %v11167_v34  ;;  %v15541_v16 = vadd.f32 %v10349_v53, %v19450_v7  ;;  %v15423_v35 = vpop.f32.mrb[50].mxu0  ;;  %v19638_v14 = vpop.f32.mrb[51].mxu1 }
 0x576   : > { %11410 = vst.msk [vmem:[%s19591_s26 + $0x38] sm:$0xff] %vm11402_vm2, %v11289_v1  ;;  %v11052_v54 = vadd.f32 %v15540_v5, %v19568_v55  ;;  %v15542_v59 = vadd.f32 %v15423_v35, %v19453_v25  ;;  %v10352_v26 = vpop.f32.mrb[51].mxu0 }
 0x577   : > { %11408 = vst.msk [vmem:[%s19591_s26 + $0x28] sm:$0xff] %vm11402_vm2, %v11287_v43  ;;  %v11050_v2 = vadd.f32 %v15541_v16, %v19568_v55  ;;  %v15543_v6 = vadd.f32 %v10352_v26, %v19456_v10  ;;  %14873 = vmatmul.mubr.msk.bf16.gmra.mrb[156].mxu1 %vm1436_vm1, %v17214_v40 }
 0x578   : > { %v11172_v7 = vmul.f32 0.2, %v11052_v54  ;;  %v11053_v39 = vadd.f32 %v15542_v59, %v19568_v55  ;;  %15529 = vmatmul.mubr.msk.bf16.gmra.mrb[156].mxu0 %vm1436_vm1, %v17214_v40 }
 0x579   : > { %v11170_v18 = vmul.f32 0.2, %v11050_v2  ;;  %v11051_v24 = vadd.f32 %v15543_v6, %v19568_v55 }
 0x57a   : > { %v11292_v25 = vmax.f32 %v11052_v54, %v11172_v7  ;;  %v11173_v34 = vmul.f32 0.2, %v11053_v39  ;;  %v19652_v60 = vpop.f32.mrb[52].mxu1 }
 0x57b   : > { %v11290_v1 = vmax.f32 %v11050_v2, %v11170_v18  ;;  %v11171_v5 = vmul.f32 0.2, %v11051_v24  ;;  %v15426_v53 = vpop.f32.mrb[52].mxu0  ;;  %v19654_v10 = vpop.f32.mrb[53].mxu1 }
 0x57c   : > { %11413 = vst.msk [vmem:[%s19591_s26 + $0x50] sm:$0xff] %vm11402_vm2, %v11292_v25  ;;  %v11293_v43 = vmax.f32 %v11053_v39, %v11173_v34  ;;  %v15544_v16 = vadd.f32 %v15426_v53, %v19462_v11  ;;  %v10365_v40 = vpop.f32.mrb[53].mxu0  ;;  %v19659_v35 = vpop.f32.mrb[54].mxu1 }
 0x57d   : > { %11411 = vst.msk [vmem:[%s19591_s26 + $0x40] sm:$0xff] %vm11402_vm2, %v11290_v1  ;;  %v11291_v54 = vmax.f32 %v11051_v24, %v11171_v5  ;;  %v15545_v59 = vadd.f32 %v10365_v40, %v19464_v15  ;;  %v15427_v26 = vpop.f32.mrb[54].mxu0  ;;  %v19664_v2 = vpop.f32.mrb[55].mxu1 }
 0x57e   : > { %11414 = vst.msk [vmem:[%s19591_s26 + $0x58] sm:$0xff] %vm11402_vm2, %v11293_v43  ;;  %v11056_v6 = vadd.f32 %v15544_v16, %v19568_v55  ;;  %v15546_v7 = vadd.f32 %v15427_v26, %v19467_v19  ;;  %v10368_v39 = vpop.f32.mrb[55].mxu0 }
 0x57f   : > { %11412 = vst.msk [vmem:[%s19591_s26 + $0x48] sm:$0xff] %vm11402_vm2, %v11291_v54  ;;  %v11054_v11 = vadd.f32 %v15545_v59, %v19568_v55  ;;  %v15547_v18 = vadd.f32 %v10368_v39, %v19470_v23 }
 0x580   : > { %v11176_v24 = vmul.f32 0.2, %v11056_v6  ;;  %v11057_v15 = vadd.f32 %v15546_v7, %v19568_v55 }
 0x581   : > { %v11174_v25 = vmul.f32 0.2, %v11054_v11  ;;  %v11055_v34 = vadd.f32 %v15547_v18, %v19568_v55 }
 0x582   : > { %v11296_v1 = vmax.f32 %v11056_v6, %v11176_v24  ;;  %v11177_v5 = vmul.f32 0.2, %v11057_v15  ;;  %v19676_v53 = vpop.f32.mrb[56].mxu1 }
 0x583   : > { %v11294_v19 = vmax.f32 %v11054_v11, %v11174_v25  ;;  %v11175_v43 = vmul.f32 0.2, %v11055_v34  ;;  %v15430_v16 = vpop.f32.mrb[56].mxu0  ;;  %v19678_v40 = vpop.f32.mrb[57].mxu1 }
 0x584   : > { %11417 = vst.msk [vmem:[%s19591_s26 + $0x70] sm:$0xff] %vm11402_vm2, %v11296_v1  ;;  %v11297_v23 = vmax.f32 %v11057_v15, %v11177_v5  ;;  %v15548_v54 = vadd.f32 %v15430_v16, %v19476_v13  ;;  %v10381_v59 = vpop.f32.mrb[57].mxu0  ;;  %v19683_v26 = vpop.f32.mrb[58].mxu1 }
 0x585   : > { %11415 = vst.msk [vmem:[%s19591_s26 + $0x60] sm:$0xff] %vm11402_vm2, %v11294_v19  ;;  %v11295_v6 = vmax.f32 %v11055_v34, %v11175_v43  ;;  %v15549_v7 = vadd.f32 %v10381_v59, %v19478_v17  ;;  %v15431_v39 = vpop.f32.mrb[58].mxu0  ;;  %v19688_v11 = vpop.f32.mrb[59].mxu1 }
 0x586   : > { %11418 = vst.msk [vmem:[%s19591_s26 + $0x78] sm:$0xff] %vm11402_vm2, %v11297_v23  ;;  %v11060_v18 = vadd.f32 %v15548_v54, %v19568_v55  ;;  %v15550_v24 = vadd.f32 %v15431_v39, %v19481_v3  ;;  %v10384_v15 = vpop.f32.mrb[59].mxu0 }
 0x587   : > { %11416 = vst.msk [vmem:[%s19591_s26 + $0x68] sm:$0xff] %vm11402_vm2, %v11295_v6  ;;  %v11058_v13 = vadd.f32 %v15549_v7, %v19568_v55  ;;  %v15551_v25 = vadd.f32 %v10384_v15, %v19484_v33 }
 0x588   : > { %v11180_v34 = vmul.f32 0.2, %v11060_v18  ;;  %v11061_v17 = vadd.f32 %v15550_v24, %v19568_v55 }
 0x589   : > { %v11178_v1 = vmul.f32 0.2, %v11058_v13  ;;  %v11059_v5 = vadd.f32 %v15551_v25, %v19568_v55 }
 0x58a   : > { %v11300_v19 = vmax.f32 %v11060_v18, %v11180_v34  ;;  %v11181_v43 = vmul.f32 0.2, %v11061_v17  ;;  %v19700_v16 = vpop.f32.mrb[60].mxu1 }
 0x58b   : > { %v11298_v3 = vmax.f32 %v11058_v13, %v11178_v1  ;;  %v11179_v23 = vmul.f32 0.2, %v11059_v5  ;;  %v15434_v54 = vpop.f32.mrb[60].mxu0  ;;  %v19702_v59 = vpop.f32.mrb[61].mxu1 }
 0x58c   : > { %11421 = vst.msk [vmem:[%s19591_s26 + $0x90] sm:$0xff] %vm11402_vm2, %v11300_v19  ;;  %v11301_v33 = vmax.f32 %v11061_v17, %v11181_v43  ;;  %v15552_v6 = vadd.f32 %v15434_v54, %v19490_v36  ;;  %v10397_v7 = vpop.f32.mrb[61].mxu0  ;;  %v19707_v39 = vpop.f32.mrb[62].mxu1 }
 0x58d   : > { %11419 = vst.msk [vmem:[%s19591_s26 + $0x80] sm:$0xff] %vm11402_vm2, %v11298_v3  ;;  %v11299_v18 = vmax.f32 %v11059_v5, %v11179_v23  ;;  %v15553_v24 = vadd.f32 %v10397_v7, %v19492_v38  ;;  %v15435_v15 = vpop.f32.mrb[62].mxu0  ;;  %v19712_v13 = vpop.f32.mrb[63].mxu1 }
 0x58e   : > { %11422 = vst.msk [vmem:[%s19591_s26 + $0x98] sm:$0xff] %vm11402_vm2, %v11301_v33  ;;  %v11064_v25 = vadd.f32 %v15552_v6, %v19568_v55  ;;  %v15554_v34 = vadd.f32 %v15435_v15, %v19495_v42  ;;  %v10400_v17 = vpop.f32.mrb[63].mxu0 }
 0x58f   : > { %11420 = vst.msk [vmem:[%s19591_s26 + $0x88] sm:$0xff] %vm11402_vm2, %v11299_v18  ;;  %v11062_v36 = vadd.f32 %v15553_v24, %v19568_v55  ;;  %v15555_v1 = vadd.f32 %v10400_v17, %v19498_v46 }
 0x590   : > { %v11184_v5 = vmul.f32 0.2, %v11064_v25  ;;  %v11065_v38 = vadd.f32 %v15554_v34, %v19568_v55 }
 0x591   : > { %v11182_v19 = vmul.f32 0.2, %v11062_v36  ;;  %v11063_v43 = vadd.f32 %v15555_v1, %v19568_v55 }
 0x592   : > { %v11304_v3 = vmax.f32 %v11064_v25, %v11184_v5  ;;  %v11185_v23 = vmul.f32 0.2, %v11065_v38  ;;  %v19724_v54 = vpop.f32.mrb[64].mxu1 }
 0x593   : > { %v11302_v42 = vmax.f32 %v11062_v36, %v11182_v19  ;;  %v11183_v33 = vmul.f32 0.2, %v11063_v43  ;;  %v15438_v6 = vpop.f32.mrb[64].mxu0  ;;  %v19726_v7 = vpop.f32.mrb[65].mxu1 }
 0x594   : > { %11425 = vst.msk [vmem:[%s19591_s26 + $0xb0] sm:$0xff] %vm11402_vm2, %v11304_v3  ;;  %v11305_v46 = vmax.f32 %v11065_v38, %v11185_v23  ;;  %v15556_v18 = vadd.f32 %v15438_v6, %v19504_v48  ;;  %v10413_v24 = vpop.f32.mrb[65].mxu0  ;;  %v19731_v15 = vpop.f32.mrb[66].mxu1 }
 0x595   : > { %11423 = vst.msk [vmem:[%s19591_s26 + $0xa0] sm:$0xff] %vm11402_vm2, %v11302_v42  ;;  %v11303_v25 = vmax.f32 %v11063_v43, %v11183_v33  ;;  %v15557_v34 = vadd.f32 %v10413_v24, %v19506_v28  ;;  %v15439_v17 = vpop.f32.mrb[66].mxu0  ;;  %v19736_v36 = vpop.f32.mrb[67].mxu1 }
 0x596   : > { %11426 = vst.msk [vmem:[%s19591_s26 + $0xb8] sm:$0xff] %vm11402_vm2, %v11305_v46  ;;  %v11068_v1 = vadd.f32 %v15556_v18, %v19568_v55  ;;  %v15558_v5 = vadd.f32 %v15439_v17, %v19509_v52  ;;  %v10416_v38 = vpop.f32.mrb[67].mxu0 }
 0x597   : > { %11424 = vst.msk [vmem:[%s19591_s26 + $0xa8] sm:$0xff] %vm11402_vm2, %v11303_v25  ;;  %v11066_v48 = vadd.f32 %v15557_v34, %v19568_v55  ;;  %v15559_v19 = vadd.f32 %v10416_v38, %v19512_v57 }
 0x598   : > { %v11188_v43 = vmul.f32 0.2, %v11068_v1  ;;  %v11069_v28 = vadd.f32 %v15558_v5, %v19568_v55 }
 0x599   : > { %v11186_v3 = vmul.f32 0.2, %v11066_v48  ;;  %v11067_v23 = vadd.f32 %v15559_v19, %v19568_v55 }
 0x59a   : > { %v11308_v42 = vmax.f32 %v11068_v1, %v11188_v43  ;;  %v11189_v33 = vmul.f32 0.2, %v11069_v28  ;;  %v19748_v6 = vpop.f32.mrb[68].mxu1 }
 0x59b   : > { %v11306_v52 = vmax.f32 %v11066_v48, %v11186_v3  ;;  %v11187_v46 = vmul.f32 0.2, %v11067_v23  ;;  %v15442_v18 = vpop.f32.mrb[68].mxu0  ;;  %v19750_v24 = vpop.f32.mrb[69].mxu1 }
 0x59c   : > { %11429 = vst.msk [vmem:[%s19591_s26 + $0xd0] sm:$0xff] %vm11402_vm2, %v11308_v42  ;;  %v11309_v57 = vmax.f32 %v11069_v28, %v11189_v33  ;;  %v15560_v25 = vadd.f32 %v15442_v18, %v19518_v58  ;;  %v10429_v34 = vpop.f32.mrb[69].mxu0  ;;  %v19755_v17 = vpop.f32.mrb[70].mxu1 }
 0x59d   : > { %11427 = vst.msk [vmem:[%s19591_s26 + $0xc0] sm:$0xff] %vm11402_vm2, %v11306_v52  ;;  %v11307_v1 = vmax.f32 %v11067_v23, %v11187_v46  ;;  %v15561_v5 = vadd.f32 %v10429_v34, %v19520_v61  ;;  %v15443_v38 = vpop.f32.mrb[70].mxu0  ;;  %v19760_v48 = vpop.f32.mrb[71].mxu1 }
 0x59e   : > { %11430 = vst.msk [vmem:[%s19591_s26 + $0xd8] sm:$0xff] %vm11402_vm2, %v11309_v57  ;;  %v11072_v19 = vadd.f32 %v15560_v25, %v19568_v55  ;;  %v15562_v43 = vadd.f32 %v15443_v38, %v19523_v63  ;;  %v10432_v28 = vpop.f32.mrb[71].mxu0 }
 0x59f   : > { %11428 = vst.msk [vmem:[%s19591_s26 + $0xc8] sm:$0xff] %vm11402_vm2, %v11307_v1  ;;  %v11070_v58 = vadd.f32 %v15561_v5, %v19568_v55  ;;  %v15563_v3 = vadd.f32 %v10432_v28, %v19526_v4 }
 0x5a0   : > { %v11192_v23 = vmul.f32 0.2, %v11072_v19  ;;  %v11073_v61 = vadd.f32 %v15562_v43, %v19568_v55 }
 0x5a1   : > { %v11190_v42 = vmul.f32 0.2, %v11070_v58  ;;  %v11071_v33 = vadd.f32 %v15563_v3, %v19568_v55 }
 0x5a2   : > { %v11312_v52 = vmax.f32 %v11072_v19, %v11192_v23  ;;  %v11193_v46 = vmul.f32 0.2, %v11073_v61  ;;  %v19772_v18 = vpop.f32.mrb[72].mxu1 }
 0x5a3   : > { %v11310_v63 = vmax.f32 %v11070_v58, %v11190_v42  ;;  %v11191_v57 = vmul.f32 0.2, %v11071_v33  ;;  %v15446_v25 = vpop.f32.mrb[72].mxu0  ;;  %v19774_v34 = vpop.f32.mrb[73].mxu1 }
 0x5a4   : > { %11433 = vst.msk [vmem:[%s19591_s26 + $0xf0] sm:$0xff] %vm11402_vm2, %v11312_v52  ;;  %v11313_v4 = vmax.f32 %v11073_v61, %v11193_v46  ;;  %v15564_v1 = vadd.f32 %v15446_v25, %v19532_v12  ;;  %v10445_v5 = vpop.f32.mrb[73].mxu0  ;;  %v19779_v38 = vpop.f32.mrb[74].mxu1 }
 0x5a5   : > { %11431 = vst.msk [vmem:[%s19591_s26 + $0xe0] sm:$0xff] %vm11402_vm2, %v11310_v63  ;;  %v11311_v19 = vmax.f32 %v11071_v33, %v11191_v57  ;;  %v15565_v43 = vadd.f32 %v10445_v5, %v19534_v20  ;;  %v15447_v28 = vpop.f32.mrb[74].mxu0  ;;  %v19784_v58 = vpop.f32.mrb[75].mxu1 }
 0x5a6   : > { %11434 = vst.msk [vmem:[%s19591_s26 + $0xf8] sm:$0xff] %vm11402_vm2, %v11313_v4  ;;  %v11076_v3 = vadd.f32 %v15564_v1, %v19568_v55  ;;  %v15566_v23 = vadd.f32 %v15447_v28, %v19537_v51  ;;  %v10448_v61 = vpop.f32.mrb[75].mxu0 }
 0x5a7   : > { %11432 = vst.msk [vmem:[%s19591_s26 + $0xe8] sm:$0xff] %vm11402_vm2, %v11311_v19  ;;  %v11074_v12 = vadd.f32 %v15565_v43, %v19568_v55  ;;  %v15567_v42 = vadd.f32 %v10448_v61, %v19540_v30 }
 0x5a8   : > { %v11196_v33 = vmul.f32 0.2, %v11076_v3  ;;  %v11077_v20 = vadd.f32 %v15566_v23, %v19568_v55 }
 0x5a9   : > { %v11194_v52 = vmul.f32 0.2, %v11074_v12  ;;  %v11075_v46 = vadd.f32 %v15567_v42, %v19568_v55 }
 0x5aa   : > { %v11316_v63 = vmax.f32 %v11076_v3, %v11196_v33  ;;  %v11197_v57 = vmul.f32 0.2, %v11077_v20  ;;  %v19796_v25 = vpop.f32.mrb[76].mxu1 }
 0x5ab   : > { %v11314_v51 = vmax.f32 %v11074_v12, %v11194_v52  ;;  %v11195_v4 = vmul.f32 0.2, %v11075_v46  ;;  %v15450_v1 = vpop.f32.mrb[76].mxu0  ;;  %v19798_v5 = vpop.f32.mrb[77].mxu1 }
 0x5ac   : > { %11437 = vst.msk [vmem:[%s19591_s26 + $0x110] sm:$0xff] %vm11402_vm2, %v11316_v63  ;;  %v11317_v30 = vmax.f32 %v11077_v20, %v11197_v57  ;;  %v15568_v19 = vadd.f32 %v15450_v1, %v19548_v45  ;;  %v10461_v43 = vpop.f32.mrb[77].mxu0  ;;  %v19803_v28 = vpop.f32.mrb[78].mxu1 }
 0x5ad   : > { %11435 = vst.msk [vmem:[%s19591_s26 + $0x100] sm:$0xff] %vm11402_vm2, %v11314_v51  ;;  %v11315_v3 = vmax.f32 %v11075_v46, %v11195_v4  ;;  %v15569_v23 = vadd.f32 %v10461_v43, %v19551_v8  ;;  %v15451_v61 = vpop.f32.mrb[78].mxu0  ;;  %v19808_v12 = vpop.f32.mrb[79].mxu1 }
 0x5ae   : > { %11438 = vst.msk [vmem:[%s19591_s26 + $0x118] sm:$0xff] %vm11402_vm2, %v11317_v30  ;;  %v11080_v42 = vadd.f32 %v15568_v19, %v19568_v55  ;;  %v15570_v33 = vadd.f32 %v15451_v61, %v19554_v62  ;;  %v10464_v20 = vpop.f32.mrb[79].mxu0 }
 0x5af   : > { %11436 = vst.msk [vmem:[%s19591_s26 + $0x108] sm:$0xff] %vm11402_vm2, %v11315_v3  ;;  %v11078_v45 = vadd.f32 %v15569_v23, %v19568_v55  ;;  %v15571_v52 = vadd.f32 %v10464_v20, %v19557_v44 }
 0x5b0   : > { %v11200_v46 = vmul.f32 0.2, %v11080_v42  ;;  %v11081_v8 = vadd.f32 %v15570_v33, %v19568_v55 }
 0x5b1   : > { %v11198_v63 = vmul.f32 0.2, %v11078_v45  ;;  %v11079_v57 = vadd.f32 %v15571_v52, %v19568_v55 }
 0x5b2   : > { %v11320_v51 = vmax.f32 %v11080_v42, %v11200_v46  ;;  %v11201_v4 = vmul.f32 0.2, %v11081_v8  ;;  %v19820_v1 = vpop.f32.mrb[80].mxu1 }
 0x5b3   : > { %v11318_v62 = vmax.f32 %v11078_v45, %v11198_v63  ;;  %v11199_v30 = vmul.f32 0.2, %v11079_v57  ;;  %v15454_v19 = vpop.f32.mrb[80].mxu0  ;;  %v19822_v43 = vpop.f32.mrb[81].mxu1 }
 0x5b4   : > { %11441 = vst.msk [vmem:[%s19591_s26 + $0x130] sm:$0xff] %vm11402_vm2, %v11320_v51  ;;  %v11321_v44 = vmax.f32 %v11081_v8, %v11201_v4  ;;  %v15572_v3 = vadd.f32 %v15454_v19, %v19563_v50  ;;  %v10477_v23 = vpop.f32.mrb[81].mxu0  ;;  %v19827_v61 = vpop.f32.mrb[82].mxu1 }
 0x5b5   : > { %11439 = vst.msk [vmem:[%s19591_s26 + $0x120] sm:$0xff] %vm11402_vm2, %v11318_v62  ;;  %v11319_v42 = vmax.f32 %v11079_v57, %v11199_v30  ;;  %v15573_v33 = vadd.f32 %v10477_v23, %v19570_v0  ;;  %v15455_v20 = vpop.f32.mrb[82].mxu0  ;;  %v19832_v45 = vpop.f32.mrb[83].mxu1 }
 0x5b6   : > { %11442 = vst.msk [vmem:[%s19591_s26 + $0x138] sm:$0xff] %vm11402_vm2, %v11321_v44  ;;  %v11084_v52 = vadd.f32 %v15572_v3, %v19568_v55  ;;  %v15574_v46 = vadd.f32 %v15455_v20, %v19574_v47  ;;  %v10480_v8 = vpop.f32.mrb[83].mxu0 }
 0x5b7   : > { %11440 = vst.msk [vmem:[%s19591_s26 + $0x128] sm:$0xff] %vm11402_vm2, %v11319_v42  ;;  %v11082_v50 = vadd.f32 %v15573_v33, %v19568_v55  ;;  %v15575_v63 = vadd.f32 %v10480_v8, %v19578_v21 }
 0x5b8   : > { %v11204_v57 = vmul.f32 0.2, %v11084_v52  ;;  %v11085_v0 = vadd.f32 %v15574_v46, %v19568_v55 }
 0x5b9   : > { %v11202_v51 = vmul.f32 0.2, %v11082_v50  ;;  %v11083_v4 = vadd.f32 %v15575_v63, %v19568_v55 }
 0x5ba   : > { %v11324_v62 = vmax.f32 %v11084_v52, %v11204_v57  ;;  %v11205_v30 = vmul.f32 0.2, %v11085_v0  ;;  %v19844_v19 = vpop.f32.mrb[84].mxu1 }
 0x5bb   : > { %v11322_v47 = vmax.f32 %v11082_v50, %v11202_v51  ;;  %v11203_v44 = vmul.f32 0.2, %v11083_v4  ;;  %v15458_v3 = vpop.f32.mrb[84].mxu0  ;;  %v19846_v23 = vpop.f32.mrb[85].mxu1 }
 0x5bc   : > { %11445 = vst.msk [vmem:[%s19591_s26 + $0x150] sm:$0xff] %vm11402_vm2, %v11324_v62  ;;  %v11325_v21 = vmax.f32 %v11085_v0, %v11205_v30  ;;  %v15576_v42 = vadd.f32 %v15458_v3, %v19595_v9  ;;  %v10493_v33 = vpop.f32.mrb[85].mxu0  ;;  %v19851_v20 = vpop.f32.mrb[86].mxu1 }
 0x5bd   : > { %11443 = vst.msk [vmem:[%s19591_s26 + $0x140] sm:$0xff] %vm11402_vm2, %v11322_v47  ;;  %v11323_v52 = vmax.f32 %v11083_v4, %v11203_v44  ;;  %v15577_v46 = vadd.f32 %v10493_v33, %v19597_v22  ;;  %v15459_v8 = vpop.f32.mrb[86].mxu0  ;;  %v19856_v50 = vpop.f32.mrb[87].mxu1 }
 0x5be   : > { %11446 = vst.msk [vmem:[%s19591_s26 + $0x158] sm:$0xff] %vm11402_vm2, %v11325_v21  ;;  %v11088_v63 = vadd.f32 %v15576_v42, %v19568_v55  ;;  %v15578_v57 = vadd.f32 %v15459_v8, %v19603_v49  ;;  %v10496_v0 = vpop.f32.mrb[87].mxu0 }
 0x5bf   : > { %11444 = vst.msk [vmem:[%s19591_s26 + $0x148] sm:$0xff] %vm11402_vm2, %v11323_v52  ;;  %v11086_v9 = vadd.f32 %v15577_v46, %v19568_v55  ;;  %v15579_v51 = vadd.f32 %v10496_v0, %v19609_v27 }
 0x5c0   : > { %v11208_v4 = vmul.f32 0.2, %v11088_v63  ;;  %v11089_v22 = vadd.f32 %v15578_v57, %v19568_v55 }
 0x5c1   : > { %v11206_v62 = vmul.f32 0.2, %v11086_v9  ;;  %v11087_v30 = vadd.f32 %v15579_v51, %v19568_v55 }
 0x5c2   : > { %v11328_v47 = vmax.f32 %v11088_v63, %v11208_v4  ;;  %v11209_v44 = vmul.f32 0.2, %v11089_v22  ;;  %v19868_v3 = vpop.f32.mrb[88].mxu1 }
 0x5c3   : > { %v11326_v49 = vmax.f32 %v11086_v9, %v11206_v62  ;;  %v11207_v21 = vmul.f32 0.2, %v11087_v30  ;;  %v15462_v42 = vpop.f32.mrb[88].mxu0  ;;  %v19870_v33 = vpop.f32.mrb[89].mxu1 }
 0x5c4   : > { %11449 = vst.msk [vmem:[%s19591_s26 + $0x170] sm:$0xff] %vm11402_vm2, %v11328_v47  ;;  %v11329_v27 = vmax.f32 %v11089_v22, %v11209_v44  ;;  %v15580_v52 = vadd.f32 %v15462_v42, %v19625_v56  ;;  %v10509_v46 = vpop.f32.mrb[89].mxu0  ;;  %v19875_v8 = vpop.f32.mrb[90].mxu1 }
 0x5c5   : > { %11447 = vst.msk [vmem:[%s19591_s26 + $0x160] sm:$0xff] %vm11402_vm2, %v11326_v49  ;;  %v11327_v63 = vmax.f32 %v11087_v30, %v11207_v21  ;;  %v15581_v57 = vadd.f32 %v10509_v46, %v19627_v29  ;;  %v15463_v0 = vpop.f32.mrb[90].mxu0  ;;  %v19880_v9 = vpop.f32.mrb[91].mxu1 }
 0x5c6   : > { %11450 = vst.msk [vmem:[%s19591_s26 + $0x178] sm:$0xff] %vm11402_vm2, %v11329_v27  ;;  %v11092_v51 = vadd.f32 %v15580_v52, %v19568_v55  ;;  %v15582_v4 = vadd.f32 %v15463_v0, %v19633_v31  ;;  %v10512_v22 = vpop.f32.mrb[91].mxu0 }
 0x5c7   : > { %11448 = vst.msk [vmem:[%s19591_s26 + $0x168] sm:$0xff] %vm11402_vm2, %v11327_v63  ;;  %v11090_v56 = vadd.f32 %v15581_v57, %v19568_v55  ;;  %v15583_v62 = vadd.f32 %v10512_v22, %v19638_v14 }
 0x5c8   : > { %v11212_v30 = vmul.f32 0.2, %v11092_v51  ;;  %v11093_v29 = vadd.f32 %v15582_v4, %v19568_v55 }
 0x5c9   : > { %v11210_v47 = vmul.f32 0.2, %v11090_v56  ;;  %v11091_v44 = vadd.f32 %v15583_v62, %v19568_v55 }
 0x5ca   : > { %v11332_v49 = vmax.f32 %v11092_v51, %v11212_v30  ;;  %v11213_v21 = vmul.f32 0.2, %v11093_v29  ;;  %v19892_v42 = vpop.f32.mrb[92].mxu1 }
 0x5cb   : > { %v11330_v31 = vmax.f32 %v11090_v56, %v11210_v47  ;;  %v11211_v27 = vmul.f32 0.2, %v11091_v44  ;;  %v15466_v52 = vpop.f32.mrb[92].mxu0  ;;  %v19894_v46 = vpop.f32.mrb[93].mxu1 }
 0x5cc   : > { %11453 = vst.msk [vmem:[%s19591_s26 + $0x190] sm:$0xff] %vm11402_vm2, %v11332_v49  ;;  %v11333_v14 = vmax.f32 %v11093_v29, %v11213_v21  ;;  %v15584_v63 = vadd.f32 %v15466_v52, %v19652_v60  ;;  %v10525_v57 = vpop.f32.mrb[93].mxu0  ;;  %v19899_v0 = vpop.f32.mrb[94].mxu1 }
 0x5cd   : > { %11451 = vst.msk [vmem:[%s19591_s26 + $0x180] sm:$0xff] %vm11402_vm2, %v11330_v31  ;;  %v11331_v51 = vmax.f32 %v11091_v44, %v11211_v27  ;;  %v15585_v4 = vadd.f32 %v10525_v57, %v19654_v10  ;;  %v15467_v22 = vpop.f32.mrb[94].mxu0  ;;  %v19904_v56 = vpop.f32.mrb[95].mxu1 }
 0x5ce   : > { %11454 = vst.msk [vmem:[%s19591_s26 + $0x198] sm:$0xff] %vm11402_vm2, %v11333_v14  ;;  %v11096_v62 = vadd.f32 %v15584_v63, %v19568_v55  ;;  %v15586_v30 = vadd.f32 %v15467_v22, %v19659_v35  ;;  %v10528_v29 = vpop.f32.mrb[95].mxu0 }
 0x5cf   : > { %11452 = vst.msk [vmem:[%s19591_s26 + $0x188] sm:$0xff] %vm11402_vm2, %v11331_v51  ;;  %v11094_v60 = vadd.f32 %v15585_v4, %v19568_v55  ;;  %v15587_v47 = vadd.f32 %v10528_v29, %v19664_v2 }
 0x5d0   : > { %v11216_v44 = vmul.f32 0.2, %v11096_v62  ;;  %v11097_v10 = vadd.f32 %v15586_v30, %v19568_v55 }
 0x5d1   : > { %v11214_v49 = vmul.f32 0.2, %v11094_v60  ;;  %v11095_v21 = vadd.f32 %v15587_v47, %v19568_v55 }
 0x5d2   : > { %v11336_v31 = vmax.f32 %v11096_v62, %v11216_v44  ;;  %v11217_v27 = vmul.f32 0.2, %v11097_v10  ;;  %v19916_v52 = vpop.f32.mrb[96].mxu1 }
 0x5d3   : > { %v11334_v35 = vmax.f32 %v11094_v60, %v11214_v49  ;;  %v11215_v14 = vmul.f32 0.2, %v11095_v21  ;;  %v15470_v63 = vpop.f32.mrb[96].mxu0  ;;  %v19918_v57 = vpop.f32.mrb[97].mxu1 }
 0x5d4   : > { %11457 = vst.msk [vmem:[%s19591_s26 + $0x1b0] sm:$0xff] %vm11402_vm2, %v11336_v31  ;;  %v11337_v2 = vmax.f32 %v11097_v10, %v11217_v27  ;;  %v15588_v51 = vadd.f32 %v15470_v63, %v19676_v53  ;;  %v10541_v4 = vpop.f32.mrb[97].mxu0  ;;  %v19923_v22 = vpop.f32.mrb[98].mxu1 }
 0x5d5   : > { %11455 = vst.msk [vmem:[%s19591_s26 + $0x1a0] sm:$0xff] %vm11402_vm2, %v11334_v35  ;;  %v11335_v62 = vmax.f32 %v11095_v21, %v11215_v14  ;;  %v15589_v30 = vadd.f32 %v10541_v4, %v19678_v40  ;;  %v15471_v29 = vpop.f32.mrb[98].mxu0  ;;  %v19928_v60 = vpop.f32.mrb[99].mxu1 }
 0x5d6   : > { %11458 = vst.msk [vmem:[%s19591_s26 + $0x1b8] sm:$0xff] %vm11402_vm2, %v11337_v2  ;;  %v11100_v47 = vadd.f32 %v15588_v51, %v19568_v55  ;;  %v15590_v44 = vadd.f32 %v15471_v29, %v19683_v26  ;;  %v10544_v10 = vpop.f32.mrb[99].mxu0 }
 0x5d7   : > { %11456 = vst.msk [vmem:[%s19591_s26 + $0x1a8] sm:$0xff] %vm11402_vm2, %v11335_v62  ;;  %v11098_v53 = vadd.f32 %v15589_v30, %v19568_v55  ;;  %v15591_v49 = vadd.f32 %v10544_v10, %v19688_v11 }
 0x5d8   : > { %v11220_v21 = vmul.f32 0.2, %v11100_v47  ;;  %v11101_v40 = vadd.f32 %v15590_v44, %v19568_v55 }
 0x5d9   : > { %v11218_v31 = vmul.f32 0.2, %v11098_v53  ;;  %v11099_v27 = vadd.f32 %v15591_v49, %v19568_v55 }
 0x5da   : > { %v11340_v35 = vmax.f32 %v11100_v47, %v11220_v21  ;;  %v11221_v14 = vmul.f32 0.2, %v11101_v40  ;;  %v19940_v63 = vpop.f32.mrb[100].mxu1 }
 0x5db   : > { %v11338_v26 = vmax.f32 %v11098_v53, %v11218_v31  ;;  %v11219_v2 = vmul.f32 0.2, %v11099_v27  ;;  %v15474_v51 = vpop.f32.mrb[100].mxu0  ;;  %v19942_v4 = vpop.f32.mrb[101].mxu1 }
 0x5dc   : > { %11461 = vst.msk [vmem:[%s19591_s26 + $0x1d0] sm:$0xff] %vm11402_vm2, %v11340_v35  ;;  %v11341_v11 = vmax.f32 %v11101_v40, %v11221_v14  ;;  %v15592_v62 = vadd.f32 %v15474_v51, %v19700_v16  ;;  %v10557_v30 = vpop.f32.mrb[101].mxu0  ;;  %v19947_v29 = vpop.f32.mrb[102].mxu1 }
 0x5dd   : > { %11459 = vst.msk [vmem:[%s19591_s26 + $0x1c0] sm:$0xff] %vm11402_vm2, %v11338_v26  ;;  %v11339_v47 = vmax.f32 %v11099_v27, %v11219_v2  ;;  %v15593_v44 = vadd.f32 %v10557_v30, %v19702_v59  ;;  %v15475_v10 = vpop.f32.mrb[102].mxu0  ;;  %v19952_v53 = vpop.f32.mrb[103].mxu1 }
 0x5de   : > { %11462 = vst.msk [vmem:[%s19591_s26 + $0x1d8] sm:$0xff] %vm11402_vm2, %v11341_v11  ;;  %v11104_v49 = vadd.f32 %v15592_v62, %v19568_v55  ;;  %v15594_v21 = vadd.f32 %v15475_v10, %v19707_v39  ;;  %v10560_v40 = vpop.f32.mrb[103].mxu0 }
 0x5df   : > { %11460 = vst.msk [vmem:[%s19591_s26 + $0x1c8] sm:$0xff] %vm11402_vm2, %v11339_v47  ;;  %v11102_v16 = vadd.f32 %v15593_v44, %v19568_v55  ;;  %v15595_v31 = vadd.f32 %v10560_v40, %v19712_v13 }
 0x5e0   : > { %v11224_v27 = vmul.f32 0.2, %v11104_v49  ;;  %v11105_v59 = vadd.f32 %v15594_v21, %v19568_v55 }
 0x5e1   : > { %v11222_v35 = vmul.f32 0.2, %v11102_v16  ;;  %v11103_v14 = vadd.f32 %v15595_v31, %v19568_v55 }
 0x5e2   : > { %v11344_v26 = vmax.f32 %v11104_v49, %v11224_v27  ;;  %v11225_v2 = vmul.f32 0.2, %v11105_v59  ;;  %v19964_v51 = vpop.f32.mrb[104].mxu1 }
 0x5e3   : > { %v11342_v39 = vmax.f32 %v11102_v16, %v11222_v35  ;;  %v11223_v11 = vmul.f32 0.2, %v11103_v14  ;;  %v15478_v62 = vpop.f32.mrb[104].mxu0  ;;  %v19966_v30 = vpop.f32.mrb[105].mxu1 }
 0x5e4   : > { %11465 = vst.msk [vmem:[%s19591_s26 + $0x1f0] sm:$0xff] %vm11402_vm2, %v11344_v26  ;;  %v11345_v13 = vmax.f32 %v11105_v59, %v11225_v2  ;;  %v15596_v47 = vadd.f32 %v15478_v62, %v19724_v54  ;;  %v10573_v44 = vpop.f32.mrb[105].mxu0  ;;  %v19971_v10 = vpop.f32.mrb[106].mxu1 }
 0x5e5   : > { %11463 = vst.msk [vmem:[%s19591_s26 + $0x1e0] sm:$0xff] %vm11402_vm2, %v11342_v39  ;;  %v11343_v49 = vmax.f32 %v11103_v14, %v11223_v11  ;;  %v15597_v21 = vadd.f32 %v10573_v44, %v19726_v7  ;;  %v15479_v40 = vpop.f32.mrb[106].mxu0  ;;  %v19976_v16 = vpop.f32.mrb[107].mxu1 }
 0x5e6   : > { %11466 = vst.msk [vmem:[%s19591_s26 + $0x1f8] sm:$0xff] %vm11402_vm2, %v11345_v13  ;;  %v11108_v31 = vadd.f32 %v15596_v47, %v19568_v55  ;;  %v15598_v27 = vadd.f32 %v15479_v40, %v19731_v15  ;;  %v10576_v59 = vpop.f32.mrb[107].mxu0 }
 0x5e7   : > { %11464 = vst.msk [vmem:[%s19591_s26 + $0x1e8] sm:$0xff] %vm11402_vm2, %v11343_v49  ;;  %v11106_v54 = vadd.f32 %v15597_v21, %v19568_v55  ;;  %v15599_v35 = vadd.f32 %v10576_v59, %v19736_v36 }
 0x5e8   : > { %v11228_v14 = vmul.f32 0.2, %v11108_v31  ;;  %v11109_v7 = vadd.f32 %v15598_v27, %v19568_v55 }
 0x5e9   : > { %v11226_v26 = vmul.f32 0.2, %v11106_v54  ;;  %v11107_v2 = vadd.f32 %v15599_v35, %v19568_v55 }
 0x5ea   : > { %v11348_v39 = vmax.f32 %v11108_v31, %v11228_v14  ;;  %v11229_v11 = vmul.f32 0.2, %v11109_v7  ;;  %v19988_v62 = vpop.f32.mrb[108].mxu1 }
 0x5eb   : > { %v11346_v15 = vmax.f32 %v11106_v54, %v11226_v26  ;;  %v11227_v13 = vmul.f32 0.2, %v11107_v2  ;;  %v15482_v47 = vpop.f32.mrb[108].mxu0  ;;  %v19990_v44 = vpop.f32.mrb[109].mxu1 }
 0x5ec   : > { %11469 = vst.msk [vmem:[%s19591_s26 + $0x210] sm:$0xff] %vm11402_vm2, %v11348_v39  ;;  %v11349_v36 = vmax.f32 %v11109_v7, %v11229_v11  ;;  %v15600_v49 = vadd.f32 %v15482_v47, %v19748_v6  ;;  %v10589_v21 = vpop.f32.mrb[109].mxu0  ;;  %v19995_v40 = vpop.f32.mrb[110].mxu1 }
 0x5ed   : > { %11467 = vst.msk [vmem:[%s19591_s26 + $0x200] sm:$0xff] %vm11402_vm2, %v11346_v15  ;;  %v11347_v31 = vmax.f32 %v11107_v2, %v11227_v13  ;;  %v15601_v27 = vadd.f32 %v10589_v21, %v19750_v24  ;;  %v15483_v59 = vpop.f32.mrb[110].mxu0  ;;  %v20000_v54 = vpop.f32.mrb[111].mxu1 }
 0x5ee   : > { %11470 = vst.msk [vmem:[%s19591_s26 + $0x218] sm:$0xff] %vm11402_vm2, %v11349_v36  ;;  %v11112_v35 = vadd.f32 %v15600_v49, %v19568_v55  ;;  %v15602_v14 = vadd.f32 %v15483_v59, %v19755_v17  ;;  %v10592_v7 = vpop.f32.mrb[111].mxu0 }
 0x5ef   : > { %11468 = vst.msk [vmem:[%s19591_s26 + $0x208] sm:$0xff] %vm11402_vm2, %v11347_v31  ;;  %v11110_v6 = vadd.f32 %v15601_v27, %v19568_v55  ;;  %v15603_v26 = vadd.f32 %v10592_v7, %v19760_v48 }
 0x5f0   : > { %v11232_v2 = vmul.f32 0.2, %v11112_v35  ;;  %v11113_v24 = vadd.f32 %v15602_v14, %v19568_v55 }
 0x5f1   : > { %v11230_v39 = vmul.f32 0.2, %v11110_v6  ;;  %v11111_v11 = vadd.f32 %v15603_v26, %v19568_v55 }
 0x5f2   : > { %v11352_v15 = vmax.f32 %v11112_v35, %v11232_v2  ;;  %v11233_v13 = vmul.f32 0.2, %v11113_v24  ;;  %v20012_v47 = vpop.f32.mrb[112].mxu1 }
 0x5f3   : > { %v11350_v17 = vmax.f32 %v11110_v6, %v11230_v39  ;;  %v11231_v36 = vmul.f32 0.2, %v11111_v11  ;;  %v15486_v49 = vpop.f32.mrb[112].mxu0  ;;  %v20014_v21 = vpop.f32.mrb[113].mxu1  ;;  %v20031_v6 = vld [vmem:[%s20420_s3] ss:$0 sm:$0xff] }
 0x5f4   : > { %11473 = vst.msk [vmem:[%s19591_s26 + $0x230] sm:$0xff] %vm11402_vm2, %v11352_v15  ;;  %v11353_v48 = vmax.f32 %v11113_v24, %v11233_v13  ;;  %v15604_v31 = vadd.f32 %v15486_v49, %v19772_v18  ;;  %v10605_v27 = vpop.f32.mrb[113].mxu0  ;;  %v20019_v59 = vpop.f32.mrb[114].mxu1 }
 0x5f5   : > { %11471 = vst.msk [vmem:[%s19591_s26 + $0x220] sm:$0xff] %vm11402_vm2, %v11350_v17  ;;  %v11351_v55 = vmax.f32 %v11111_v11, %v11231_v36  ;;  %v15605_v35 = vadd.f32 %v10605_v27, %v19774_v34  ;;  %v15487_v14 = vpop.f32.mrb[114].mxu0  ;;  %v20024_v7 = vpop.f32.mrb[115].mxu1 }
 0x5f6   : > { %11474 = vst.msk [vmem:[%s19591_s26 + $0x238] sm:$0xff] %vm11402_vm2, %v11353_v48  ;;  %v11116_v18 = vadd.f32 %v20031_v6, %v15604_v31  ;;  %v15606_v26 = vadd.f32 %v15487_v14, %v19779_v38  ;;  %v10608_v2 = vpop.f32.mrb[115].mxu0 }
 0x5f7   : > { %11472 = vst.msk [vmem:[%s19591_s26 + $0x228] sm:$0xff] %vm11402_vm2, %v11351_v55  ;;  %v11114_v34 = vadd.f32 %v20031_v6, %v15605_v35  ;;  %v15607_v24 = vadd.f32 %v10608_v2, %v19784_v58 }
 0x5f8   : > { %v11236_v39 = vmul.f32 0.2, %v11116_v18  ;;  %v11117_v11 = vadd.f32 %v20031_v6, %v15606_v26 }
 0x5f9   : > { %v11234_v15 = vmul.f32 0.2, %v11114_v34  ;;  %v11115_v13 = vadd.f32 %v20031_v6, %v15607_v24 }
 0x5fa   : > { %v11356_v17 = vmax.f32 %v11116_v18, %v11236_v39  ;;  %v11237_v36 = vmul.f32 0.2, %v11117_v11  ;;  %v20041_v49 = vpop.f32.mrb[116].mxu1 }
 0x5fb   : > { %v11354_v38 = vmax.f32 %v11114_v34, %v11234_v15  ;;  %v11235_v48 = vmul.f32 0.2, %v11115_v13  ;;  %v15490_v31 = vpop.f32.mrb[116].mxu0  ;;  %v20043_v27 = vpop.f32.mrb[117].mxu1 }
 0x5fc   : > { %11477 = vst.msk [vmem:[%s19591_s26 + $0x250] sm:$0xff] %vm11402_vm2, %v11356_v17  ;;  %v11357_v58 = vmax.f32 %v11117_v11, %v11237_v36  ;;  %v15608_v55 = vadd.f32 %v15490_v31, %v19796_v25  ;;  %v10621_v35 = vpop.f32.mrb[117].mxu0  ;;  %v20048_v14 = vpop.f32.mrb[118].mxu1 }
 0x5fd   : > { %11475 = vst.msk [vmem:[%s19591_s26 + $0x240] sm:$0xff] %vm11402_vm2, %v11354_v38  ;;  %v11355_v18 = vmax.f32 %v11115_v13, %v11235_v48  ;;  %v15609_v26 = vadd.f32 %v10621_v35, %v19798_v5  ;;  %v15491_v2 = vpop.f32.mrb[118].mxu0  ;;  %v20053_v34 = vpop.f32.mrb[119].mxu1 }
 0x5fe   : > { %11478 = vst.msk [vmem:[%s19591_s26 + $0x258] sm:$0xff] %vm11402_vm2, %v11357_v58  ;;  %v11120_v24 = vadd.f32 %v20031_v6, %v15608_v55  ;;  %v15610_v39 = vadd.f32 %v15491_v2, %v19803_v28  ;;  %v10624_v11 = vpop.f32.mrb[119].mxu0 }
 0x5ff   : > { %11476 = vst.msk [vmem:[%s19591_s26 + $0x248] sm:$0xff] %vm11402_vm2, %v11355_v18  ;;  %v11118_v25 = vadd.f32 %v20031_v6, %v15609_v26  ;;  %v15611_v15 = vadd.f32 %v10624_v11, %v19808_v12 }
 0x600   : > { %v11240_v13 = vmul.f32 0.2, %v11120_v24  ;;  %v11121_v5 = vadd.f32 %v20031_v6, %v15610_v39 }
 0x601   : > { %v11238_v17 = vmul.f32 0.2, %v11118_v25  ;;  %v11119_v36 = vadd.f32 %v20031_v6, %v15611_v15 }
 0x602   : > { %v11360_v38 = vmax.f32 %v11120_v24, %v11240_v13  ;;  %v11241_v48 = vmul.f32 0.2, %v11121_v5  ;;  %v14838_v31 = vpop.f32.mrb[120].mxu1 }
 0x603   : > { %v11358_v58 = vmax.f32 %v11118_v25, %v11238_v17  ;;  %v11239_v28 = vmul.f32 0.2, %v11119_v36  ;;  %v15652_v55 = vadd.f32 %v18325_v32, %v14838_v31  ;;  %v15494_v35 = vpop.f32.mrb[120].mxu0  ;;  %v6629_v18 = vpop.f32.mrb[121].mxu1 }
 0x604   : > { %11481 = vst.msk [vmem:[%s19591_s26 + $0x270] sm:$0xff] %vm11402_vm2, %v11360_v38  ;;  %v11361_v12 = vmax.f32 %v11121_v5, %v11241_v48  ;;  %v15612_v26 = vadd.f32 %v15494_v35, %v19820_v1  ;;  %v15653_v2 = vadd.f32 %v18330_v37, %v6629_v18  ;;  %v10637_v39 = vpop.f32.mrb[121].mxu0  ;;  %v14839_v11 = vpop.f32.mrb[122].mxu1  ;;  %v20466_v38 = vld [vmem:[#allocation9_spill] sm:$0xff] }
 0x605   : > { %11479 = vst.msk [vmem:[%s19591_s26 + $0x260] sm:$0xff] %vm11402_vm2, %v11358_v58  ;;  %v11359_v24 = vmax.f32 %v11119_v36, %v11239_v28  ;;  %v11565_v25 = vadd.f32 %v20031_v6, %v15652_v55  ;;  %v15613_v32 = vadd.f32 %v10637_v39, %v19822_v43  ;;  %v15654_v15 = vadd.f32 %v18335_v41, %v14839_v11  ;;  %v15495_v13 = vpop.f32.mrb[122].mxu0  ;;  %v6632_v17 = vpop.f32.mrb[123].mxu1 }
 0x606   : > { %11482 = vst.msk [vmem:[%s19591_s26 + $0x278] sm:$0xff] %vm11402_vm2, %v11361_v12  ;;  %v11124_v1 = vadd.f32 %v20031_v6, %v15612_v26  ;;  %v11563_v37 = vadd.f32 %v20031_v6, %v15653_v2  ;;  %v15614_v5 = vadd.f32 %v15495_v13, %v19827_v61  ;;  %v15655_v48 = vadd.f32 %v20466_v38, %v6632_v17  ;;  %v10640_v31 = vpop.f32.mrb[123].mxu0 }
 0x607   : > { %11480 = vst.msk [vmem:[%s19591_s26 + $0x268] sm:$0xff] %vm11402_vm2, %v11359_v24  ;;  %v11605_v36 = vmul.f32 0.2, %v11565_v25  ;;  %v11122_v43 = vadd.f32 %v20031_v6, %v15613_v32  ;;  %v11566_v41 = vadd.f32 %v20031_v6, %v15654_v15  ;;  %v15615_v58 = vadd.f32 %v10640_v31, %v19832_v45 }
 0x608   : > { %v11244_v28 = vmul.f32 0.2, %v11124_v1  ;;  %v11603_v55 = vmul.f32 0.2, %v11563_v37  ;;  %v11125_v35 = vadd.f32 %v20031_v6, %v15614_v5  ;;  %v11564_v18 = vadd.f32 %v20031_v6, %v15655_v48  ;;  %v20467_v5 = vld [vmem:[#allocation10_spill] sm:$0xff] }
 0x609   : > { %v11645_v61 = vmax.f32 %v11565_v25, %v11605_v36  ;;  %v11242_v12 = vmul.f32 0.2, %v11122_v43  ;;  %v11606_v26 = vmul.f32 0.2, %v11566_v41  ;;  %v11123_v2 = vadd.f32 %v20031_v6, %v15615_v58  ;;  %v20468_v36 = vld [vmem:[#allocation11_spill] sm:$0xff] }
 0x60a   : > { %v11364_v39 = vmax.f32 %v11124_v1, %v11244_v28  ;;  %v11643_v11 = vmax.f32 %v11563_v37, %v11603_v55  ;;  %v11245_v24 = vmul.f32 0.2, %v11125_v35  ;;  %v11604_v32 = vmul.f32 0.2, %v11564_v18  ;;  %v14842_v15 = vpop.f32.mrb[124].mxu1 }
 0x60b   : > { %11685 = vst.msk [vmem:[%s19591_s26 + $0x3d0] sm:$0xff] %vm11402_vm2, %v11645_v61  ;;  %v11362_v45 = vmax.f32 %v11122_v43, %v11242_v12  ;;  %v11646_v13 = vmax.f32 %v11566_v41, %v11606_v26  ;;  %v11243_v17 = vmul.f32 0.2, %v11123_v2  ;;  %v15656_v25 = vadd.f32 %v20467_v5, %v14842_v15  ;;  %v15498_v38 = vpop.f32.mrb[124].mxu0  ;;  %v6645_v48 = vpop.f32.mrb[125].mxu1  ;;  %v20469_v12 = vld [vmem:[#allocation12_spill] sm:$0xff] }
 0x60c   : > { %11485 = vst.msk [vmem:[%s19591_s26 + $0x290] sm:$0xff] %vm11402_vm2, %v11364_v39  ;;  %11683 = vst.msk [vmem:[%s19591_s26 + $0x3c0] sm:$0xff] %vm11402_vm2, %v11643_v11  ;;  %v11365_v1 = vmax.f32 %v11125_v35, %v11245_v24  ;;  %v11644_v37 = vmax.f32 %v11564_v18, %v11604_v32  ;;  %v15616_v31 = vadd.f32 %v15498_v38, %v19844_v19  ;;  %v10653_v28 = vpop.f32.mrb[125].mxu0  ;;  %v14843_v43 = vpop.f32.mrb[126].mxu1  ;;  %v20470_v24 = vld [vmem:[#allocation13_spill] sm:$0xff] }
 0x60d   : > { %v15657_v58 = vadd.f32 %v20468_v36, %v6645_v48  ;;  %11483 = vst.msk [vmem:[%s19591_s26 + $0x280] sm:$0xff] %vm11402_vm2, %v11362_v45  ;;  %11686 = vst.msk [vmem:[%s19591_s26 + $0x3d8] sm:$0xff] %vm11402_vm2, %v11646_v13  ;;  %v11363_v41 = vmax.f32 %v11123_v2, %v11243_v17  ;;  %v11569_v55 = vadd.f32 %v20031_v6, %v15656_v25  ;;  %v15499_v35 = vpop.f32.mrb[126].mxu0  ;;  %v6648_v18 = vpop.f32.mrb[127].mxu1 }
 0x60e   : > { %v15617_v61 = vadd.f32 %v10653_v28, %v19846_v23  ;;  %v15658_v26 = vadd.f32 %v20469_v12, %v14843_v43  ;;  %11486 = vst.msk [vmem:[%s19591_s26 + $0x298] sm:$0xff] %vm11402_vm2, %v11365_v1  ;;  %11684 = vst.msk [vmem:[%s19591_s26 + $0x3c8] sm:$0xff] %vm11402_vm2, %v11644_v37  ;;  %v11128_v19 = vadd.f32 %v20031_v6, %v15616_v31  ;;  %v10656_v32 = vpop.f32.mrb[127].mxu0  ;;  %v20471_v12 = vld [vmem:[#allocation14_spill] sm:$0xff] }
 0x60f   : > { %v11567_v39 = vadd.f32 %v20031_v6, %v15657_v58  ;;  %v15618_v11 = vadd.f32 %v15499_v35, %v19851_v20  ;;  %v15659_v2 = vadd.f32 %v20470_v24, %v6648_v18  ;;  %11484 = vst.msk [vmem:[%s19591_s26 + $0x288] sm:$0xff] %vm11402_vm2, %v11363_v41  ;;  %v11609_v23 = vmul.f32 0.2, %v11569_v55 }
 0x610   : > { %v11126_v15 = vadd.f32 %v20031_v6, %v15617_v61  ;;  %v11570_v45 = vadd.f32 %v20031_v6, %v15658_v26  ;;  %v15619_v13 = vadd.f32 %v10656_v32, %v19856_v50  ;;  %v11248_v17 = vmul.f32 0.2, %v11128_v19 }
 0x611   : > { %v11607_v5 = vmul.f32 0.2, %v11567_v39  ;;  %v11129_v25 = vadd.f32 %v20031_v6, %v15618_v11  ;;  %v11568_v38 = vadd.f32 %v20031_v6, %v15659_v2  ;;  %v11649_v20 = vmax.f32 %v11569_v55, %v11609_v23  ;;  %v20472_v11 = vld [vmem:[#allocation15_spill] sm:$0xff] }
 0x612   : > { %v11246_v48 = vmul.f32 0.2, %v11126_v15  ;;  %v11610_v1 = vmul.f32 0.2, %v11570_v45  ;;  %v11127_v37 = vadd.f32 %v20031_v6, %v15619_v13  ;;  %v11368_v31 = vmax.f32 %v11128_v19, %v11248_v17  ;;  %v14846_v43 = vpop.f32.mrb[128].mxu1  ;;  %v20473_v13 = vld [vmem:[#allocation16_spill] sm:$0xff] }
 0x613   : > { %v11647_v36 = vmax.f32 %v11567_v39, %v11607_v5  ;;  %v11249_v58 = vmul.f32 0.2, %v11129_v25  ;;  %v11608_v28 = vmul.f32 0.2, %v11568_v38  ;;  %11689 = vst.msk [vmem:[%s19591_s26 + $0x3f0] sm:$0xff] %vm11402_vm2, %v11649_v20  ;;  %v15660_v55 = vadd.f32 %v20471_v12, %v14846_v43  ;;  %v15502_v26 = vpop.f32.mrb[128].mxu0 }
 0x614   : > { %v11366_v50 = vmax.f32 %v11126_v15, %v11246_v48  ;;  %v11650_v41 = vmax.f32 %v11570_v45, %v11610_v1  ;;  %v11247_v61 = vmul.f32 0.2, %v11127_v37  ;;  %v6661_v35 = vpop.f32.mrb[129].mxu1  ;;  %11489 = vst.msk [vmem:[%s19591_s26 + $0x2b0] sm:$0xff] %vm11402_vm2, %v11368_v31  ;;  %v15620_v39 = vadd.f32 %v15502_v26, %v19868_v3  ;;  %v10669_v2 = vpop.f32.mrb[129].mxu0  ;;  %v20474_v48 = vld [vmem:[#allocation17_spill] sm:$0xff] }
 0x615   : > { %11687 = vst.msk [vmem:[%s19591_s26 + $0x3e0] sm:$0xff] %vm11402_vm2, %v11647_v36  ;;  %v11369_v18 = vmax.f32 %v11129_v25, %v11249_v58  ;;  %v11648_v19 = vmax.f32 %v11568_v38, %v11608_v28  ;;  %v15661_v24 = vadd.f32 %v20472_v11, %v6661_v35  ;;  %v14847_v32 = vpop.f32.mrb[130].mxu1  ;;  %v11573_v15 = vadd.f32 %v20031_v6, %v15660_v55  ;;  %v15503_v5 = vpop.f32.mrb[130].mxu0 }
 0x616   : > { %11487 = vst.msk [vmem:[%s19591_s26 + $0x2a0] sm:$0xff] %vm11402_vm2, %v11366_v50  ;;  %11690 = vst.msk [vmem:[%s19591_s26 + $0x3f8] sm:$0xff] %vm11402_vm2, %v11650_v41  ;;  %v11367_v23 = vmax.f32 %v11127_v37, %v11247_v61  ;;  %v15621_v45 = vadd.f32 %v10669_v2, %v19870_v33  ;;  %v15662_v17 = vadd.f32 %v20473_v13, %v14847_v32  ;;  %v6664_v25 = vpop.f32.mrb[131].mxu1  ;;  %v10672_v37 = vpop.f32.mrb[131].mxu0  ;;  %v20475_v2 = vld [vmem:[#allocation18_spill] sm:$0xff] }
 0x617   : > { %11490 = vst.msk [vmem:[%s19591_s26 + $0x2b8] sm:$0xff] %vm11402_vm2, %v11369_v18  ;;  %11688 = vst.msk [vmem:[%s19591_s26 + $0x3e8] sm:$0xff] %vm11402_vm2, %v11648_v19  ;;  %v11132_v3 = vadd.f32 %v20031_v6, %v15620_v39  ;;  %v11571_v38 = vadd.f32 %v20031_v6, %v15661_v24  ;;  %v15622_v20 = vadd.f32 %v15503_v5, %v19875_v8  ;;  %v11613_v33 = vmul.f32 0.2, %v11573_v15  ;;  %v20476_v5 = vld [vmem:[#allocation19_spill] sm:$0xff] }
 0x618   : > { %v15663_v1 = vadd.f32 %v20474_v48, %v6664_v25  ;;  %11488 = vst.msk [vmem:[%s19591_s26 + $0x2a8] sm:$0xff] %vm11402_vm2, %v11367_v23  ;;  %v11130_v31 = vadd.f32 %v20031_v6, %v15621_v45  ;;  %v11574_v36 = vadd.f32 %v20031_v6, %v15662_v17  ;;  %v15623_v58 = vadd.f32 %v10672_v37, %v19880_v9  ;;  %v20477_v37 = vld [vmem:[#allocation20_spill] sm:$0xff] }
 0x619   : > { %v11252_v28 = vmul.f32 0.2, %v11132_v3  ;;  %v11611_v43 = vmul.f32 0.2, %v11571_v38  ;;  %v11133_v50 = vadd.f32 %v20031_v6, %v15622_v20  ;;  %v11653_v8 = vmax.f32 %v11573_v15, %v11613_v33 }
 0x61a   : > { %v11572_v41 = vadd.f32 %v20031_v6, %v15663_v1  ;;  %v11250_v61 = vmul.f32 0.2, %v11130_v31  ;;  %v11614_v12 = vmul.f32 0.2, %v11574_v36  ;;  %v11131_v55 = vadd.f32 %v20031_v6, %v15623_v58  ;;  %v14850_v39 = vpop.f32.mrb[132].mxu1 }
 0x61b   : > { %v11372_v26 = vmax.f32 %v11132_v3, %v11252_v28  ;;  %v11651_v35 = vmax.f32 %v11571_v38, %v11611_v43  ;;  %v11253_v18 = vmul.f32 0.2, %v11133_v50  ;;  %11693 = vst.msk [vmem:[%s19591_s26 + $0x410] sm:$0xff] %vm11402_vm2, %v11653_v8  ;;  %v15664_v32 = vadd.f32 %v20475_v2, %v14850_v39  ;;  %v15506_v23 = vpop.f32.mrb[132].mxu0  ;;  %v6677_v15 = vpop.f32.mrb[133].mxu1  ;;  %v20478_v43 = vld [vmem:[#allocation21_spill] sm:$0xff] }
 0x61c   : > { %v11612_v19 = vmul.f32 0.2, %v11572_v41  ;;  %v11370_v9 = vmax.f32 %v11130_v31, %v11250_v61  ;;  %v11654_v11 = vmax.f32 %v11574_v36, %v11614_v12  ;;  %v11251_v24 = vmul.f32 0.2, %v11131_v55  ;;  %v10685_v3 = vpop.f32.mrb[133].mxu0  ;;  %v14851_v38 = vpop.f32.mrb[134].mxu1 }
 0x61d   : > { %11493 = vst.msk [vmem:[%s19591_s26 + $0x2d0] sm:$0xff] %vm11402_vm2, %v11372_v26  ;;  %11691 = vst.msk [vmem:[%s19591_s26 + $0x400] sm:$0xff] %vm11402_vm2, %v11651_v35  ;;  %v11373_v45 = vmax.f32 %v11133_v50, %v11253_v18  ;;  %v15624_v17 = vadd.f32 %v15506_v23, %v19892_v42  ;;  %v15665_v25 = vadd.f32 %v20476_v5, %v6677_v15  ;;  %v15507_v31 = vpop.f32.mrb[134].mxu0  ;;  %v6680_v36 = vpop.f32.mrb[135].mxu1 }
 0x61e   : > { %v11652_v13 = vmax.f32 %v11572_v41, %v11612_v19  ;;  %11491 = vst.msk [vmem:[%s19591_s26 + $0x2c0] sm:$0xff] %vm11402_vm2, %v11370_v9  ;;  %11694 = vst.msk [vmem:[%s19591_s26 + $0x418] sm:$0xff] %vm11402_vm2, %v11654_v11  ;;  %v11371_v20 = vmax.f32 %v11131_v55, %v11251_v24  ;;  %v11577_v48 = vadd.f32 %v20031_v6, %v15664_v32  ;;  %v10688_v41 = vpop.f32.mrb[135].mxu0 }
 0x61f   : > { %v15625_v1 = vadd.f32 %v10685_v3, %v19894_v46  ;;  %v15666_v33 = vadd.f32 %v20477_v37, %v14851_v38  ;;  %11494 = vst.msk [vmem:[%s19591_s26 + $0x2d8] sm:$0xff] %vm11402_vm2, %v11373_v45  ;;  %v11136_v42 = vadd.f32 %v20031_v6, %v15624_v17  ;;  %v11575_v58 = vadd.f32 %v20031_v6, %v15665_v25 }
 0x620   : > { %11692 = vst.msk [vmem:[%s19591_s26 + $0x408] sm:$0xff] %vm11402_vm2, %v11652_v13  ;;  %v15626_v28 = vadd.f32 %v15507_v31, %v19899_v0  ;;  %v15667_v50 = vadd.f32 %v20478_v43, %v6680_v36  ;;  %11492 = vst.msk [vmem:[%s19591_s26 + $0x2c8] sm:$0xff] %vm11402_vm2, %v11371_v20  ;;  %v11617_v46 = vmul.f32 0.2, %v11577_v48  ;;  %v15627_v12 = vadd.f32 %v10688_v41, %v19904_v56  ;;  %v20479_v13 = vld [vmem:[#allocation22_spill] sm:$0xff] }
 0x621   : > { %v11134_v8 = vadd.f32 %v20031_v6, %v15625_v1  ;;  %v11578_v61 = vadd.f32 %v20031_v6, %v15666_v33  ;;  %v11256_v55 = vmul.f32 0.2, %v11136_v42  ;;  %v11615_v26 = vmul.f32 0.2, %v11575_v58 }
 0x622   : > { %v11137_v35 = vadd.f32 %v20031_v6, %v15626_v28  ;;  %v11576_v18 = vadd.f32 %v20031_v6, %v15667_v50  ;;  %v11657_v0 = vmax.f32 %v11577_v48, %v11617_v46  ;;  %v11135_v9 = vadd.f32 %v20031_v6, %v15627_v12  ;;  %v14854_v23 = vpop.f32.mrb[136].mxu1  ;;  %v20480_v48 = vld [vmem:[#allocation23_spill] sm:$0xff] }
 0x623   : > { %v11254_v19 = vmul.f32 0.2, %v11134_v8  ;;  %v11618_v39 = vmul.f32 0.2, %v11578_v61  ;;  %v11376_v11 = vmax.f32 %v11136_v42, %v11256_v55  ;;  %v11655_v24 = vmax.f32 %v11575_v58, %v11615_v26  ;;  %v15510_v5 = vpop.f32.mrb[136].mxu0  ;;  %v6693_v25 = vpop.f32.mrb[137].mxu1 }
 0x624   : > { %v11257_v2 = vmul.f32 0.2, %v11137_v35  ;;  %v11616_v32 = vmul.f32 0.2, %v11576_v18  ;;  %11697 = vst.msk [vmem:[%s19591_s26 + $0x430] sm:$0xff] %vm11402_vm2, %v11657_v0  ;;  %v15668_v17 = vadd.f32 %v20479_v13, %v14854_v23  ;;  %v15628_v20 = vadd.f32 %v15510_v5, %v19916_v52  ;;  %v10701_v37 = vpop.f32.mrb[137].mxu0 }
 0x625   : > { %v11374_v56 = vmax.f32 %v11134_v8, %v11254_v19  ;;  %v11658_v15 = vmax.f32 %v11578_v61, %v11618_v39  ;;  %v11255_v45 = vmul.f32 0.2, %v11135_v9  ;;  %11497 = vst.msk [vmem:[%s19591_s26 + $0x2f0] sm:$0xff] %vm11402_vm2, %v11376_v11  ;;  %11695 = vst.msk [vmem:[%s19591_s26 + $0x420] sm:$0xff] %vm11402_vm2, %v11655_v24  ;;  %v15669_v1 = vadd.f32 %v20480_v48, %v6693_v25  ;;  %v14855_v33 = vpop.f32.mrb[138].mxu1  ;;  %v20481_v58 = vld [vmem:[#allocation24_spill] sm:$0xff] }
 0x626   : > { %v11377_v3 = vmax.f32 %v11137_v35, %v11257_v2  ;;  %v11656_v38 = vmax.f32 %v11576_v18, %v11616_v32  ;;  %v11581_v36 = vadd.f32 %v20031_v6, %v15668_v17  ;;  %v15629_v42 = vadd.f32 %v10701_v37, %v19918_v57  ;;  %v15511_v43 = vpop.f32.mrb[138].mxu0  ;;  %v6696_v50 = vpop.f32.mrb[139].mxu1  ;;  %v20482_v8 = vld [vmem:[#allocation25_spill] sm:$0xff]  ;;  %v20483_v17 = vld [vmem:[#allocation26_spill] sm:$0xff] }
 0x627   : > { %11495 = vst.msk [vmem:[%s19591_s26 + $0x2e0] sm:$0xff] %vm11402_vm2, %v11374_v56  ;;  %11698 = vst.msk [vmem:[%s19591_s26 + $0x438] sm:$0xff] %vm11402_vm2, %v11658_v15  ;;  %v11375_v31 = vmax.f32 %v11135_v9, %v11255_v45  ;;  %v15670_v28 = vadd.f32 %v20481_v58, %v14855_v33  ;;  %v11140_v52 = vadd.f32 %v20031_v6, %v15628_v20  ;;  %v10704_v12 = vpop.f32.mrb[139].mxu0 }
 0x628   : > { %11498 = vst.msk [vmem:[%s19591_s26 + $0x2f8] sm:$0xff] %vm11402_vm2, %v11377_v3  ;;  %11696 = vst.msk [vmem:[%s19591_s26 + $0x428] sm:$0xff] %vm11402_vm2, %v11656_v38  ;;  %v11579_v41 = vadd.f32 %v20031_v6, %v15669_v1  ;;  %v15630_v46 = vadd.f32 %v15511_v43, %v19923_v22  ;;  %v15671_v61 = vadd.f32 %v20482_v8, %v6696_v50  ;;  %v11621_v57 = vmul.f32 0.2, %v11581_v36  ;;  %v20484_v1 = vld [vmem:[#allocation27_spill] sm:$0xff]  ;;  %v20486_v8 = vld [vmem:[#allocation29_spill] sm:$0xff] }
 0x629   : > { %11496 = vst.msk [vmem:[%s19591_s26 + $0x2e8] sm:$0xff] %vm11402_vm2, %v11375_v31  ;;  %v11138_v55 = vadd.f32 %v20031_v6, %v15629_v42  ;;  %v11582_v26 = vadd.f32 %v20031_v6, %v15670_v28  ;;  %v15631_v35 = vadd.f32 %v10704_v12, %v19928_v60  ;;  %v11260_v18 = vmul.f32 0.2, %v11140_v52  ;;  %v20485_v28 = vld [vmem:[#allocation28_spill] sm:$0xff] }
 0x62a   : > { %v11619_v0 = vmul.f32 0.2, %v11579_v41  ;;  %v11141_v19 = vadd.f32 %v20031_v6, %v15630_v46  ;;  %v11580_v39 = vadd.f32 %v20031_v6, %v15671_v61  ;;  %v11661_v22 = vmax.f32 %v11581_v36, %v11621_v57  ;;  %v14858_v15 = vpop.f32.mrb[140].mxu1 }
 0x62b   : > { %v11258_v9 = vmul.f32 0.2, %v11138_v55  ;;  %v11622_v11 = vmul.f32 0.2, %v11582_v26  ;;  %v11139_v24 = vadd.f32 %v20031_v6, %v15631_v35  ;;  %v11380_v2 = vmax.f32 %v11140_v52, %v11260_v18  ;;  %v15514_v25 = vpop.f32.mrb[140].mxu0  ;;  %v6709_v3 = vpop.f32.mrb[141].mxu1 }
 0x62c   : > { %v11659_v32 = vmax.f32 %v11579_v41, %v11619_v0  ;;  %v11261_v23 = vmul.f32 0.2, %v11141_v19  ;;  %v11620_v56 = vmul.f32 0.2, %v11580_v39  ;;  %11701 = vst.msk [vmem:[%s19591_s26 + $0x450] sm:$0xff] %vm11402_vm2, %v11661_v22  ;;  %v15672_v5 = vadd.f32 %v20483_v17, %v14858_v15  ;;  %v10717_v33 = vpop.f32.mrb[141].mxu0 }
 0x62d   : > { %v11378_v60 = vmax.f32 %v11138_v55, %v11258_v9  ;;  %v11662_v45 = vmax.f32 %v11582_v26, %v11622_v11  ;;  %v11259_v13 = vmul.f32 0.2, %v11139_v24  ;;  %11501 = vst.msk [vmem:[%s19591_s26 + $0x310] sm:$0xff] %vm11402_vm2, %v11380_v2  ;;  %v15632_v48 = vadd.f32 %v15514_v25, %v19940_v63  ;;  %v14859_v31 = vpop.f32.mrb[142].mxu1  ;;  %v15515_v50 = vpop.f32.mrb[142].mxu0 }
 0x62e   : > { %11699 = vst.msk [vmem:[%s19591_s26 + $0x440] sm:$0xff] %vm11402_vm2, %v11659_v32  ;;  %v11381_v38 = vmax.f32 %v11141_v19, %v11261_v23  ;;  %v11660_v20 = vmax.f32 %v11580_v39, %v11620_v56  ;;  %v15673_v37 = vadd.f32 %v20484_v1, %v6709_v3  ;;  %v11585_v42 = vadd.f32 %v20031_v6, %v15672_v5  ;;  %v6712_v52 = vpop.f32.mrb[143].mxu1  ;;  %v10720_v12 = vpop.f32.mrb[143].mxu0 }
 0x62f   : > { %11499 = vst.msk [vmem:[%s19591_s26 + $0x300] sm:$0xff] %vm11402_vm2, %v11378_v60  ;;  %11702 = vst.msk [vmem:[%s19591_s26 + $0x458] sm:$0xff] %vm11402_vm2, %v11662_v45  ;;  %v11379_v36 = vmax.f32 %v11139_v24, %v11259_v13  ;;  %v15633_v58 = vadd.f32 %v10717_v33, %v19942_v4  ;;  %v15674_v43 = vadd.f32 %v20485_v28, %v14859_v31  ;;  %v20487_v60 = vld [vmem:[#allocation30_spill] sm:$0xff] }
 0x630   : > { %11502 = vst.msk [vmem:[%s19591_s26 + $0x318] sm:$0xff] %vm11402_vm2, %v11381_v38  ;;  %11700 = vst.msk [vmem:[%s19591_s26 + $0x448] sm:$0xff] %vm11402_vm2, %v11660_v20  ;;  %v11144_v63 = vadd.f32 %v20031_v6, %v15632_v48  ;;  %v11583_v41 = vadd.f32 %v20031_v6, %v15673_v37  ;;  %v15634_v46 = vadd.f32 %v15515_v50, %v19947_v29  ;;  %v11625_v4 = vmul.f32 0.2, %v11585_v42  ;;  %v20488_v38 = vld [vmem:[#allocation31_spill] sm:$0xff] }
 0x631   : > { %v15675_v61 = vadd.f32 %v20486_v8, %v6712_v52  ;;  %11500 = vst.msk [vmem:[%s19591_s26 + $0x308] sm:$0xff] %vm11402_vm2, %v11379_v36  ;;  %v11142_v57 = vadd.f32 %v20031_v6, %v15633_v58  ;;  %v11586_v55 = vadd.f32 %v20031_v6, %v15674_v43  ;;  %v15635_v26 = vadd.f32 %v10720_v12, %v19952_v53  ;;  %v20489_v36 = vld [vmem:[#allocation32_spill] sm:$0xff]  ;;  %v20490_v52 = vld [vmem:[#allocation33_spill] sm:$0xff] }
 0x632   : > { %v11264_v35 = vmul.f32 0.2, %v11144_v63  ;;  %v11623_v18 = vmul.f32 0.2, %v11583_v41  ;;  %v11145_v0 = vadd.f32 %v20031_v6, %v15634_v46  ;;  %v11665_v29 = vmax.f32 %v11585_v42, %v11625_v4  ;;  %v14862_v23 = vpop.f32.mrb[144].mxu1 }
 0x633   : > { %v11584_v19 = vadd.f32 %v20031_v6, %v15675_v61  ;;  %v11262_v39 = vmul.f32 0.2, %v11142_v57  ;;  %v11626_v22 = vmul.f32 0.2, %v11586_v55  ;;  %v11143_v9 = vadd.f32 %v20031_v6, %v15635_v26  ;;  %v15518_v13 = vpop.f32.mrb[144].mxu0  ;;  %v6725_v17 = vpop.f32.mrb[145].mxu1 }
 0x634   : > { %v11384_v11 = vmax.f32 %v11144_v63, %v11264_v35  ;;  %v11663_v24 = vmax.f32 %v11583_v41, %v11623_v18  ;;  %v11265_v2 = vmul.f32 0.2, %v11145_v0  ;;  %11705 = vst.msk [vmem:[%s19591_s26 + $0x470] sm:$0xff] %vm11402_vm2, %v11665_v29  ;;  %v15676_v45 = vadd.f32 %v20487_v60, %v14862_v23  ;;  %v10733_v48 = vpop.f32.mrb[145].mxu0  ;;  %v14863_v1 = vpop.f32.mrb[146].mxu1  ;;  %v20492_v60 = vld [vmem:[#allocation35_spill] sm:$0xff] }
 0x635   : > { %v11624_v32 = vmul.f32 0.2, %v11584_v19  ;;  %v11382_v53 = vmax.f32 %v11142_v57, %v11262_v39  ;;  %v11666_v56 = vmax.f32 %v11586_v55, %v11626_v22  ;;  %v11263_v15 = vmul.f32 0.2, %v11143_v9  ;;  %v15519_v58 = vpop.f32.mrb[146].mxu0  ;;  %v6728_v28 = vpop.f32.mrb[147].mxu1 }
 0x636   : > { %11505 = vst.msk [vmem:[%s19591_s26 + $0x330] sm:$0xff] %vm11402_vm2, %v11384_v11  ;;  %11703 = vst.msk [vmem:[%s19591_s26 + $0x460] sm:$0xff] %vm11402_vm2, %v11663_v24  ;;  %v11385_v5 = vmax.f32 %v11145_v0, %v11265_v2  ;;  %v15636_v3 = vadd.f32 %v15518_v13, %v19964_v51  ;;  %v15677_v20 = vadd.f32 %v20488_v38, %v6725_v17  ;;  %v10736_v41 = vpop.f32.mrb[147].mxu0  ;;  %v20491_v24 = vld [vmem:[#allocation34_spill] sm:$0xff]  ;;  %v20493_v38 = vld [vmem:[#allocation36_spill] sm:$0xff] }
 0x637   : > { %v11664_v25 = vmax.f32 %v11584_v19, %v11624_v32  ;;  %11503 = vst.msk [vmem:[%s19591_s26 + $0x320] sm:$0xff] %vm11402_vm2, %v11382_v53  ;;  %11706 = vst.msk [vmem:[%s19591_s26 + $0x478] sm:$0xff] %vm11402_vm2, %v11666_v56  ;;  %v11383_v37 = vmax.f32 %v11143_v9, %v11263_v15  ;;  %v11589_v33 = vadd.f32 %v20031_v6, %v15676_v45 }
 0x638   : > { %v15637_v31 = vadd.f32 %v10733_v48, %v19966_v30  ;;  %v15678_v42 = vadd.f32 %v20489_v36, %v14863_v1  ;;  %11506 = vst.msk [vmem:[%s19591_s26 + $0x338] sm:$0xff] %vm11402_vm2, %v11385_v5  ;;  %v11148_v51 = vadd.f32 %v20031_v6, %v15636_v3  ;;  %v11587_v43 = vadd.f32 %v20031_v6, %v15677_v20 }
 0x639   : > { %11704 = vst.msk [vmem:[%s19591_s26 + $0x468] sm:$0xff] %vm11402_vm2, %v11664_v25  ;;  %v15638_v50 = vadd.f32 %v15519_v58, %v19971_v10  ;;  %v15679_v63 = vadd.f32 %v20490_v52, %v6728_v28  ;;  %11504 = vst.msk [vmem:[%s19591_s26 + $0x328] sm:$0xff] %vm11402_vm2, %v11383_v37  ;;  %v11629_v30 = vmul.f32 0.2, %v11589_v33  ;;  %v15639_v61 = vadd.f32 %v10736_v41, %v19976_v16 }
 0x63a   : > { %v11146_v46 = vadd.f32 %v20031_v6, %v15637_v31  ;;  %v11590_v8 = vadd.f32 %v20031_v6, %v15678_v42  ;;  %v11268_v12 = vmul.f32 0.2, %v11148_v51  ;;  %v11627_v4 = vmul.f32 0.2, %v11587_v43  ;;  %v14866_v22 = vpop.f32.mrb[148].mxu1  ;;  %v20494_v31 = vld [vmem:[#allocation37_spill] sm:$0xff] }
 0x63b   : > { %v11149_v57 = vadd.f32 %v20031_v6, %v15638_v50  ;;  %v11588_v55 = vadd.f32 %v20031_v6, %v15679_v63  ;;  %v11669_v10 = vmax.f32 %v11589_v33, %v11629_v30  ;;  %v11147_v18 = vadd.f32 %v20031_v6, %v15639_v61  ;;  %v15522_v32 = vpop.f32.mrb[148].mxu0  ;;  %v6741_v23 = vpop.f32.mrb[149].mxu1 }
 0x63c   : > { %v11266_v26 = vmul.f32 0.2, %v11146_v46  ;;  %v11630_v35 = vmul.f32 0.2, %v11590_v8  ;;  %v11388_v0 = vmax.f32 %v11148_v51, %v11268_v12  ;;  %v11667_v19 = vmax.f32 %v11587_v43, %v11627_v4  ;;  %v10749_v13 = vpop.f32.mrb[149].mxu0  ;;  %v14867_v17 = vpop.f32.mrb[150].mxu1 }
 0x63d   : > { %v11269_v29 = vmul.f32 0.2, %v11149_v57  ;;  %v11628_v39 = vmul.f32 0.2, %v11588_v55  ;;  %11709 = vst.msk [vmem:[%s19591_s26 + $0x490] sm:$0xff] %vm11402_vm2, %v11669_v10  ;;  %v15680_v2 = vadd.f32 %v20491_v24, %v14866_v22  ;;  %v15640_v15 = vadd.f32 %v15522_v32, %v19988_v62  ;;  %v15523_v48 = vpop.f32.mrb[150].mxu0 }
 0x63e   : > { %v11386_v16 = vmax.f32 %v11146_v46, %v11266_v26  ;;  %v11670_v9 = vmax.f32 %v11590_v8, %v11630_v35  ;;  %v11267_v11 = vmul.f32 0.2, %v11147_v18  ;;  %11509 = vst.msk [vmem:[%s19591_s26 + $0x350] sm:$0xff] %vm11402_vm2, %v11388_v0  ;;  %11707 = vst.msk [vmem:[%s19591_s26 + $0x480] sm:$0xff] %vm11402_vm2, %v11667_v19  ;;  %v15681_v45 = vadd.f32 %v20492_v60, %v6741_v23  ;;  %v6744_v1 = vpop.f32.mrb[151].mxu1  ;;  %v10752_v42 = vpop.f32.mrb[151].mxu0 }
 0x63f   : > { %v11389_v53 = vmax.f32 %v11149_v57, %v11269_v29  ;;  %v11668_v56 = vmax.f32 %v11588_v55, %v11628_v39  ;;  %v11593_v25 = vadd.f32 %v20031_v6, %v15680_v2  ;;  %v15641_v3 = vadd.f32 %v10749_v13, %v19990_v44  ;;  %v20495_v26 = vld [vmem:[#allocation38_spill] sm:$0xff]  ;;  %v20496_v22 = vld [vmem:[#allocation39_spill] sm:$0xff]  ;;  %v20497_v23 = vld [vmem:[#allocation40_spill] sm:$0xff] }
 0x640   : > { %11507 = vst.msk [vmem:[%s19591_s26 + $0x340] sm:$0xff] %vm11402_vm2, %v11386_v16  ;;  %11710 = vst.msk [vmem:[%s19591_s26 + $0x498] sm:$0xff] %vm11402_vm2, %v11670_v9  ;;  %v11387_v5 = vmax.f32 %v11147_v18, %v11267_v11  ;;  %v15682_v20 = vadd.f32 %v20493_v38, %v14867_v17  ;;  %v11152_v62 = vadd.f32 %v20031_v6, %v15640_v15  ;;  %v20498_v13 = vld [vmem:[#allocation41_spill] sm:$0xff] }
 0x641   : > { %11510 = vst.msk [vmem:[%s19591_s26 + $0x358] sm:$0xff] %vm11402_vm2, %v11389_v53  ;;  %11708 = vst.msk [vmem:[%s19591_s26 + $0x488] sm:$0xff] %vm11402_vm2, %v11668_v56  ;;  %v11591_v37 = vadd.f32 %v20031_v6, %v15681_v45  ;;  %v15642_v33 = vadd.f32 %v15523_v48, %v19995_v40  ;;  %v15683_v36 = vadd.f32 %v20494_v31, %v6744_v1  ;;  %v11633_v44 = vmul.f32 0.2, %v11593_v25 }
 0x642   : > { %11508 = vst.msk [vmem:[%s19591_s26 + $0x348] sm:$0xff] %vm11402_vm2, %v11387_v5  ;;  %v11150_v58 = vadd.f32 %v20031_v6, %v15641_v3  ;;  %v11594_v28 = vadd.f32 %v20031_v6, %v15682_v20  ;;  %v15643_v51 = vadd.f32 %v10752_v42, %v20000_v54  ;;  %v11272_v43 = vmul.f32 0.2, %v11152_v62  ;;  %v14870_v57 = vpop.f32.mrb[152].mxu1 }
 0x643   : > { %v11631_v50 = vmul.f32 0.2, %v11591_v37  ;;  %v11153_v52 = vadd.f32 %v20031_v6, %v15642_v33  ;;  %v11592_v63 = vadd.f32 %v20031_v6, %v15683_v36  ;;  %v11673_v40 = vmax.f32 %v11593_v25, %v11633_v44  ;;  %v15526_v18 = vpop.f32.mrb[152].mxu0  ;;  %v6757_v0 = vpop.f32.mrb[153].mxu1 }
 0x644   : > { %v11270_v41 = vmul.f32 0.2, %v11150_v58  ;;  %v11634_v30 = vmul.f32 0.2, %v11594_v28  ;;  %v11151_v46 = vadd.f32 %v20031_v6, %v15643_v51  ;;  %v11392_v8 = vmax.f32 %v11152_v62, %v11272_v43  ;;  %v10765_v9 = vpop.f32.mrb[153].mxu0  ;;  %v14871_v11 = vpop.f32.mrb[154].mxu1 }
 0x645   : > { %v11671_v61 = vmax.f32 %v11591_v37, %v11631_v50  ;;  %v11273_v12 = vmul.f32 0.2, %v11153_v52  ;;  %v11632_v4 = vmul.f32 0.2, %v11592_v63  ;;  %11713 = vst.msk [vmem:[%s19591_s26 + $0x4b0] sm:$0xff] %vm11402_vm2, %v11673_v40  ;;  %v15684_v35 = vadd.f32 %v20495_v26, %v14870_v57  ;;  %v15527_v56 = vpop.f32.mrb[154].mxu0 }
 0x646   : > { %v11390_v54 = vmax.f32 %v11150_v58, %v11270_v41  ;;  %v11674_v55 = vmax.f32 %v11594_v28, %v11634_v30  ;;  %v11271_v10 = vmul.f32 0.2, %v11151_v46  ;;  %11513 = vst.msk [vmem:[%s19591_s26 + $0x370] sm:$0xff] %vm11402_vm2, %v11392_v8  ;;  %v15644_v39 = vadd.f32 %v15526_v18, %v20012_v47  ;;  %v6760_v15 = vpop.f32.mrb[155].mxu1  ;;  %v10768_v5 = vpop.f32.mrb[155].mxu0  ;;  %v20499_v50 = vld [vmem:[#allocation42_spill] sm:$0xff] }
 0x647   : > { %11711 = vst.msk [vmem:[%s19591_s26 + $0x4a0] sm:$0xff] %vm11402_vm2, %v11671_v61  ;;  %v11393_v19 = vmax.f32 %v11153_v52, %v11273_v12  ;;  %v11672_v29 = vmax.f32 %v11592_v63, %v11632_v4  ;;  %v15685_v16 = vadd.f32 %v20496_v22, %v6757_v0  ;;  %v11597_v2 = vadd.f32 %v20031_v6, %v15684_v35  ;;  %v20500_v8 = vld [vmem:[#allocation43_spill] sm:$0xff] }
 0x648   : > { %11511 = vst.msk [vmem:[%s19591_s26 + $0x360] sm:$0xff] %vm11402_vm2, %v11390_v54  ;;  %11714 = vst.msk [vmem:[%s19591_s26 + $0x4b8] sm:$0xff] %vm11402_vm2, %v11674_v55  ;;  %v11391_v24 = vmax.f32 %v11151_v46, %v11271_v10  ;;  %v15645_v32 = vadd.f32 %v10765_v9, %v20014_v21  ;;  %v15686_v53 = vadd.f32 %v20497_v23, %v14871_v11  ;;  %v20501_v10 = vld [vmem:[#allocation44_spill] sm:$0xff] }
 0x649   : > { %11514 = vst.msk [vmem:[%s19591_s26 + $0x378] sm:$0xff] %vm11402_vm2, %v11393_v19  ;;  %11712 = vst.msk [vmem:[%s19591_s26 + $0x4a8] sm:$0xff] %vm11402_vm2, %v11672_v29  ;;  %v11156_v47 = vadd.f32 %v20031_v6, %v15644_v39  ;;  %v11595_v60 = vadd.f32 %v20031_v6, %v15685_v16  ;;  %v15646_v45 = vadd.f32 %v15527_v56, %v20019_v59  ;;  %v11637_v21 = vmul.f32 0.2, %v11597_v2  ;;  %v20502_v29 = vld [vmem:[#allocation45_spill] sm:$0xff] }
 0x64a   : > { %v15687_v17 = vadd.f32 %v20498_v13, %v6760_v15  ;;  %11512 = vst.msk [vmem:[%s19591_s26 + $0x368] sm:$0xff] %vm11402_vm2, %v11391_v24  ;;  %v11154_v25 = vadd.f32 %v20031_v6, %v15645_v32  ;;  %v11598_v3 = vadd.f32 %v20031_v6, %v15686_v53  ;;  %v15647_v38 = vadd.f32 %v10768_v5, %v20024_v7  ;;  %v14874_v28 = vpop.f32.mrb[156].mxu1 }
 0x64b   : > { %v11276_v20 = vmul.f32 0.2, %v11156_v47  ;;  %v11635_v48 = vmul.f32 0.2, %v11595_v60  ;;  %v11157_v1 = vadd.f32 %v20031_v6, %v15646_v45  ;;  %v11677_v59 = vmax.f32 %v11597_v2, %v11637_v21  ;;  %v15530_v63 = vpop.f32.mrb[156].mxu0  ;;  %v6773_v40 = vpop.f32.mrb[157].mxu1 }
 0x64c   : > { %v11596_v62 = vadd.f32 %v20031_v6, %v15687_v17  ;;  %v11274_v37 = vmul.f32 0.2, %v11154_v25  ;;  %v11638_v33 = vmul.f32 0.2, %v11598_v3  ;;  %v11155_v31 = vadd.f32 %v20031_v6, %v15647_v38  ;;  %v10781_v12 = vpop.f32.mrb[157].mxu0  ;;  %v14875_v4 = vpop.f32.mrb[158].mxu1 }
 0x64d   : > { %v11396_v36 = vmax.f32 %v11156_v47, %v11276_v20  ;;  %v11675_v42 = vmax.f32 %v11595_v60, %v11635_v48  ;;  %v11277_v44 = vmul.f32 0.2, %v11157_v1  ;;  %11717 = vst.msk [vmem:[%s19591_s26 + $0x4d0] sm:$0xff] %vm11402_vm2, %v11677_v59  ;;  %v15688_v52 = vadd.f32 %v20499_v50, %v14874_v28  ;;  %v15531_v35 = vpop.f32.mrb[158].mxu0  ;;  %v6776_v18 = vpop.f32.mrb[159].mxu1 }
 0x64e   : > { %v11636_v58 = vmul.f32 0.2, %v11596_v62  ;;  %v11394_v7 = vmax.f32 %v11154_v25, %v11274_v37  ;;  %v11678_v51 = vmax.f32 %v11598_v3, %v11638_v33  ;;  %v11275_v43 = vmul.f32 0.2, %v11155_v31  ;;  %v10784_v22 = vpop.f32.mrb[159].mxu0 }
 0x64f   : > { %11517 = vst.msk [vmem:[%s19591_s26 + $0x390] sm:$0xff] %vm11402_vm2, %v11396_v36  ;;  %11715 = vst.msk [vmem:[%s19591_s26 + $0x4c0] sm:$0xff] %vm11402_vm2, %v11675_v42  ;;  %v11397_v41 = vmax.f32 %v11157_v1, %v11277_v44  ;;  %v15648_v46 = vadd.f32 %v15530_v63, %v20041_v49  ;;  %v15689_v61 = vadd.f32 %v20500_v8, %v6773_v40 }
 0x650   : > { %v11676_v30 = vmax.f32 %v11596_v62, %v11636_v58  ;;  %11515 = vst.msk [vmem:[%s19591_s26 + $0x380] sm:$0xff] %vm11402_vm2, %v11394_v7  ;;  %11718 = vst.msk [vmem:[%s19591_s26 + $0x4d8] sm:$0xff] %vm11402_vm2, %v11678_v51  ;;  %v11395_v57 = vmax.f32 %v11155_v31, %v11275_v43  ;;  %v11601_v54 = vadd.f32 %v20031_v6, %v15688_v52 }
 0x651   : > { %v15649_v55 = vadd.f32 %v10781_v12, %v20043_v27  ;;  %v15690_v26 = vadd.f32 %v20501_v10, %v14875_v4  ;;  %11518 = vst.msk [vmem:[%s19591_s26 + $0x398] sm:$0xff] %vm11402_vm2, %v11397_v41  ;;  %v11160_v49 = vadd.f32 %v20031_v6, %v15648_v46  ;;  %v11599_v0 = vadd.f32 %v20031_v6, %v15689_v61 }
 0x652   : > { %11716 = vst.msk [vmem:[%s19591_s26 + $0x4c8] sm:$0xff] %vm11402_vm2, %v11676_v30  ;;  %v15650_v19 = vadd.f32 %v15531_v35, %v20048_v14  ;;  %v15691_v39 = vadd.f32 %v20502_v29, %v6776_v18  ;;  %11516 = vst.msk [vmem:[%s19591_s26 + $0x388] sm:$0xff] %vm11402_vm2, %v11395_v57  ;;  %v11641_v27 = vmul.f32 0.2, %v11601_v54  ;;  %v15651_v11 = vadd.f32 %v10784_v22, %v20053_v34 }
 0x653   : > { %v11158_v16 = vadd.f32 %v20031_v6, %v15649_v55  ;;  %v11602_v9 = vadd.f32 %v20031_v6, %v15690_v26  ;;  %v11280_v24 = vmul.f32 0.2, %v11160_v49  ;;  %v11639_v2 = vmul.f32 0.2, %v11599_v0 }
 0x654   : > { %v11161_v32 = vadd.f32 %v20031_v6, %v15650_v19  ;;  %v11600_v14 = vadd.f32 %v20031_v6, %v15691_v39  ;;  %v11681_v23 = vmax.f32 %v11601_v54, %v11641_v27  ;;  %v11159_v15 = vadd.f32 %v20031_v6, %v15651_v11 }
 0x655   : > { %v11278_v53 = vmul.f32 0.2, %v11158_v16  ;;  %v11642_v56 = vmul.f32 0.2, %v11602_v9  ;;  %v11400_v47 = vmax.f32 %v11160_v49, %v11280_v24  ;;  %v11679_v60 = vmax.f32 %v11599_v0, %v11639_v2 }
 0x656   : > { %v11281_v34 = vmul.f32 0.2, %v11161_v32  ;;  %v11640_v45 = vmul.f32 0.2, %v11600_v14  ;;  %11721 = vst.msk [vmem:[%s19591_s26 + $0x4f0] sm:$0xff] %vm11402_vm2, %v11681_v23 }
 0x657   : > { %v11398_v13 = vmax.f32 %v11158_v16, %v11278_v53  ;;  %v11682_v17 = vmax.f32 %v11602_v9, %v11642_v56  ;;  %v11279_v5 = vmul.f32 0.2, %v11159_v15  ;;  %11521 = vst.msk [vmem:[%s19591_s26 + $0x3b0] sm:$0xff] %vm11402_vm2, %v11400_v47  ;;  %11719 = vst.msk [vmem:[%s19591_s26 + $0x4e0] sm:$0xff] %vm11402_vm2, %v11679_v60 }
 0x658   : > { %v11401_v21 = vmax.f32 %v11161_v32, %v11281_v34  ;;  %v11680_v25 = vmax.f32 %v11600_v14, %v11640_v45 }
 0x659   : > { %11519 = vst.msk [vmem:[%s19591_s26 + $0x3a0] sm:$0xff] %vm11402_vm2, %v11398_v13  ;;  %11722 = vst.msk [vmem:[%s19591_s26 + $0x4f8] sm:$0xff] %vm11402_vm2, %v11682_v17  ;;  %v11399_v6 = vmax.f32 %v11159_v15, %v11279_v5 }
 0x65a   : > { %11522 = vst.msk [vmem:[%s19591_s26 + $0x3b8] sm:$0xff] %vm11402_vm2, %v11401_v21  ;;  %11720 = vst.msk [vmem:[%s19591_s26 + $0x4e8] sm:$0xff] %vm11402_vm2, %v11680_v25 }
 0x65b   : > { %11520 = vst.msk [vmem:[%s19591_s26 + $0x3a8] sm:$0xff] %vm11402_vm2, %v11399_v6 }
 0x65c PF: > { %s17_s22 = sadd.s32 1, %s17362_s22   ;;  %s20503_s15 = smov %s17338_s16 }
 0x65d   : > { %p14_p3 = scmp.ge.s32.totalorder %s17_s22, 10   ;;  %s20504_s16 = smov %s17342_s17 }
 0x65e   : > { %s20505_s17 = smov %s17475_s6  ;;  %s20506_s18 = smov %s17354_s20 }
 0x65f   : > { %s20507_s19 = smov %s17358_s21  ;;  %s20508_s20 = smov %s20511_s23 }
 0x660   : > { %s20509_s21 = smov %s20515_s24  ;;  %16 = sbr.rel (!%p14_p3) target bundleno = 7 (0x7), region = 200 }
 0x667   :  { %11753 = vsyncpa [#allocation4], 1 }
 0x668   :  { %11755 = vsyncpa [#allocation4 + $0x1], 1 }

// kernel: sub_discriminator_forward.5
= control target key start
LH: loop header
LB: loop body
LE: loop exit
PB: predicated region body
PF: predicated region fallthrough
CT: control target
= control target key end

     0   :  { %s9711_s15 = smov 0   ;;  %s9713_s16 = smov 0   ;;  %s11732_s0 = inlined_call_operand.vmem [shape: bf16[2,4,720,32], index: 0, kind: input, shape index: {}]   ;;  %s11733_s1 = inlined_call_operand.vmem [shape: bf16[2,4,1,80,32], index: 1, kind: input, shape index: {}]   ;;  %s11734_s2 = inlined_call_operand.vmem [shape: bf16[4,2,32,8], index: 2, kind: input, shape index: {}]   ;;  %s11735_s3 = inlined_call_operand.vmem [shape: f32[1,8], index: 3, kind: input, shape index: {}]   ;;  %s11736_s4 = inlined_call_operand.vmem [shape: f32[2,640,8], index: 4, kind: output, shape index: {}]  }
   0x1   :  { %s9715_s17 = smov 0   ;;  %s9717_s18 = smov 0  }
   0x2   :  { %s9719_s19 = smov 0  }
   0x3 LB: > { %s26_s20 = sadd.s32 1, %s9662_s18  ;;  %p42_p1 = scmp.ne.s32.totalorder %s9654_s16, %s9650_s15  ;;  %s9666_s19 = sphi %s9719_s19, %s14_s19   ;;  %s9662_s18 = sphi %s9717_s18, %s11845_s18   ;;  %s9658_s17 = sphi %s9715_s17, %s11844_s17   ;;  %s9654_s16 = sphi %s9713_s16, %s11843_s16   ;;  %s9650_s15 = sphi %s9711_s15, %s11842_s15  }
   0x4   : > { %p28_p0 = scmp.ge.s32.totalorder %s26_s20, 2  ;;  %p43_p2 = scmp.eq.s32.totalorder %s9666_s19, 0 }
   0x5   : > { %s35_s22 = sadd.s32 1, %s9654_s16  ;;  %p6477_p5 = scmp.ge.s32.totalorder %s9666_s19, 2 }
   0x6   : > { %s11847_s20 = smov (%p28_p0, %s26_s20), 0  ;;  %p44_p3 = por %p43_p2, %p42_p1 }
   0x7   : > { %s30_s21 = ssub.s32 %s9662_s18, %s11847_s20  ;;  %172 = sbr.rel (%p6477_p5) target bundleno = 75 (0x4b), region = 24 }
   0x8   : > { %p33_p4 = scmp.eq.s32.totalorder %s30_s21, 0 }
   0xa   : > { %s9746_s23 = scalar_select %p33_p4, %s9654_s16, %s35_s22  }
   0xe   : > { %175 = sbr.rel (!%p44_p3) target bundleno = 75 (0x4b), region = 28  ;;  %s177_s24 = sand.u32 (%p44_p3), 1, %s9654_s16  }
   0xf   : > { %s9300_s25 = smul.u32 (%p44_p3), 1440, %s9662_s18  ;;  %s9766_s7 = smov (%p44_p3), 0  }
  0x10   : > { %s9751_s26 = smul.u32 (%p44_p3), 1280, %s177_s24  ;;  %s9768_s8 = smov (%p44_p3), 0  }
  0x11   : > { %s9756_s29 = scalar_lea.vmem (%p44_p3), %s11732_s0, %s9300_s25  }
  0x12   : > { %s179_s30 = scalar_lea.vmem (%p44_p3), [#allocation2], %s9751_s26   ;;  %s11738_s6 = smov (%p44_p3), %s9756_s29 }
  0x13   : > { %s11737_s5 = smov (%p44_p3), %s179_s30 }
  0x15 LB: >> { %v208_v0 = vld [vmem:[%s9674_s6] sm:$0xf]  ;;  %v210_v1 = vld [vmem:[%s9674_s6 + $0x4] sm:$0xf]  ;;  %v212_v2 = vld [vmem:[%s9674_s6 + $0x8] sm:$0xf]  ;;  %s9682_s8 = sphi %s9768_s8, %s202_s8   ;;  %s9678_s7 = sphi %s9766_s7, %s11739_s7   ;;  %s9674_s6 = sphi %s11738_s6, %s341_s6   ;;  %s9670_s5 = sphi %s11737_s5, %s342_s5  }
  0x16   : >> { %209 = vst [vmem:[%s9670_s5] sm:$0xf] %v208_v0  ;;  %211 = vst [vmem:[%s9670_s5 + $0x4] sm:$0xf] %v210_v1  ;;  %v214_v3 = vld [vmem:[%s9674_s6 + $0xc] sm:$0xf]  ;;  %s336_s9 = sadd.s32 1, %s9678_s7 }
  0x17   : >> { %213 = vst [vmem:[%s9670_s5 + $0x8] sm:$0xf] %v212_v2  ;;  %v216_v4 = vld [vmem:[%s9674_s6 + $0x10] sm:$0xf]  ;;  %v218_v5 = vld [vmem:[%s9674_s6 + $0x14] sm:$0xf] }
  0x18   : >> { %215 = vst [vmem:[%s9670_s5 + $0xc] sm:$0xf] %v214_v3  ;;  %217 = vst [vmem:[%s9670_s5 + $0x10] sm:$0xf] %v216_v4  ;;  %v220_v6 = vld [vmem:[%s9674_s6 + $0x18] sm:$0xf] }
  0x19   : >> { %219 = vst [vmem:[%s9670_s5 + $0x14] sm:$0xf] %v218_v5  ;;  %v222_v7 = vld [vmem:[%s9674_s6 + $0x1c] sm:$0xf]  ;;  %v224_v8 = vld [vmem:[%s9674_s6 + $0x20] sm:$0xf] }
  0x1a   : >> { %221 = vst [vmem:[%s9670_s5 + $0x18] sm:$0xf] %v220_v6  ;;  %223 = vst [vmem:[%s9670_s5 + $0x1c] sm:$0xf] %v222_v7  ;;  %v226_v9 = vld [vmem:[%s9674_s6 + $0x24] sm:$0xf] }
  0x1b   : >> { %225 = vst [vmem:[%s9670_s5 + $0x20] sm:$0xf] %v224_v8  ;;  %v228_v10 = vld [vmem:[%s9674_s6 + $0x28] sm:$0xf]  ;;  %v230_v11 = vld [vmem:[%s9674_s6 + $0x2c] sm:$0xf] }
  0x1c   : >> { %227 = vst [vmem:[%s9670_s5 + $0x24] sm:$0xf] %v226_v9  ;;  %229 = vst [vmem:[%s9670_s5 + $0x28] sm:$0xf] %v228_v10  ;;  %v232_v12 = vld [vmem:[%s9674_s6 + $0x30] sm:$0xf] }
  0x1d   : >> { %231 = vst [vmem:[%s9670_s5 + $0x2c] sm:$0xf] %v230_v11  ;;  %v234_v13 = vld [vmem:[%s9674_s6 + $0x34] sm:$0xf]  ;;  %v236_v14 = vld [vmem:[%s9674_s6 + $0x38] sm:$0xf] }
  0x1e   : >> { %233 = vst [vmem:[%s9670_s5 + $0x30] sm:$0xf] %v232_v12  ;;  %235 = vst [vmem:[%s9670_s5 + $0x34] sm:$0xf] %v234_v13  ;;  %v238_v15 = vld [vmem:[%s9674_s6 + $0x3c] sm:$0xf] }
  0x1f   : >> { %237 = vst [vmem:[%s9670_s5 + $0x38] sm:$0xf] %v236_v14  ;;  %v240_v16 = vld [vmem:[%s9674_s6 + $0x168] sm:$0xf]  ;;  %v242_v17 = vld [vmem:[%s9674_s6 + $0x16c] sm:$0xf] }
  0x20   : >> { %239 = vst [vmem:[%s9670_s5 + $0x3c] sm:$0xf] %v238_v15  ;;  %241 = vst [vmem:[%s9670_s5 + $0x140] sm:$0xf] %v240_v16  ;;  %v244_v18 = vld [vmem:[%s9674_s6 + $0x170] sm:$0xf] }
  0x21   : >> { %243 = vst [vmem:[%s9670_s5 + $0x144] sm:$0xf] %v242_v17  ;;  %v246_v19 = vld [vmem:[%s9674_s6 + $0x174] sm:$0xf]  ;;  %v248_v20 = vld [vmem:[%s9674_s6 + $0x178] sm:$0xf] }
  0x22   : >> { %245 = vst [vmem:[%s9670_s5 + $0x148] sm:$0xf] %v244_v18  ;;  %247 = vst [vmem:[%s9670_s5 + $0x14c] sm:$0xf] %v246_v19  ;;  %v250_v21 = vld [vmem:[%s9674_s6 + $0x17c] sm:$0xf] }
  0x23   : >> { %249 = vst [vmem:[%s9670_s5 + $0x150] sm:$0xf] %v248_v20  ;;  %v252_v22 = vld [vmem:[%s9674_s6 + $0x180] sm:$0xf]  ;;  %v254_v23 = vld [vmem:[%s9674_s6 + $0x184] sm:$0xf] }
  0x24   : >> { %251 = vst [vmem:[%s9670_s5 + $0x154] sm:$0xf] %v250_v21  ;;  %253 = vst [vmem:[%s9670_s5 + $0x158] sm:$0xf] %v252_v22  ;;  %v256_v24 = vld [vmem:[%s9674_s6 + $0x188] sm:$0xf] }
  0x25   : >> { %255 = vst [vmem:[%s9670_s5 + $0x15c] sm:$0xf] %v254_v23  ;;  %v258_v25 = vld [vmem:[%s9674_s6 + $0x18c] sm:$0xf]  ;;  %v260_v26 = vld [vmem:[%s9674_s6 + $0x190] sm:$0xf] }
  0x26   : >> { %257 = vst [vmem:[%s9670_s5 + $0x160] sm:$0xf] %v256_v24  ;;  %259 = vst [vmem:[%s9670_s5 + $0x164] sm:$0xf] %v258_v25  ;;  %v262_v27 = vld [vmem:[%s9674_s6 + $0x194] sm:$0xf] }
  0x27   : >> { %261 = vst [vmem:[%s9670_s5 + $0x168] sm:$0xf] %v260_v26  ;;  %v264_v28 = vld [vmem:[%s9674_s6 + $0x198] sm:$0xf]  ;;  %v266_v29 = vld [vmem:[%s9674_s6 + $0x19c] sm:$0xf] }
  0x28   : >> { %263 = vst [vmem:[%s9670_s5 + $0x16c] sm:$0xf] %v262_v27  ;;  %265 = vst [vmem:[%s9670_s5 + $0x170] sm:$0xf] %v264_v28  ;;  %v268_v30 = vld [vmem:[%s9674_s6 + $0x1a0] sm:$0xf] }
  0x29   : >> { %267 = vst [vmem:[%s9670_s5 + $0x174] sm:$0xf] %v266_v29  ;;  %v270_v31 = vld [vmem:[%s9674_s6 + $0x1a4] sm:$0xf]  ;;  %v272_v32 = vld [vmem:[%s9674_s6 + $0x2d0] sm:$0xf] }
  0x2a   : >> { %269 = vst [vmem:[%s9670_s5 + $0x178] sm:$0xf] %v268_v30  ;;  %271 = vst [vmem:[%s9670_s5 + $0x17c] sm:$0xf] %v270_v31  ;;  %v274_v33 = vld [vmem:[%s9674_s6 + $0x2d4] sm:$0xf] }
  0x2b   : >> { %273 = vst [vmem:[%s9670_s5 + $0x280] sm:$0xf] %v272_v32  ;;  %v276_v34 = vld [vmem:[%s9674_s6 + $0x2d8] sm:$0xf]  ;;  %v278_v35 = vld [vmem:[%s9674_s6 + $0x2dc] sm:$0xf] }
  0x2c   : >> { %275 = vst [vmem:[%s9670_s5 + $0x284] sm:$0xf] %v274_v33  ;;  %277 = vst [vmem:[%s9670_s5 + $0x288] sm:$0xf] %v276_v34  ;;  %v280_v36 = vld [vmem:[%s9674_s6 + $0x2e0] sm:$0xf] }
  0x2d   : >> { %279 = vst [vmem:[%s9670_s5 + $0x28c] sm:$0xf] %v278_v35  ;;  %v282_v37 = vld [vmem:[%s9674_s6 + $0x2e4] sm:$0xf]  ;;  %v284_v38 = vld [vmem:[%s9674_s6 + $0x2e8] sm:$0xf] }
  0x2e   : >> { %281 = vst [vmem:[%s9670_s5 + $0x290] sm:$0xf] %v280_v36  ;;  %283 = vst [vmem:[%s9670_s5 + $0x294] sm:$0xf] %v282_v37  ;;  %v286_v39 = vld [vmem:[%s9674_s6 + $0x2ec] sm:$0xf] }
  0x2f   : >> { %285 = vst [vmem:[%s9670_s5 + $0x298] sm:$0xf] %v284_v38  ;;  %v288_v40 = vld [vmem:[%s9674_s6 + $0x2f0] sm:$0xf]  ;;  %v290_v41 = vld [vmem:[%s9674_s6 + $0x2f4] sm:$0xf] }
  0x30   : >> { %287 = vst [vmem:[%s9670_s5 + $0x29c] sm:$0xf] %v286_v39  ;;  %289 = vst [vmem:[%s9670_s5 + $0x2a0] sm:$0xf] %v288_v40  ;;  %v292_v42 = vld [vmem:[%s9674_s6 + $0x2f8] sm:$0xf] }
  0x31   : >> { %291 = vst [vmem:[%s9670_s5 + $0x2a4] sm:$0xf] %v290_v41  ;;  %v294_v43 = vld [vmem:[%s9674_s6 + $0x2fc] sm:$0xf]  ;;  %v296_v44 = vld [vmem:[%s9674_s6 + $0x300] sm:$0xf] }
  0x32   : >> { %293 = vst [vmem:[%s9670_s5 + $0x2a8] sm:$0xf] %v292_v42  ;;  %295 = vst [vmem:[%s9670_s5 + $0x2ac] sm:$0xf] %v294_v43  ;;  %v298_v45 = vld [vmem:[%s9674_s6 + $0x304] sm:$0xf] }
  0x33   : >> { %297 = vst [vmem:[%s9670_s5 + $0x2b0] sm:$0xf] %v296_v44  ;;  %v300_v46 = vld [vmem:[%s9674_s6 + $0x308] sm:$0xf]  ;;  %v302_v47 = vld [vmem:[%s9674_s6 + $0x30c] sm:$0xf] }
  0x34   : >> { %299 = vst [vmem:[%s9670_s5 + $0x2b4] sm:$0xf] %v298_v45  ;;  %301 = vst [vmem:[%s9670_s5 + $0x2b8] sm:$0xf] %v300_v46  ;;  %v304_v48 = vld [vmem:[%s9674_s6 + $0x438] sm:$0xf] }
  0x35   : >> { %303 = vst [vmem:[%s9670_s5 + $0x2bc] sm:$0xf] %v302_v47  ;;  %v306_v49 = vld [vmem:[%s9674_s6 + $0x43c] sm:$0xf]  ;;  %v308_v50 = vld [vmem:[%s9674_s6 + $0x440] sm:$0xf] }
  0x36   : >> { %305 = vst [vmem:[%s9670_s5 + $0x3c0] sm:$0xf] %v304_v48  ;;  %307 = vst [vmem:[%s9670_s5 + $0x3c4] sm:$0xf] %v306_v49  ;;  %v310_v51 = vld [vmem:[%s9674_s6 + $0x444] sm:$0xf] }
  0x37   : >> { %309 = vst [vmem:[%s9670_s5 + $0x3c8] sm:$0xf] %v308_v50  ;;  %v312_v52 = vld [vmem:[%s9674_s6 + $0x448] sm:$0xf]  ;;  %v314_v53 = vld [vmem:[%s9674_s6 + $0x44c] sm:$0xf] }
  0x38   : >> { %311 = vst [vmem:[%s9670_s5 + $0x3cc] sm:$0xf] %v310_v51  ;;  %313 = vst [vmem:[%s9670_s5 + $0x3d0] sm:$0xf] %v312_v52  ;;  %v316_v54 = vld [vmem:[%s9674_s6 + $0x450] sm:$0xf] }
  0x39   : >> { %315 = vst [vmem:[%s9670_s5 + $0x3d4] sm:$0xf] %v314_v53  ;;  %v318_v55 = vld [vmem:[%s9674_s6 + $0x454] sm:$0xf]  ;;  %v320_v56 = vld [vmem:[%s9674_s6 + $0x458] sm:$0xf] }
  0x3a   : >> { %317 = vst [vmem:[%s9670_s5 + $0x3d8] sm:$0xf] %v316_v54  ;;  %319 = vst [vmem:[%s9670_s5 + $0x3dc] sm:$0xf] %v318_v55  ;;  %v322_v57 = vld [vmem:[%s9674_s6 + $0x45c] sm:$0xf] }
  0x3b   : >> { %321 = vst [vmem:[%s9670_s5 + $0x3e0] sm:$0xf] %v320_v56  ;;  %v324_v58 = vld [vmem:[%s9674_s6 + $0x460] sm:$0xf]  ;;  %v326_v59 = vld [vmem:[%s9674_s6 + $0x464] sm:$0xf] }
  0x3c   : >> { %323 = vst [vmem:[%s9670_s5 + $0x3e4] sm:$0xf] %v322_v57  ;;  %325 = vst [vmem:[%s9670_s5 + $0x3e8] sm:$0xf] %v324_v58  ;;  %v328_v60 = vld [vmem:[%s9674_s6 + $0x468] sm:$0xf] }
  0x3d   : >> { %327 = vst [vmem:[%s9670_s5 + $0x3ec] sm:$0xf] %v326_v59  ;;  %v330_v61 = vld [vmem:[%s9674_s6 + $0x46c] sm:$0xf]  ;;  %v332_v62 = vld [vmem:[%s9674_s6 + $0x470] sm:$0xf] }
  0x3e   : >> { %329 = vst [vmem:[%s9670_s5 + $0x3f0] sm:$0xf] %v328_v60  ;;  %331 = vst [vmem:[%s9670_s5 + $0x3f4] sm:$0xf] %v330_v61  ;;  %v334_v63 = vld [vmem:[%s9674_s6 + $0x474] sm:$0xf] }
  0x3f   : >> { %333 = vst [vmem:[%s9670_s5 + $0x3f8] sm:$0xf] %v332_v62  ;;  %335 = vst [vmem:[%s9670_s5 + $0x3fc] sm:$0xf] %v334_v63  ;;  %p337_p6 = scmp.ge.s32.totalorder %s336_s9, 5  ;;  %s202_s8 = sadd.s32 1, %s9682_s8  }
  0x40   : >> { %p201_p7 = scmp.ge.s32.totalorder %s202_s8, 5 }
  0x41   : >> { %s11849_s9 = smov (%p337_p6, %s336_s9), 0 }
  0x42   : >> { %s6479_s10 = sshll.u32 %s11849_s9, 6  ;;  %s11739_s7 = smov %s11849_s9 }
  0x43   : >> { %s341_s6 = scalar_lea.vmem %s9756_s29, %s6479_s10   ;;  %s342_s5 = scalar_lea.vmem %s179_s30, %s6479_s10 [#allocation2]  }
  0x44   : > { %204 = sbr.rel (!%p201_p7) target bundleno = 21 (0x15), region = 163 }
  0x4b PF: > { %p6487_p8 = scmp.ge.s32.totalorder %s9666_s19, 1  ;;  %p607_p9 = scmp.lt.s32.totalorder %s9666_s19, 3 }
  0x4d   : > { %p608_p10 = pnand %p6487_p8, %p607_p9 }
  0x4f   : > { %611 = sbr.rel (%p608_p10) target bundleno = 1273 (0x4f9), region = 94 }
  0x56   : > { %v9378_v0 = vld [vmem:[%s11734_s2 + $0x20] sm:$0xff]   ;;  %v9684_v1 = vmov 0.0   ;;  %v9932_v2 = vld [vmem:[%s11734_s2 + $0x10] sm:$0xff]   ;;  %v9380_v3 = vld [vmem:[%s11734_s2 + $0x28] sm:$0xff]   ;;  %vm9685_vm0 = vmmov 0   ;;  %s614_s24 = sand.u32 1, %s9650_s15  }
  0x57   : > { %8011 = vmatprep.subr.bf16.mxu1 %v9684_v1  ;;  %7651 = vmatprep.subr.bf16.mxu0 %v9378_v0  ;;  %v9944_v4 = vld [vmem:[%s11734_s2 + $0x18] sm:$0xff]   ;;  %s9301_s27 = smul.u32 1280, %s614_s24  ;;  %vm1059_vm1 = vcmask 261120   ;;  %p657_p11 = scmp.lt.s32.totalorder %s9658_s17, 1  ;;  %v9385_v5 = vld [vmem:[%s11734_s2] sm:$0xff]   ;;  %v9972_v9 = vld [vmem:[%s11734_s2 + $0x50] sm:$0xff]  }
  0x58   : > { %8015 = vmatprep.mubr.msk.bf16.mxu1 %vm9685_vm0, %v9684_v1  ;;  %8012 = vmatpush3.bf16.msra.mxu1 %v9932_v2  ;;  %v9986_v13 = vld [vmem:[%s11734_s2 + $0x58] sm:$0xff]   ;;  %v9420_v24 = vld [vmem:[%s11734_s2 + $0x8] sm:$0xff]   ;;  %v9403_v28 = vld [vmem:[%s11734_s2 + $0x70] sm:$0xff]   ;;  %vm6182_vm2 = vcmask 64512  }
  0x59   : > { %7652 = vmatpush3.bf16.msra.mxu0 %v9378_v0  ;;  %8013 = vmatprep.subr.bf16.mxu1 %v9684_v1  ;;  %s9951_s30 = scalar_lea.vmem [#allocation2], %s9301_s27  ;;  %s11851_s17 = smov (!%p657_p11, %s9658_s17), 1  ;;  %v9410_v30 = vld [vmem:[%s11734_s2 + $0x78] sm:$0xff]   ;;  %v10062_v39 = vld [vmem:[%s11734_s2 + $0x40] sm:$0xff]  }
  0x5a   : > { %7653 = vmatprep.subr.bf16.mxu0 %v9380_v3  ;;  %v9382_v6 = vld [vmem:[%s9951_s30 + $0x140] sm:$0xff]   ;;  %v9384_v7 = vld [vmem:[%s9951_s30 + $0x148] sm:$0xff]   ;;  %s9302_s15 = smul.u32 160, %s11851_s17  ;;  %v9387_v8 = vld [vmem:[%s9951_s30 + $0x150] sm:$0xff]  }
  0x5b   : > { %7655 = vmatprep.mubr.msk.bf16.mxu0 %vm1059_vm1, %v9382_v6  ;;  %v9389_v11 = vld [vmem:[%s9951_s30 + $0x158] sm:$0xff]   ;;  %v9390_v12 = vld [vmem:[%s9951_s30 + $0x160] sm:$0xff]   ;;  %v9392_v15 = vld [vmem:[%s9951_s30 + $0x168] sm:$0xff]   ;;  %s9303_s24 = smul.u32 640, %s11851_s17 }
  0x5c   : > { %8014 = vmatpush3.bf16.msra.mxu1 %v9944_v4  ;;  %s9966_s7 = scalar_lea.vmem %s11733_s1, %s9302_s15  ;;  %v9394_v16 = vld [vmem:[%s9951_s30 + $0x170] sm:$0xff]   ;;  %v9396_v18 = vld [vmem:[%s9951_s30 + $0x178] sm:$0xff]   ;;  %v9397_v19 = vld [vmem:[%s9951_s30 + $0x180] sm:$0xff]  }
  0x5d   : > { %7654 = vmatpush3.bf16.msra.mxu0 %v9380_v3  ;;  %8035 = vmatprep.subr.bf16.mxu1 %v9684_v1  ;;  %v9383_v10 = vld [vmem:[%s9966_s7] sm:$0xff]   ;;  %v9388_v14 = vld [vmem:[%s9966_s7 + $0x8] sm:$0xff]   ;;  %v9391_v17 = vld [vmem:[%s9966_s7 + $0x10] sm:$0xff]   ;;  %s11292_s27 = scalar_lea.vmem %s11736_s4, %s9303_s24 }
  0x5e   : > { %7735 = vmatprep.subr.bf16.mxu0 %v9385_v5  ;;  %v9395_v20 = vld [vmem:[%s9966_s7 + $0x18] sm:$0xff]   ;;  %v9399_v21 = vld [vmem:[%s9951_s30 + $0x188] sm:$0xff]   ;;  %v9400_v22 = vld [vmem:[%s9951_s30 + $0x190] sm:$0xff]  }
  0x5f   : > { %8016 = vmatmul.mubr.msk.bf16.vlgmr.msra.gmra.mrb[0].mxu1 %vm1059_vm1, %v9383_v10  ;;  %v9398_v23 = vld [vmem:[%s9966_s7 + $0x20] sm:$0xff]   ;;  %v9402_v25 = vld [vmem:[%s9951_s30 + $0x198] sm:$0xff]   ;;  %v9401_v27 = vld [vmem:[%s9966_s7 + $0x50] sm:$0xff]  }
  0x60   : > { %7656 = vmatmul.mubr.msk.bf16.vlgmr.msra.gmra.mrb[0].mxu0 %vm1059_vm1, %v9384_v7  ;;  %8036 = vmatpush3.bf16.msra.mxu1 %v9972_v9  ;;  %v9404_v26 = vld [vmem:[%s9951_s30 + $0x1a0] sm:$0xff]   ;;  %v9406_v29 = vld [vmem:[%s9951_s30 + $0x1a8] sm:$0xff]   ;;  %v9407_v31 = vld [vmem:[%s9951_s30 + $0x1b0] sm:$0xff]  }
  0x61   : > { %7736 = vmatpush3.bf16.msra.mxu0 %v9385_v5  ;;  %7659 = vmatprep.mubr.msk.bf16.mxu0 %vm1059_vm1, %v9387_v8  ;;  %v9405_v32 = vld [vmem:[%s9966_s7 + $0x58] sm:$0xff]   ;;  %v9411_v34 = vld [vmem:[%s9951_s30 + $0x1c0] sm:$0xff]   ;;  %v9413_v36 = vld [vmem:[%s9951_s30 + $0x1c8] sm:$0xff]  }
  0x62   : > { %8019 = vmatprep.mubr.msk.bf16.mxu1 %vm9685_vm0, %v9684_v1  ;;  %8037 = vmatprep.subr.bf16.mxu1 %v9684_v1  ;;  %v9409_v33 = vld [vmem:[%s9951_s30 + $0x1b8] sm:$0xff]   ;;  %v9408_v35 = vld [vmem:[%s9966_s7 + $0x60] sm:$0xff]   ;;  %v9414_v37 = vld [vmem:[%s9951_s30 + $0x1d0] sm:$0xff]  }
  0x63   : > { %7737 = vmatprep.subr.bf16.mxu0 %v9420_v24  ;;  %v9412_v38 = vld [vmem:[%s9966_s7 + $0x68] sm:$0xff]   ;;  %v9416_v40 = vld [vmem:[%s9951_s30 + $0x1d8] sm:$0xff]   ;;  %v9417_v41 = vld [vmem:[%s9951_s30 + $0x1e0] sm:$0xff]  }
  0x64   : > { %8038 = vmatpush3.bf16.msra.mxu1 %v9986_v13  ;;  %v9415_v42 = vld [vmem:[%s9966_s7 + $0x70] sm:$0xff]   ;;  %v9419_v43 = vld [vmem:[%s9951_s30 + $0x1e8] sm:$0xff]   ;;  %v9418_v45 = vld [vmem:[%s9966_s7 + $0x78] sm:$0xff]  }
  0x65   : > { %8059 = vmatprep.subr.bf16.mxu1 %v9684_v1  ;;  %7738 = vmatpush3.bf16.msra.mxu0 %v9420_v24  ;;  %v9421_v44 = vld [vmem:[%s9951_s30 + $0x1f0] sm:$0xff]   ;;  %v9423_v46 = vld [vmem:[%s9951_s30 + $0x1f8] sm:$0xff]   ;;  %v9424_v47 = vld [vmem:[%s9951_s30 + $0x200] sm:$0xff]  }
  0x66   : > { %7819 = vmatprep.subr.bf16.mxu0 %v10062_v39  ;;  %v9422_v48 = vld [vmem:[%s9966_s7 + $0x80] sm:$0xff]   ;;  %v9426_v49 = vld [vmem:[%s9951_s30 + $0x208] sm:$0xff]   ;;  %v9427_v50 = vld [vmem:[%s9951_s30 + $0x210] sm:$0xff]  }
  0x67   : > { %8020 = vmatmul.mubr.msk.bf16.gmra.mrb[4].mxu1 %vm1059_vm1, %v9388_v14  ;;  %v9425_v51 = vld [vmem:[%s9966_s7 + $0x88] sm:$0xff]   ;;  %v9429_v52 = vld [vmem:[%s9951_s30 + $0x218] sm:$0xff]   ;;  %v9430_v53 = vld [vmem:[%s9951_s30 + $0x220] sm:$0xff]  }
  0x68   : > { %7660 = vmatmul.mubr.msk.bf16.gmra.mrb[4].mxu0 %vm1059_vm1, %v9389_v11  ;;  %8023 = vmatprep.mubr.msk.bf16.mxu1 %vm9685_vm0, %v9684_v1  ;;  %v9428_v54 = vld [vmem:[%s9966_s7 + $0x90] sm:$0xff]   ;;  %v9432_v55 = vld [vmem:[%s9951_s30 + $0x228] sm:$0xff]   ;;  %v9431_v57 = vld [vmem:[%s9966_s7 + $0x98] sm:$0xff]  }
  0x69   : > { %7663 = vmatprep.mubr.msk.bf16.mxu0 %vm1059_vm1, %v9390_v12  ;;  %v9433_v56 = vld [vmem:[%s9951_s30 + $0x230] sm:$0xff]   ;;  %v9435_v58 = vld [vmem:[%s9951_s30 + $0x238] sm:$0xff]   ;;  %v9436_v59 = vld [vmem:[%s9951_s30 + $0x240] sm:$0xff]  }
  0x6a   : > { %v9434_v60 = vld [vmem:[%s9951_s30 + $0x28] sm:$0xff]   ;;  %v9439_v62 = vld [vmem:[%s9951_s30 + $0x250] sm:$0xff]   ;;  %v9441_v0 = vld [vmem:[%s9951_s30 + $0x258] sm:$0xff]  }
  0x6b   : > { %v9438_v61 = vld [vmem:[%s9951_s30 + $0x248] sm:$0xff]   ;;  %v9437_v63 = vld [vmem:[%s9951_s30 + $0x30] sm:$0xff]   ;;  %v9440_v3 = vld [vmem:[%s9951_s30 + $0x38] sm:$0xff]  }
  0x6c   : > { %v9445_v5 = vld [vmem:[%s9951_s30 + $0x270] sm:$0xff]   ;;  %v9443_v6 = vld [vmem:[%s9951_s30 + $0x40] sm:$0xff]   ;;  %v9447_v7 = vld [vmem:[%s9951_s30 + $0x278] sm:$0xff]  }
  0x6d   : > { %v9448_v8 = vld [vmem:[%s9951_s30] sm:$0xff]   ;;  %v9450_v10 = vld [vmem:[%s9951_s30 + $0x8] sm:$0xff]   ;;  %v9452_v11 = vld [vmem:[%s9951_s30 + $0x10] sm:$0xff]  }
  0x6e   : > { %v9466_v12 = vld [vmem:[%s11734_s2 + $0x48] sm:$0xff]   ;;  %v9454_v14 = vld [vmem:[%s9951_s30 + $0x18] sm:$0xff]   ;;  %v9462_v24 = vld [vmem:[%s9951_s30 + $0x90] sm:$0xff]  }
  0x6f   : > { %8024 = vmatmul.mubr.msk.bf16.gmra.mrb[8].mxu1 %vm1059_vm1, %v9391_v17  ;;  %v9456_v17 = vld [vmem:[%s9951_s30 + $0x60] sm:$0xff]  }
  0x70   : > { %7664 = vmatmul.mubr.msk.bf16.gmra.mrb[8].mxu0 %vm1059_vm1, %v9392_v15  ;;  %8027 = vmatprep.mubr.msk.bf16.mxu1 %vm9685_vm0, %v9684_v1  ;;  %v9455_v15 = vld [vmem:[%s9951_s30 + $0x20] sm:$0xff]  }
  0x71   : > { %7667 = vmatprep.mubr.msk.bf16.mxu0 %vm1059_vm1, %v9394_v16  ;;  %v9453_v16 = vld [vmem:[%s9951_s30 + $0x58] sm:$0xff]  }
  0x77   : > { %8028 = vmatmul.mubr.msk.bf16.gmra.mrb[12].mxu1 %vm1059_vm1, %v9395_v20  ;;  %v10204_v20 = vld [vmem:[%s11734_s2 + $0x60] sm:$0xff]  }
  0x78   : > { %7668 = vmatmul.mubr.msk.bf16.gmra.mrb[12].mxu0 %vm1059_vm1, %v9396_v18  ;;  %8031 = vmatprep.mubr.msk.bf16.mxu1 %vm9685_vm0, %v9684_v1  ;;  %v9457_v18 = vld [vmem:[%s9951_s30 + $0x68] sm:$0xff]  }
  0x79   : > { %7671 = vmatprep.mubr.msk.bf16.mxu0 %vm1059_vm1, %v9397_v19  ;;  %v9458_v19 = vld [vmem:[%s9951_s30 + $0x70] sm:$0xff]  }
  0x7f   : > { %8032 = vmatmul.mubr.msk.bf16.gmra.mrb[16].mxu1 %vm1059_vm1, %v9398_v23  ;;  %v9461_v23 = vld [vmem:[%s9951_s30 + $0x88] sm:$0xff]  }
  0x80   : > { %7672 = vmatmul.mubr.msk.bf16.gmra.mrb[16].mxu0 %vm1059_vm1, %v9399_v21  ;;  %8039 = vmatprep.mubr.msk.bf16.mxu1 %vm9685_vm0, %v9684_v1  ;;  %v9459_v21 = vld [vmem:[%s9951_s30 + $0x78] sm:$0xff]  }
  0x81   : > { %7675 = vmatprep.mubr.msk.bf16.mxu0 %vm1059_vm1, %v9400_v22  ;;  %v9460_v22 = vld [vmem:[%s9951_s30 + $0x80] sm:$0xff]  }
  0x87   : > { %8040 = vmatmul.mubr.msk.bf16.vlgmr.msra.gmra.mrb[0].mxu1 %vm1059_vm1, %v9401_v27  ;;  %v9465_v27 = vld [vmem:[%s9951_s30 + $0xa8] sm:$0xff]  }
  0x88   : > { %7676 = vmatmul.mubr.msk.bf16.gmra.mrb[20].mxu0 %vm1059_vm1, %v9402_v25  ;;  %8060 = vmatpush3.bf16.msra.mxu1 %v9403_v28  ;;  %v9463_v25 = vld [vmem:[%s9951_s30 + $0x98] sm:$0xff]   ;;  %v9467_v28 = vld [vmem:[%s9951_s30 + $0xb0] sm:$0xff]  }
  0x89   : > { %7679 = vmatprep.mubr.msk.bf16.mxu0 %vm1059_vm1, %v9404_v26  ;;  %8043 = vmatprep.mubr.msk.bf16.mxu1 %vm9685_vm0, %v9684_v1  ;;  %v9464_v26 = vld [vmem:[%s9951_s30 + $0xa0] sm:$0xff]  }
  0x8a   : > { %8061 = vmatprep.subr.bf16.mxu1 %v9684_v1 }
  0x8c   : > { %8062 = vmatpush3.bf16.msra.mxu1 %v9410_v30  ;;  %v9469_v30 = vld [vmem:[%s9951_s30 + $0xc0] sm:$0xff]  }
  0x8d   : > { %8227 = vmatprep.subr.bf16.mxu1 %v9684_v1 }
  0x8f   : > { %8044 = vmatmul.mubr.msk.bf16.gmra.mrb[4].mxu1 %vm1059_vm1, %v9405_v32  ;;  %v9471_v32 = vld [vmem:[%s9951_s30 + $0xd0] sm:$0xff]  }
  0x90   : > { %7680 = vmatmul.mubr.msk.bf16.gmra.mrb[24].mxu0 %vm1059_vm1, %v9406_v29  ;;  %8047 = vmatprep.mubr.msk.bf16.mxu1 %vm9685_vm0, %v9684_v1  ;;  %v9468_v29 = vld [vmem:[%s9951_s30 + $0xb8] sm:$0xff]  }
  0x91   : > { %7683 = vmatprep.mubr.msk.bf16.mxu0 %vm1059_vm1, %v9407_v31  ;;  %v9470_v31 = vld [vmem:[%s9951_s30 + $0xc8] sm:$0xff]  }
  0x97   : > { %8048 = vmatmul.mubr.msk.bf16.gmra.mrb[8].mxu1 %vm1059_vm1, %v9408_v35  ;;  %v9474_v35 = vld [vmem:[%s9951_s30 + $0xe8] sm:$0xff]  }
  0x98   : > { %7684 = vmatmul.mubr.msk.bf16.gmra.mrb[28].mxu0 %vm1059_vm1, %v9409_v33  ;;  %8051 = vmatprep.mubr.msk.bf16.mxu1 %vm9685_vm0, %v9684_v1  ;;  %v9472_v33 = vld [vmem:[%s9951_s30 + $0xd8] sm:$0xff]  }
  0x99   : > { %7687 = vmatprep.mubr.msk.bf16.mxu0 %vm1059_vm1, %v9411_v34  ;;  %v9473_v34 = vld [vmem:[%s9951_s30 + $0xe0] sm:$0xff]  }
  0x9f   : > { %8052 = vmatmul.mubr.msk.bf16.gmra.mrb[12].mxu1 %vm1059_vm1, %v9412_v38  ;;  %v10279_v38 = vld [vmem:[%s9951_s30 + $0x100] sm:$0xff]  }
  0xa0   : > { %7688 = vmatmul.mubr.msk.bf16.gmra.mrb[32].mxu0 %vm1059_vm1, %v9413_v36  ;;  %8055 = vmatprep.mubr.msk.bf16.mxu1 %vm9685_vm0, %v9684_v1  ;;  %v9475_v36 = vld [vmem:[%s9951_s30 + $0xf0] sm:$0xff]  }
  0xa1   : > { %7691 = vmatprep.mubr.msk.bf16.mxu0 %vm1059_vm1, %v9414_v37  ;;  %v10276_v37 = vld [vmem:[%s9951_s30 + $0xf8] sm:$0xff]  }
  0xa7   : > { %8056 = vmatmul.mubr.msk.bf16.gmra.mrb[16].mxu1 %vm1059_vm1, %v9415_v42  ;;  %v10305_v42 = vld [vmem:[%s9951_s30 + $0x120] sm:$0xff]  }
  0xa8   : > { %7692 = vmatmul.mubr.msk.bf16.gmra.mrb[36].mxu0 %vm1059_vm1, %v9416_v40  ;;  %8063 = vmatprep.mubr.msk.bf16.mxu1 %vm9685_vm0, %v9684_v1  ;;  %v10292_v40 = vld [vmem:[%s9951_s30 + $0x110] sm:$0xff]  }
  0xa9   : > { %7695 = vmatprep.mubr.msk.bf16.mxu0 %vm1059_vm1, %v9417_v41  ;;  %v10302_v41 = vld [vmem:[%s9951_s30 + $0x118] sm:$0xff]  }
  0xaf   : > { %8064 = vmatmul.mubr.msk.bf16.vlgmr.msra.gmra.mrb[0].mxu1 %vm1059_vm1, %v9418_v45 }
  0xb0   : > { %7696 = vmatmul.mubr.msk.bf16.gmra.mrb[40].mxu0 %vm1059_vm1, %v9419_v43  ;;  %8228 = vmatpush3.bf16.msra.mxu1 %v9932_v2  ;;  %v9442_v2 = vld [vmem:[%s9951_s30 + $0x260] sm:$0xff]  }
  0xb1   : > { %7699 = vmatprep.mubr.msk.bf16.mxu0 %vm1059_vm1, %v9421_v44  ;;  %8067 = vmatprep.mubr.msk.bf16.mxu1 %vm9685_vm0, %v9684_v1 }
  0xb2   : > { %8229 = vmatprep.subr.bf16.mxu1 %v9684_v1 }
  0xb4   : > { %8230 = vmatpush3.bf16.msra.mxu1 %v9944_v4  ;;  %v9444_v4 = vld [vmem:[%s9951_s30 + $0x268] sm:$0xff]  }
  0xb5   : > { %8371 = vmatprep.subr.bf16.mxu1 %v9684_v1 }
  0xb7   : > { %8068 = vmatmul.mubr.msk.bf16.gmra.mrb[4].mxu1 %vm1059_vm1, %v9422_v48  ;;  %v10322_v48 = vld [vmem:[%s9951_s30 + $0x130] sm:$0xff]  }
  0xb8   : > { %7700 = vmatmul.mubr.msk.bf16.gmra.mrb[44].mxu0 %vm1059_vm1, %v9423_v46  ;;  %8071 = vmatprep.mubr.msk.bf16.mxu1 %vm9685_vm0, %v9684_v1 }
  0xb9   : > { %7703 = vmatprep.mubr.msk.bf16.mxu0 %vm1059_vm1, %v9424_v47  ;;  %v10319_v47 = vld [vmem:[%s9951_s30 + $0x128] sm:$0xff]  }
  0xbf   : > { %8072 = vmatmul.mubr.msk.bf16.gmra.mrb[8].mxu1 %vm1059_vm1, %v9425_v51 }
  0xc0   : > { %7704 = vmatmul.mubr.msk.bf16.gmra.mrb[48].mxu0 %vm1059_vm1, %v9426_v49  ;;  %8075 = vmatprep.mubr.msk.bf16.mxu1 %vm9685_vm0, %v9684_v1 }
  0xc1   : > { %7707 = vmatprep.mubr.msk.bf16.mxu0 %vm1059_vm1, %v9427_v50 }
  0xc7   : > { %8076 = vmatmul.mubr.msk.bf16.gmra.mrb[12].mxu1 %vm1059_vm1, %v9428_v54  ;;  %v9485_v54 = vld [vmem:[%s9951_s30 + $0x280] sm:$0xff]  }
  0xc8   : > { %7708 = vmatmul.mubr.msk.bf16.gmra.mrb[52].mxu0 %vm1059_vm1, %v9429_v52  ;;  %8079 = vmatprep.mubr.msk.bf16.mxu1 %vm9685_vm0, %v9684_v1 }
  0xc9   : > { %7711 = vmatprep.mubr.msk.bf16.mxu0 %vm1059_vm1, %v9430_v53  ;;  %v10336_v53 = vld [vmem:[%s9951_s30 + $0x138] sm:$0xff]  }
  0xcf   : > { %8080 = vmatmul.mubr.msk.bf16.gmra.mrb[16].mxu1 %vm1059_vm1, %v9431_v57 }
  0xd0   : > { %7712 = vmatmul.mubr.msk.bf16.gmra.mrb[56].mxu0 %vm1059_vm1, %v9432_v55  ;;  %8231 = vmatprep.mubr.msk.bf16.mxu1 %vm9685_vm0, %v9684_v1 }
  0xd1   : > { %7715 = vmatprep.mubr.msk.bf16.mxu0 %vm1059_vm1, %v9433_v56 }
  0xd7   : > { %8232 = vmatmul.mubr.msk.bf16.vlgmr.msra.gmra.mrb[20].mxu1 %vm1059_vm1, %v9434_v60 }
  0xd8   : > { %7716 = vmatmul.mubr.msk.bf16.gmra.mrb[60].mxu0 %vm1059_vm1, %v9435_v58  ;;  %8372 = vmatpush3.bf16.msra.mxu1 %v9972_v9  ;;  %v9446_v9 = vld [vmem:[%s9951_s30 + $0x48] sm:$0xff]  }
  0xd9   : > { %7719 = vmatprep.mubr.msk.bf16.mxu0 %vm1059_vm1, %v9436_v59  ;;  %8235 = vmatprep.mubr.msk.bf16.mxu1 %vm9685_vm0, %v9684_v1  ;;  %v9486_v59 = vld [vmem:[%s9951_s30 + $0x288] sm:$0xff]  }
  0xda   : > { %8373 = vmatprep.subr.bf16.mxu1 %v9684_v1 }
  0xdc   : > { %8374 = vmatpush3.bf16.msra.mxu1 %v9986_v13  ;;  %v9449_v13 = vld [vmem:[%s9951_s30 + $0x50] sm:$0xff]  }
  0xdd   : > { %8515 = vmatprep.subr.bf16.mxu1 %v9684_v1 }
  0xdf   : > { %8236 = vmatmul.mubr.msk.bf16.gmra.mrb[24].mxu1 %vm1059_vm1, %v9437_v63 }
  0xe0   : > { %7720 = vmatmul.mubr.msk.bf16.gmra.mrb[64].mxu0 %vm1059_vm1, %v9438_v61  ;;  %8239 = vmatprep.mubr.msk.bf16.mxu1 %vm9685_vm0, %v9684_v1 }
  0xe1   : > { %7723 = vmatprep.mubr.msk.bf16.mxu0 %vm1059_vm1, %v9439_v62  ;;  %v9508_v62 = vld [vmem:[%s11734_s2 + $0x68] sm:$0xff]  }
  0xe7   : > { %8240 = vmatmul.mubr.msk.bf16.gmra.mrb[28].mxu1 %vm1059_vm1, %v9440_v3 }
  0xe8   : > { %7724 = vmatmul.mubr.msk.bf16.gmra.mrb[68].mxu0 %vm1059_vm1, %v9441_v0  ;;  %8243 = vmatprep.mubr.msk.bf16.mxu1 %vm9685_vm0, %v9684_v1 }
  0xe9   : > { %7727 = vmatprep.mubr.msk.bf16.mxu0 %vm1059_vm1, %v9442_v2 }
  0xef   : > { %8244 = vmatmul.mubr.msk.bf16.gmra.mrb[32].mxu1 %vm1059_vm1, %v9443_v6 }
  0xf0   : > { %7728 = vmatmul.mubr.msk.bf16.gmra.mrb[72].mxu0 %vm1059_vm1, %v9444_v4  ;;  %8247 = vmatprep.mubr.msk.bf16.mxu1 %vm9685_vm0, %v9684_v1  ;;  %v9490_v4 = vld [vmem:[%s9951_s30 + $0x2a0] sm:$0xff]  }
  0xf1   : > { %7731 = vmatprep.mubr.msk.bf16.mxu0 %vm1059_vm1, %v9445_v5 }
  0xf7   : > { %8248 = vmatmul.mubr.msk.bf16.gmra.mrb[36].mxu1 %vm1059_vm1, %v9446_v9 }
  0xf8   : > { %7732 = vmatmul.mubr.msk.bf16.gmra.mrb[76].mxu0 %vm1059_vm1, %v9447_v7  ;;  %8251 = vmatprep.mubr.msk.bf16.mxu1 %vm9685_vm0, %v9684_v1 }
  0xf9   : > { %7739 = vmatprep.mubr.msk.bf16.mxu0 %vm1059_vm1, %v9448_v8 }
  0xff   : > { %8252 = vmatmul.mubr.msk.bf16.gmra.mrb[40].mxu1 %vm1059_vm1, %v9449_v13 }
 0x100   : > { %7740 = vmatmul.mubr.msk.bf16.vlgmr.msra.gmra.mrb[0].mxu0 %vm1059_vm1, %v9450_v10  ;;  %8255 = vmatprep.mubr.msk.bf16.mxu1 %vm9685_vm0, %v9684_v1  ;;  %v9492_v10 = vld [vmem:[%s9951_s30 + $0x2b0] sm:$0xff]  }
 0x101   : > { %7820 = vmatpush3.bf16.msra.mxu0 %v10062_v39  ;;  %7743 = vmatprep.mubr.msk.bf16.mxu0 %vm1059_vm1, %v9452_v11  ;;  %v10289_v39 = vld [vmem:[%s9951_s30 + $0x108] sm:$0xff]   ;;  %v10386_v11 = vld [vmem:[%s9951_s30 + $0x2b8] sm:$0xff]  }
 0x102   : > { %7821 = vmatprep.subr.bf16.mxu0 %v9466_v12 }
 0x105   : > { %7822 = vmatpush3.bf16.msra.mxu0 %v9466_v12  ;;  %v10389_v12 = vld [vmem:[%s9951_s30 + $0x2c0] sm:$0xff]  }
 0x106   : > { %7903 = vmatprep.subr.bf16.mxu0 %v10204_v20 }
 0x107   : > { %8256 = vmatmul.mubr.msk.bf16.gmra.mrb[44].mxu1 %vm1059_vm1, %v9453_v16 }
 0x108   : > { %7744 = vmatmul.mubr.msk.bf16.gmra.mrb[4].mxu0 %vm1059_vm1, %v9454_v14  ;;  %8259 = vmatprep.mubr.msk.bf16.mxu1 %vm9685_vm0, %v9684_v1  ;;  %v10403_v14 = vld [vmem:[%s9951_s30 + $0x2d0] sm:$0xff]  }
 0x109   : > { %7747 = vmatprep.mubr.msk.bf16.mxu0 %vm1059_vm1, %v9455_v15  ;;  %v10414_v15 = vld [vmem:[%s9951_s30 + $0x2d8] sm:$0xff]  }
 0x10f   : > { %8260 = vmatmul.mubr.msk.bf16.gmra.mrb[48].mxu1 %vm1059_vm1, %v9456_v17 }
 0x110   : > { %7748 = vmatmul.mubr.msk.bf16.gmra.mrb[8].mxu0 %vm1059_vm1, %v9434_v60  ;;  %8263 = vmatprep.mubr.msk.bf16.mxu1 %vm9685_vm0, %v9684_v1  ;;  %v9488_v60 = vld [vmem:[%s9951_s30 + $0x290] sm:$0xff]  }
 0x111   : > { %7751 = vmatprep.mubr.msk.bf16.mxu0 %vm1059_vm1, %v9437_v63 }
 0x117   : > { %8264 = vmatmul.mubr.msk.bf16.gmra.mrb[52].mxu1 %vm1059_vm1, %v9457_v18 }
 0x118   : > { %7752 = vmatmul.mubr.msk.bf16.gmra.mrb[12].mxu0 %vm1059_vm1, %v9440_v3  ;;  %8267 = vmatprep.mubr.msk.bf16.mxu1 %vm9685_vm0, %v9684_v1  ;;  %v9489_v3 = vld [vmem:[%s9951_s30 + $0x298] sm:$0xff]  }
 0x119   : > { %7755 = vmatprep.mubr.msk.bf16.mxu0 %vm1059_vm1, %v9443_v6 }
 0x11f   : > { %8268 = vmatmul.mubr.msk.bf16.gmra.mrb[56].mxu1 %vm1059_vm1, %v9458_v19 }
 0x120   : > { %7756 = vmatmul.mubr.msk.bf16.gmra.mrb[16].mxu0 %vm1059_vm1, %v9446_v9  ;;  %8271 = vmatprep.mubr.msk.bf16.mxu1 %vm9685_vm0, %v9684_v1  ;;  %v9491_v9 = vld [vmem:[%s9951_s30 + $0x2a8] sm:$0xff]  }
 0x121   : > { %7759 = vmatprep.mubr.msk.bf16.mxu0 %vm1059_vm1, %v9449_v13  ;;  %v10400_v13 = vld [vmem:[%s9951_s30 + $0x2c8] sm:$0xff]  }
 0x127   : > { %8272 = vmatmul.mubr.msk.bf16.gmra.mrb[60].mxu1 %vm1059_vm1, %v9459_v21 }
 0x128   : > { %7760 = vmatmul.mubr.msk.bf16.gmra.mrb[20].mxu0 %vm1059_vm1, %v9453_v16  ;;  %8275 = vmatprep.mubr.msk.bf16.mxu1 %vm9685_vm0, %v9684_v1  ;;  %v10417_v16 = vld [vmem:[%s9951_s30 + $0x2e0] sm:$0xff]  }
 0x129   : > { %7763 = vmatprep.mubr.msk.bf16.mxu0 %vm1059_vm1, %v9456_v17  ;;  %v10428_v17 = vld [vmem:[%s9951_s30 + $0x2e8] sm:$0xff]  }
 0x12f   : > { %8276 = vmatmul.mubr.msk.bf16.gmra.mrb[64].mxu1 %vm1059_vm1, %v9460_v22 }
 0x130   : > { %7764 = vmatmul.mubr.msk.bf16.gmra.mrb[24].mxu0 %vm1059_vm1, %v9457_v18  ;;  %8279 = vmatprep.mubr.msk.bf16.mxu1 %vm9685_vm0, %v9684_v1  ;;  %v10431_v18 = vld [vmem:[%s9951_s30 + $0x2f0] sm:$0xff]  }
 0x131   : > { %7767 = vmatprep.mubr.msk.bf16.mxu0 %vm1059_vm1, %v9458_v19  ;;  %v10442_v19 = vld [vmem:[%s9951_s30 + $0x2f8] sm:$0xff]  }
 0x137   : > { %8280 = vmatmul.mubr.msk.bf16.gmra.mrb[68].mxu1 %vm1059_vm1, %v9461_v23 }
 0x138   : > { %7768 = vmatmul.mubr.msk.bf16.gmra.mrb[28].mxu0 %vm1059_vm1, %v9459_v21  ;;  %8283 = vmatprep.mubr.msk.bf16.mxu1 %vm9685_vm0, %v9684_v1  ;;  %v10456_v21 = vld [vmem:[%s9951_s30 + $0x308] sm:$0xff]  }
 0x139   : > { %7771 = vmatprep.mubr.msk.bf16.mxu0 %vm1059_vm1, %v9460_v22  ;;  %v10459_v22 = vld [vmem:[%s9951_s30 + $0x310] sm:$0xff]  }
 0x13f   : > { %8284 = vmatmul.mubr.msk.bf16.gmra.mrb[72].mxu1 %vm1059_vm1, %v9462_v24 }
 0x140   : > { %7772 = vmatmul.mubr.msk.bf16.gmra.mrb[32].mxu0 %vm1059_vm1, %v9461_v23  ;;  %8287 = vmatprep.mubr.msk.bf16.mxu1 %vm9685_vm0, %v9684_v1  ;;  %v10470_v23 = vld [vmem:[%s9951_s30 + $0x318] sm:$0xff]  }
 0x141   : > { %7775 = vmatprep.mubr.msk.bf16.mxu0 %vm1059_vm1, %v9462_v24  ;;  %v10473_v24 = vld [vmem:[%s9951_s30 + $0x320] sm:$0xff]  }
 0x147   : > { %8288 = vmatmul.mubr.msk.bf16.gmra.mrb[76].mxu1 %vm1059_vm1, %v9463_v25 }
 0x148   : > { %7776 = vmatmul.mubr.msk.bf16.gmra.mrb[36].mxu0 %vm1059_vm1, %v9463_v25  ;;  %8291 = vmatprep.mubr.msk.bf16.mxu1 %vm9685_vm0, %v9684_v1  ;;  %v10484_v25 = vld [vmem:[%s9951_s30 + $0x328] sm:$0xff]  }
 0x149   : > { %7779 = vmatprep.mubr.msk.bf16.mxu0 %vm1059_vm1, %v9464_v26 }
 0x14f   : > { %8292 = vmatmul.mubr.msk.bf16.gmra.mrb[80].mxu1 %vm1059_vm1, %v9464_v26  ;;  %v10487_v26 = vld [vmem:[%s9951_s30 + $0x330] sm:$0xff]  }
 0x150   : > { %7780 = vmatmul.mubr.msk.bf16.gmra.mrb[40].mxu0 %vm1059_vm1, %v9465_v27  ;;  %8295 = vmatprep.mubr.msk.bf16.mxu1 %vm9685_vm0, %v9684_v1 }
 0x151   : > { %7783 = vmatprep.mubr.msk.bf16.mxu0 %vm1059_vm1, %v9467_v28 }
 0x157   : > { %8296 = vmatmul.mubr.msk.bf16.gmra.mrb[84].mxu1 %vm1059_vm1, %v9465_v27  ;;  %v9574_v27 = vld [vmem:[%s11734_s2 + $0x70] sm:$0xff]  }
 0x158   : > { %7784 = vmatmul.mubr.msk.bf16.gmra.mrb[44].mxu0 %vm1059_vm1, %v9468_v29  ;;  %8299 = vmatprep.mubr.msk.bf16.mxu1 %vm9685_vm0, %v9684_v1 }
 0x159   : > { %7787 = vmatprep.mubr.msk.bf16.mxu0 %vm1059_vm1, %v9469_v30 }
 0x15f   : > { %8300 = vmatmul.mubr.msk.bf16.gmra.mrb[88].mxu1 %vm1059_vm1, %v9467_v28  ;;  %v10500_v28 = vld [vmem:[%s9951_s30 + $0x338] sm:$0xff]  }
 0x160   : > { %7788 = vmatmul.mubr.msk.bf16.gmra.mrb[48].mxu0 %vm1059_vm1, %v9470_v31  ;;  %8303 = vmatprep.mubr.msk.bf16.mxu1 %vm9685_vm0, %v9684_v1 }
 0x161   : > { %7791 = vmatprep.mubr.msk.bf16.mxu0 %vm1059_vm1, %v9471_v32 }
 0x167   : > { %8304 = vmatmul.mubr.msk.bf16.gmra.mrb[92].mxu1 %vm1059_vm1, %v9468_v29  ;;  %v10503_v29 = vld [vmem:[%s9951_s30 + $0x340] sm:$0xff]  }
 0x168   : > { %7792 = vmatmul.mubr.msk.bf16.gmra.mrb[52].mxu0 %vm1059_vm1, %v9472_v33  ;;  %8307 = vmatprep.mubr.msk.bf16.mxu1 %vm9685_vm0, %v9684_v1 }
 0x169   : > { %7795 = vmatprep.mubr.msk.bf16.mxu0 %vm1059_vm1, %v9473_v34 }
 0x16f   : > { %8308 = vmatmul.mubr.msk.bf16.gmra.mrb[96].mxu1 %vm1059_vm1, %v9469_v30  ;;  %v9575_v30 = vld [vmem:[%s11734_s2 + $0x78] sm:$0xff]  }
 0x170   : > { %7796 = vmatmul.mubr.msk.bf16.gmra.mrb[56].mxu0 %vm1059_vm1, %v9474_v35  ;;  %8311 = vmatprep.mubr.msk.bf16.mxu1 %vm9685_vm0, %v9684_v1 }
 0x171   : > { %7799 = vmatprep.mubr.msk.bf16.mxu0 %vm1059_vm1, %v9475_v36 }
 0x177   : > { %8312 = vmatmul.mubr.msk.bf16.gmra.mrb[100].mxu1 %vm1059_vm1, %v9470_v31  ;;  %v10517_v31 = vld [vmem:[%s9951_s30 + $0x348] sm:$0xff]  }
 0x178   : > { %7800 = vmatmul.mubr.msk.bf16.gmra.mrb[60].mxu0 %vm1059_vm1, %v10276_v37  ;;  %8315 = vmatprep.mubr.msk.bf16.mxu1 %vm9685_vm0, %v9684_v1 }
 0x179   : > { %7803 = vmatprep.mubr.msk.bf16.mxu0 %vm1059_vm1, %v10279_v38 }
 0x17f   : > { %8316 = vmatmul.mubr.msk.bf16.gmra.mrb[104].mxu1 %vm1059_vm1, %v9471_v32  ;;  %v10520_v32 = vld [vmem:[%s9951_s30 + $0x350] sm:$0xff]  }
 0x180   : > { %7804 = vmatmul.mubr.msk.bf16.gmra.mrb[64].mxu0 %vm1059_vm1, %v10289_v39  ;;  %8319 = vmatprep.mubr.msk.bf16.mxu1 %vm9685_vm0, %v9684_v1 }
 0x181   : > { %7807 = vmatprep.mubr.msk.bf16.mxu0 %vm1059_vm1, %v10292_v40 }
 0x182   : > { %v10307_v43 = vpop.f32.mrb[0].mxu1 }
 0x183   : > { %v8065_v44 = vpop.f32.mrb[1].mxu1 }
 0x184   : > { %v10309_v45 = vpop.f32.mrb[2].mxu1  ;;  %v10601_v44 = vld [vmem:[%s9951_s30 + $0x3a8] sm:$0xff]  }
 0x185   : > { %v8066_v46 = vpop.f32.mrb[3].mxu1 }
 0x186   : > { %v10604_v46 = vld [vmem:[%s9951_s30 + $0x3b0] sm:$0xff]  }
 0x187   : > { %8320 = vmatmul.mubr.msk.bf16.gmra.mrb[108].mxu1 %vm1059_vm1, %v9472_v33  ;;  %v10531_v33 = vld [vmem:[%s9951_s30 + $0x358] sm:$0xff]  }
 0x188   : > { %7808 = vmatmul.mubr.msk.bf16.gmra.mrb[68].mxu0 %vm1059_vm1, %v10302_v41  ;;  %8323 = vmatprep.mubr.msk.bf16.mxu1 %vm9685_vm0, %v9684_v1 }
 0x189   : > { %7811 = vmatprep.mubr.msk.bf16.mxu0 %vm1059_vm1, %v10305_v42 }
 0x18a   : > { %v10324_v49 = vpop.f32.mrb[4].mxu1 }
 0x18b   : > { %v8069_v50 = vpop.f32.mrb[5].mxu1 }
 0x18c   : > { %v10326_v51 = vpop.f32.mrb[6].mxu1  ;;  %v9528_v50 = vld [vmem:[%s9951_s30 + $0x3c8] sm:$0xff]  }
 0x18d   : > { %v8070_v52 = vpop.f32.mrb[7].mxu1 }
 0x18e   : > { %v10629_v52 = vld [vmem:[%s11734_s2 + $0x30] sm:$0xff]  }
 0x18f   : > { %8324 = vmatmul.mubr.msk.bf16.gmra.mrb[112].mxu1 %vm1059_vm1, %v9473_v34  ;;  %v10534_v34 = vld [vmem:[%s9951_s30 + $0x360] sm:$0xff]  }
 0x190   : > { %7812 = vmatmul.mubr.msk.bf16.gmra.mrb[72].mxu0 %vm1059_vm1, %v10319_v47  ;;  %8327 = vmatprep.mubr.msk.bf16.mxu1 %vm9685_vm0, %v9684_v1 }
 0x191   : > { %7815 = vmatprep.mubr.msk.bf16.mxu0 %vm1059_vm1, %v10322_v48 }
 0x192   : > { %v10339_v55 = vpop.f32.mrb[8].mxu1 }
 0x193   : > { %v8073_v56 = vpop.f32.mrb[9].mxu1 }
 0x194   : > { %v10341_v57 = vpop.f32.mrb[10].mxu1  ;;  %v9531_v56 = vld [vmem:[%s9951_s30 + $0x3d8] sm:$0xff]  }
 0x195   : > { %v8074_v58 = vpop.f32.mrb[11].mxu1 }
 0x196   : > { %v9532_v58 = vld [vmem:[%s9951_s30 + $0x3e0] sm:$0xff]  }
 0x197   : > { %8328 = vmatmul.mubr.msk.bf16.gmra.mrb[116].mxu1 %vm1059_vm1, %v9474_v35  ;;  %v10545_v35 = vld [vmem:[%s9951_s30 + $0x368] sm:$0xff]  }
 0x198   : > { %7816 = vmatmul.mubr.msk.bf16.gmra.mrb[76].mxu0 %vm1059_vm1, %v10336_v53  ;;  %8331 = vmatprep.mubr.msk.bf16.mxu1 %vm9685_vm0, %v9684_v1 }
 0x199   : > { %7823 = vmatprep.mubr.msk.bf16.mxu0 %vm1059_vm1, %v9485_v54  ;;  %v10638_v54 = vld [vmem:[%s11734_s2 + $0x38] sm:$0xff]  }
 0x19a   : > { %v10351_v61 = vpop.f32.mrb[12].mxu1 }
 0x19b   : > { %v8077_v63 = vpop.f32.mrb[13].mxu1 }
 0x19c   : > { %v10356_v0 = vpop.f32.mrb[14].mxu1  ;;  %v10673_v63 = vld [vmem:[%s9951_s30 + $0x400] sm:$0xff]  }
 0x19d   : > { %v8078_v2 = vpop.f32.mrb[15].mxu1 }
 0x19e   : > { %v10684_v2 = vld [vmem:[%s9951_s30 + $0x408] sm:$0xff]  }
 0x19f   : > { %8332 = vmatmul.mubr.msk.bf16.gmra.mrb[120].mxu1 %vm1059_vm1, %v9475_v36  ;;  %v10548_v36 = vld [vmem:[%s9951_s30 + $0x370] sm:$0xff]  }
 0x1a0   : > { %7824 = vmatmul.mubr.msk.bf16.vlgmr.msra.gmra.mrb[0].mxu0 %vm1059_vm1, %v9486_v59  ;;  %8335 = vmatprep.mubr.msk.bf16.mxu1 %vm9685_vm0, %v9684_v1  ;;  %v10656_v59 = vld [vmem:[%s9951_s30 + $0x3e8] sm:$0xff]  }
 0x1a1   : > { %7904 = vmatpush3.bf16.msra.mxu0 %v10204_v20  ;;  %7827 = vmatprep.mubr.msk.bf16.mxu0 %vm1059_vm1, %v9488_v60  ;;  %v10445_v20 = vld [vmem:[%s9951_s30 + $0x300] sm:$0xff]   ;;  %v10659_v60 = vld [vmem:[%s9951_s30 + $0x3f0] sm:$0xff]  }
 0x1a2   : > { %7905 = vmatprep.subr.bf16.mxu0 %v9508_v62  ;;  %v10366_v5 = vpop.f32.mrb[16].mxu1 }
 0x1a3   : > { %v8081_v6 = vpop.f32.mrb[17].mxu1 }
 0x1a4   : > { %v10369_v7 = vpop.f32.mrb[18].mxu1  ;;  %v10701_v6 = vld [vmem:[%s9951_s30 + $0x420] sm:$0xff]  }
 0x1a5   : > { %7906 = vmatpush3.bf16.msra.mxu0 %v9508_v62  ;;  %v8082_v8 = vpop.f32.mrb[19].mxu1  ;;  %v10670_v62 = vld [vmem:[%s9951_s30 + $0x3f8] sm:$0xff]  }
 0x1a6   : > { %7987 = vmatprep.subr.bf16.mxu0 %v9684_v1  ;;  %v10712_v8 = vld [vmem:[%s9951_s30 + $0x428] sm:$0xff]  }
 0x1a7   : > { %8336 = vmatmul.mubr.msk.bf16.gmra.mrb[124].mxu1 %vm1059_vm1, %v10276_v37  ;;  %v10559_v37 = vld [vmem:[%s9951_s30 + $0x378] sm:$0xff]  }
 0x1a8   : > { %7828 = vmatmul.mubr.msk.bf16.gmra.mrb[4].mxu0 %vm1059_vm1, %v9489_v3  ;;  %8339 = vmatprep.mubr.msk.bf16.mxu1 %vm9685_vm0, %v9684_v1  ;;  %v10687_v3 = vld [vmem:[%s9951_s30 + $0x410] sm:$0xff]  }
 0x1a9   : > { %7831 = vmatprep.mubr.msk.bf16.mxu0 %vm1059_vm1, %v9490_v4  ;;  %v10698_v4 = vld [vmem:[%s9951_s30 + $0x418] sm:$0xff]  }
 0x1af   : > { %8340 = vmatmul.mubr.msk.bf16.gmra.mrb[128].mxu1 %vm1059_vm1, %v10279_v38  ;;  %v10562_v38 = vld [vmem:[%s9951_s30 + $0x380] sm:$0xff]  }
 0x1b0   : > { %7832 = vmatmul.mubr.msk.bf16.gmra.mrb[8].mxu0 %vm1059_vm1, %v9491_v9  ;;  %8343 = vmatprep.mubr.msk.bf16.mxu1 %vm9685_vm0, %v9684_v1 }
 0x1b1   : > { %7835 = vmatprep.mubr.msk.bf16.mxu0 %vm1059_vm1, %v9492_v10 }
 0x1b7   : > { %8344 = vmatmul.mubr.msk.bf16.gmra.mrb[132].mxu1 %vm1059_vm1, %v10289_v39  ;;  %v10573_v39 = vld [vmem:[%s9951_s30 + $0x388] sm:$0xff]  }
 0x1b8   : > { %7836 = vmatmul.mubr.msk.bf16.gmra.mrb[12].mxu0 %vm1059_vm1, %v10386_v11  ;;  %8347 = vmatprep.mubr.msk.bf16.mxu1 %vm9685_vm0, %v9684_v1 }
 0x1b9   : > { %7839 = vmatprep.mubr.msk.bf16.mxu0 %vm1059_vm1, %v10389_v12 }
 0x1bf   : > { %8348 = vmatmul.mubr.msk.bf16.gmra.mrb[136].mxu1 %vm1059_vm1, %v10292_v40  ;;  %v10576_v40 = vld [vmem:[%s9951_s30 + $0x390] sm:$0xff]  }
 0x1c0   : > { %7840 = vmatmul.mubr.msk.bf16.gmra.mrb[16].mxu0 %vm1059_vm1, %v10400_v13  ;;  %8351 = vmatprep.mubr.msk.bf16.mxu1 %vm9685_vm0, %v9684_v1 }
 0x1c1   : > { %7843 = vmatprep.mubr.msk.bf16.mxu0 %vm1059_vm1, %v10403_v14 }
 0x1c7   : > { %8352 = vmatmul.mubr.msk.bf16.gmra.mrb[140].mxu1 %vm1059_vm1, %v10302_v41  ;;  %v10587_v41 = vld [vmem:[%s9951_s30 + $0x398] sm:$0xff]  }
 0x1c8   : > { %7844 = vmatmul.mubr.msk.bf16.gmra.mrb[20].mxu0 %vm1059_vm1, %v10414_v15  ;;  %8355 = vmatprep.mubr.msk.bf16.mxu1 %vm9685_vm0, %v9684_v1 }
 0x1c9   : > { %7847 = vmatprep.mubr.msk.bf16.mxu0 %vm1059_vm1, %v10417_v16 }
 0x1cf   : > { %8356 = vmatmul.mubr.msk.bf16.gmra.mrb[144].mxu1 %vm1059_vm1, %v10305_v42  ;;  %v10590_v42 = vld [vmem:[%s9951_s30 + $0x3a0] sm:$0xff]  }
 0x1d0   : > { %7848 = vmatmul.mubr.msk.bf16.gmra.mrb[24].mxu0 %vm1059_vm1, %v10428_v17  ;;  %8359 = vmatprep.mubr.msk.bf16.mxu1 %vm9685_vm0, %v9684_v1 }
 0x1d1   : > { %7851 = vmatprep.mubr.msk.bf16.mxu0 %vm1059_vm1, %v10431_v18 }
 0x1d7   : > { %8360 = vmatmul.mubr.msk.bf16.gmra.mrb[148].mxu1 %vm1059_vm1, %v10319_v47  ;;  %v10615_v47 = vld [vmem:[%s9951_s30 + $0x3b8] sm:$0xff]  }
 0x1d8   : > { %7852 = vmatmul.mubr.msk.bf16.gmra.mrb[28].mxu0 %vm1059_vm1, %v10442_v19  ;;  %8363 = vmatprep.mubr.msk.bf16.mxu1 %vm9685_vm0, %v9684_v1 }
 0x1d9   : > { %7855 = vmatprep.mubr.msk.bf16.mxu0 %vm1059_vm1, %v10445_v20 }
 0x1df   : > { %8364 = vmatmul.mubr.msk.bf16.gmra.mrb[152].mxu1 %vm1059_vm1, %v10322_v48  ;;  %v9527_v48 = vld [vmem:[%s9951_s30 + $0x3c0] sm:$0xff]  }
 0x1e0   : > { %7856 = vmatmul.mubr.msk.bf16.gmra.mrb[32].mxu0 %vm1059_vm1, %v10456_v21  ;;  %8367 = vmatprep.mubr.msk.bf16.mxu1 %vm9685_vm0, %v9684_v1 }
 0x1e1   : > { %7859 = vmatprep.mubr.msk.bf16.mxu0 %vm1059_vm1, %v10459_v22 }
 0x1e7   : > { %8368 = vmatmul.mubr.msk.bf16.gmra.mrb[156].mxu1 %vm1059_vm1, %v10336_v53  ;;  %v9530_v53 = vld [vmem:[%s9951_s30 + $0x3d0] sm:$0xff]  }
 0x1e8   : > { %7860 = vmatmul.mubr.msk.bf16.gmra.mrb[36].mxu0 %vm1059_vm1, %v10470_v23  ;;  %8375 = vmatprep.mubr.msk.bf16.mxu1 %vm9685_vm0, %v9684_v1 }
 0x1e9   : > { %7863 = vmatprep.mubr.msk.bf16.mxu0 %vm1059_vm1, %v10473_v24 }
 0x1ef   : > { %8376 = vmatmul.mubr.msk.bf16.vlgmr.msra.gmra.mrb[20].mxu1 %vm1059_vm1, %v9491_v9  ;;  %v10715_v9 = vld [vmem:[%s9951_s30 + $0x430] sm:$0xff]  }
 0x1f0   : > { %7864 = vmatmul.mubr.msk.bf16.gmra.mrb[40].mxu0 %vm1059_vm1, %v10484_v25  ;;  %8516 = vmatpush3.bf16.msra.mxu1 %v9574_v27  ;;  %v10841_v27 = vld [vmem:[%s9951_s30 + $0x4c0] sm:$0xff]  }
 0x1f1   : > { %7867 = vmatprep.mubr.msk.bf16.mxu0 %vm1059_vm1, %v10487_v26  ;;  %8379 = vmatprep.mubr.msk.bf16.mxu1 %vm9685_vm0, %v9684_v1 }
 0x1f2   : > { %8517 = vmatprep.subr.bf16.mxu1 %v9684_v1 }
 0x1f4   : > { %8518 = vmatpush3.bf16.msra.mxu1 %v9575_v30  ;;  %v10866_v30 = vld [vmem:[%s9951_s30 + $0x4d8] sm:$0xff]  }
 0x1f7   : > { %8380 = vmatmul.mubr.msk.bf16.gmra.mrb[24].mxu1 %vm1059_vm1, %v9492_v10  ;;  %v10726_v10 = vld [vmem:[%s9951_s30 + $0x438] sm:$0xff]  }
 0x1f8   : > { %7868 = vmatmul.mubr.msk.bf16.gmra.mrb[44].mxu0 %vm1059_vm1, %v10500_v28  ;;  %8383 = vmatprep.mubr.msk.bf16.mxu1 %vm9685_vm0, %v9684_v1 }
 0x1f9   : > { %7871 = vmatprep.mubr.msk.bf16.mxu0 %vm1059_vm1, %v10503_v29 }
 0x1ff   : > { %8384 = vmatmul.mubr.msk.bf16.gmra.mrb[28].mxu1 %vm1059_vm1, %v10386_v11  ;;  %v10729_v11 = vld [vmem:[%s9951_s30 + $0x440] sm:$0xff]  }
 0x200   : > { %7872 = vmatmul.mubr.msk.bf16.gmra.mrb[48].mxu0 %vm1059_vm1, %v10517_v31  ;;  %8387 = vmatprep.mubr.msk.bf16.mxu1 %vm9685_vm0, %v9684_v1 }
 0x201   : > { %7875 = vmatprep.mubr.msk.bf16.mxu0 %vm1059_vm1, %v10520_v32 }
 0x207   : > { %8388 = vmatmul.mubr.msk.bf16.gmra.mrb[32].mxu1 %vm1059_vm1, %v10389_v12  ;;  %v10740_v12 = vld [vmem:[%s9951_s30 + $0x448] sm:$0xff]  }
 0x208   : > { %7876 = vmatmul.mubr.msk.bf16.gmra.mrb[52].mxu0 %vm1059_vm1, %v10531_v33  ;;  %8391 = vmatprep.mubr.msk.bf16.mxu1 %vm9685_vm0, %v9684_v1 }
 0x209   : > { %7879 = vmatprep.mubr.msk.bf16.mxu0 %vm1059_vm1, %v10534_v34 }
 0x20f   : > { %8392 = vmatmul.mubr.msk.bf16.gmra.mrb[36].mxu1 %vm1059_vm1, %v10400_v13  ;;  %v10743_v13 = vld [vmem:[%s9951_s30 + $0x450] sm:$0xff]  }
 0x210   : > { %7880 = vmatmul.mubr.msk.bf16.gmra.mrb[56].mxu0 %vm1059_vm1, %v10545_v35  ;;  %8395 = vmatprep.mubr.msk.bf16.mxu1 %vm9685_vm0, %v9684_v1 }
 0x211   : > { %7883 = vmatprep.mubr.msk.bf16.mxu0 %vm1059_vm1, %v10548_v36 }
 0x217   : > { %8396 = vmatmul.mubr.msk.bf16.gmra.mrb[40].mxu1 %vm1059_vm1, %v10403_v14  ;;  %v10754_v14 = vld [vmem:[%s9951_s30 + $0x458] sm:$0xff]  }
 0x218   : > { %7884 = vmatmul.mubr.msk.bf16.gmra.mrb[60].mxu0 %vm1059_vm1, %v10559_v37  ;;  %8399 = vmatprep.mubr.msk.bf16.mxu1 %vm9685_vm0, %v9684_v1 }
 0x219   : > { %7887 = vmatprep.mubr.msk.bf16.mxu0 %vm1059_vm1, %v10562_v38 }
 0x21f   : > { %8400 = vmatmul.mubr.msk.bf16.gmra.mrb[44].mxu1 %vm1059_vm1, %v10414_v15  ;;  %v10757_v15 = vld [vmem:[%s9951_s30 + $0x460] sm:$0xff]  }
 0x220   : > { %7888 = vmatmul.mubr.msk.bf16.gmra.mrb[64].mxu0 %vm1059_vm1, %v10573_v39  ;;  %8403 = vmatprep.mubr.msk.bf16.mxu1 %vm9685_vm0, %v9684_v1 }
 0x221   : > { %7891 = vmatprep.mubr.msk.bf16.mxu0 %vm1059_vm1, %v10576_v40 }
 0x227   : > { %8404 = vmatmul.mubr.msk.bf16.gmra.mrb[48].mxu1 %vm1059_vm1, %v10417_v16  ;;  %v10768_v16 = vld [vmem:[%s9951_s30 + $0x468] sm:$0xff]  }
 0x228   : > { %7892 = vmatmul.mubr.msk.bf16.gmra.mrb[68].mxu0 %vm1059_vm1, %v10587_v41  ;;  %8407 = vmatprep.mubr.msk.bf16.mxu1 %vm9685_vm0, %v9684_v1 }
 0x229   : > { %7895 = vmatprep.mubr.msk.bf16.mxu0 %vm1059_vm1, %v10590_v42 }
 0x22f   : > { %8408 = vmatmul.mubr.msk.bf16.gmra.mrb[52].mxu1 %vm1059_vm1, %v10428_v17  ;;  %v10771_v17 = vld [vmem:[%s9951_s30 + $0x470] sm:$0xff]  }
 0x230   : > { %7896 = vmatmul.mubr.msk.bf16.gmra.mrb[72].mxu0 %vm1059_vm1, %v10601_v44  ;;  %8411 = vmatprep.mubr.msk.bf16.mxu1 %vm9685_vm0, %v9684_v1 }
 0x231   : > { %7899 = vmatprep.mubr.msk.bf16.mxu0 %vm1059_vm1, %v10604_v46 }
 0x237   : > { %8412 = vmatmul.mubr.msk.bf16.gmra.mrb[56].mxu1 %vm1059_vm1, %v10431_v18  ;;  %v10782_v18 = vld [vmem:[%s9951_s30 + $0x478] sm:$0xff]  }
 0x238   : > { %7900 = vmatmul.mubr.msk.bf16.gmra.mrb[76].mxu0 %vm1059_vm1, %v10615_v47  ;;  %8415 = vmatprep.mubr.msk.bf16.mxu1 %vm9685_vm0, %v9684_v1 }
 0x239   : > { %7907 = vmatprep.mubr.msk.bf16.mxu0 %vm1059_vm1, %v9527_v48  ;;  %v9578_v48 = vld [vmem:[%s9951_s30 + $0x178] sm:$0xff]  }
 0x23f   : > { %8416 = vmatmul.mubr.msk.bf16.gmra.mrb[60].mxu1 %vm1059_vm1, %v10442_v19  ;;  %v10785_v19 = vld [vmem:[%s9951_s30 + $0x480] sm:$0xff]  }
 0x240   : > { %7908 = vmatmul.mubr.msk.bf16.vlgmr.msra.gmra.mrb[0].mxu0 %vm1059_vm1, %v9528_v50  ;;  %8419 = vmatprep.mubr.msk.bf16.mxu1 %vm9685_vm0, %v9684_v1 }
 0x241   : > { %7988 = vmatpush3.bf16.msra.mxu0 %v10629_v52  ;;  %7911 = vmatprep.mubr.msk.bf16.mxu0 %vm1059_vm1, %v9530_v53 }
 0x242   : > { %7989 = vmatprep.subr.bf16.mxu0 %v9684_v1 }
 0x245   : > { %7990 = vmatpush3.bf16.msra.mxu0 %v10638_v54 }
 0x246   : > { %8083 = vmatprep.subr.bf16.mxu0 %v9684_v1 }
 0x247   : > { %8420 = vmatmul.mubr.msk.bf16.gmra.mrb[64].mxu1 %vm1059_vm1, %v10445_v20  ;;  %v10796_v20 = vld [vmem:[%s9951_s30 + $0x488] sm:$0xff]  }
 0x248   : > { %7912 = vmatmul.mubr.msk.bf16.gmra.mrb[4].mxu0 %vm1059_vm1, %v9531_v56  ;;  %8423 = vmatprep.mubr.msk.bf16.mxu1 %vm9685_vm0, %v9684_v1  ;;  %v9579_v56 = vld [vmem:[%s9951_s30 + $0x180] sm:$0xff]  }
 0x249   : > { %7915 = vmatprep.mubr.msk.bf16.mxu0 %vm1059_vm1, %v9532_v58 }
 0x24f   : > { %8424 = vmatmul.mubr.msk.bf16.gmra.mrb[68].mxu1 %vm1059_vm1, %v10456_v21  ;;  %v10799_v21 = vld [vmem:[%s9951_s30 + $0x490] sm:$0xff]  }
 0x250   : > { %7916 = vmatmul.mubr.msk.bf16.gmra.mrb[8].mxu0 %vm1059_vm1, %v10656_v59  ;;  %8427 = vmatprep.mubr.msk.bf16.mxu1 %vm9685_vm0, %v9684_v1 }
 0x251   : > { %7919 = vmatprep.mubr.msk.bf16.mxu0 %vm1059_vm1, %v10659_v60 }
 0x257   : > { %8428 = vmatmul.mubr.msk.bf16.gmra.mrb[72].mxu1 %vm1059_vm1, %v10459_v22  ;;  %v10810_v22 = vld [vmem:[%s9951_s30 + $0x498] sm:$0xff]  }
 0x258   : > { %7920 = vmatmul.mubr.msk.bf16.gmra.mrb[12].mxu0 %vm1059_vm1, %v10670_v62  ;;  %8431 = vmatprep.mubr.msk.bf16.mxu1 %vm9685_vm0, %v9684_v1 }
 0x259   : > { %7923 = vmatprep.mubr.msk.bf16.mxu0 %vm1059_vm1, %v10673_v63 }
 0x25f   : > { %8432 = vmatmul.mubr.msk.bf16.gmra.mrb[76].mxu1 %vm1059_vm1, %v10470_v23  ;;  %v10813_v23 = vld [vmem:[%s9951_s30 + $0x4a0] sm:$0xff]  }
 0x260   : > { %7924 = vmatmul.mubr.msk.bf16.gmra.mrb[16].mxu0 %vm1059_vm1, %v10684_v2  ;;  %8435 = vmatprep.mubr.msk.bf16.mxu1 %vm9685_vm0, %v9684_v1 }
 0x261   : > { %7927 = vmatprep.mubr.msk.bf16.mxu0 %vm1059_vm1, %v10687_v3 }
 0x267   : > { %8436 = vmatmul.mubr.msk.bf16.gmra.mrb[80].mxu1 %vm1059_vm1, %v10473_v24  ;;  %v10824_v24 = vld [vmem:[%s9951_s30 + $0x4a8] sm:$0xff]  }
 0x268   : > { %7928 = vmatmul.mubr.msk.bf16.gmra.mrb[20].mxu0 %vm1059_vm1, %v10698_v4  ;;  %8439 = vmatprep.mubr.msk.bf16.mxu1 %vm9685_vm0, %v9684_v1 }
 0x269   : > { %7931 = vmatprep.mubr.msk.bf16.mxu0 %vm1059_vm1, %v10701_v6 }
 0x26f   : > { %8440 = vmatmul.mubr.msk.bf16.gmra.mrb[84].mxu1 %vm1059_vm1, %v10484_v25  ;;  %v10827_v25 = vld [vmem:[%s9951_s30 + $0x4b0] sm:$0xff]  }
 0x270   : > { %7932 = vmatmul.mubr.msk.bf16.gmra.mrb[24].mxu0 %vm1059_vm1, %v10712_v8  ;;  %8443 = vmatprep.mubr.msk.bf16.mxu1 %vm9685_vm0, %v9684_v1 }
 0x271   : > { %7935 = vmatprep.mubr.msk.bf16.mxu0 %vm1059_vm1, %v10715_v9 }
 0x277   : > { %8444 = vmatmul.mubr.msk.bf16.gmra.mrb[88].mxu1 %vm1059_vm1, %v10487_v26  ;;  %v10838_v26 = vld [vmem:[%s9951_s30 + $0x4b8] sm:$0xff]  }
 0x278   : > { %7936 = vmatmul.mubr.msk.bf16.gmra.mrb[28].mxu0 %vm1059_vm1, %v10726_v10  ;;  %8447 = vmatprep.mubr.msk.bf16.mxu1 %vm9685_vm0, %v9684_v1 }
 0x279   : > { %7939 = vmatprep.mubr.msk.bf16.mxu0 %vm1059_vm1, %v10729_v11 }
 0x27f   : > { %8448 = vmatmul.mubr.msk.bf16.gmra.mrb[92].mxu1 %vm1059_vm1, %v10500_v28  ;;  %v10852_v28 = vld [vmem:[%s9951_s30 + $0x4c8] sm:$0xff]  }
 0x280   : > { %7940 = vmatmul.mubr.msk.bf16.gmra.mrb[32].mxu0 %vm1059_vm1, %v10740_v12  ;;  %8451 = vmatprep.mubr.msk.bf16.mxu1 %vm9685_vm0, %v9684_v1 }
 0x281   : > { %7943 = vmatprep.mubr.msk.bf16.mxu0 %vm1059_vm1, %v10743_v13 }
 0x287   : > { %8452 = vmatmul.mubr.msk.bf16.gmra.mrb[96].mxu1 %vm1059_vm1, %v10503_v29  ;;  %v10855_v29 = vld [vmem:[%s9951_s30 + $0x4d0] sm:$0xff]  }
 0x288   : > { %7944 = vmatmul.mubr.msk.bf16.gmra.mrb[36].mxu0 %vm1059_vm1, %v10754_v14  ;;  %8455 = vmatprep.mubr.msk.bf16.mxu1 %vm9685_vm0, %v9684_v1 }
 0x289   : > { %7947 = vmatprep.mubr.msk.bf16.mxu0 %vm1059_vm1, %v10757_v15 }
 0x28f   : > { %8456 = vmatmul.mubr.msk.bf16.gmra.mrb[100].mxu1 %vm1059_vm1, %v10517_v31  ;;  %v10869_v31 = vld [vmem:[%s9951_s30 + $0x4e0] sm:$0xff]  }
 0x290   : > { %7948 = vmatmul.mubr.msk.bf16.gmra.mrb[40].mxu0 %vm1059_vm1, %v10768_v16  ;;  %8459 = vmatprep.mubr.msk.bf16.mxu1 %vm9685_vm0, %v9684_v1 }
 0x291   : > { %7951 = vmatprep.mubr.msk.bf16.mxu0 %vm1059_vm1, %v10771_v17 }
 0x297   : > { %8460 = vmatmul.mubr.msk.bf16.gmra.mrb[104].mxu1 %vm1059_vm1, %v10520_v32  ;;  %v10880_v32 = vld [vmem:[%s9951_s30 + $0x4e8] sm:$0xff]  }
 0x298   : > { %7952 = vmatmul.mubr.msk.bf16.gmra.mrb[44].mxu0 %vm1059_vm1, %v10782_v18  ;;  %8463 = vmatprep.mubr.msk.bf16.mxu1 %vm9685_vm0, %v9684_v1 }
 0x299   : > { %7955 = vmatprep.mubr.msk.bf16.mxu0 %vm1059_vm1, %v10785_v19 }
 0x29f   : > { %8464 = vmatmul.mubr.msk.bf16.gmra.mrb[108].mxu1 %vm1059_vm1, %v10531_v33  ;;  %v10883_v33 = vld [vmem:[%s9951_s30 + $0x4f0] sm:$0xff]  }
 0x2a0   : > { %7956 = vmatmul.mubr.msk.bf16.gmra.mrb[48].mxu0 %vm1059_vm1, %v10796_v20  ;;  %8467 = vmatprep.mubr.msk.bf16.mxu1 %vm9685_vm0, %v9684_v1 }
 0x2a1   : > { %7959 = vmatprep.mubr.msk.bf16.mxu0 %vm1059_vm1, %v10799_v21 }
 0x2a7   : > { %8468 = vmatmul.mubr.msk.bf16.gmra.mrb[112].mxu1 %vm1059_vm1, %v10534_v34  ;;  %v10894_v34 = vld [vmem:[%s9951_s30 + $0x4f8] sm:$0xff]  }
 0x2a8   : > { %7960 = vmatmul.mubr.msk.bf16.gmra.mrb[52].mxu0 %vm1059_vm1, %v10810_v22  ;;  %8471 = vmatprep.mubr.msk.bf16.mxu1 %vm9685_vm0, %v9684_v1 }
 0x2a9   : > { %7963 = vmatprep.mubr.msk.bf16.mxu0 %vm1059_vm1, %v10813_v23 }
 0x2af   : > { %8472 = vmatmul.mubr.msk.bf16.gmra.mrb[116].mxu1 %vm1059_vm1, %v10545_v35  ;;  %v9569_v35 = vld [vmem:[%s9966_s7 + $0x28] sm:$0xff]  }
 0x2b0   : > { %7964 = vmatmul.mubr.msk.bf16.gmra.mrb[56].mxu0 %vm1059_vm1, %v10824_v24  ;;  %8475 = vmatprep.mubr.msk.bf16.mxu1 %vm9685_vm0, %v9684_v1 }
 0x2b1   : > { %7967 = vmatprep.mubr.msk.bf16.mxu0 %vm1059_vm1, %v10827_v25 }
 0x2b7   : > { %8476 = vmatmul.mubr.msk.bf16.gmra.mrb[120].mxu1 %vm1059_vm1, %v10548_v36  ;;  %v9570_v36 = vld [vmem:[%s9966_s7 + $0x30] sm:$0xff]  }
 0x2b8   : > { %7968 = vmatmul.mubr.msk.bf16.gmra.mrb[60].mxu0 %vm1059_vm1, %v10838_v26  ;;  %8479 = vmatprep.mubr.msk.bf16.mxu1 %vm9685_vm0, %v9684_v1 }
 0x2b9   : > { %7971 = vmatprep.mubr.msk.bf16.mxu0 %vm1059_vm1, %v10841_v27 }
 0x2bf   : > { %8480 = vmatmul.mubr.msk.bf16.gmra.mrb[124].mxu1 %vm1059_vm1, %v10559_v37  ;;  %v9571_v37 = vld [vmem:[%s9966_s7 + $0x38] sm:$0xff]  }
 0x2c0   : > { %7972 = vmatmul.mubr.msk.bf16.gmra.mrb[64].mxu0 %vm1059_vm1, %v10852_v28  ;;  %8483 = vmatprep.mubr.msk.bf16.mxu1 %vm9685_vm0, %v9684_v1 }
 0x2c1   : > { %7975 = vmatprep.mubr.msk.bf16.mxu0 %vm1059_vm1, %v10855_v29 }
 0x2c7   : > { %8484 = vmatmul.mubr.msk.bf16.gmra.mrb[128].mxu1 %vm1059_vm1, %v10562_v38  ;;  %v9572_v38 = vld [vmem:[%s9966_s7 + $0x40] sm:$0xff]  }
 0x2c8   : > { %7976 = vmatmul.mubr.msk.bf16.gmra.mrb[68].mxu0 %vm1059_vm1, %v10866_v30  ;;  %8487 = vmatprep.mubr.msk.bf16.mxu1 %vm9685_vm0, %v9684_v1 }
 0x2c9   : > { %7979 = vmatprep.mubr.msk.bf16.mxu0 %vm1059_vm1, %v10869_v31 }
 0x2cf   : > { %8488 = vmatmul.mubr.msk.bf16.gmra.mrb[132].mxu1 %vm1059_vm1, %v10573_v39  ;;  %v9573_v39 = vld [vmem:[%s9966_s7 + $0x48] sm:$0xff]  }
 0x2d0   : > { %7980 = vmatmul.mubr.msk.bf16.gmra.mrb[72].mxu0 %vm1059_vm1, %v10880_v32  ;;  %8491 = vmatprep.mubr.msk.bf16.mxu1 %vm9685_vm0, %v9684_v1 }
 0x2d1   : > { %7983 = vmatprep.mubr.msk.bf16.mxu0 %vm1059_vm1, %v10883_v33 }
 0x2d7   : > { %8492 = vmatmul.mubr.msk.bf16.gmra.mrb[136].mxu1 %vm1059_vm1, %v10576_v40  ;;  %v9576_v40 = vld [vmem:[%s9951_s30 + $0x168] sm:$0xff]  }
 0x2d8   : > { %7984 = vmatmul.mubr.msk.bf16.gmra.mrb[76].mxu0 %vm1059_vm1, %v10894_v34  ;;  %8495 = vmatprep.mubr.msk.bf16.mxu1 %vm9685_vm0, %v9684_v1 }
 0x2d9   : > { %7991 = vmatprep.mubr.msk.bf16.mxu0 %vm9685_vm0, %v9684_v1 }
 0x2df   : > { %8496 = vmatmul.mubr.msk.bf16.gmra.mrb[140].mxu1 %vm1059_vm1, %v10587_v41  ;;  %v9577_v41 = vld [vmem:[%s9951_s30 + $0x170] sm:$0xff]  }
 0x2e0   : > { %7992 = vmatmul.mubr.msk.bf16.vlgmr.msra.gmra.mrb[80].mxu0 %vm1059_vm1, %v9569_v35  ;;  %8499 = vmatprep.mubr.msk.bf16.mxu1 %vm9685_vm0, %v9684_v1  ;;  %v9580_v35 = vld [vmem:[%s9951_s30 + $0x188] sm:$0xff]  }
 0x2e1   : > { %8084 = vmatpush3.bf16.msra.mxu0 %v10629_v52  ;;  %7995 = vmatprep.mubr.msk.bf16.mxu0 %vm9685_vm0, %v9684_v1 }
 0x2e2   : > { %8085 = vmatprep.subr.bf16.mxu0 %v9684_v1 }
 0x2e5   : > { %8086 = vmatpush3.bf16.msra.mxu0 %v10638_v54 }
 0x2e7   : > { %8500 = vmatmul.mubr.msk.bf16.gmra.mrb[144].mxu1 %vm1059_vm1, %v10590_v42 }
 0x2e8   : > { %7996 = vmatmul.mubr.msk.bf16.gmra.mrb[84].mxu0 %vm1059_vm1, %v9570_v36  ;;  %8503 = vmatprep.mubr.msk.bf16.mxu1 %vm9685_vm0, %v9684_v1 }
 0x2e9   : > { %7999 = vmatprep.mubr.msk.bf16.mxu0 %vm9685_vm0, %v9684_v1 }
 0x2ef   : > { %8504 = vmatmul.mubr.msk.bf16.gmra.mrb[148].mxu1 %vm1059_vm1, %v10601_v44 }
 0x2f0   : > { %8000 = vmatmul.mubr.msk.bf16.gmra.mrb[88].mxu0 %vm1059_vm1, %v9571_v37  ;;  %8507 = vmatprep.mubr.msk.bf16.mxu1 %vm9685_vm0, %v9684_v1 }
 0x2f1   : > { %8003 = vmatprep.mubr.msk.bf16.mxu0 %vm9685_vm0, %v9684_v1 }
 0x2f7   : > { %8508 = vmatmul.mubr.msk.bf16.gmra.mrb[152].mxu1 %vm1059_vm1, %v10604_v46 }
 0x2f8   : > { %8004 = vmatmul.mubr.msk.bf16.gmra.mrb[92].mxu0 %vm1059_vm1, %v9572_v38  ;;  %8511 = vmatprep.mubr.msk.bf16.mxu1 %vm9685_vm0, %v9684_v1 }
 0x2f9   : > { %8007 = vmatprep.mubr.msk.bf16.mxu0 %vm9685_vm0, %v9684_v1 }
 0x2ff   : > { %8512 = vmatmul.mubr.msk.bf16.gmra.mrb[156].mxu1 %vm1059_vm1, %v10615_v47 }
 0x300   : > { %8008 = vmatmul.mubr.msk.bf16.gmra.mrb[96].mxu0 %vm1059_vm1, %v9573_v39  ;;  %8519 = vmatprep.mubr.msk.bf16.mxu1 %vm9685_vm0, %v9684_v1  ;;  %v9581_v39 = vld [vmem:[%s9951_s30 + $0x190] sm:$0xff]  }
 0x301   : > { %8087 = vmatprep.mubr.msk.bf16.mxu0 %vm9685_vm0, %v9684_v1 }
 0x307   : > { %8520 = vmatmul.mubr.msk.bf16.vlgmr.msra.gmra.mrb[20].mxu1 %vm1059_vm1, %v10656_v59 }
 0x308   : > { %8088 = vmatmul.mubr.msk.bf16.vlgmr.msra.gmra.mrb[100].mxu0 %vm1059_vm1, %v9576_v40  ;;  %8523 = vmatprep.mubr.msk.bf16.mxu1 %vm9685_vm0, %v9684_v1 }
 0x309   : > { %8091 = vmatprep.mubr.msk.bf16.mxu0 %vm9685_vm0, %v9684_v1 }
 0x30f   : > { %8524 = vmatmul.mubr.msk.bf16.gmra.mrb[24].mxu1 %vm1059_vm1, %v10659_v60 }
 0x310   : > { %8092 = vmatmul.mubr.msk.bf16.gmra.mrb[104].mxu0 %vm1059_vm1, %v9577_v41  ;;  %8527 = vmatprep.mubr.msk.bf16.mxu1 %vm9685_vm0, %v9684_v1 }
 0x311   : > { %8095 = vmatprep.mubr.msk.bf16.mxu0 %vm9685_vm0, %v9684_v1 }
 0x313   : > { %v10961_v42 = vpop.f32.mrb[0].mxu0 }
 0x314   : > { %v10963_v44 = vpop.f32.mrb[1].mxu0 }
 0x315   : > { %v10967_v46 = vpop.f32.mrb[2].mxu0 }
 0x316   : > { %v10969_v47 = vpop.f32.mrb[3].mxu0 }
 0x317   : > { %8528 = vmatmul.mubr.msk.bf16.gmra.mrb[28].mxu1 %vm1059_vm1, %v10670_v62 }
 0x318   : > { %8096 = vmatmul.mubr.msk.bf16.gmra.mrb[108].mxu0 %vm1059_vm1, %v9578_v48  ;;  %8531 = vmatprep.mubr.msk.bf16.mxu1 %vm9685_vm0, %v9684_v1 }
 0x319   : > { %8099 = vmatprep.mubr.msk.bf16.mxu0 %vm9685_vm0, %v9684_v1 }
 0x31b   : > { %v10977_v50 = vpop.f32.mrb[4].mxu0 }
 0x31c   : > { %v10979_v52 = vpop.f32.mrb[5].mxu0 }
 0x31d   : > { %v10983_v53 = vpop.f32.mrb[6].mxu0 }
 0x31e   : > { %v10985_v54 = vpop.f32.mrb[7].mxu0 }
 0x31f   : > { %8532 = vmatmul.mubr.msk.bf16.gmra.mrb[32].mxu1 %vm1059_vm1, %v10673_v63 }
 0x320   : > { %8100 = vmatmul.mubr.msk.bf16.gmra.mrb[112].mxu0 %vm1059_vm1, %v9579_v56  ;;  %8535 = vmatprep.mubr.msk.bf16.mxu1 %vm9685_vm0, %v9684_v1  ;;  %v9582_v56 = vld [vmem:[%s9951_s30 + $0x198] sm:$0xff]  }
 0x321   : > { %8103 = vmatprep.mubr.msk.bf16.mxu0 %vm9685_vm0, %v9684_v1 }
 0x323   : > { %v10993_v58 = vpop.f32.mrb[8].mxu0 }
 0x324   : > { %v10995_v59 = vpop.f32.mrb[9].mxu0 }
 0x325   : > { %v10999_v60 = vpop.f32.mrb[10].mxu0 }
 0x326   : > { %v11001_v62 = vpop.f32.mrb[11].mxu0 }
 0x327   : > { %8536 = vmatmul.mubr.msk.bf16.gmra.mrb[36].mxu1 %vm1059_vm1, %v10684_v2 }
 0x328   : > { %8104 = vmatmul.mubr.msk.bf16.gmra.mrb[116].mxu0 %vm1059_vm1, %v9580_v35  ;;  %8539 = vmatprep.mubr.msk.bf16.mxu1 %vm9685_vm0, %v9684_v1 }
 0x329   : > { %8107 = vmatprep.mubr.msk.bf16.mxu0 %vm9685_vm0, %v9684_v1 }
 0x32b   : > { %v11009_v63 = vpop.f32.mrb[12].mxu0 }
 0x32c   : > { %v11011_v36 = vpop.f32.mrb[13].mxu0 }
 0x32d   : > { %v11015_v37 = vpop.f32.mrb[14].mxu0 }
 0x32e   : > { %v11017_v38 = vpop.f32.mrb[15].mxu0 }
 0x32f   : > { %8540 = vmatmul.mubr.msk.bf16.gmra.mrb[40].mxu1 %vm1059_vm1, %v10687_v3 }
 0x330   : > { %8108 = vmatmul.mubr.msk.bf16.gmra.mrb[120].mxu0 %vm1059_vm1, %v9581_v39  ;;  %8543 = vmatprep.mubr.msk.bf16.mxu1 %vm9685_vm0, %v9684_v1 }
 0x331   : > { %8111 = vmatprep.mubr.msk.bf16.mxu0 %vm9685_vm0, %v9684_v1 }
 0x333   : > { %v11025_v2 = vpop.f32.mrb[16].mxu0 }
 0x334   : > { %11740 = vst [vmem:[#allocation3_spill] sm:$0xff] %v11025_v2  ;;  %v11027_v40 = vpop.f32.mrb[17].mxu0  ;;  %v9583_v2 = vld [vmem:[%s9951_s30 + $0x1a0] sm:$0xff]  }
 0x335   : > { %v11031_v41 = vpop.f32.mrb[18].mxu0 }
 0x336   : > { %11741 = vst [vmem:[#allocation4_spill] sm:$0xff] %v11031_v41  ;;  %v11033_v48 = vpop.f32.mrb[19].mxu0 }
 0x337   : > { %8544 = vmatmul.mubr.msk.bf16.gmra.mrb[44].mxu1 %vm1059_vm1, %v10698_v4 }
 0x338   : > { %8112 = vmatmul.mubr.msk.bf16.gmra.mrb[124].mxu0 %vm1059_vm1, %v9582_v56  ;;  %8547 = vmatprep.mubr.msk.bf16.mxu1 %vm9685_vm0, %v9684_v1 }
 0x339   : > { %8115 = vmatprep.mubr.msk.bf16.mxu0 %vm9685_vm0, %v9684_v1 }
 0x33b   : > { %v11041_v3 = vpop.f32.mrb[20].mxu0 }
 0x33c   : > { %11742 = vst [vmem:[#allocation5_spill] sm:$0xff] %v11041_v3  ;;  %v11043_v35 = vpop.f32.mrb[21].mxu0 }
 0x33d   : > { %v11047_v39 = vpop.f32.mrb[22].mxu0 }
 0x33e   : > { %11743 = vst [vmem:[#allocation6_spill] sm:$0xff] %v11047_v39  ;;  %v11049_v41 = vpop.f32.mrb[23].mxu0 }
 0x33f   : > { %11744 = vst [vmem:[#allocation7_spill] sm:$0xff] %v11049_v41  ;;  %8548 = vmatmul.mubr.msk.bf16.gmra.mrb[48].mxu1 %vm1059_vm1, %v10701_v6  ;;  %v9584_v41 = vld [vmem:[%s9951_s30 + $0x1a8] sm:$0xff]  }
 0x340   : > { %8116 = vmatmul.mubr.msk.bf16.gmra.mrb[128].mxu0 %vm1059_vm1, %v9583_v2  ;;  %8551 = vmatprep.mubr.msk.bf16.mxu1 %vm9685_vm0, %v9684_v1 }
 0x341   : > { %8119 = vmatprep.mubr.msk.bf16.mxu0 %vm9685_vm0, %v9684_v1 }
 0x343   : > { %v11057_v4 = vpop.f32.mrb[24].mxu0 }
 0x344   : > { %11745 = vst [vmem:[#allocation8_spill] sm:$0xff] %v11057_v4  ;;  %v11059_v56 = vpop.f32.mrb[25].mxu0 }
 0x345   : > { %11746 = vst [vmem:[#allocation9_spill] sm:$0xff] %v11059_v56  ;;  %v11063_v39 = vpop.f32.mrb[26].mxu0  ;;  %v9598_v56 = vld [vmem:[%s9951_s30 + $0x218] sm:$0xff]  }
 0x346   : > { %11747 = vst [vmem:[#allocation10_spill] sm:$0xff] %v11063_v39  ;;  %v11065_v3 = vpop.f32.mrb[27].mxu0 }
 0x347   : > { %11748 = vst [vmem:[#allocation11_spill] sm:$0xff] %v11065_v3  ;;  %8552 = vmatmul.mubr.msk.bf16.gmra.mrb[52].mxu1 %vm1059_vm1, %v10712_v8  ;;  %v9585_v3 = vld [vmem:[%s9951_s30 + $0x1b0] sm:$0xff]  }
 0x348   : > { %8120 = vmatmul.mubr.msk.bf16.gmra.mrb[132].mxu0 %vm1059_vm1, %v9584_v41  ;;  %8555 = vmatprep.mubr.msk.bf16.mxu1 %vm9685_vm0, %v9684_v1 }
 0x349   : > { %8123 = vmatprep.mubr.msk.bf16.mxu0 %vm9685_vm0, %v9684_v1 }
 0x34b   : > { %v11073_v6 = vpop.f32.mrb[28].mxu0 }
 0x34c   : > { %11749 = vst [vmem:[#allocation12_spill] sm:$0xff] %v11073_v6  ;;  %v11075_v2 = vpop.f32.mrb[29].mxu0 }
 0x34d   : > { %11750 = vst [vmem:[#allocation13_spill] sm:$0xff] %v11075_v2  ;;  %v11079_v39 = vpop.f32.mrb[30].mxu0 }
 0x34e   : > { %11751 = vst [vmem:[#allocation14_spill] sm:$0xff] %v11079_v39  ;;  %v11081_v4 = vpop.f32.mrb[31].mxu0 }
 0x34f   : > { %11752 = vst [vmem:[#allocation15_spill] sm:$0xff] %v11081_v4  ;;  %8556 = vmatmul.mubr.msk.bf16.gmra.mrb[56].mxu1 %vm1059_vm1, %v10715_v9  ;;  %v9586_v4 = vld [vmem:[%s9951_s30 + $0x1b8] sm:$0xff]  }
 0x350   : > { %8124 = vmatmul.mubr.msk.bf16.gmra.mrb[136].mxu0 %vm1059_vm1, %v9585_v3  ;;  %8559 = vmatprep.mubr.msk.bf16.mxu1 %vm9685_vm0, %v9684_v1 }
 0x351   : > { %8127 = vmatprep.mubr.msk.bf16.mxu0 %vm9685_vm0, %v9684_v1 }
 0x353   : > { %v11089_v8 = vpop.f32.mrb[32].mxu0 }
 0x354   : > { %11753 = vst [vmem:[#allocation16_spill] sm:$0xff] %v11089_v8  ;;  %v11091_v41 = vpop.f32.mrb[33].mxu0 }
 0x355   : > { %11754 = vst [vmem:[#allocation17_spill] sm:$0xff] %v11091_v41  ;;  %v11095_v39 = vpop.f32.mrb[34].mxu0 }
 0x356   : > { %11755 = vst [vmem:[#allocation18_spill] sm:$0xff] %v11095_v39  ;;  %v11097_v6 = vpop.f32.mrb[35].mxu0 }
 0x357   : > { %11756 = vst [vmem:[#allocation19_spill] sm:$0xff] %v11097_v6  ;;  %8560 = vmatmul.mubr.msk.bf16.gmra.mrb[60].mxu1 %vm1059_vm1, %v10726_v10  ;;  %v9587_v6 = vld [vmem:[%s9951_s30 + $0x1c0] sm:$0xff]  }
 0x358   : > { %8128 = vmatmul.mubr.msk.bf16.gmra.mrb[140].mxu0 %vm1059_vm1, %v9586_v4  ;;  %8563 = vmatprep.mubr.msk.bf16.mxu1 %vm9685_vm0, %v9684_v1 }
 0x359   : > { %8131 = vmatprep.mubr.msk.bf16.mxu0 %vm9685_vm0, %v9684_v1 }
 0x35b   : > { %v11105_v9 = vpop.f32.mrb[36].mxu0 }
 0x35c   : > { %11757 = vst [vmem:[#allocation20_spill] sm:$0xff] %v11105_v9  ;;  %v11107_v3 = vpop.f32.mrb[37].mxu0 }
 0x35d   : > { %11758 = vst [vmem:[#allocation21_spill] sm:$0xff] %v11107_v3  ;;  %v11111_v39 = vpop.f32.mrb[38].mxu0 }
 0x35e   : > { %11759 = vst [vmem:[#allocation22_spill] sm:$0xff] %v11111_v39  ;;  %v11113_v8 = vpop.f32.mrb[39].mxu0 }
 0x35f   : > { %11760 = vst [vmem:[#allocation23_spill] sm:$0xff] %v11113_v8  ;;  %8564 = vmatmul.mubr.msk.bf16.gmra.mrb[64].mxu1 %vm1059_vm1, %v10729_v11  ;;  %v9588_v8 = vld [vmem:[%s9951_s30 + $0x1c8] sm:$0xff]  }
 0x360   : > { %8132 = vmatmul.mubr.msk.bf16.gmra.mrb[144].mxu0 %vm1059_vm1, %v9587_v6  ;;  %8567 = vmatprep.mubr.msk.bf16.mxu1 %vm9685_vm0, %v9684_v1 }
 0x361   : > { %8135 = vmatprep.mubr.msk.bf16.mxu0 %vm9685_vm0, %v9684_v1 }
 0x363   : > { %v11121_v10 = vpop.f32.mrb[40].mxu0 }
 0x364   : > { %11761 = vst [vmem:[#allocation24_spill] sm:$0xff] %v11121_v10  ;;  %v11123_v4 = vpop.f32.mrb[41].mxu0 }
 0x365   : > { %11762 = vst [vmem:[#allocation25_spill] sm:$0xff] %v11123_v4  ;;  %v11127_v39 = vpop.f32.mrb[42].mxu0 }
 0x366   : > { %11763 = vst [vmem:[#allocation26_spill] sm:$0xff] %v11127_v39  ;;  %v11129_v9 = vpop.f32.mrb[43].mxu0 }
 0x367   : > { %11764 = vst [vmem:[#allocation27_spill] sm:$0xff] %v11129_v9  ;;  %8568 = vmatmul.mubr.msk.bf16.gmra.mrb[68].mxu1 %vm1059_vm1, %v10740_v12  ;;  %v9589_v9 = vld [vmem:[%s9951_s30 + $0x1d0] sm:$0xff]  }
 0x368   : > { %8136 = vmatmul.mubr.msk.bf16.gmra.mrb[148].mxu0 %vm1059_vm1, %v9588_v8  ;;  %8571 = vmatprep.mubr.msk.bf16.mxu1 %vm9685_vm0, %v9684_v1 }
 0x369   : > { %8139 = vmatprep.mubr.msk.bf16.mxu0 %vm9685_vm0, %v9684_v1 }
 0x36b   : > { %v11137_v11 = vpop.f32.mrb[44].mxu0 }
 0x36c   : > { %11765 = vst [vmem:[#allocation28_spill] sm:$0xff] %v11137_v11  ;;  %v11139_v6 = vpop.f32.mrb[45].mxu0 }
 0x36d   : > { %11766 = vst [vmem:[#allocation29_spill] sm:$0xff] %v11139_v6  ;;  %v11143_v39 = vpop.f32.mrb[46].mxu0  ;;  %v11279_v6 = vld [vmem:[%s11735_s3] ss:$0 sm:$0xff] }
 0x36e   : > { %11767 = vst [vmem:[#allocation30_spill] sm:$0xff] %v11143_v39  ;;  %v11145_v10 = vpop.f32.mrb[47].mxu0 }
 0x36f   : > { %11768 = vst [vmem:[#allocation31_spill] sm:$0xff] %v11145_v10  ;;  %8572 = vmatmul.mubr.msk.bf16.gmra.mrb[72].mxu1 %vm1059_vm1, %v10743_v13  ;;  %v9590_v10 = vld [vmem:[%s9951_s30 + $0x1d8] sm:$0xff]  }
 0x370   : > { %8140 = vmatmul.mubr.msk.bf16.gmra.mrb[152].mxu0 %vm1059_vm1, %v9589_v9  ;;  %8575 = vmatprep.mubr.msk.bf16.mxu1 %vm9685_vm0, %v9684_v1 }
 0x371   : > { %8143 = vmatprep.mubr.msk.bf16.mxu0 %vm9685_vm0, %v9684_v1 }
 0x373   : > { %v11153_v12 = vpop.f32.mrb[48].mxu0 }
 0x374   : > { %11769 = vst [vmem:[#allocation32_spill] sm:$0xff] %v11153_v12  ;;  %v11155_v8 = vpop.f32.mrb[49].mxu0 }
 0x375   : > { %11770 = vst [vmem:[#allocation33_spill] sm:$0xff] %v11155_v8  ;;  %v11159_v39 = vpop.f32.mrb[50].mxu0 }
 0x376   : > { %11771 = vst [vmem:[#allocation34_spill] sm:$0xff] %v11159_v39  ;;  %v11161_v11 = vpop.f32.mrb[51].mxu0 }
 0x377   : > { %11772 = vst [vmem:[#allocation35_spill] sm:$0xff] %v11161_v11  ;;  %8576 = vmatmul.mubr.msk.bf16.gmra.mrb[76].mxu1 %vm1059_vm1, %v10754_v14  ;;  %v9591_v11 = vld [vmem:[%s9951_s30 + $0x1e0] sm:$0xff]  }
 0x378   : > { %8144 = vmatmul.mubr.msk.bf16.gmra.mrb[156].mxu0 %vm1059_vm1, %v9590_v10  ;;  %8579 = vmatprep.mubr.msk.bf16.mxu1 %vm9685_vm0, %v9684_v1 }
 0x379   : > { %8147 = vmatprep.mubr.msk.bf16.mxu0 %vm9685_vm0, %v9684_v1 }
 0x37b   : > { %v11169_v13 = vpop.f32.mrb[52].mxu0 }
 0x37c   : > { %11773 = vst [vmem:[#allocation36_spill] sm:$0xff] %v11169_v13  ;;  %v11171_v9 = vpop.f32.mrb[53].mxu0 }
 0x37d   : > { %11774 = vst [vmem:[#allocation37_spill] sm:$0xff] %v11171_v9  ;;  %v11175_v39 = vpop.f32.mrb[54].mxu0  ;;  %v9597_v9 = vld [vmem:[%s9951_s30 + $0x210] sm:$0xff]  }
 0x37e   : > { %11775 = vst [vmem:[#allocation38_spill] sm:$0xff] %v11175_v39  ;;  %v11177_v12 = vpop.f32.mrb[55].mxu0 }
 0x37f   : > { %11776 = vst [vmem:[#allocation39_spill] sm:$0xff] %v11177_v12  ;;  %8580 = vmatmul.mubr.msk.bf16.gmra.mrb[80].mxu1 %vm1059_vm1, %v10757_v15  ;;  %v9592_v12 = vld [vmem:[%s9951_s30 + $0x1e8] sm:$0xff]  }
 0x380   : > { %8148 = vmatmul.mubr.msk.bf16.gmra.mrb[160].mxu0 %vm1059_vm1, %v9591_v11  ;;  %8583 = vmatprep.mubr.msk.bf16.mxu1 %vm9685_vm0, %v9684_v1 }
 0x381   : > { %8151 = vmatprep.mubr.msk.bf16.mxu0 %vm9685_vm0, %v9684_v1 }
 0x383   : > { %v11185_v14 = vpop.f32.mrb[56].mxu0 }
 0x384   : > { %11777 = vst [vmem:[#allocation40_spill] sm:$0xff] %v11185_v14  ;;  %v11187_v10 = vpop.f32.mrb[57].mxu0 }
 0x385   : > { %11778 = vst [vmem:[#allocation41_spill] sm:$0xff] %v11187_v10  ;;  %v11191_v39 = vpop.f32.mrb[58].mxu0 }
 0x386   : > { %11779 = vst [vmem:[#allocation42_spill] sm:$0xff] %v11191_v39  ;;  %v11193_v13 = vpop.f32.mrb[59].mxu0 }
 0x387   : > { %11780 = vst [vmem:[#allocation43_spill] sm:$0xff] %v11193_v13  ;;  %8584 = vmatmul.mubr.msk.bf16.gmra.mrb[84].mxu1 %vm1059_vm1, %v10768_v16  ;;  %v9593_v13 = vld [vmem:[%s9951_s30 + $0x1f0] sm:$0xff]  }
 0x388   : > { %8152 = vmatmul.mubr.msk.bf16.gmra.mrb[164].mxu0 %vm1059_vm1, %v9592_v12  ;;  %8587 = vmatprep.mubr.msk.bf16.mxu1 %vm9685_vm0, %v9684_v1 }
 0x389   : > { %8155 = vmatprep.mubr.msk.bf16.mxu0 %vm9685_vm0, %v9684_v1 }
 0x38b   : > { %v11201_v15 = vpop.f32.mrb[60].mxu0 }
 0x38c   : > { %11781 = vst [vmem:[#allocation44_spill] sm:$0xff] %v11201_v15  ;;  %v11203_v11 = vpop.f32.mrb[61].mxu0 }
 0x38d   : > { %11782 = vst [vmem:[#allocation45_spill] sm:$0xff] %v11203_v11  ;;  %v11207_v39 = vpop.f32.mrb[62].mxu0 }
 0x38e   : > { %11783 = vst [vmem:[#allocation46_spill] sm:$0xff] %v11207_v39  ;;  %v11209_v14 = vpop.f32.mrb[63].mxu0 }
 0x38f   : > { %11784 = vst [vmem:[#allocation47_spill] sm:$0xff] %v11209_v14  ;;  %8588 = vmatmul.mubr.msk.bf16.gmra.mrb[88].mxu1 %vm1059_vm1, %v10771_v17  ;;  %v9594_v14 = vld [vmem:[%s9951_s30 + $0x1f8] sm:$0xff]  }
 0x390   : > { %8156 = vmatmul.mubr.msk.bf16.gmra.mrb[168].mxu0 %vm1059_vm1, %v9593_v13  ;;  %8591 = vmatprep.mubr.msk.bf16.mxu1 %vm9685_vm0, %v9684_v1 }
 0x391   : > { %8159 = vmatprep.mubr.msk.bf16.mxu0 %vm9685_vm0, %v9684_v1 }
 0x393   : > { %v11217_v16 = vpop.f32.mrb[64].mxu0 }
 0x394   : > { %11785 = vst [vmem:[#allocation48_spill] sm:$0xff] %v11217_v16  ;;  %v11219_v12 = vpop.f32.mrb[65].mxu0 }
 0x395   : > { %11786 = vst [vmem:[#allocation49_spill] sm:$0xff] %v11219_v12  ;;  %v11223_v39 = vpop.f32.mrb[66].mxu0 }
 0x396   : > { %11787 = vst [vmem:[#allocation50_spill] sm:$0xff] %v11223_v39  ;;  %v11225_v15 = vpop.f32.mrb[67].mxu0 }
 0x397   : > { %11788 = vst [vmem:[#allocation51_spill] sm:$0xff] %v11225_v15  ;;  %8592 = vmatmul.mubr.msk.bf16.gmra.mrb[92].mxu1 %vm1059_vm1, %v10782_v18  ;;  %v9595_v15 = vld [vmem:[%s9951_s30 + $0x200] sm:$0xff]  }
 0x398   : > { %8160 = vmatmul.mubr.msk.bf16.gmra.mrb[172].mxu0 %vm1059_vm1, %v9594_v14  ;;  %8595 = vmatprep.mubr.msk.bf16.mxu1 %vm9685_vm0, %v9684_v1 }
 0x399   : > { %8163 = vmatprep.mubr.msk.bf16.mxu0 %vm9685_vm0, %v9684_v1 }
 0x39b   : > { %v7977_v17 = vpop.f32.mrb[68].mxu0 }
 0x39c   : > { %v11233_v13 = vpop.f32.mrb[69].mxu0 }
 0x39d   : > { %11789 = vst [vmem:[#allocation52_spill] sm:$0xff] %v11233_v13  ;;  %v7978_v16 = vpop.f32.mrb[70].mxu0 }
 0x39e   : > { %v11237_v39 = vpop.f32.mrb[71].mxu0 }
 0x39f   : > { %11790 = vst [vmem:[#allocation53_spill] sm:$0xff] %v11237_v39  ;;  %8596 = vmatmul.mubr.msk.bf16.gmra.mrb[96].mxu1 %vm1059_vm1, %v10785_v19  ;;  %v9596_v39 = vld [vmem:[%s9951_s30 + $0x208] sm:$0xff]  }
 0x3a0   : > { %8164 = vmatmul.mubr.msk.bf16.gmra.mrb[176].mxu0 %vm1059_vm1, %v9595_v15  ;;  %8599 = vmatprep.mubr.msk.bf16.mxu1 %vm9685_vm0, %v9684_v1 }
 0x3a1   : > { %8167 = vmatprep.mubr.msk.bf16.mxu0 %vm9685_vm0, %v9684_v1 }
 0x3a3   : > { %v11245_v18 = vpop.f32.mrb[72].mxu0 }
 0x3a4   : > { %v3809_v14 = vpop.f32.mrb[73].mxu0 }
 0x3a5   : > { %v11249_v13 = vpop.f32.mrb[74].mxu0 }
 0x3a6   : > { %v3812_v12 = vpop.f32.mrb[75].mxu0 }
 0x3a7   : > { %8600 = vmatmul.mubr.msk.bf16.gmra.mrb[100].mxu1 %vm1059_vm1, %v10796_v20 }
 0x3a8   : > { %8168 = vmatmul.mubr.msk.bf16.gmra.mrb[180].mxu0 %vm1059_vm1, %v9596_v39  ;;  %8603 = vmatprep.mubr.msk.bf16.mxu1 %vm9685_vm0, %v9684_v1 }
 0x3a9   : > { %8171 = vmatprep.mubr.msk.bf16.mxu0 %vm9685_vm0, %v9684_v1 }
 0x3ab   : > { %v11257_v15 = vpop.f32.mrb[76].mxu0 }
 0x3ac   : > { %v11259_v19 = vpop.f32.mrb[77].mxu0 }
 0x3ad   : > { %v11263_v11 = vpop.f32.mrb[78].mxu0 }
 0x3ae   : > { %v11265_v10 = vpop.f32.mrb[79].mxu0 }
 0x3af   : > { %8604 = vmatmul.mubr.msk.bf16.gmra.mrb[104].mxu1 %vm1059_vm1, %v10799_v21 }
 0x3b0   : > { %8172 = vmatmul.mubr.msk.bf16.gmra.mrb[184].mxu0 %vm1059_vm1, %v9597_v9  ;;  %8607 = vmatprep.mubr.msk.bf16.mxu1 %vm9685_vm0, %v9684_v1 }
 0x3b1   : > { %8175 = vmatprep.mubr.msk.bf16.mxu0 %vm9685_vm0, %v9684_v1 }
 0x3b3   : > { %v4037_v20 = vpop.f32.mrb[80].mxu0 }
 0x3b4   : > { %v8659_v39 = vadd.f32 %v10307_v43, %v4037_v20  ;;  %v7993_v8 = vpop.f32.mrb[81].mxu0 }
 0x3b5   : > { %v4040_v4 = vpop.f32.mrb[82].mxu0 }
 0x3b6   : > { %v6253_v9 = vadd.f32 %v8659_v39, %v7977_v17  ;;  %v8660_v3 = vadd.f32 %v10309_v45, %v4040_v4  ;;  %v7994_v41 = vpop.f32.mrb[83].mxu0 }
 0x3b7   : > { %8608 = vmatmul.mubr.msk.bf16.gmra.mrb[108].mxu1 %vm1059_vm1, %v10810_v22 }
 0x3b8   : > { %v6263_v21 = vadd.f32 %v11279_v6, %v6253_v9  ;;  %v6254_v2 = vadd.f32 %v8660_v3, %v7978_v16  ;;  %8176 = vmatmul.mubr.msk.bf16.gmra.mrb[188].mxu0 %vm1059_vm1, %v9598_v56  ;;  %8611 = vmatprep.mubr.msk.bf16.mxu1 %vm9685_vm0, %v9684_v1 }
 0x3b9   : > { %8179 = vmatprep.mubr.msk.bf16.mxu0 %vm9685_vm0, %v9684_v1 }
 0x3ba   : > { %v6273_v43 = vmul.f32 0.2, %v6263_v21  ;;  %v6264_v8 = vadd.f32 %v11279_v6, %v6254_v2 }
 0x3bb   : > { %v4045_v45 = vpop.f32.mrb[84].mxu0 }
 0x3bc   : > { %v6283_v56 = vmax.f32 %v6263_v21, %v6273_v43  ;;  %v6274_v41 = vmul.f32 0.2, %v6264_v8  ;;  %v8661_v3 = vadd.f32 %v10324_v49, %v4045_v45  ;;  %v7997_v4 = vpop.f32.mrb[85].mxu0  ;;  %v9599_v21 = vld [vmem:[%s9951_s30 + $0x220] sm:$0xff]  }
 0x3bd   : > { %v4048_v2 = vpop.f32.mrb[86].mxu0 }
 0x3be   : > { %6293 = vst.msk [vmem:[%s11292_s27 + $0x230] sm:$0xff] %vm6182_vm2, %v6283_v56  ;;  %v6284_v16 = vmax.f32 %v6264_v8, %v6274_v41  ;;  %v6255_v17 = vadd.f32 %v8661_v3, %v3809_v14  ;;  %v8662_v20 = vadd.f32 %v10326_v51, %v4048_v2  ;;  %v7998_v39 = vpop.f32.mrb[87].mxu0 }
 0x3bf   : > { %8612 = vmatmul.mubr.msk.bf16.gmra.mrb[112].mxu1 %vm1059_vm1, %v10813_v23 }
 0x3c0   : > { %6294 = vst.msk [vmem:[%s11292_s27 + $0x238] sm:$0xff] %vm6182_vm2, %v6284_v16  ;;  %v6265_v22 = vadd.f32 %v11279_v6, %v6255_v17  ;;  %v6256_v9 = vadd.f32 %v8662_v20, %v3812_v12  ;;  %8180 = vmatmul.mubr.msk.bf16.gmra.mrb[192].mxu0 %vm1059_vm1, %v9599_v21  ;;  %8615 = vmatprep.mubr.msk.bf16.mxu1 %vm9685_vm0, %v9684_v1  ;;  %v9600_v16 = vld [vmem:[%s9951_s30 + $0x228] sm:$0xff]  }
 0x3c1   : > { %8183 = vmatprep.mubr.msk.bf16.mxu0 %vm9685_vm0, %v9684_v1 }
 0x3c2   : > { %v6275_v49 = vmul.f32 0.2, %v6265_v22  ;;  %v6266_v43 = vadd.f32 %v11279_v6, %v6256_v9 }
 0x3c3   : > { %v4053_v51 = vpop.f32.mrb[88].mxu0 }
 0x3c4   : > { %v6285_v14 = vmax.f32 %v6265_v22, %v6275_v49  ;;  %v6276_v8 = vmul.f32 0.2, %v6266_v43  ;;  %v8663_v45 = vadd.f32 %v10339_v55, %v4053_v51  ;;  %v8001_v12 = vpop.f32.mrb[89].mxu0 }
 0x3c5   : > { %v4056_v56 = vpop.f32.mrb[90].mxu0 }
 0x3c6   : > { %6295 = vst.msk [vmem:[%s11292_s27 + $0x240] sm:$0xff] %vm6182_vm2, %v6285_v14  ;;  %v6286_v41 = vmax.f32 %v6266_v43, %v6276_v8  ;;  %v6257_v3 = vadd.f32 %v8663_v45, %v11245_v18  ;;  %v8664_v4 = vadd.f32 %v10341_v57, %v4056_v56  ;;  %v8002_v2 = vpop.f32.mrb[91].mxu0  ;;  %v9601_v14 = vld [vmem:[%s9951_s30 + $0x230] sm:$0xff]  }
 0x3c7   : > { %8616 = vmatmul.mubr.msk.bf16.gmra.mrb[116].mxu1 %vm1059_vm1, %v10824_v24 }
 0x3c8   : > { %6296 = vst.msk [vmem:[%s11292_s27 + $0x248] sm:$0xff] %vm6182_vm2, %v6286_v41  ;;  %v6267_v23 = vadd.f32 %v11279_v6, %v6257_v3  ;;  %v6258_v55 = vadd.f32 %v8664_v4, %v11249_v13  ;;  %8184 = vmatmul.mubr.msk.bf16.gmra.mrb[196].mxu0 %vm1059_vm1, %v9600_v16  ;;  %8619 = vmatprep.mubr.msk.bf16.mxu1 %vm9685_vm0, %v9684_v1 }
 0x3c9   : > { %8187 = vmatprep.mubr.msk.bf16.mxu0 %vm9685_vm0, %v9684_v1 }
 0x3ca   : > { %v6277_v17 = vmul.f32 0.2, %v6267_v23  ;;  %v6268_v18 = vadd.f32 %v11279_v6, %v6258_v55  ;;  %v9602_v55 = vld [vmem:[%s9951_s30 + $0x238] sm:$0xff]  }
 0x3cb   : > { %v4061_v57 = vpop.f32.mrb[92].mxu0 }
 0x3cc   : > { %v6287_v20 = vmax.f32 %v6267_v23, %v6277_v17  ;;  %v6278_v39 = vmul.f32 0.2, %v6268_v18  ;;  %v8665_v22 = vadd.f32 %v10351_v61, %v4061_v57  ;;  %v8005_v13 = vpop.f32.mrb[93].mxu0 }
 0x3cd   : > { %v4064_v9 = vpop.f32.mrb[94].mxu0 }
 0x3ce   : > { %6297 = vst.msk [vmem:[%s11292_s27 + $0x250] sm:$0xff] %vm6182_vm2, %v6287_v20  ;;  %v6288_v21 = vmax.f32 %v6268_v18, %v6278_v39  ;;  %v6259_v49 = vadd.f32 %v8665_v22, %v11259_v19  ;;  %v8666_v43 = vadd.f32 %v10356_v0, %v4064_v9  ;;  %v8006_v51 = vpop.f32.mrb[95].mxu0 }
 0x3cf   : > { %8620 = vmatmul.mubr.msk.bf16.gmra.mrb[120].mxu1 %vm1059_vm1, %v10827_v25 }
 0x3d0   : > { %6298 = vst.msk [vmem:[%s11292_s27 + $0x258] sm:$0xff] %vm6182_vm2, %v6288_v21  ;;  %v6269_v24 = vadd.f32 %v11279_v6, %v6259_v49  ;;  %v6260_v61 = vadd.f32 %v8666_v43, %v11265_v10  ;;  %8188 = vmatmul.mubr.msk.bf16.gmra.mrb[200].mxu0 %vm1059_vm1, %v9601_v14  ;;  %8623 = vmatprep.mubr.msk.bf16.mxu1 %vm9685_vm0, %v9684_v1  ;;  %v9603_v49 = vld [vmem:[%s9951_s30 + $0x240] sm:$0xff]  }
 0x3d1   : > { %8191 = vmatprep.mubr.msk.bf16.mxu0 %vm9685_vm0, %v9684_v1 }
 0x3d2   : > { %v6279_v8 = vmul.f32 0.2, %v6269_v24  ;;  %v6270_v19 = vadd.f32 %v11279_v6, %v6260_v61 }
 0x3d3   : > { %v4069_v0 = vpop.f32.mrb[96].mxu0 }
 0x3d4   : > { %v6289_v45 = vmax.f32 %v6269_v24, %v6279_v8  ;;  %v6280_v12 = vmul.f32 0.2, %v6270_v19  ;;  %v8667_v56 = vadd.f32 %v10366_v5, %v4069_v0  ;;  %v8009_v10 = vpop.f32.mrb[97].mxu0 }
 0x3d5   : > { %v4072_v41 = vpop.f32.mrb[98].mxu0 }
 0x3d6   : > { %6299 = vst.msk [vmem:[%s11292_s27 + $0x260] sm:$0xff] %vm6182_vm2, %v6289_v45  ;;  %v6290_v3 = vmax.f32 %v6270_v19, %v6280_v12  ;;  %v6261_v4 = vadd.f32 %v8667_v56, %v11257_v15  ;;  %v8668_v2 = vadd.f32 %v10369_v7, %v4072_v41  ;;  %v8010_v23 = vpop.f32.mrb[99].mxu0 }
 0x3d7   : > { %8624 = vmatmul.mubr.msk.bf16.gmra.mrb[124].mxu1 %vm1059_vm1, %v10838_v26 }
 0x3d8   : > { %6300 = vst.msk [vmem:[%s11292_s27 + $0x268] sm:$0xff] %vm6182_vm2, %v6290_v3  ;;  %v6271_v25 = vadd.f32 %v11279_v6, %v6261_v4  ;;  %v6262_v5 = vadd.f32 %v8668_v2, %v11263_v11  ;;  %8192 = vmatmul.mubr.msk.bf16.gmra.mrb[204].mxu0 %vm1059_vm1, %v9602_v55  ;;  %8627 = vmatprep.mubr.msk.bf16.mxu1 %vm9685_vm0, %v9684_v1  ;;  %v9604_v4 = vld [vmem:[%s9951_s30 + $0x248] sm:$0xff]  }
 0x3d9   : > { %8195 = vmatprep.mubr.msk.bf16.mxu0 %vm9685_vm0, %v9684_v1 }
 0x3da   : > { %v6281_v16 = vmul.f32 0.2, %v6271_v25  ;;  %v6272_v15 = vadd.f32 %v11279_v6, %v6262_v5  ;;  %v5547_v39 = vpop.f32.mrb[20].mxu1 }
 0x3db   : > { %v4538_v7 = vpop.f32.mrb[100].mxu0  ;;  %v8521_v9 = vpop.f32.mrb[21].mxu1 }
 0x3dc   : > { %v6291_v17 = vmax.f32 %v6271_v25, %v6281_v16  ;;  %v6282_v18 = vmul.f32 0.2, %v6272_v15  ;;  %v8089_v57 = vpop.f32.mrb[101].mxu0  ;;  %v8669_v13 = vadd.f32 %v5547_v39, %v4538_v7  ;;  %v5550_v21 = vpop.f32.mrb[22].mxu1 }
 0x3dd   : > { %v4541_v11 = vpop.f32.mrb[102].mxu0  ;;  %v8522_v51 = vpop.f32.mrb[23].mxu1 }
 0x3de   : > { %6301 = vst.msk [vmem:[%s11292_s27 + $0x270] sm:$0xff] %vm6182_vm2, %v6291_v17  ;;  %v6292_v20 = vmax.f32 %v6272_v15, %v6282_v18  ;;  %v8090_v22 = vpop.f32.mrb[103].mxu0  ;;  %v5896_v26 = vadd.f32 %v8669_v13, %v10963_v44  ;;  %v8670_v43 = vadd.f32 %v5550_v21, %v4541_v11  ;;  %v9605_v13 = vld [vmem:[%s9951_s30 + $0x250] sm:$0xff]  }
 0x3df   : > { %8628 = vmatmul.mubr.msk.bf16.gmra.mrb[128].mxu1 %vm1059_vm1, %v10841_v27 }
 0x3e0   : > { %6302 = vst.msk [vmem:[%s11292_s27 + $0x278] sm:$0xff] %vm6182_vm2, %v6292_v20  ;;  %8196 = vmatmul.mubr.msk.bf16.gmra.mrb[208].mxu0 %vm1059_vm1, %v9603_v49  ;;  %v5972_v24 = vadd.f32 %v11279_v6, %v5896_v26  ;;  %v5897_v61 = vadd.f32 %v8670_v43, %v10969_v47  ;;  %8631 = vmatprep.mubr.msk.bf16.mxu1 %vm9685_vm0, %v9684_v1 }
 0x3e1   : > { %8199 = vmatprep.mubr.msk.bf16.mxu0 %vm9685_vm0, %v9684_v1 }
 0x3e2   : > { %v6042_v44 = vmul.f32 0.2, %v5972_v24  ;;  %v5973_v19 = vadd.f32 %v11279_v6, %v5897_v61  ;;  %v5555_v45 = vpop.f32.mrb[24].mxu1 }
 0x3e3   : > { %v4546_v14 = vpop.f32.mrb[104].mxu0  ;;  %v8525_v47 = vpop.f32.mrb[25].mxu1 }
 0x3e4   : > { %v8093_v8 = vpop.f32.mrb[105].mxu0  ;;  %v6112_v56 = vmax.f32 %v5972_v24, %v6042_v44  ;;  %v6043_v10 = vmul.f32 0.2, %v5973_v19  ;;  %v8671_v41 = vadd.f32 %v5555_v45, %v4546_v14  ;;  %v5558_v3 = vpop.f32.mrb[26].mxu1 }
 0x3e5   : > { %v4549_v0 = vpop.f32.mrb[106].mxu0  ;;  %v8526_v25 = vpop.f32.mrb[27].mxu1 }
 0x3e6   : > { %v8094_v12 = vpop.f32.mrb[107].mxu0  ;;  %6183 = vst.msk [vmem:[%s11292_s27] sm:$0xff] %vm6182_vm2, %v6112_v56  ;;  %v6113_v27 = vmax.f32 %v5973_v19, %v6043_v10  ;;  %v5898_v2 = vadd.f32 %v8671_v41, %v10961_v42  ;;  %v8672_v23 = vadd.f32 %v5558_v3, %v4549_v0  ;;  %v9606_v56 = vld [vmem:[%s9951_s30 + $0x258] sm:$0xff]  }
 0x3e7   : > { %8632 = vmatmul.mubr.msk.bf16.gmra.mrb[132].mxu1 %vm1059_vm1, %v10852_v28 }
 0x3e8   : > { %8200 = vmatmul.mubr.msk.bf16.gmra.mrb[212].mxu0 %vm1059_vm1, %v9604_v4  ;;  %6184 = vst.msk [vmem:[%s11292_s27 + $0x8] sm:$0xff] %vm6182_vm2, %v6113_v27  ;;  %v5974_v5 = vadd.f32 %v11279_v6, %v5898_v2  ;;  %v5899_v55 = vadd.f32 %v8672_v23, %v10967_v46  ;;  %8635 = vmatprep.mubr.msk.bf16.mxu1 %vm9685_vm0, %v9684_v1 }
 0x3e9   : > { %8203 = vmatprep.mubr.msk.bf16.mxu0 %vm9685_vm0, %v9684_v1 }
 0x3ea   : > { %v6044_v42 = vmul.f32 0.2, %v5974_v5  ;;  %v5975_v7 = vadd.f32 %v11279_v6, %v5899_v55  ;;  %v5563_v18 = vpop.f32.mrb[28].mxu1 }
 0x3eb   : > { %v4554_v16 = vpop.f32.mrb[108].mxu0  ;;  %v8529_v46 = vpop.f32.mrb[29].mxu1 }
 0x3ec   : > { %v8097_v15 = vpop.f32.mrb[109].mxu0  ;;  %v6114_v11 = vmax.f32 %v5974_v5, %v6044_v42  ;;  %v6045_v20 = vmul.f32 0.2, %v5975_v7  ;;  %v8673_v39 = vadd.f32 %v5563_v18, %v4554_v16  ;;  %v5566_v22 = vpop.f32.mrb[30].mxu1 }
 0x3ed   : > { %v4557_v17 = vpop.f32.mrb[110].mxu0  ;;  %v8530_v49 = vpop.f32.mrb[31].mxu1 }
 0x3ee   : > { %v8098_v57 = vpop.f32.mrb[111].mxu0  ;;  %6185 = vst.msk [vmem:[%s11292_s27 + $0x10] sm:$0xff] %vm6182_vm2, %v6114_v11  ;;  %v6115_v28 = vmax.f32 %v5975_v7, %v6045_v20  ;;  %v5900_v9 = vadd.f32 %v8673_v39, %v10979_v52  ;;  %v8674_v21 = vadd.f32 %v5566_v22, %v4557_v17  ;;  %v9607_v17 = vld [vmem:[%s9951_s30 + $0x260] sm:$0xff]  }
 0x3ef   : > { %8636 = vmatmul.mubr.msk.bf16.gmra.mrb[136].mxu1 %vm1059_vm1, %v10855_v29 }
 0x3f0   : > { %8204 = vmatmul.mubr.msk.bf16.gmra.mrb[216].mxu0 %vm1059_vm1, %v9605_v13  ;;  %6186 = vst.msk [vmem:[%s11292_s27 + $0x18] sm:$0xff] %vm6182_vm2, %v6115_v28  ;;  %v5976_v26 = vadd.f32 %v11279_v6, %v5900_v9  ;;  %v5901_v43 = vadd.f32 %v8674_v21, %v10985_v54  ;;  %8639 = vmatprep.mubr.msk.bf16.mxu1 %vm9685_vm0, %v9684_v1 }
 0x3f1   : > { %8207 = vmatprep.mubr.msk.bf16.mxu0 %vm9685_vm0, %v9684_v1 }
 0x3f2   : > { %v6046_v52 = vmul.f32 0.2, %v5976_v26  ;;  %v5977_v61 = vadd.f32 %v11279_v6, %v5901_v43  ;;  %v5571_v8 = vpop.f32.mrb[32].mxu1 }
 0x3f3   : > { %v4562_v51 = vpop.f32.mrb[112].mxu0  ;;  %v8533_v54 = vpop.f32.mrb[33].mxu1 }
 0x3f4   : > { %v8101_v24 = vpop.f32.mrb[113].mxu0  ;;  %v6116_v19 = vmax.f32 %v5976_v26, %v6046_v52  ;;  %v6047_v0 = vmul.f32 0.2, %v5977_v61  ;;  %v8675_v45 = vadd.f32 %v5571_v8, %v4562_v51  ;;  %v5574_v12 = vpop.f32.mrb[34].mxu1 }
 0x3f5   : > { %v4565_v14 = vpop.f32.mrb[114].mxu0  ;;  %v8534_v47 = vpop.f32.mrb[35].mxu1  ;;  %v9608_v24 = vld [vmem:[%s9951_s30 + $0x268] sm:$0xff]  }
 0x3f6   : > { %v8102_v44 = vpop.f32.mrb[115].mxu0  ;;  %6187 = vst.msk [vmem:[%s11292_s27 + $0x20] sm:$0xff] %vm6182_vm2, %v6116_v19  ;;  %v6117_v29 = vmax.f32 %v5977_v61, %v6047_v0  ;;  %v5902_v10 = vadd.f32 %v8675_v45, %v10977_v50  ;;  %v8676_v41 = vadd.f32 %v5574_v12, %v4565_v14 }
 0x3f7   : > { %8640 = vmatmul.mubr.msk.bf16.gmra.mrb[140].mxu1 %vm1059_vm1, %v10866_v30 }
 0x3f8   : > { %8208 = vmatmul.mubr.msk.bf16.gmra.mrb[220].mxu0 %vm1059_vm1, %v9606_v56  ;;  %6188 = vst.msk [vmem:[%s11292_s27 + $0x28] sm:$0xff] %vm6182_vm2, %v6117_v29  ;;  %v5978_v3 = vadd.f32 %v11279_v6, %v5902_v10  ;;  %v5903_v4 = vadd.f32 %v8676_v41, %v10983_v53  ;;  %8643 = vmatprep.mubr.msk.bf16.mxu1 %vm9685_vm0, %v9684_v1 }
 0x3f9   : > { %8211 = vmatprep.mubr.msk.bf16.mxu0 %vm9685_vm0, %v9684_v1 }
 0x3fa   : > { %v6048_v50 = vmul.f32 0.2, %v5978_v3  ;;  %v5979_v23 = vadd.f32 %v11279_v6, %v5903_v4  ;;  %v5579_v5 = vpop.f32.mrb[36].mxu1 }
 0x3fb   : > { %v4570_v27 = vpop.f32.mrb[116].mxu0  ;;  %v8537_v53 = vpop.f32.mrb[37].mxu1 }
 0x3fc   : > { %v8105_v2 = vpop.f32.mrb[117].mxu0  ;;  %v6118_v16 = vmax.f32 %v5978_v3, %v6048_v50  ;;  %v6049_v15 = vmul.f32 0.2, %v5979_v23  ;;  %v8677_v42 = vadd.f32 %v5579_v5, %v4570_v27  ;;  %v5582_v7 = vpop.f32.mrb[38].mxu1  ;;  %v9609_v3 = vld [vmem:[%s9951_s30 + $0x270] sm:$0xff]  }
 0x3fd   : > { %v4573_v25 = vpop.f32.mrb[118].mxu0  ;;  %v8538_v11 = vpop.f32.mrb[39].mxu1 }
 0x3fe   : > { %v8106_v55 = vpop.f32.mrb[119].mxu0  ;;  %6189 = vst.msk [vmem:[%s11292_s27 + $0x30] sm:$0xff] %vm6182_vm2, %v6118_v16  ;;  %v6119_v30 = vmax.f32 %v5979_v23, %v6049_v15  ;;  %v5904_v18 = vadd.f32 %v8677_v42, %v10995_v59  ;;  %v8678_v57 = vadd.f32 %v5582_v7, %v4573_v25 }
 0x3ff   : > { %8644 = vmatmul.mubr.msk.bf16.gmra.mrb[144].mxu1 %vm1059_vm1, %v10869_v31 }
 0x400   : > { %8212 = vmatmul.mubr.msk.bf16.gmra.mrb[224].mxu0 %vm1059_vm1, %v9607_v17  ;;  %6190 = vst.msk [vmem:[%s11292_s27 + $0x38] sm:$0xff] %vm6182_vm2, %v6119_v30  ;;  %v5980_v20 = vadd.f32 %v11279_v6, %v5904_v18  ;;  %v5905_v39 = vadd.f32 %v8678_v57, %v11001_v62  ;;  %8647 = vmatprep.mubr.msk.bf16.mxu1 %vm9685_vm0, %v9684_v1  ;;  %v9610_v18 = vld [vmem:[%s9951_s30 + $0x278] sm:$0xff]  }
 0x401   : > { %8215 = vmatprep.mubr.msk.bf16.mxu0 %vm9685_vm0, %v9684_v1 }
 0x402   : > { %v6050_v59 = vmul.f32 0.2, %v5980_v20  ;;  %v5981_v13 = vadd.f32 %v11279_v6, %v5905_v39  ;;  %v5587_v9 = vpop.f32.mrb[40].mxu1 }
 0x403   : > { %v4578_v46 = vpop.f32.mrb[120].mxu0  ;;  %v8541_v62 = vpop.f32.mrb[41].mxu1 }
 0x404   : > { %v8109_v22 = vpop.f32.mrb[121].mxu0  ;;  %v6120_v49 = vmax.f32 %v5980_v20, %v6050_v59  ;;  %v6051_v26 = vmul.f32 0.2, %v5981_v13  ;;  %v8679_v43 = vadd.f32 %v5587_v9, %v4578_v46  ;;  %v5590_v51 = vpop.f32.mrb[42].mxu1 }
 0x405   : > { %v4581_v28 = vpop.f32.mrb[122].mxu0  ;;  %v8542_v14 = vpop.f32.mrb[43].mxu1 }
 0x406   : > { %v8110_v21 = vpop.f32.mrb[123].mxu0  ;;  %6191 = vst.msk [vmem:[%s11292_s27 + $0x40] sm:$0xff] %vm6182_vm2, %v6120_v49  ;;  %v6121_v31 = vmax.f32 %v5981_v13, %v6051_v26  ;;  %v5906_v52 = vadd.f32 %v8679_v43, %v10993_v58  ;;  %v8680_v61 = vadd.f32 %v5590_v51, %v4581_v28 }
 0x407   : > { %8648 = vmatmul.mubr.msk.bf16.gmra.mrb[148].mxu1 %vm1059_vm1, %v10880_v32 }
 0x408   : > { %8216 = vmatmul.mubr.msk.bf16.gmra.mrb[228].mxu0 %vm1059_vm1, %v9608_v24  ;;  %6192 = vst.msk [vmem:[%s11292_s27 + $0x48] sm:$0xff] %vm6182_vm2, %v6121_v31  ;;  %v5982_v8 = vadd.f32 %v11279_v6, %v5906_v52  ;;  %v5907_v44 = vadd.f32 %v8680_v61, %v10999_v60  ;;  %8651 = vmatprep.mubr.msk.bf16.mxu1 %vm9685_vm0, %v9684_v1 }
 0x409   : > { %8219 = vmatprep.mubr.msk.bf16.mxu0 %vm9685_vm0, %v9684_v1 }
 0x40a   : > { %v6052_v58 = vmul.f32 0.2, %v5982_v8  ;;  %v5983_v45 = vadd.f32 %v11279_v6, %v5907_v44  ;;  %v5595_v12 = vpop.f32.mrb[44].mxu1 }
 0x40b   : > { %v4586_v19 = vpop.f32.mrb[124].mxu0  ;;  %v8545_v60 = vpop.f32.mrb[45].mxu1 }
 0x40c   : > { %v8113_v0 = vpop.f32.mrb[125].mxu0  ;;  %v6122_v29 = vmax.f32 %v5982_v8, %v6052_v58  ;;  %v6053_v10 = vmul.f32 0.2, %v5983_v45  ;;  %v8681_v41 = vadd.f32 %v5595_v12, %v4586_v19  ;;  %v5598_v47 = vpop.f32.mrb[46].mxu1 }
 0x40d   : > { %v4589_v54 = vpop.f32.mrb[126].mxu0  ;;  %v8546_v2 = vpop.f32.mrb[47].mxu1 }
 0x40e   : > { %v8114_v56 = vpop.f32.mrb[127].mxu0  ;;  %6193 = vst.msk [vmem:[%s11292_s27 + $0x50] sm:$0xff] %vm6182_vm2, %v6122_v29  ;;  %v6123_v32 = vmax.f32 %v5983_v45, %v6053_v10  ;;  %v5908_v4 = vadd.f32 %v8681_v41, %v11011_v36  ;;  %v8682_v27 = vadd.f32 %v5598_v47, %v4589_v54  ;;  %v11791_v10 = vld [vmem:[#allocation3_spill] sm:$0xff] }
 0x40f   : > { %8652 = vmatmul.mubr.msk.bf16.gmra.mrb[152].mxu1 %vm1059_vm1, %v10883_v33 }
 0x410   : > { %8220 = vmatmul.mubr.msk.bf16.gmra.mrb[232].mxu0 %vm1059_vm1, %v9609_v3  ;;  %6194 = vst.msk [vmem:[%s11292_s27 + $0x58] sm:$0xff] %vm6182_vm2, %v6123_v32  ;;  %v5984_v50 = vadd.f32 %v11279_v6, %v5908_v4  ;;  %v5909_v23 = vadd.f32 %v8682_v27, %v11017_v38  ;;  %8655 = vmatprep.mubr.msk.bf16.mxu1 %vm9685_vm0, %v9684_v1  ;;  %v11792_v3 = vld [vmem:[#allocation4_spill] sm:$0xff] }
 0x411   : > { %8223 = vmatprep.mubr.msk.bf16.mxu0 %vm9685_vm0, %v9684_v1 }
 0x412   : > { %v6054_v36 = vmul.f32 0.2, %v5984_v50  ;;  %v5985_v55 = vadd.f32 %v11279_v6, %v5909_v23  ;;  %v5603_v15 = vpop.f32.mrb[48].mxu1 }
 0x413   : > { %v4594_v25 = vpop.f32.mrb[128].mxu0  ;;  %v8549_v38 = vpop.f32.mrb[49].mxu1 }
 0x414   : > { %v8117_v5 = vpop.f32.mrb[129].mxu0  ;;  %v6124_v53 = vmax.f32 %v5984_v50, %v6054_v36  ;;  %v6055_v7 = vmul.f32 0.2, %v5985_v55  ;;  %v8683_v17 = vadd.f32 %v5603_v15, %v4594_v25  ;;  %v5606_v30 = vpop.f32.mrb[50].mxu1 }
 0x415   : > { %v4597_v16 = vpop.f32.mrb[130].mxu0  ;;  %v8550_v11 = vpop.f32.mrb[51].mxu1 }
 0x416   : > { %v8118_v42 = vpop.f32.mrb[131].mxu0  ;;  %6195 = vst.msk [vmem:[%s11292_s27 + $0x60] sm:$0xff] %vm6182_vm2, %v6124_v53  ;;  %v6125_v33 = vmax.f32 %v5985_v55, %v6055_v7  ;;  %v5910_v1 = vadd.f32 %v8683_v17, %v11009_v63  ;;  %v8684_v57 = vadd.f32 %v5606_v30, %v4597_v16 }
 0x417   : > { %8656 = vmatmul.mubr.msk.bf16.gmra.mrb[156].mxu1 %vm1059_vm1, %v10894_v34 }
 0x418   : > { %8224 = vmatmul.mubr.msk.bf16.gmra.mrb[236].mxu0 %vm1059_vm1, %v9610_v18  ;;  %6196 = vst.msk [vmem:[%s11292_s27 + $0x68] sm:$0xff] %vm6182_vm2, %v6125_v33  ;;  %v5986_v20 = vadd.f32 %v11279_v6, %v5910_v1  ;;  %v5911_v39 = vadd.f32 %v8684_v57, %v11015_v37  ;;  %v11793_v18 = vld [vmem:[#allocation7_spill] sm:$0xff] }
 0x41a   : > { %v6056_v59 = vmul.f32 0.2, %v5986_v20  ;;  %v5987_v13 = vadd.f32 %v11279_v6, %v5911_v39  ;;  %v5611_v63 = vpop.f32.mrb[52].mxu1 }
 0x41b   : > { %v4602_v46 = vpop.f32.mrb[132].mxu0  ;;  %v8553_v43 = vpop.f32.mrb[53].mxu1 }
 0x41c   : > { %v8121_v22 = vpop.f32.mrb[133].mxu0  ;;  %v6126_v21 = vmax.f32 %v5986_v20, %v6056_v59  ;;  %v6057_v49 = vmul.f32 0.2, %v5987_v13  ;;  %v8685_v26 = vadd.f32 %v5611_v63, %v4602_v46  ;;  %v5614_v62 = vpop.f32.mrb[54].mxu1 }
 0x41d   : > { %v4605_v28 = vpop.f32.mrb[134].mxu0  ;;  %v8554_v24 = vpop.f32.mrb[55].mxu1 }
 0x41e   : > { %v8122_v9 = vpop.f32.mrb[135].mxu0  ;;  %6197 = vst.msk [vmem:[%s11292_s27 + $0x70] sm:$0xff] %vm6182_vm2, %v6126_v21  ;;  %v6127_v37 = vmax.f32 %v5987_v13, %v6057_v49  ;;  %v5912_v51 = vadd.f32 %v8685_v26, %v11027_v40  ;;  %v8686_v34 = vadd.f32 %v5614_v62, %v4605_v28  ;;  %v11794_v21 = vld [vmem:[#allocation5_spill] sm:$0xff] }
 0x420   : > { %6198 = vst.msk [vmem:[%s11292_s27 + $0x78] sm:$0xff] %vm6182_vm2, %v6127_v37  ;;  %v5988_v31 = vadd.f32 %v11279_v6, %v5912_v51  ;;  %v5913_v52 = vadd.f32 %v8686_v34, %v11033_v48  ;;  %v11795_v37 = vld [vmem:[#allocation6_spill] sm:$0xff] }
 0x422   : > { %v6058_v8 = vmul.f32 0.2, %v5988_v31  ;;  %v5989_v44 = vadd.f32 %v11279_v6, %v5913_v52  ;;  %v5619_v0 = vpop.f32.mrb[56].mxu1 }
 0x423   : > { %v4610_v61 = vpop.f32.mrb[136].mxu0  ;;  %v8557_v12 = vpop.f32.mrb[57].mxu1 }
 0x424   : > { %v8125_v14 = vpop.f32.mrb[137].mxu0  ;;  %v6128_v45 = vmax.f32 %v5988_v31, %v6058_v8  ;;  %v6059_v40 = vmul.f32 0.2, %v5989_v44  ;;  %v8687_v54 = vadd.f32 %v5619_v0, %v4610_v61  ;;  %v5622_v56 = vpop.f32.mrb[58].mxu1 }
 0x425   : > { %v4613_v19 = vpop.f32.mrb[138].mxu0  ;;  %v8558_v60 = vpop.f32.mrb[59].mxu1 }
 0x426   : > { %v8126_v58 = vpop.f32.mrb[139].mxu0  ;;  %6199 = vst.msk [vmem:[%s11292_s27 + $0x80] sm:$0xff] %vm6182_vm2, %v6128_v45  ;;  %v6129_v29 = vmax.f32 %v5989_v44, %v6059_v40  ;;  %v5914_v41 = vadd.f32 %v8687_v54, %v11791_v10  ;;  %v8688_v48 = vadd.f32 %v5622_v56, %v4613_v19  ;;  %v11796_v54 = vld [vmem:[#allocation9_spill] sm:$0xff] }
 0x428   : > { %6200 = vst.msk [vmem:[%s11292_s27 + $0x88] sm:$0xff] %vm6182_vm2, %v6129_v29  ;;  %v5990_v47 = vadd.f32 %v11279_v6, %v5914_v41  ;;  %v5915_v32 = vadd.f32 %v8688_v48, %v11792_v3  ;;  %v11797_v41 = vld [vmem:[#allocation11_spill] sm:$0xff] }
 0x42a   : > { %v6060_v2 = vmul.f32 0.2, %v5990_v47  ;;  %v5991_v50 = vadd.f32 %v11279_v6, %v5915_v32  ;;  %v5627_v25 = vpop.f32.mrb[60].mxu1 }
 0x42b   : > { %v4618_v4 = vpop.f32.mrb[140].mxu0  ;;  %v8561_v15 = vpop.f32.mrb[61].mxu1 }
 0x42c   : > { %v8129_v27 = vpop.f32.mrb[141].mxu0  ;;  %v6130_v36 = vmax.f32 %v5990_v47, %v6060_v2  ;;  %v6061_v55 = vmul.f32 0.2, %v5991_v50  ;;  %v8689_v16 = vadd.f32 %v5627_v25, %v4618_v4  ;;  %v5630_v42 = vpop.f32.mrb[62].mxu1 }
 0x42d   : > { %v4621_v23 = vpop.f32.mrb[142].mxu0  ;;  %v8562_v38 = vpop.f32.mrb[63].mxu1 }
 0x42e   : > { %v8130_v5 = vpop.f32.mrb[143].mxu0  ;;  %6201 = vst.msk [vmem:[%s11292_s27 + $0x90] sm:$0xff] %vm6182_vm2, %v6130_v36  ;;  %v6131_v53 = vmax.f32 %v5991_v50, %v6061_v55  ;;  %v5916_v7 = vadd.f32 %v8689_v16, %v11043_v35  ;;  %v8690_v17 = vadd.f32 %v5630_v42, %v4621_v23  ;;  %v11798_v16 = vld [vmem:[#allocation8_spill] sm:$0xff] }
 0x430   : > { %6202 = vst.msk [vmem:[%s11292_s27 + $0x98] sm:$0xff] %vm6182_vm2, %v6131_v53  ;;  %v5992_v30 = vadd.f32 %v11279_v6, %v5916_v7  ;;  %v5917_v33 = vadd.f32 %v8690_v17, %v11793_v18  ;;  %v11799_v17 = vld [vmem:[#allocation10_spill] sm:$0xff] }
 0x432   : > { %v6062_v11 = vmul.f32 0.2, %v5992_v30  ;;  %v5993_v20 = vadd.f32 %v11279_v6, %v5917_v33  ;;  %v5635_v46 = vpop.f32.mrb[64].mxu1 }
 0x433   : > { %v4626_v1 = vpop.f32.mrb[144].mxu0  ;;  %v8565_v28 = vpop.f32.mrb[65].mxu1 }
 0x434   : > { %v8133_v57 = vpop.f32.mrb[145].mxu0  ;;  %v6132_v59 = vmax.f32 %v5992_v30, %v6062_v11  ;;  %v6063_v35 = vmul.f32 0.2, %v5993_v20  ;;  %v8691_v13 = vadd.f32 %v5635_v46, %v4626_v1  ;;  %v5638_v63 = vpop.f32.mrb[66].mxu1  ;;  %v11800_v28 = vld [vmem:[#allocation13_spill] sm:$0xff] }
 0x435   : > { %v4629_v39 = vpop.f32.mrb[146].mxu0  ;;  %v8566_v43 = vpop.f32.mrb[67].mxu1 }
 0x436   : > { %v8134_v22 = vpop.f32.mrb[147].mxu0  ;;  %6203 = vst.msk [vmem:[%s11292_s27 + $0xa0] sm:$0xff] %vm6182_vm2, %v6132_v59  ;;  %v6133_v9 = vmax.f32 %v5993_v20, %v6063_v35  ;;  %v5918_v49 = vadd.f32 %v8691_v13, %v11794_v21  ;;  %v8692_v26 = vadd.f32 %v5638_v63, %v4629_v39 }
 0x438   : > { %6204 = vst.msk [vmem:[%s11292_s27 + $0xa8] sm:$0xff] %vm6182_vm2, %v6133_v9  ;;  %v5994_v62 = vadd.f32 %v11279_v6, %v5918_v49  ;;  %v5919_v51 = vadd.f32 %v8692_v26, %v11795_v37  ;;  %v11801_v26 = vld [vmem:[#allocation15_spill] sm:$0xff] }
 0x43a   : > { %v6064_v31 = vmul.f32 0.2, %v5994_v62  ;;  %v5995_v52 = vadd.f32 %v11279_v6, %v5919_v51  ;;  %v5643_v14 = vpop.f32.mrb[68].mxu1 }
 0x43b   : > { %v4634_v34 = vpop.f32.mrb[148].mxu0  ;;  %v8569_v58 = vpop.f32.mrb[69].mxu1 }
 0x43c   : > { %v8137_v24 = vpop.f32.mrb[149].mxu0  ;;  %v6134_v44 = vmax.f32 %v5994_v62, %v6064_v31  ;;  %v6065_v19 = vmul.f32 0.2, %v5995_v52  ;;  %v8693_v0 = vadd.f32 %v5643_v14, %v4634_v34  ;;  %v5646_v45 = vpop.f32.mrb[70].mxu1  ;;  %v11802_v58 = vld [vmem:[#allocation12_spill] sm:$0xff] }
 0x43d   : > { %v4637_v61 = vpop.f32.mrb[150].mxu0  ;;  %v8570_v29 = vpop.f32.mrb[71].mxu1 }
 0x43e   : > { %v8138_v8 = vpop.f32.mrb[151].mxu0  ;;  %6205 = vst.msk [vmem:[%s11292_s27 + $0xb0] sm:$0xff] %vm6182_vm2, %v6134_v44  ;;  %v6135_v40 = vmax.f32 %v5995_v52, %v6065_v19  ;;  %v5920_v12 = vadd.f32 %v8693_v0, %v11796_v54  ;;  %v8694_v56 = vadd.f32 %v5646_v45, %v4637_v61 }
 0x440   : > { %6206 = vst.msk [vmem:[%s11292_s27 + $0xb8] sm:$0xff] %vm6182_vm2, %v6135_v40  ;;  %v5996_v10 = vadd.f32 %v11279_v6, %v5920_v12  ;;  %v5921_v48 = vadd.f32 %v8694_v56, %v11797_v41  ;;  %v11803_v56 = vld [vmem:[#allocation14_spill] sm:$0xff] }
 0x442   : > { %v6066_v3 = vmul.f32 0.2, %v5996_v10  ;;  %v5997_v32 = vadd.f32 %v11279_v6, %v5921_v48  ;;  %v5651_v27 = vpop.f32.mrb[72].mxu1 }
 0x443   : > { %v4642_v60 = vpop.f32.mrb[152].mxu0  ;;  %v8573_v5 = vpop.f32.mrb[73].mxu1 }
 0x444   : > { %v8141_v47 = vpop.f32.mrb[153].mxu0  ;;  %v6136_v50 = vmax.f32 %v5996_v10, %v6066_v3  ;;  %v6067_v23 = vmul.f32 0.2, %v5997_v32  ;;  %v8695_v25 = vadd.f32 %v5651_v27, %v4642_v60  ;;  %v5654_v36 = vpop.f32.mrb[74].mxu1  ;;  %v11804_v5 = vld [vmem:[#allocation17_spill] sm:$0xff] }
 0x445   : > { %v4645_v4 = vpop.f32.mrb[154].mxu0  ;;  %v8574_v53 = vpop.f32.mrb[75].mxu1 }
 0x446   : > { %v8142_v2 = vpop.f32.mrb[155].mxu0  ;;  %6207 = vst.msk [vmem:[%s11292_s27 + $0xc0] sm:$0xff] %vm6182_vm2, %v6136_v50  ;;  %v6137_v55 = vmax.f32 %v5997_v32, %v6067_v23  ;;  %v5922_v15 = vadd.f32 %v8695_v25, %v11798_v16  ;;  %v8696_v42 = vadd.f32 %v5654_v36, %v4645_v4 }
 0x448   : > { %6208 = vst.msk [vmem:[%s11292_s27 + $0xc8] sm:$0xff] %vm6182_vm2, %v6137_v55  ;;  %v5998_v7 = vadd.f32 %v11279_v6, %v5922_v15  ;;  %v5923_v38 = vadd.f32 %v8696_v42, %v11799_v17  ;;  %v11805_v42 = vld [vmem:[#allocation19_spill] sm:$0xff] }
 0x44a   : > { %v6068_v33 = vmul.f32 0.2, %v5998_v7  ;;  %v5999_v1 = vadd.f32 %v11279_v6, %v5923_v38  ;;  %v5659_v11 = vpop.f32.mrb[76].mxu1 }
 0x44b   : > { %v4650_v30 = vpop.f32.mrb[156].mxu0  ;;  %v8577_v59 = vpop.f32.mrb[77].mxu1 }
 0x44c   : > { %v8145_v18 = vpop.f32.mrb[157].mxu0  ;;  %v6138_v39 = vmax.f32 %v5998_v7, %v6068_v33  ;;  %v6069_v46 = vmul.f32 0.2, %v5999_v1  ;;  %v8697_v22 = vadd.f32 %v5659_v11, %v4650_v30  ;;  %v5662_v35 = vpop.f32.mrb[78].mxu1  ;;  %v11806_v59 = vld [vmem:[#allocation16_spill] sm:$0xff] }
 0x44d   : > { %v4653_v57 = vpop.f32.mrb[158].mxu0  ;;  %v8578_v21 = vpop.f32.mrb[79].mxu1 }
 0x44e   : > { %v8146_v20 = vpop.f32.mrb[159].mxu0  ;;  %6209 = vst.msk [vmem:[%s11292_s27 + $0xd0] sm:$0xff] %vm6182_vm2, %v6138_v39  ;;  %v6139_v13 = vmax.f32 %v5999_v1, %v6069_v46  ;;  %v5924_v63 = vadd.f32 %v8697_v22, %v11800_v28  ;;  %v8698_v9 = vadd.f32 %v5662_v35, %v4653_v57 }
 0x450   : > { %6210 = vst.msk [vmem:[%s11292_s27 + $0xd8] sm:$0xff] %vm6182_vm2, %v6139_v13  ;;  %v6000_v49 = vadd.f32 %v11279_v6, %v5924_v63  ;;  %v5925_v43 = vadd.f32 %v8698_v9, %v11801_v26  ;;  %v11807_v9 = vld [vmem:[#allocation18_spill] sm:$0xff] }
 0x452   : > { %v6070_v51 = vmul.f32 0.2, %v6000_v49  ;;  %v6001_v34 = vadd.f32 %v11279_v6, %v5925_v43  ;;  %v5667_v31 = vpop.f32.mrb[80].mxu1 }
 0x453   : > { %v4658_v62 = vpop.f32.mrb[160].mxu0  ;;  %v8581_v44 = vpop.f32.mrb[81].mxu1 }
 0x454   : > { %v8149_v37 = vpop.f32.mrb[161].mxu0  ;;  %v6140_v61 = vmax.f32 %v6000_v49, %v6070_v51  ;;  %v6071_v14 = vmul.f32 0.2, %v6001_v34  ;;  %v8699_v8 = vadd.f32 %v5667_v31, %v4658_v62  ;;  %v5670_v19 = vpop.f32.mrb[82].mxu1  ;;  %v11808_v44 = vld [vmem:[#allocation21_spill] sm:$0xff] }
 0x455   : > { %v4661_v24 = vpop.f32.mrb[162].mxu0  ;;  %v8582_v54 = vpop.f32.mrb[83].mxu1 }
 0x456   : > { %v8150_v52 = vpop.f32.mrb[163].mxu0  ;;  %6211 = vst.msk [vmem:[%s11292_s27 + $0xe0] sm:$0xff] %vm6182_vm2, %v6140_v61  ;;  %v6141_v0 = vmax.f32 %v6001_v34, %v6071_v14  ;;  %v5926_v45 = vadd.f32 %v8699_v8, %v11802_v58  ;;  %v8700_v40 = vadd.f32 %v5670_v19, %v4661_v24 }
 0x458   : > { %6212 = vst.msk [vmem:[%s11292_s27 + $0xe8] sm:$0xff] %vm6182_vm2, %v6141_v0  ;;  %v6002_v12 = vadd.f32 %v11279_v6, %v5926_v45  ;;  %v5927_v29 = vadd.f32 %v8700_v40, %v11803_v56  ;;  %v11809_v40 = vld [vmem:[#allocation23_spill] sm:$0xff] }
 0x45a   : > { %v6072_v48 = vmul.f32 0.2, %v6002_v12  ;;  %v6003_v60 = vadd.f32 %v11279_v6, %v5927_v29  ;;  %v5675_v3 = vpop.f32.mrb[84].mxu1 }
 0x45b   : > { %v4666_v10 = vpop.f32.mrb[164].mxu0  ;;  %v8585_v50 = vpop.f32.mrb[85].mxu1 }
 0x45c   : > { %v8153_v41 = vpop.f32.mrb[165].mxu0  ;;  %v6142_v4 = vmax.f32 %v6002_v12, %v6072_v48  ;;  %v6073_v27 = vmul.f32 0.2, %v6003_v60  ;;  %v8701_v2 = vadd.f32 %v5675_v3, %v4666_v10  ;;  %v5678_v23 = vpop.f32.mrb[86].mxu1  ;;  %v11810_v50 = vld [vmem:[#allocation20_spill] sm:$0xff] }
 0x45d   : > { %v4669_v47 = vpop.f32.mrb[166].mxu0  ;;  %v8586_v16 = vpop.f32.mrb[87].mxu1 }
 0x45e   : > { %v8154_v32 = vpop.f32.mrb[167].mxu0  ;;  %6213 = vst.msk [vmem:[%s11292_s27 + $0xf0] sm:$0xff] %vm6182_vm2, %v6142_v4  ;;  %v6143_v25 = vmax.f32 %v6003_v60, %v6073_v27  ;;  %v5928_v36 = vadd.f32 %v8701_v2, %v11804_v5  ;;  %v8702_v55 = vadd.f32 %v5678_v23, %v4669_v47 }
 0x460   : > { %6214 = vst.msk [vmem:[%s11292_s27 + $0xf8] sm:$0xff] %vm6182_vm2, %v6143_v25  ;;  %v6004_v15 = vadd.f32 %v11279_v6, %v5928_v36  ;;  %v5929_v53 = vadd.f32 %v8702_v55, %v11805_v42  ;;  %v11811_v55 = vld [vmem:[#allocation22_spill] sm:$0xff] }
 0x462   : > { %v6074_v38 = vmul.f32 0.2, %v6004_v15  ;;  %v6005_v30 = vadd.f32 %v11279_v6, %v5929_v53  ;;  %v5683_v33 = vpop.f32.mrb[88].mxu1 }
 0x463   : > { %v4674_v7 = vpop.f32.mrb[168].mxu0  ;;  %v8589_v39 = vpop.f32.mrb[89].mxu1 }
 0x464   : > { %v8157_v17 = vpop.f32.mrb[169].mxu0  ;;  %v6144_v57 = vmax.f32 %v6004_v15, %v6074_v38  ;;  %v6075_v11 = vmul.f32 0.2, %v6005_v30  ;;  %v8703_v20 = vadd.f32 %v5683_v33, %v4674_v7  ;;  %v5686_v46 = vpop.f32.mrb[90].mxu1  ;;  %v11812_v39 = vld [vmem:[#allocation25_spill] sm:$0xff] }
 0x465   : > { %v4677_v18 = vpop.f32.mrb[170].mxu0  ;;  %v8590_v28 = vpop.f32.mrb[91].mxu1 }
 0x466   : > { %v8158_v1 = vpop.f32.mrb[171].mxu0  ;;  %6215 = vst.msk [vmem:[%s11292_s27 + $0x100] sm:$0xff] %vm6182_vm2, %v6144_v57  ;;  %v6145_v22 = vmax.f32 %v6005_v30, %v6075_v11  ;;  %v5930_v35 = vadd.f32 %v8703_v20, %v11806_v59  ;;  %v8704_v13 = vadd.f32 %v5686_v46, %v4677_v18 }
 0x468   : > { %6216 = vst.msk [vmem:[%s11292_s27 + $0x108] sm:$0xff] %vm6182_vm2, %v6145_v22  ;;  %v6006_v63 = vadd.f32 %v11279_v6, %v5930_v35  ;;  %v5931_v21 = vadd.f32 %v8704_v13, %v11807_v9  ;;  %v11813_v13 = vld [vmem:[#allocation27_spill] sm:$0xff] }
 0x46a   : > { %v6076_v43 = vmul.f32 0.2, %v6006_v63  ;;  %v6007_v62 = vadd.f32 %v11279_v6, %v5931_v21  ;;  %v5691_v51 = vpop.f32.mrb[92].mxu1 }
 0x46b   : > { %v4682_v49 = vpop.f32.mrb[172].mxu0  ;;  %v8593_v61 = vpop.f32.mrb[93].mxu1 }
 0x46c   : > { %v8161_v26 = vpop.f32.mrb[173].mxu0  ;;  %v6146_v24 = vmax.f32 %v6006_v63, %v6076_v43  ;;  %v6077_v31 = vmul.f32 0.2, %v6007_v62  ;;  %v8705_v52 = vadd.f32 %v5691_v51, %v4682_v49  ;;  %v5694_v14 = vpop.f32.mrb[94].mxu1  ;;  %v11814_v61 = vld [vmem:[#allocation24_spill] sm:$0xff] }
 0x46d   : > { %v4685_v37 = vpop.f32.mrb[174].mxu0  ;;  %v8594_v58 = vpop.f32.mrb[95].mxu1 }
 0x46e   : > { %v8162_v34 = vpop.f32.mrb[175].mxu0  ;;  %6217 = vst.msk [vmem:[%s11292_s27 + $0x110] sm:$0xff] %vm6182_vm2, %v6146_v24  ;;  %v6147_v8 = vmax.f32 %v6007_v62, %v6077_v31  ;;  %v5932_v19 = vadd.f32 %v8705_v52, %v11808_v44  ;;  %v8706_v0 = vadd.f32 %v5694_v14, %v4685_v37 }
 0x470   : > { %6218 = vst.msk [vmem:[%s11292_s27 + $0x118] sm:$0xff] %vm6182_vm2, %v6147_v8  ;;  %v6008_v45 = vadd.f32 %v11279_v6, %v5932_v19  ;;  %v5933_v54 = vadd.f32 %v8706_v0, %v11809_v40  ;;  %v11815_v0 = vld [vmem:[#allocation26_spill] sm:$0xff] }
 0x472   : > { %v6078_v29 = vmul.f32 0.2, %v6008_v45  ;;  %v6009_v10 = vadd.f32 %v11279_v6, %v5933_v54  ;;  %v5699_v48 = vpop.f32.mrb[96].mxu1  ;;  %v11588_v6 = vld [vmem:[%s11735_s3] ss:$0 sm:$0xff] }
 0x473   : > { %v4690_v12 = vpop.f32.mrb[176].mxu0  ;;  %v8597_v4 = vpop.f32.mrb[97].mxu1 }
 0x474   : > { %v8165_v56 = vpop.f32.mrb[177].mxu0  ;;  %v6148_v47 = vmax.f32 %v6008_v45, %v6078_v29  ;;  %v6079_v3 = vmul.f32 0.2, %v6009_v10  ;;  %v8707_v32 = vadd.f32 %v5699_v48, %v4690_v12  ;;  %v5702_v27 = vpop.f32.mrb[98].mxu1  ;;  %v11816_v4 = vld [vmem:[#allocation29_spill] sm:$0xff] }
 0x475   : > { %v4693_v41 = vpop.f32.mrb[178].mxu0  ;;  %v8598_v5 = vpop.f32.mrb[99].mxu1 }
 0x476   : > { %v8166_v60 = vpop.f32.mrb[179].mxu0  ;;  %6219 = vst.msk [vmem:[%s11292_s27 + $0x120] sm:$0xff] %vm6182_vm2, %v6148_v47  ;;  %v6149_v2 = vmax.f32 %v6009_v10, %v6079_v3  ;;  %v5934_v23 = vadd.f32 %v8707_v32, %v11810_v50  ;;  %v8708_v25 = vadd.f32 %v5702_v27, %v4693_v41 }
 0x478   : > { %6220 = vst.msk [vmem:[%s11292_s27 + $0x128] sm:$0xff] %vm6182_vm2, %v6149_v2  ;;  %v6010_v36 = vadd.f32 %v11588_v6, %v5934_v23  ;;  %v5935_v16 = vadd.f32 %v8708_v25, %v11811_v55  ;;  %v11817_v25 = vld [vmem:[#allocation31_spill] sm:$0xff] }
 0x47a   : > { %v6080_v53 = vmul.f32 0.2, %v6010_v36  ;;  %v6011_v7 = vadd.f32 %v11588_v6, %v5935_v16  ;;  %v5707_v38 = vpop.f32.mrb[100].mxu1 }
 0x47b   : > { %v4698_v15 = vpop.f32.mrb[180].mxu0  ;;  %v8601_v57 = vpop.f32.mrb[101].mxu1 }
 0x47c   : > { %v8169_v42 = vpop.f32.mrb[181].mxu0  ;;  %v6150_v18 = vmax.f32 %v6010_v36, %v6080_v53  ;;  %v6081_v33 = vmul.f32 0.2, %v6011_v7  ;;  %v8709_v1 = vadd.f32 %v5707_v38, %v4698_v15  ;;  %v5710_v11 = vpop.f32.mrb[102].mxu1  ;;  %v11818_v57 = vld [vmem:[#allocation28_spill] sm:$0xff] }
 0x47d   : > { %v4701_v17 = vpop.f32.mrb[182].mxu0  ;;  %v8602_v59 = vpop.f32.mrb[103].mxu1 }
 0x47e   : > { %v8170_v30 = vpop.f32.mrb[183].mxu0  ;;  %6221 = vst.msk [vmem:[%s11292_s27 + $0x130] sm:$0xff] %vm6182_vm2, %v6150_v18  ;;  %v6151_v20 = vmax.f32 %v6011_v7, %v6081_v33  ;;  %v5936_v46 = vadd.f32 %v8709_v1, %v11812_v39  ;;  %v8710_v22 = vadd.f32 %v5710_v11, %v4701_v17 }
 0x480   : > { %6222 = vst.msk [vmem:[%s11292_s27 + $0x138] sm:$0xff] %vm6182_vm2, %v6151_v20  ;;  %v6012_v35 = vadd.f32 %v11588_v6, %v5936_v46  ;;  %v5937_v28 = vadd.f32 %v8710_v22, %v11813_v13  ;;  %v11819_v22 = vld [vmem:[#allocation30_spill] sm:$0xff] }
 0x482   : > { %v6082_v21 = vmul.f32 0.2, %v6012_v35  ;;  %v6013_v49 = vadd.f32 %v11588_v6, %v5937_v28  ;;  %v5715_v43 = vpop.f32.mrb[104].mxu1 }
 0x483   : > { %v4706_v63 = vpop.f32.mrb[184].mxu0  ;;  %v8605_v24 = vpop.f32.mrb[105].mxu1 }
 0x484   : > { %v8173_v9 = vpop.f32.mrb[185].mxu0  ;;  %v6152_v37 = vmax.f32 %v6012_v35, %v6082_v21  ;;  %v6083_v51 = vmul.f32 0.2, %v6013_v49  ;;  %v8711_v34 = vadd.f32 %v5715_v43, %v4706_v63  ;;  %v5718_v31 = vpop.f32.mrb[106].mxu1  ;;  %v11820_v24 = vld [vmem:[#allocation33_spill] sm:$0xff] }
 0x485   : > { %v4709_v26 = vpop.f32.mrb[186].mxu0  ;;  %v8606_v44 = vpop.f32.mrb[107].mxu1 }
 0x486   : > { %v8174_v62 = vpop.f32.mrb[187].mxu0  ;;  %6223 = vst.msk [vmem:[%s11292_s27 + $0x140] sm:$0xff] %vm6182_vm2, %v6152_v37  ;;  %v6153_v52 = vmax.f32 %v6013_v49, %v6083_v51  ;;  %v5938_v14 = vadd.f32 %v8711_v34, %v11814_v61  ;;  %v8712_v8 = vadd.f32 %v5718_v31, %v4709_v26 }
 0x488   : > { %6224 = vst.msk [vmem:[%s11292_s27 + $0x148] sm:$0xff] %vm6182_vm2, %v6153_v52  ;;  %v6014_v19 = vadd.f32 %v11588_v6, %v5938_v14  ;;  %v5939_v58 = vadd.f32 %v8712_v8, %v11815_v0  ;;  %v11821_v8 = vld [vmem:[#allocation35_spill] sm:$0xff] }
 0x48a   : > { %v6084_v54 = vmul.f32 0.2, %v6014_v19  ;;  %v6015_v12 = vadd.f32 %v11588_v6, %v5939_v58  ;;  %v5723_v29 = vpop.f32.mrb[108].mxu1 }
 0x48b   : > { %v4714_v45 = vpop.f32.mrb[188].mxu0  ;;  %v8609_v47 = vpop.f32.mrb[109].mxu1 }
 0x48c   : > { %v8177_v40 = vpop.f32.mrb[189].mxu0  ;;  %v6154_v41 = vmax.f32 %v6014_v19, %v6084_v54  ;;  %v6085_v48 = vmul.f32 0.2, %v6015_v12  ;;  %v8713_v60 = vadd.f32 %v5723_v29, %v4714_v45  ;;  %v5726_v3 = vpop.f32.mrb[110].mxu1  ;;  %v11822_v47 = vld [vmem:[#allocation32_spill] sm:$0xff] }
 0x48d   : > { %v4717_v56 = vpop.f32.mrb[190].mxu0  ;;  %v8610_v50 = vpop.f32.mrb[111].mxu1 }
 0x48e   : > { %v8178_v10 = vpop.f32.mrb[191].mxu0  ;;  %6225 = vst.msk [vmem:[%s11292_s27 + $0x150] sm:$0xff] %vm6182_vm2, %v6154_v41  ;;  %v6155_v32 = vmax.f32 %v6015_v12, %v6085_v48  ;;  %v5940_v27 = vadd.f32 %v8713_v60, %v11816_v4  ;;  %v8714_v2 = vadd.f32 %v5726_v3, %v4717_v56 }
 0x490   : > { %6226 = vst.msk [vmem:[%s11292_s27 + $0x158] sm:$0xff] %vm6182_vm2, %v6155_v32  ;;  %v6016_v23 = vadd.f32 %v11588_v6, %v5940_v27  ;;  %v5941_v5 = vadd.f32 %v8714_v2, %v11817_v25  ;;  %v11823_v2 = vld [vmem:[#allocation34_spill] sm:$0xff] }
 0x492   : > { %v6086_v16 = vmul.f32 0.2, %v6016_v23  ;;  %v6017_v15 = vadd.f32 %v11588_v6, %v5941_v5  ;;  %v5731_v53 = vpop.f32.mrb[112].mxu1 }
 0x493   : > { %v4722_v36 = vpop.f32.mrb[192].mxu0  ;;  %v8613_v18 = vpop.f32.mrb[113].mxu1 }
 0x494   : > { %v8181_v55 = vpop.f32.mrb[193].mxu0  ;;  %v6156_v17 = vmax.f32 %v6016_v23, %v6086_v16  ;;  %v6087_v38 = vmul.f32 0.2, %v6017_v15  ;;  %v8715_v30 = vadd.f32 %v5731_v53, %v4722_v36  ;;  %v5734_v33 = vpop.f32.mrb[114].mxu1  ;;  %v11824_v18 = vld [vmem:[#allocation37_spill] sm:$0xff] }
 0x495   : > { %v4725_v42 = vpop.f32.mrb[194].mxu0  ;;  %v8614_v39 = vpop.f32.mrb[115].mxu1 }
 0x496   : > { %v8182_v7 = vpop.f32.mrb[195].mxu0  ;;  %6227 = vst.msk [vmem:[%s11292_s27 + $0x160] sm:$0xff] %vm6182_vm2, %v6156_v17  ;;  %v6157_v1 = vmax.f32 %v6017_v15, %v6087_v38  ;;  %v5942_v11 = vadd.f32 %v8715_v30, %v11818_v57  ;;  %v8716_v20 = vadd.f32 %v5734_v33, %v4725_v42 }
 0x498   : > { %6228 = vst.msk [vmem:[%s11292_s27 + $0x168] sm:$0xff] %vm6182_vm2, %v6157_v1  ;;  %v6018_v46 = vadd.f32 %v11588_v6, %v5942_v11  ;;  %v5943_v59 = vadd.f32 %v8716_v20, %v11819_v22  ;;  %v11825_v20 = vld [vmem:[#allocation39_spill] sm:$0xff] }
 0x49a   : > { %v6088_v28 = vmul.f32 0.2, %v6018_v46  ;;  %v6019_v63 = vadd.f32 %v11588_v6, %v5943_v59  ;;  %v5739_v21 = vpop.f32.mrb[116].mxu1 }
 0x49b   : > { %v4730_v35 = vpop.f32.mrb[196].mxu0  ;;  %v8617_v37 = vpop.f32.mrb[117].mxu1 }
 0x49c   : > { %v8185_v13 = vpop.f32.mrb[197].mxu0  ;;  %v6158_v26 = vmax.f32 %v6018_v46, %v6088_v28  ;;  %v6089_v43 = vmul.f32 0.2, %v6019_v63  ;;  %v8717_v62 = vadd.f32 %v5739_v21, %v4730_v35  ;;  %v5742_v51 = vpop.f32.mrb[118].mxu1  ;;  %v11826_v37 = vld [vmem:[#allocation36_spill] sm:$0xff] }
 0x49d   : > { %v4733_v9 = vpop.f32.mrb[198].mxu0  ;;  %v8618_v61 = vpop.f32.mrb[119].mxu1 }
 0x49e   : > { %v8186_v49 = vpop.f32.mrb[199].mxu0  ;;  %6229 = vst.msk [vmem:[%s11292_s27 + $0x170] sm:$0xff] %vm6182_vm2, %v6158_v26  ;;  %v6159_v34 = vmax.f32 %v6019_v63, %v6089_v43  ;;  %v5944_v31 = vadd.f32 %v8717_v62, %v11820_v24  ;;  %v8718_v52 = vadd.f32 %v5742_v51, %v4733_v9 }
 0x4a0   : > { %6230 = vst.msk [vmem:[%s11292_s27 + $0x178] sm:$0xff] %vm6182_vm2, %v6159_v34  ;;  %v6020_v14 = vadd.f32 %v11588_v6, %v5944_v31  ;;  %v5945_v44 = vadd.f32 %v8718_v52, %v11821_v8  ;;  %v11827_v52 = vld [vmem:[#allocation38_spill] sm:$0xff] }
 0x4a2   : > { %v6090_v58 = vmul.f32 0.2, %v6020_v14  ;;  %v6021_v45 = vadd.f32 %v11588_v6, %v5945_v44  ;;  %v5747_v54 = vpop.f32.mrb[120].mxu1 }
 0x4a3   : > { %v4738_v19 = vpop.f32.mrb[200].mxu0  ;;  %v8621_v41 = vpop.f32.mrb[121].mxu1 }
 0x4a4   : > { %v8189_v0 = vpop.f32.mrb[201].mxu0  ;;  %v6160_v56 = vmax.f32 %v6020_v14, %v6090_v58  ;;  %v6091_v29 = vmul.f32 0.2, %v6021_v45  ;;  %v8719_v10 = vadd.f32 %v5747_v54, %v4738_v19  ;;  %v5750_v48 = vpop.f32.mrb[122].mxu1  ;;  %v11828_v41 = vld [vmem:[#allocation41_spill] sm:$0xff] }
 0x4a5   : > { %v4741_v40 = vpop.f32.mrb[202].mxu0  ;;  %v8622_v4 = vpop.f32.mrb[123].mxu1 }
 0x4a6   : > { %v8190_v12 = vpop.f32.mrb[203].mxu0  ;;  %6231 = vst.msk [vmem:[%s11292_s27 + $0x180] sm:$0xff] %vm6182_vm2, %v6160_v56  ;;  %v6161_v60 = vmax.f32 %v6021_v45, %v6091_v29  ;;  %v5946_v3 = vadd.f32 %v8719_v10, %v11822_v47  ;;  %v8720_v32 = vadd.f32 %v5750_v48, %v4741_v40 }
 0x4a8   : > { %6232 = vst.msk [vmem:[%s11292_s27 + $0x188] sm:$0xff] %vm6182_vm2, %v6161_v60  ;;  %v6022_v27 = vadd.f32 %v11588_v6, %v5946_v3  ;;  %v5947_v50 = vadd.f32 %v8720_v32, %v11823_v2  ;;  %v11829_v32 = vld [vmem:[#allocation43_spill] sm:$0xff] }
 0x4aa   : > { %v6092_v5 = vmul.f32 0.2, %v6022_v27  ;;  %v6023_v36 = vadd.f32 %v11588_v6, %v5947_v50  ;;  %v5755_v16 = vpop.f32.mrb[124].mxu1 }
 0x4ab   : > { %v4746_v23 = vpop.f32.mrb[204].mxu0  ;;  %v8625_v17 = vpop.f32.mrb[125].mxu1 }
 0x4ac   : > { %v8193_v25 = vpop.f32.mrb[205].mxu0  ;;  %v6162_v42 = vmax.f32 %v6022_v27, %v6092_v5  ;;  %v6093_v53 = vmul.f32 0.2, %v6023_v36  ;;  %v8721_v7 = vadd.f32 %v5755_v16, %v4746_v23  ;;  %v5758_v38 = vpop.f32.mrb[126].mxu1  ;;  %v11830_v17 = vld [vmem:[#allocation40_spill] sm:$0xff] }
 0x4ad   : > { %v4749_v55 = vpop.f32.mrb[206].mxu0  ;;  %v8626_v57 = vpop.f32.mrb[127].mxu1 }
 0x4ae   : > { %v8194_v15 = vpop.f32.mrb[207].mxu0  ;;  %6233 = vst.msk [vmem:[%s11292_s27 + $0x190] sm:$0xff] %vm6182_vm2, %v6162_v42  ;;  %v6163_v30 = vmax.f32 %v6023_v36, %v6093_v53  ;;  %v5948_v33 = vadd.f32 %v8721_v7, %v11824_v18  ;;  %v8722_v1 = vadd.f32 %v5758_v38, %v4749_v55 }
 0x4b0   : > { %6234 = vst.msk [vmem:[%s11292_s27 + $0x198] sm:$0xff] %vm6182_vm2, %v6163_v30  ;;  %v6024_v11 = vadd.f32 %v11588_v6, %v5948_v33  ;;  %v5949_v39 = vadd.f32 %v8722_v1, %v11825_v20  ;;  %v11831_v1 = vld [vmem:[#allocation42_spill] sm:$0xff] }
 0x4b2   : > { %v6094_v59 = vmul.f32 0.2, %v6024_v11  ;;  %v6025_v35 = vadd.f32 %v11588_v6, %v5949_v39  ;;  %v5763_v28 = vpop.f32.mrb[128].mxu1 }
 0x4b3   : > { %v4754_v46 = vpop.f32.mrb[208].mxu0  ;;  %v8629_v26 = vpop.f32.mrb[129].mxu1 }
 0x4b4   : > { %v8197_v22 = vpop.f32.mrb[209].mxu0  ;;  %v6164_v9 = vmax.f32 %v6024_v11, %v6094_v59  ;;  %v6095_v21 = vmul.f32 0.2, %v6025_v35  ;;  %v8723_v49 = vadd.f32 %v5763_v28, %v4754_v46  ;;  %v5766_v43 = vpop.f32.mrb[130].mxu1  ;;  %v11832_v26 = vld [vmem:[#allocation45_spill] sm:$0xff] }
 0x4b5   : > { %v4757_v13 = vpop.f32.mrb[210].mxu0  ;;  %v8630_v24 = vpop.f32.mrb[131].mxu1 }
 0x4b6   : > { %v8198_v63 = vpop.f32.mrb[211].mxu0  ;;  %6235 = vst.msk [vmem:[%s11292_s27 + $0x1a0] sm:$0xff] %vm6182_vm2, %v6164_v9  ;;  %v6165_v62 = vmax.f32 %v6025_v35, %v6095_v21  ;;  %v5950_v51 = vadd.f32 %v8723_v49, %v11826_v37  ;;  %v8724_v34 = vadd.f32 %v5766_v43, %v4757_v13 }
 0x4b8   : > { %6236 = vst.msk [vmem:[%s11292_s27 + $0x1a8] sm:$0xff] %vm6182_vm2, %v6165_v62  ;;  %v6026_v31 = vadd.f32 %v11588_v6, %v5950_v51  ;;  %v5951_v61 = vadd.f32 %v8724_v34, %v11827_v52  ;;  %v11833_v34 = vld [vmem:[#allocation47_spill] sm:$0xff] }
 0x4ba   : > { %v6096_v44 = vmul.f32 0.2, %v6026_v31  ;;  %v6027_v19 = vadd.f32 %v11588_v6, %v5951_v61  ;;  %v5771_v58 = vpop.f32.mrb[132].mxu1 }
 0x4bb   : > { %v4762_v14 = vpop.f32.mrb[212].mxu0  ;;  %v8633_v56 = vpop.f32.mrb[133].mxu1 }
 0x4bc   : > { %v8201_v8 = vpop.f32.mrb[213].mxu0  ;;  %v6166_v40 = vmax.f32 %v6026_v31, %v6096_v44  ;;  %v6097_v54 = vmul.f32 0.2, %v6027_v19  ;;  %v8725_v12 = vadd.f32 %v5771_v58, %v4762_v14  ;;  %v5774_v29 = vpop.f32.mrb[134].mxu1  ;;  %v11834_v56 = vld [vmem:[#allocation44_spill] sm:$0xff] }
 0x4bd   : > { %v4765_v0 = vpop.f32.mrb[214].mxu0  ;;  %v8634_v47 = vpop.f32.mrb[135].mxu1 }
 0x4be   : > { %v8202_v45 = vpop.f32.mrb[215].mxu0  ;;  %6237 = vst.msk [vmem:[%s11292_s27 + $0x1b0] sm:$0xff] %vm6182_vm2, %v6166_v40  ;;  %v6167_v10 = vmax.f32 %v6027_v19, %v6097_v54  ;;  %v5952_v48 = vadd.f32 %v8725_v12, %v11828_v41  ;;  %v8726_v60 = vadd.f32 %v5774_v29, %v4765_v0 }
 0x4c0   : > { %6238 = vst.msk [vmem:[%s11292_s27 + $0x1b8] sm:$0xff] %vm6182_vm2, %v6167_v10  ;;  %v6028_v3 = vadd.f32 %v11588_v6, %v5952_v48  ;;  %v5953_v4 = vadd.f32 %v8726_v60, %v11829_v32  ;;  %v11835_v60 = vld [vmem:[#allocation46_spill] sm:$0xff] }
 0x4c2   : > { %v6098_v50 = vmul.f32 0.2, %v6028_v3  ;;  %v6029_v23 = vadd.f32 %v11588_v6, %v5953_v4  ;;  %v5779_v5 = vpop.f32.mrb[136].mxu1 }
 0x4c3   : > { %v4770_v27 = vpop.f32.mrb[216].mxu0  ;;  %v8637_v42 = vpop.f32.mrb[137].mxu1 }
 0x4c4   : > { %v8205_v2 = vpop.f32.mrb[217].mxu0  ;;  %v6168_v55 = vmax.f32 %v6028_v3, %v6098_v50  ;;  %v6099_v16 = vmul.f32 0.2, %v6029_v23  ;;  %v8727_v15 = vadd.f32 %v5779_v5, %v4770_v27  ;;  %v5782_v53 = vpop.f32.mrb[138].mxu1  ;;  %v11836_v42 = vld [vmem:[#allocation49_spill] sm:$0xff] }
 0x4c5   : > { %v4773_v25 = vpop.f32.mrb[218].mxu0  ;;  %v8638_v18 = vpop.f32.mrb[139].mxu1 }
 0x4c6   : > { %v8206_v36 = vpop.f32.mrb[219].mxu0  ;;  %6239 = vst.msk [vmem:[%s11292_s27 + $0x1c0] sm:$0xff] %vm6182_vm2, %v6168_v55  ;;  %v6169_v7 = vmax.f32 %v6029_v23, %v6099_v16  ;;  %v5954_v38 = vadd.f32 %v8727_v15, %v11830_v17  ;;  %v8728_v30 = vadd.f32 %v5782_v53, %v4773_v25 }
 0x4c8   : > { %6240 = vst.msk [vmem:[%s11292_s27 + $0x1c8] sm:$0xff] %vm6182_vm2, %v6169_v7  ;;  %v6030_v33 = vadd.f32 %v11588_v6, %v5954_v38  ;;  %v5955_v57 = vadd.f32 %v8728_v30, %v11831_v1  ;;  %v11837_v30 = vld [vmem:[#allocation51_spill] sm:$0xff] }
 0x4ca   : > { %v6100_v39 = vmul.f32 0.2, %v6030_v33  ;;  %v6031_v46 = vadd.f32 %v11588_v6, %v5955_v57  ;;  %v5787_v59 = vpop.f32.mrb[140].mxu1 }
 0x4cb   : > { %v4778_v11 = vpop.f32.mrb[220].mxu0  ;;  %v8641_v9 = vpop.f32.mrb[141].mxu1 }
 0x4cc   : > { %v8209_v20 = vpop.f32.mrb[221].mxu0  ;;  %v6170_v13 = vmax.f32 %v6030_v33, %v6100_v39  ;;  %v6101_v28 = vmul.f32 0.2, %v6031_v46  ;;  %v8729_v63 = vadd.f32 %v5787_v59, %v4778_v11  ;;  %v5790_v21 = vpop.f32.mrb[142].mxu1  ;;  %v11838_v9 = vld [vmem:[#allocation48_spill] sm:$0xff] }
 0x4cd   : > { %v4781_v22 = vpop.f32.mrb[222].mxu0  ;;  %v8642_v37 = vpop.f32.mrb[143].mxu1 }
 0x4ce   : > { %v8210_v35 = vpop.f32.mrb[223].mxu0  ;;  %6241 = vst.msk [vmem:[%s11292_s27 + $0x1d0] sm:$0xff] %vm6182_vm2, %v6170_v13  ;;  %v6171_v49 = vmax.f32 %v6031_v46, %v6101_v28  ;;  %v5956_v43 = vadd.f32 %v8729_v63, %v11832_v26  ;;  %v8730_v62 = vadd.f32 %v5790_v21, %v4781_v22 }
 0x4d0   : > { %6242 = vst.msk [vmem:[%s11292_s27 + $0x1d8] sm:$0xff] %vm6182_vm2, %v6171_v49  ;;  %v6032_v51 = vadd.f32 %v11588_v6, %v5956_v43  ;;  %v5957_v24 = vadd.f32 %v8730_v62, %v11833_v34  ;;  %v11839_v62 = vld [vmem:[#allocation50_spill] sm:$0xff] }
 0x4d2   : > { %v6102_v61 = vmul.f32 0.2, %v6032_v51  ;;  %v6033_v14 = vadd.f32 %v11588_v6, %v5957_v24  ;;  %v5795_v44 = vpop.f32.mrb[144].mxu1 }
 0x4d3   : > { %v4786_v31 = vpop.f32.mrb[224].mxu0  ;;  %v8645_v40 = vpop.f32.mrb[145].mxu1 }
 0x4d4   : > { %v8213_v52 = vpop.f32.mrb[225].mxu0  ;;  %v6172_v0 = vmax.f32 %v6032_v51, %v6102_v61  ;;  %v6103_v58 = vmul.f32 0.2, %v6033_v14  ;;  %v8731_v45 = vadd.f32 %v5795_v44, %v4786_v31  ;;  %v5798_v54 = vpop.f32.mrb[146].mxu1  ;;  %v11840_v40 = vld [vmem:[#allocation52_spill] sm:$0xff] }
 0x4d5   : > { %v4789_v8 = vpop.f32.mrb[226].mxu0  ;;  %v8646_v41 = vpop.f32.mrb[147].mxu1 }
 0x4d6   : > { %v8214_v19 = vpop.f32.mrb[227].mxu0  ;;  %6243 = vst.msk [vmem:[%s11292_s27 + $0x1e0] sm:$0xff] %vm6182_vm2, %v6172_v0  ;;  %v6173_v12 = vmax.f32 %v6033_v14, %v6103_v58  ;;  %v5958_v29 = vadd.f32 %v8731_v45, %v11834_v56  ;;  %v8732_v10 = vadd.f32 %v5798_v54, %v4789_v8 }
 0x4d8   : > { %6244 = vst.msk [vmem:[%s11292_s27 + $0x1e8] sm:$0xff] %vm6182_vm2, %v6173_v12  ;;  %v6034_v48 = vadd.f32 %v11588_v6, %v5958_v29  ;;  %v5959_v47 = vadd.f32 %v8732_v10, %v11835_v60  ;;  %v11841_v10 = vld [vmem:[#allocation53_spill] sm:$0xff] }
 0x4da   : > { %v6104_v4 = vmul.f32 0.2, %v6034_v48  ;;  %v6035_v27 = vadd.f32 %v11588_v6, %v5959_v47  ;;  %v5803_v50 = vpop.f32.mrb[148].mxu1 }
 0x4db   : > { %v4794_v3 = vpop.f32.mrb[228].mxu0  ;;  %v8649_v55 = vpop.f32.mrb[149].mxu1 }
 0x4dc   : > { %v8217_v32 = vpop.f32.mrb[229].mxu0  ;;  %v6174_v25 = vmax.f32 %v6034_v48, %v6104_v4  ;;  %v6105_v5 = vmul.f32 0.2, %v6035_v27  ;;  %v8733_v36 = vadd.f32 %v5803_v50, %v4794_v3  ;;  %v5806_v16 = vpop.f32.mrb[150].mxu1 }
 0x4dd   : > { %v4797_v2 = vpop.f32.mrb[230].mxu0  ;;  %v8650_v17 = vpop.f32.mrb[151].mxu1 }
 0x4de   : > { %v8218_v23 = vpop.f32.mrb[231].mxu0  ;;  %6245 = vst.msk [vmem:[%s11292_s27 + $0x1f0] sm:$0xff] %vm6182_vm2, %v6174_v25  ;;  %v6175_v15 = vmax.f32 %v6035_v27, %v6105_v5  ;;  %v5960_v53 = vadd.f32 %v8733_v36, %v11836_v42  ;;  %v8734_v7 = vadd.f32 %v5806_v16, %v4797_v2 }
 0x4e0   : > { %6246 = vst.msk [vmem:[%s11292_s27 + $0x1f8] sm:$0xff] %vm6182_vm2, %v6175_v15  ;;  %v6036_v38 = vadd.f32 %v11588_v6, %v5960_v53  ;;  %v5961_v18 = vadd.f32 %v8734_v7, %v11837_v30 }
 0x4e2   : > { %v6106_v57 = vmul.f32 0.2, %v6036_v38  ;;  %v6037_v11 = vadd.f32 %v11588_v6, %v5961_v18  ;;  %v5811_v39 = vpop.f32.mrb[152].mxu1 }
 0x4e3   : > { %v4802_v33 = vpop.f32.mrb[232].mxu0  ;;  %v8653_v13 = vpop.f32.mrb[153].mxu1 }
 0x4e4   : > { %v8221_v1 = vpop.f32.mrb[233].mxu0  ;;  %v6176_v22 = vmax.f32 %v6036_v38, %v6106_v57  ;;  %v6107_v59 = vmul.f32 0.2, %v6037_v11  ;;  %v8735_v35 = vadd.f32 %v5811_v39, %v4802_v33  ;;  %v5814_v28 = vpop.f32.mrb[154].mxu1 }
 0x4e5   : > { %v4805_v20 = vpop.f32.mrb[234].mxu0  ;;  %v8654_v26 = vpop.f32.mrb[155].mxu1 }
 0x4e6   : > { %v8222_v46 = vpop.f32.mrb[235].mxu0  ;;  %6247 = vst.msk [vmem:[%s11292_s27 + $0x200] sm:$0xff] %vm6182_vm2, %v6176_v22  ;;  %v6177_v63 = vmax.f32 %v6037_v11, %v6107_v59  ;;  %v5962_v21 = vadd.f32 %v8735_v35, %v11838_v9  ;;  %v8736_v49 = vadd.f32 %v5814_v28, %v4805_v20 }
 0x4e8   : > { %6248 = vst.msk [vmem:[%s11292_s27 + $0x208] sm:$0xff] %vm6182_vm2, %v6177_v63  ;;  %v6038_v43 = vadd.f32 %v11588_v6, %v5962_v21  ;;  %v5963_v37 = vadd.f32 %v8736_v49, %v11839_v62 }
 0x4ea   : > { %v6108_v24 = vmul.f32 0.2, %v6038_v43  ;;  %v6039_v31 = vadd.f32 %v11588_v6, %v5963_v37  ;;  %v5819_v61 = vpop.f32.mrb[156].mxu1 }
 0x4eb   : > { %v4810_v51 = vpop.f32.mrb[236].mxu0  ;;  %v8657_v0 = vpop.f32.mrb[157].mxu1 }
 0x4ec   : > { %v8225_v34 = vpop.f32.mrb[237].mxu0  ;;  %v6178_v8 = vmax.f32 %v6038_v43, %v6108_v24  ;;  %v6109_v44 = vmul.f32 0.2, %v6039_v31  ;;  %v8737_v19 = vadd.f32 %v5819_v61, %v4810_v51  ;;  %v5822_v58 = vpop.f32.mrb[158].mxu1 }
 0x4ed   : > { %v4813_v52 = vpop.f32.mrb[238].mxu0  ;;  %v8658_v56 = vpop.f32.mrb[159].mxu1 }
 0x4ee   : > { %v8226_v14 = vpop.f32.mrb[239].mxu0  ;;  %6249 = vst.msk [vmem:[%s11292_s27 + $0x210] sm:$0xff] %vm6182_vm2, %v6178_v8  ;;  %v6179_v45 = vmax.f32 %v6039_v31, %v6109_v44  ;;  %v5964_v54 = vadd.f32 %v8737_v19, %v11840_v40  ;;  %v8738_v12 = vadd.f32 %v5822_v58, %v4813_v52 }
 0x4f0   : > { %6250 = vst.msk [vmem:[%s11292_s27 + $0x218] sm:$0xff] %vm6182_vm2, %v6179_v45  ;;  %v6040_v29 = vadd.f32 %v11588_v6, %v5964_v54  ;;  %v5965_v41 = vadd.f32 %v8738_v12, %v11841_v10 }
 0x4f2   : > { %v6110_v48 = vmul.f32 0.2, %v6040_v29  ;;  %v6041_v60 = vadd.f32 %v11588_v6, %v5965_v41 }
 0x4f4   : > { %v6180_v47 = vmax.f32 %v6040_v29, %v6110_v48  ;;  %v6111_v3 = vmul.f32 0.2, %v6041_v60 }
 0x4f6   : > { %6251 = vst.msk [vmem:[%s11292_s27 + $0x220] sm:$0xff] %vm6182_vm2, %v6180_v47  ;;  %v6181_v32 = vmax.f32 %v6041_v60, %v6111_v3 }
 0x4f8   : > { %6252 = vst.msk [vmem:[%s11292_s27 + $0x228] sm:$0xff] %vm6182_vm2, %v6181_v32 }
 0x4f9 PF: > { %s14_s19 = sadd.s32 1, %s9666_s19   ;;  %s11842_s15 = smov %s9654_s16 }
 0x4fa   : > { %p11_p12 = scmp.ge.s32.totalorder %s14_s19, 4   ;;  %s11843_s16 = smov %s9746_s23 }
 0x4fb   : > { %s11844_s17 = smov %s9662_s18  ;;  %s11845_s18 = smov %s11847_s20 }
 0x4fc   :  { %13 = sbr.rel (!%p11_p12) target bundleno = 3 (0x3), region = 185 }

// kernel: sub_discriminator_forward.6
= control target key start
LH: loop header
LB: loop body
LE: loop exit
PB: predicated region body
PF: predicated region fallthrough
CT: control target
= control target key end

     0   :  { %s3108_s15 = smov 0   ;;  %s3110_s16 = smov 0   ;;  %s3712_s0 = inlined_call_operand.vmem [shape: bf16[2,4,100,64], index: 0, kind: input, shape index: {}]   ;;  %s3713_s1 = inlined_call_operand.vmem [shape: bf16[2,4,1,20,64], index: 1, kind: input, shape index: {}]   ;;  %s3714_s2 = inlined_call_operand.vmem [shape: bf16[4,2,64,16], index: 2, kind: input, shape index: {}]   ;;  %s3715_s3 = inlined_call_operand.vmem [shape: f32[1,16], index: 3, kind: input, shape index: {}]   ;;  %s3716_s4 = inlined_call_operand.vmem [shape: f32[2,80,16], index: 4, kind: output, shape index: {}]  }
   0x1   :  { %s3112_s17 = smov 0   ;;  %s3114_s18 = smov 0  }
   0x2   :  { %s3116_s19 = smov 0  }
   0x3 LB: > { %s26_s20 = sadd.s32 1, %s3071_s18  ;;  %p42_p1 = scmp.ne.s32.totalorder %s3063_s16, %s3059_s15  ;;  %s3075_s19 = sphi %s3116_s19, %s14_s19   ;;  %s3071_s18 = sphi %s3114_s18, %s3720_s18   ;;  %s3067_s17 = sphi %s3112_s17, %s3719_s17   ;;  %s3063_s16 = sphi %s3110_s16, %s3718_s16   ;;  %s3059_s15 = sphi %s3108_s15, %s3717_s15  }
   0x4   : > { %p28_p0 = scmp.ge.s32.totalorder %s26_s20, 2  ;;  %p43_p2 = scmp.eq.s32.totalorder %s3075_s19, 0 }
   0x5   : > { %s35_s22 = sadd.s32 1, %s3063_s16  ;;  %p2252_p5 = scmp.ge.s32.totalorder %s3075_s19, 2 }
   0x6   : > { %s3722_s20 = smov (%p28_p0, %s26_s20), 0  ;;  %p44_p3 = por %p43_p2, %p42_p1 }
   0x7   : > { %s30_s21 = ssub.s32 %s3071_s18, %s3722_s20  ;;  %172 = sbr.rel (%p2252_p5) target bundleno = 56 (0x38), region = 24 }
   0x8   : > { %p33_p4 = scmp.eq.s32.totalorder %s30_s21, 0 }
   0xa   : > { %s3143_s23 = scalar_select %p33_p4, %s3063_s16, %s35_s22  }
   0xe   : > { %175 = sbr.rel (!%p44_p3) target bundleno = 56 (0x38), region = 28  ;;  %s177_s24 = sand.u32 (%p44_p3), 1, %s3063_s16  }
   0xf   : > { %s2879_s25 = smul.u32 (%p44_p3), 208, %s3071_s18  ;;  %s3155_s5 = smov (%p44_p3), 0  }
  0x10   : > { %s2878_s26 = smul.u32 (%p44_p3), 160, %s177_s24 }
  0x11   : > { %s3151_s29 = scalar_lea.vmem (%p44_p3), %s3712_s0, %s2879_s25  }
  0x12   : > { %s3153_s30 = scalar_lea.vmem (%p44_p3), [#allocation2], %s2878_s26  }
  0x15 LB: >> { %v209_v0 = vld [vmem:[%s3151_s29] sm:$0xf]  ;;  %v211_v1 = vld [vmem:[%s3151_s29 + $0x4] sm:$0xf]  ;;  %v213_v2 = vld [vmem:[%s3151_s29 + $0x8] sm:$0xf]  ;;  %s3079_s5 = sphi %s3155_s5, %s203_s5  }
  0x16   : >> { %210 = vst [vmem:[%s3153_s30] sm:$0xf] %v209_v0  ;;  %212 = vst [vmem:[%s3153_s30 + $0x4] sm:$0xf] %v211_v1  ;;  %v215_v3 = vld [vmem:[%s3151_s29 + $0xc] sm:$0xf]  ;;  %s203_s5 = sadd.s32 1, %s3079_s5  }
  0x17   : >> { %214 = vst [vmem:[%s3153_s30 + $0x8] sm:$0xf] %v213_v2  ;;  %v217_v4 = vld [vmem:[%s3151_s29 + $0x10] sm:$0xf]  ;;  %v219_v5 = vld [vmem:[%s3151_s29 + $0x14] sm:$0xf] }
  0x18   : >> { %216 = vst [vmem:[%s3153_s30 + $0xc] sm:$0xf] %v215_v3  ;;  %218 = vst [vmem:[%s3153_s30 + $0x10] sm:$0xf] %v217_v4  ;;  %v221_v6 = vld [vmem:[%s3151_s29 + $0x18] sm:$0xf] }
  0x19   : >> { %220 = vst [vmem:[%s3153_s30 + $0x14] sm:$0xf] %v219_v5  ;;  %v223_v7 = vld [vmem:[%s3151_s29 + $0x1c] sm:$0xf]  ;;  %v225_v8 = vld [vmem:[%s3151_s29 + $0x20] sm:$0xf] }
  0x1a   : >> { %222 = vst [vmem:[%s3153_s30 + $0x18] sm:$0xf] %v221_v6  ;;  %224 = vst [vmem:[%s3153_s30 + $0x1c] sm:$0xf] %v223_v7  ;;  %v227_v9 = vld [vmem:[%s3151_s29 + $0x24] sm:$0xf] }
  0x1b   : >> { %226 = vst [vmem:[%s3153_s30 + $0x20] sm:$0xf] %v225_v8  ;;  %v229_v10 = vld [vmem:[%s3151_s29 + $0x34] sm:$0xf]  ;;  %v231_v11 = vld [vmem:[%s3151_s29 + $0x38] sm:$0xf] }
  0x1c   : >> { %228 = vst [vmem:[%s3153_s30 + $0x24] sm:$0xf] %v227_v9  ;;  %230 = vst [vmem:[%s3153_s30 + $0x28] sm:$0xf] %v229_v10  ;;  %v233_v12 = vld [vmem:[%s3151_s29 + $0x3c] sm:$0xf] }
  0x1d   : >> { %232 = vst [vmem:[%s3153_s30 + $0x2c] sm:$0xf] %v231_v11  ;;  %v235_v13 = vld [vmem:[%s3151_s29 + $0x40] sm:$0xf]  ;;  %v237_v14 = vld [vmem:[%s3151_s29 + $0x44] sm:$0xf] }
  0x1e   : >> { %234 = vst [vmem:[%s3153_s30 + $0x30] sm:$0xf] %v233_v12  ;;  %236 = vst [vmem:[%s3153_s30 + $0x34] sm:$0xf] %v235_v13  ;;  %v239_v15 = vld [vmem:[%s3151_s29 + $0x48] sm:$0xf] }
  0x1f   : >> { %238 = vst [vmem:[%s3153_s30 + $0x38] sm:$0xf] %v237_v14  ;;  %v241_v16 = vld [vmem:[%s3151_s29 + $0x4c] sm:$0xf]  ;;  %v243_v17 = vld [vmem:[%s3151_s29 + $0x50] sm:$0xf] }
  0x20   : >> { %240 = vst [vmem:[%s3153_s30 + $0x3c] sm:$0xf] %v239_v15  ;;  %242 = vst [vmem:[%s3153_s30 + $0x40] sm:$0xf] %v241_v16  ;;  %v245_v18 = vld [vmem:[%s3151_s29 + $0x54] sm:$0xf] }
  0x21   : >> { %244 = vst [vmem:[%s3153_s30 + $0x44] sm:$0xf] %v243_v17  ;;  %v247_v19 = vld [vmem:[%s3151_s29 + $0x58] sm:$0xf]  ;;  %v249_v20 = vld [vmem:[%s3151_s29 + $0x68] sm:$0xf] }
  0x22   : >> { %246 = vst [vmem:[%s3153_s30 + $0x48] sm:$0xf] %v245_v18  ;;  %248 = vst [vmem:[%s3153_s30 + $0x4c] sm:$0xf] %v247_v19  ;;  %v251_v21 = vld [vmem:[%s3151_s29 + $0x6c] sm:$0xf] }
  0x23   : >> { %250 = vst [vmem:[%s3153_s30 + $0x50] sm:$0xf] %v249_v20  ;;  %v253_v22 = vld [vmem:[%s3151_s29 + $0x70] sm:$0xf]  ;;  %v255_v23 = vld [vmem:[%s3151_s29 + $0x74] sm:$0xf] }
  0x24   : >> { %252 = vst [vmem:[%s3153_s30 + $0x54] sm:$0xf] %v251_v21  ;;  %254 = vst [vmem:[%s3153_s30 + $0x58] sm:$0xf] %v253_v22  ;;  %v257_v24 = vld [vmem:[%s3151_s29 + $0x78] sm:$0xf] }
  0x25   : >> { %256 = vst [vmem:[%s3153_s30 + $0x5c] sm:$0xf] %v255_v23  ;;  %v259_v25 = vld [vmem:[%s3151_s29 + $0x7c] sm:$0xf]  ;;  %v261_v26 = vld [vmem:[%s3151_s29 + $0x80] sm:$0xf] }
  0x26   : >> { %258 = vst [vmem:[%s3153_s30 + $0x60] sm:$0xf] %v257_v24  ;;  %260 = vst [vmem:[%s3153_s30 + $0x64] sm:$0xf] %v259_v25  ;;  %v263_v27 = vld [vmem:[%s3151_s29 + $0x84] sm:$0xf] }
  0x27   : >> { %262 = vst [vmem:[%s3153_s30 + $0x68] sm:$0xf] %v261_v26  ;;  %v265_v28 = vld [vmem:[%s3151_s29 + $0x88] sm:$0xf]  ;;  %v267_v29 = vld [vmem:[%s3151_s29 + $0x8c] sm:$0xf] }
  0x28   : >> { %264 = vst [vmem:[%s3153_s30 + $0x6c] sm:$0xf] %v263_v27  ;;  %266 = vst [vmem:[%s3153_s30 + $0x70] sm:$0xf] %v265_v28  ;;  %v269_v30 = vld [vmem:[%s3151_s29 + $0x9c] sm:$0xf] }
  0x29   : >> { %268 = vst [vmem:[%s3153_s30 + $0x74] sm:$0xf] %v267_v29  ;;  %v271_v31 = vld [vmem:[%s3151_s29 + $0xa0] sm:$0xf]  ;;  %v273_v32 = vld [vmem:[%s3151_s29 + $0xa4] sm:$0xf] }
  0x2a   : >> { %270 = vst [vmem:[%s3153_s30 + $0x78] sm:$0xf] %v269_v30  ;;  %272 = vst [vmem:[%s3153_s30 + $0x7c] sm:$0xf] %v271_v31  ;;  %v275_v33 = vld [vmem:[%s3151_s29 + $0xa8] sm:$0xf] }
  0x2b   : >> { %274 = vst [vmem:[%s3153_s30 + $0x80] sm:$0xf] %v273_v32  ;;  %v277_v34 = vld [vmem:[%s3151_s29 + $0xac] sm:$0xf]  ;;  %v279_v35 = vld [vmem:[%s3151_s29 + $0xb0] sm:$0xf] }
  0x2c   : >> { %276 = vst [vmem:[%s3153_s30 + $0x84] sm:$0xf] %v275_v33  ;;  %278 = vst [vmem:[%s3153_s30 + $0x88] sm:$0xf] %v277_v34  ;;  %v281_v36 = vld [vmem:[%s3151_s29 + $0xb4] sm:$0xf] }
  0x2d   : >> { %280 = vst [vmem:[%s3153_s30 + $0x8c] sm:$0xf] %v279_v35  ;;  %v283_v37 = vld [vmem:[%s3151_s29 + $0xb8] sm:$0xf]  ;;  %v285_v38 = vld [vmem:[%s3151_s29 + $0xbc] sm:$0xf] }
  0x2e   : >> { %282 = vst [vmem:[%s3153_s30 + $0x90] sm:$0xf] %v281_v36  ;;  %284 = vst [vmem:[%s3153_s30 + $0x94] sm:$0xf] %v283_v37  ;;  %v287_v39 = vld [vmem:[%s3151_s29 + $0xc0] sm:$0xf] }
  0x2f   : >> { %286 = vst [vmem:[%s3153_s30 + $0x98] sm:$0xf] %v285_v38  ;;  %288 = vst [vmem:[%s3153_s30 + $0x9c] sm:$0xf] %v287_v39  ;;  %p202_p6 = scmp.ge.s32.totalorder %s203_s5, 1 }
  0x31   : > { %205 = sbr.rel (!%p202_p6) target bundleno = 21 (0x15), region = 163 }
  0x38 PF: > { %p2260_p7 = scmp.ge.s32.totalorder %s3075_s19, 1  ;;  %p514_p8 = scmp.lt.s32.totalorder %s3075_s19, 3 }
  0x3a   : > { %p515_p9 = pnand %p2260_p7, %p514_p8 }
  0x3b   : > { %v2957_v40 = vld [vmem:[%s3714_s2 + $0x40] sm:$0xff] (!%p515_p9)   ;;  %v3081_v41 = vmov (!%p515_p9), 0.0   ;;  %v2958_v42 = vld [vmem:[%s3714_s2 + $0x48] sm:$0xff] (!%p515_p9)   ;;  %s521_s10 = sand.u32 (!%p515_p9), 1, %s3059_s15   ;;  %vm3082_vm0 = vmmov (!%p515_p9), 0   ;;  %v2959_v43 = vld [vmem:[%s3714_s2 + $0x50] sm:$0xff] (!%p515_p9)  }
  0x3c   : > { %518 = sbr.rel (%p515_p9) target bundleno = 437 (0x1b5), region = 94  ;;  %2564 = vmatprep.subr.bf16.mxu0 (!%p515_p9), %v3081_v41  ;;  %2788 = vmatprep.subr.bf16.mxu1 (!%p515_p9), %v3081_v41  ;;  %p564_p10 = scmp.lt.s32.totalorder (!%p515_p9), %s3067_s17, 1  ;;  %v2960_v44 = vld [vmem:[%s3714_s2 + $0x58] sm:$0xff] (!%p515_p9)   ;;  %v3280_v46 = vld [vmem:[%s3714_s2 + $0x60] sm:$0xff] (!%p515_p9)   ;;  %vm671_vm1 = vcmask (!%p515_p9), 523264   ;;  %vm1638_vm2 = vcmask (!%p515_p9), 1045504  }
  0x3d   : > { %2565 = vmatpush3.bf16.msra.mxu0 (!%p515_p9), %v2957_v40  ;;  %2792 = vmatpush3.bf16.msra.mxu1 (!%p515_p9), %v2957_v40  ;;  %s2880_s11 = smul.u32 (!%p515_p9), 160, %s521_s10  ;;  %v2964_v51 = vld [vmem:[%s3714_s2] sm:$0xff] (!%p515_p9)   ;;  %v3304_v52 = vld [vmem:[%s3714_s2 + $0x68] sm:$0xff] (!%p515_p9)   ;;  %v3327_v57 = vld [vmem:[%s3714_s2 + $0x70] sm:$0xff] (!%p515_p9)   ;;  %vm2053_vm3 = vcmask (!%p515_p9), 1043456   ;;  %vm2040_vm4 = vcmask (!%p515_p9), 130048  }
  0x3e   : > { %2566 = vmatprep.subr.bf16.mxu0 (!%p515_p9), %v3081_v41  ;;  %2789 = vmatprep.subr.bf16.mxu1 (!%p515_p9), %v3081_v41  ;;  %v2966_v54 = vld [vmem:[%s3714_s2 + $0x8] sm:$0xff] (!%p515_p9)   ;;  %v2971_v59 = vld [vmem:[%s3714_s2 + $0x10] sm:$0xff] (!%p515_p9)   ;;  %v3345_v60 = vld [vmem:[%s3714_s2 + $0x78] sm:$0xff] (!%p515_p9)   ;;  %vm2074_vm5 = vcmask (!%p515_p9), 130052   ;;  %vm2048_vm6 = vcmask (!%p515_p9), 125952  }
  0x3f   : > { %2572 = vmatprep.mubr.msk.bf16.mxu0 (!%p515_p9), %vm3082_vm0, %v3081_v41  ;;  %2584 = vmatprep.mubr.msk.bf16.mxu1 (!%p515_p9), %vm3082_vm0, %v3081_v41  ;;  %s3263_s14 = scalar_lea.vmem (!%p515_p9), [#allocation2], %s2880_s11  ;;  %v2976_v62 = vld [vmem:[%s3714_s2 + $0x18] sm:$0xff] (!%p515_p9)   ;;  %v3361_v63 = vld [vmem:[%s3714_s2 + $0x20] sm:$0xff] (!%p515_p9)   ;;  %v3373_v2 = vld [vmem:[%s3714_s2 + $0x28] sm:$0xff] (!%p515_p9)  }
  0x40   : > { %v3275_v45 = vld [vmem:[%s3263_s14 + $0x40] sm:$0xff] (!%p515_p9)   ;;  %v3285_v47 = vld [vmem:[%s3263_s14 + $0x48] sm:$0xff] (!%p515_p9)   ;;  %v2265_v55 = vld [vmem:[%s3263_s14 + $0x30] sm:$0xf] (!%p515_p9) }
  0x41   : > { %2567 = vmatpush3.bf16.msra.mxu0 (!%p515_p9), %v2958_v42  ;;  %2793 = vmatpush3.bf16.msra.mxu1 (!%p515_p9), %v2958_v42  ;;  %v2961_v48 = vld [vmem:[%s3263_s14 + $0x28] sm:$0xff] (!%p515_p9)   ;;  %v1642_v49 = vrot.slane (!%p515_p9), %v3275_v45, 2  ;;  %v1644_v50 = vrot.slane (!%p515_p9), %v3285_v47, 2  ;;  %v3322_v56 = vld [vmem:[%s3263_s14 + $0x34] sm:$0xf] (!%p515_p9)  ;;  %v3367_v1 = vld [vmem:[%s3263_s14 + $0x38] sm:$0xff] (!%p515_p9)  }
  0x42   : > { %2568 = vmatprep.subr.bf16.mxu0 (!%p515_p9), %v3081_v41  ;;  %2790 = vmatprep.subr.bf16.mxu1 (!%p515_p9), %v3081_v41  ;;  %v2282_v58 = vcombine.low (!%p515_p9), %v2265_v55, %v3322_v56  ;;  %v3388_v4 = vld [vmem:[%s3714_s2 + $0x30] sm:$0xff] (!%p515_p9)   ;;  %v2978_v5 = vld [vmem:[%s3263_s14] sm:$0xff] (!%p515_p9)   ;;  %v3400_v7 = vld [vmem:[%s3714_s2 + $0x38] sm:$0xff] (!%p515_p9)   ;;  %v1640_v34 = vrot.slane (!%p515_p9), %v3367_v1, 2 }
  0x43   : > { %s3724_s17 = smov (!%p564_p10, %s3067_s17), 1  ;;  %v3311_v53 = vsel %vm1638_vm2, %v1642_v49, %v1644_v50  ;;  %v2980_v6 = vld [vmem:[%s3714_s2 + $0x80] sm:$0xff]   ;;  %v586_v8 = vld [vmem:[%s3263_s14 + $0x8] sm:$0xf]  ;;  %v3405_v9 = vld [vmem:[%s3263_s14 + $0xc] sm:$0xf] }
  0x44   : > { %s2881_s25 = smul.u32 48, %s3724_s17  ;;  %v2986_v10 = vld [vmem:[%s3714_s2 + $0x88] sm:$0xff]   ;;  %v3417_v11 = vld [vmem:[%s3714_s2 + $0xa0] sm:$0xff]   ;;  %v2296_v13 = vcombine.low %v586_v8, %v3405_v9  ;;  %v2991_v15 = vld [vmem:[%s3714_s2 + $0x90] sm:$0xff]  }
  0x45   : > { %2569 = vmatpush3.bf16.msra.mxu0 %v2959_v43  ;;  %2794 = vmatpush3.bf16.msra.mxu1 %v2959_v43  ;;  %v3427_v14 = vld [vmem:[%s3714_s2 + $0xa8] sm:$0xff]   ;;  %v3442_v17 = vld [vmem:[%s3714_s2 + $0xb0] sm:$0xff]   ;;  %v2997_v18 = vld [vmem:[%s3714_s2 + $0x98] sm:$0xff]   ;;  %s2882_s28 = smul.u32 80, %s3724_s17 }
  0x46   : > { %2570 = vmatprep.subr.bf16.mxu0 %v3081_v41  ;;  %2791 = vmatprep.subr.bf16.mxu1 %v3081_v41  ;;  %s3297_s30 = scalar_lea.vmem %s3713_s1, %s2881_s25  ;;  %v3449_v19 = vld [vmem:[%s3263_s14 + $0x10] sm:$0xff]   ;;  %v3458_v20 = vld [vmem:[%s3714_s2 + $0xb8] sm:$0xff]   ;;  %v3470_v21 = vld [vmem:[%s3714_s2 + $0xe0] sm:$0xff]  }
  0x47   : > { %v2973_v61 = vld [vmem:[%s3297_s30 + $0xc] sm:$0xff]   ;;  %v2975_v0 = vld [vmem:[%s3297_s30 + $0x14] ss:$0 sps:$4 sm:$0x33]   ;;  %v2983_v3 = vld [vmem:[%s3297_s30] sm:$0xff]   ;;  %s3663_s17 = scalar_lea.vmem %s3716_s4, %s2882_s28 }
  0x48   : > { %v2985_v12 = vld [vmem:[%s3297_s30 + $0x8] ss:$0 sps:$4 sm:$0x33]   ;;  %v2993_v16 = vld [vmem:[%s3297_s30 + $0x18] sm:$0xff]   ;;  %v3494_v26 = vld [vmem:[%s3714_s2 + $0xf0] sm:$0xff]  }
  0x49   : > { %2571 = vmatpush3.bf16.msra.mxu0 %v2960_v44  ;;  %2795 = vmatpush3.bf16.msra.mxu1 %v2960_v44  ;;  %v3473_v22 = vld [vmem:[%s3263_s14 + $0x18] sm:$0xff]   ;;  %v2995_v23 = vld [vmem:[%s3297_s30 + $0x20] ss:$0 sps:$4 sm:$0x33]   ;;  %v3481_v24 = vld [vmem:[%s3714_s2 + $0xe8] sm:$0xff]  }
  0x4a   : > { %2592 = vmatprep.subr.bf16.mxu0 %v3081_v41  ;;  %2676 = vmatprep.subr.bf16.mxu1 %v3280_v46  ;;  %v3001_v25 = vld [vmem:[%s3297_s30 + $0x24] sm:$0xff]   ;;  %v2446_v28 = vld [vmem:[%s3263_s14 + $0x30] sm:$0xc]  ;;  %v3506_v29 = vld [vmem:[%s3714_s2 + $0xf8] sm:$0xff]   ;;  %v1729_v55 = vrot.slane %v3473_v22, 2 }
  0x4b   : > { %v3498_v27 = vld [vmem:[%s3263_s14 + $0x20] sm:$0xff]   ;;  %v2447_v30 = vcombine.low %v2446_v28, %v3322_v56  ;;  %v3002_v31 = vld [vmem:[%s3263_s14 + $0x50] sm:$0xff]   ;;  %v3003_v32 = vld [vmem:[%s3297_s30 + $0x2c] ss:$0 sps:$4 sm:$0x33]  }
  0x4c   : > { %2573 = vmatmul.mubr.msk.bf16.vlgmr.msra.gmra.mrb[0].mxu0 %vm671_vm1, %v2961_v48  ;;  %2585 = vmatmul.mubr.msk.bf16.vlgmr.msra.gmra.mrb[0].mxu1 %vm671_vm1, %v3275_v45  ;;  %v3004_v35 = vld [vmem:[%s3714_s2 + $0xc0] sm:$0xff]   ;;  %v2311_v37 = vld [vmem:[%s3263_s14 + $0x58] sm:$0xf]  ;;  %v2312_v38 = vld [vmem:[%s3263_s14 + $0x5c] sm:$0xf]  ;;  %v1643_v48 = vsel %vm1638_vm2, %v1640_v34, %v1642_v49  ;;  %v1727_v49 = vrot.slane %v3449_v19, 2 }
  0x4d   : > { %2593 = vmatpush3.bf16.msra.mxu0 %v2964_v51  ;;  %2677 = vmatpush3.bf16.msra.mxu1 %v3280_v46  ;;  %v1639_v33 = vrot.slane %v2447_v30, 2  ;;  %v3006_v39 = vld [vmem:[%s3714_s2 + $0xc8] sm:$0xff]   ;;  %v2328_v40 = vcombine.low %v2311_v37, %v2312_v38  ;;  %v3009_v42 = vld [vmem:[%s3714_s2 + $0xd0] sm:$0xff]   ;;  %v3011_v43 = vld [vmem:[%s3714_s2 + $0xd8] sm:$0xff]  }
  0x4e   : > { %2678 = vmatprep.subr.bf16.mxu1 %v3304_v52  ;;  %2594 = vmatprep.subr.bf16.mxu0 %v3081_v41  ;;  %v3008_v44 = vld [vmem:[%s3263_s14 + $0x60] sm:$0xff]   ;;  %v3013_v56 = vld [vmem:[%s3263_s14 + $0x70] sm:$0xff]   ;;  %v3017_v8 = vld [vmem:[%s3263_s14 + $0x88] sm:$0xff]  }
  0x4f   : > { %2576 = vmatprep.mubr.msk.bf16.mxu0 %vm3082_vm0, %v3081_v41  ;;  %2588 = vmatprep.mubr.msk.bf16.mxu1 %vm3082_vm0, %v3081_v41  ;;  %v1641_v36 = vsel %vm1638_vm2, %v1639_v33, %v1640_v34 }
  0x51   : > { %2679 = vmatpush3.bf16.msra.mxu1 %v3304_v52  ;;  %2595 = vmatpush3.bf16.msra.mxu0 %v2966_v54 }
  0x52   : > { %2680 = vmatprep.subr.bf16.mxu1 %v3327_v57  ;;  %2596 = vmatprep.subr.bf16.mxu0 %v3081_v41 }
  0x54   : > { %2577 = vmatmul.mubr.msk.bf16.gmra.mrb[4].mxu0 %vm671_vm1, %v2282_v58  ;;  %2589 = vmatmul.mubr.msk.bf16.gmra.mrb[4].mxu1 %vm671_vm1, %v3285_v47  ;;  %v1730_v47 = vsel %vm1638_vm2, %v1727_v49, %v1729_v55 }
  0x55   : > { %2681 = vmatpush3.bf16.msra.mxu1 %v3327_v57  ;;  %2597 = vmatpush3.bf16.msra.mxu0 %v2971_v59 }
  0x56   : > { %2682 = vmatprep.subr.bf16.mxu1 %v3345_v60  ;;  %2580 = vmatprep.mubr.msk.bf16.mxu0 %vm3082_vm0, %v3081_v41 }
  0x57   : > { %2684 = vmatprep.mubr.msk.bf16.mxu1 %vm671_vm1, %v2973_v61  ;;  %2598 = vmatprep.subr.bf16.mxu0 %v3081_v41  ;;  %v3014_v61 = vld [vmem:[%s3263_s14 + $0x78] sm:$0xff]  }
  0x59   : > { %2683 = vmatpush3.bf16.msra.mxu1 %v3345_v60  ;;  %2599 = vmatpush3.bf16.msra.mxu0 %v2976_v62 }
  0x5a   : > { %2688 = vmatprep.subr.bf16.mxu1 %v3361_v63  ;;  %2620 = vmatprep.subr.bf16.mxu0 %v3081_v41 }
  0x5c   : > { %2581 = vmatmul.mubr.msk.bf16.gmra.mrb[8].mxu0 %vm671_vm1, %v3367_v1  ;;  %2685 = vmatmul.mubr.msk.bf16.vlgmr.msra.gmra.mrb[8].mxu1 %vm671_vm1, %v2975_v0  ;;  %v2343_v0 = vld [vmem:[%s3263_s14 + $0x80] sm:$0xf]  ;;  %v2344_v1 = vld [vmem:[%s3263_s14 + $0x84] sm:$0xf] }
  0x5d   : > { %2689 = vmatpush3.bf16.msra.mxu1 %v3361_v63  ;;  %2600 = vmatprep.mubr.msk.bf16.mxu0 %vm3082_vm0, %v3081_v41 }
  0x5e   : > { %2690 = vmatprep.subr.bf16.mxu1 %v3373_v2  ;;  %2696 = vmatprep.mubr.msk.bf16.mxu1 %vm671_vm1, %v2983_v3  ;;  %v2360_v3 = vcombine.low %v2343_v0, %v2344_v1 }
  0x61   : > { %2691 = vmatpush3.bf16.msra.mxu1 %v3373_v2 }
  0x62   : > { %2692 = vmatprep.subr.bf16.mxu1 %v3388_v4 }
  0x64   : > { %2601 = vmatmul.mubr.msk.bf16.vlgmr.msra.gmra.mrb[0].mxu0 %vm671_vm1, %v2978_v5 }
  0x65   : > { %2621 = vmatpush3.bf16.msra.mxu0 %v2980_v6  ;;  %2693 = vmatpush3.bf16.msra.mxu1 %v3388_v4 }
  0x66   : > { %2694 = vmatprep.subr.bf16.mxu1 %v3400_v7  ;;  %2604 = vmatprep.mubr.msk.bf16.mxu0 %vm3082_vm0, %v3081_v41 }
  0x67   : > { %2622 = vmatprep.subr.bf16.mxu0 %v3081_v41 }
  0x69   : > { %2695 = vmatpush3.bf16.msra.mxu1 %v3400_v7  ;;  %2623 = vmatpush3.bf16.msra.mxu0 %v2986_v10  ;;  %v1911_v10 = vrot.slane %v3017_v8, 2 }
  0x6a   : > { %2700 = vmatprep.subr.bf16.mxu1 %v3417_v11  ;;  %2624 = vmatprep.subr.bf16.mxu0 %v3081_v41 }
  0x6c   : > { %2605 = vmatmul.mubr.msk.bf16.gmra.mrb[4].mxu0 %vm671_vm1, %v2296_v13  ;;  %2697 = vmatmul.mubr.msk.bf16.vlgmr.msra.gmra.mrb[8].mxu1 %vm671_vm1, %v2985_v12  ;;  %v3020_v12 = vld [vmem:[%s3263_s14 + $0x98] sm:$0xff]  }
  0x6d   : > { %2701 = vmatpush3.bf16.msra.mxu1 %v3417_v11  ;;  %2608 = vmatprep.mubr.msk.bf16.mxu0 %vm3082_vm0, %v3081_v41 }
  0x6e   : > { %2702 = vmatprep.subr.bf16.mxu1 %v3427_v14  ;;  %2625 = vmatpush3.bf16.msra.mxu0 %v2991_v15  ;;  %v1915_v15 = vrot.slane %v3020_v12, 2 }
  0x6f   : > { %2708 = vmatprep.mubr.msk.bf16.mxu1 %vm671_vm1, %v2993_v16  ;;  %2626 = vmatprep.subr.bf16.mxu0 %v3081_v41 }
  0x71   : > { %2703 = vmatpush3.bf16.msra.mxu1 %v3427_v14 }
  0x72   : > { %2704 = vmatprep.subr.bf16.mxu1 %v3442_v17  ;;  %2627 = vmatpush3.bf16.msra.mxu0 %v2997_v18 }
  0x73   : > { %2648 = vmatprep.subr.bf16.mxu0 %v3081_v41 }
  0x74   : > { %2609 = vmatmul.mubr.msk.bf16.gmra.mrb[8].mxu0 %vm671_vm1, %v3449_v19 }
  0x75   : > { %2705 = vmatpush3.bf16.msra.mxu1 %v3442_v17  ;;  %2612 = vmatprep.mubr.msk.bf16.mxu0 %vm3082_vm0, %v3081_v41 }
  0x76   : > { %2706 = vmatprep.subr.bf16.mxu1 %v3458_v20 }
  0x79   : > { %2707 = vmatpush3.bf16.msra.mxu1 %v3458_v20 }
  0x7a   : > { %2712 = vmatprep.subr.bf16.mxu1 %v3470_v21 }
  0x7c   : > { %2613 = vmatmul.mubr.msk.bf16.gmra.mrb[12].mxu0 %vm671_vm1, %v3473_v22  ;;  %2709 = vmatmul.mubr.msk.bf16.vlgmr.msra.gmra.mrb[8].mxu1 %vm671_vm1, %v2995_v23 }
  0x7d   : > { %2713 = vmatpush3.bf16.msra.mxu1 %v3470_v21  ;;  %2616 = vmatprep.mubr.msk.bf16.mxu0 %vm3082_vm0, %v3081_v41 }
  0x7e   : > { %2714 = vmatprep.subr.bf16.mxu1 %v3481_v24  ;;  %2720 = vmatprep.mubr.msk.bf16.mxu1 %vm671_vm1, %v3001_v25 }
  0x81   : > { %2715 = vmatpush3.bf16.msra.mxu1 %v3481_v24 }
  0x82   : > { %2716 = vmatprep.subr.bf16.mxu1 %v3494_v26 }
  0x84   : > { %2617 = vmatmul.mubr.msk.bf16.gmra.mrb[16].mxu0 %vm671_vm1, %v3498_v27 }
  0x85   : > { %2717 = vmatpush3.bf16.msra.mxu1 %v3494_v26  ;;  %2628 = vmatprep.mubr.msk.bf16.mxu0 %vm3082_vm0, %v3081_v41 }
  0x86   : > { %2718 = vmatprep.subr.bf16.mxu1 %v3506_v29 }
  0x89   : > { %2719 = vmatpush3.bf16.msra.mxu1 %v3506_v29 }
  0x8a   : > { %2724 = vmatprep.subr.bf16.mxu1 %v3280_v46 }
  0x8c   : > { %2629 = vmatmul.mubr.msk.bf16.vlgmr.msra.gmra.mrb[0].mxu0 %vm671_vm1, %v3002_v31  ;;  %2721 = vmatmul.mubr.msk.bf16.vlgmr.msra.gmra.mrb[8].mxu1 %vm671_vm1, %v3003_v32 }
  0x8d   : > { %2649 = vmatpush3.bf16.msra.mxu0 %v3004_v35  ;;  %2725 = vmatpush3.bf16.msra.mxu1 %v3280_v46  ;;  %v1633_v46 = vld [vmem:[%s3263_s14 + $0x8] sm:$0xc] }
  0x8e   : > { %2726 = vmatprep.subr.bf16.mxu1 %v3304_v52  ;;  %2632 = vmatprep.mubr.msk.bf16.mxu0 %vm3082_vm0, %v3081_v41  ;;  %v2452_v51 = vcombine.low %v1633_v46, %v3405_v9 }
  0x8f   : > { %2650 = vmatprep.subr.bf16.mxu0 %v3081_v41  ;;  %2732 = vmatprep.mubr.msk.bf16.mxu1 %vm671_vm1, %v1641_v36 }
  0x90   : > { %v1726_v45 = vrot.slane %v2452_v51, 2 }
  0x91   : > { %2727 = vmatpush3.bf16.msra.mxu1 %v3304_v52  ;;  %2651 = vmatpush3.bf16.msra.mxu0 %v3006_v39  ;;  %v3010_v52 = vld [vmem:[%s3263_s14 + $0x68] sm:$0xff]  }
  0x92   : > { %2728 = vmatprep.subr.bf16.mxu1 %v3327_v57  ;;  %2652 = vmatprep.subr.bf16.mxu0 %v3081_v41  ;;  %v1728_v54 = vsel %vm1638_vm2, %v1726_v45, %v1727_v49 }
  0x94   : > { %2633 = vmatmul.mubr.msk.bf16.gmra.mrb[4].mxu0 %vm671_vm1, %v2328_v40 }
  0x95   : > { %2729 = vmatpush3.bf16.msra.mxu1 %v3327_v57  ;;  %2636 = vmatprep.mubr.msk.bf16.mxu0 %vm3082_vm0, %v3081_v41  ;;  %v2457_v57 = vld [vmem:[%s3263_s14 + $0x58] sm:$0xc] }
  0x96   : > { %2730 = vmatprep.subr.bf16.mxu1 %v3345_v60  ;;  %2653 = vmatpush3.bf16.msra.mxu0 %v3009_v42  ;;  %v2458_v58 = vcombine.low %v2457_v57, %v2312_v38 }
  0x97   : > { %2654 = vmatprep.subr.bf16.mxu0 %v3081_v41 }
  0x98   : > { %v1814_v59 = vrot.slane %v2458_v58, 2 }
  0x99   : > { %2731 = vmatpush3.bf16.msra.mxu1 %v3345_v60  ;;  %v1815_v60 = vrot.slane %v3008_v44, 2 }
  0x9a   : > { %2740 = vmatprep.subr.bf16.mxu1 %v3361_v63  ;;  %2655 = vmatpush3.bf16.msra.mxu0 %v3011_v43 }
  0x9b   : > { %v1816_v62 = vsel %vm1638_vm2, %v1814_v59, %v1815_v60 }
  0x9c   : > { %2637 = vmatmul.mubr.msk.bf16.gmra.mrb[8].mxu0 %vm671_vm1, %v3008_v44  ;;  %2733 = vmatmul.mubr.msk.bf16.vlgmr.msra.gmra.mrb[12].mxu1 %vm671_vm1, %v1643_v48 }
  0x9d   : > { %2741 = vmatpush3.bf16.msra.mxu1 %v3361_v63  ;;  %2640 = vmatprep.mubr.msk.bf16.mxu0 %vm3082_vm0, %v3081_v41  ;;  %v1817_v63 = vrot.slane %v3010_v52, 2 }
  0x9e   : > { %2742 = vmatprep.subr.bf16.mxu1 %v3373_v2  ;;  %2736 = vmatprep.mubr.msk.bf16.mxu1 %vm671_vm1, %v3311_v53  ;;  %v1731_v53 = vrot.slane %v3498_v27, 2 }
  0x9f   : > { %v1818_v5 = vsel %vm1638_vm2, %v1815_v60, %v1817_v63  ;;  %v3654_v60 = vld [vmem:[%s3715_s3] ss:$0 sm:$0xff] }
  0xa1   : > { %2743 = vmatpush3.bf16.msra.mxu1 %v3373_v2  ;;  %v1819_v2 = vrot.slane %v3013_v56, 2 }
  0xa2   : > { %2744 = vmatprep.subr.bf16.mxu1 %v3388_v4 }
  0xa3   : > { %v1820_v6 = vsel %vm1638_vm2, %v1817_v63, %v1819_v2 }
  0xa4   : > { %2641 = vmatmul.mubr.msk.bf16.gmra.mrb[12].mxu0 %vm671_vm1, %v3010_v52  ;;  %2737 = vmatmul.mubr.msk.bf16.gmra.mrb[16].mxu1 %vm671_vm1, %v1644_v50  ;;  %v1732_v50 = vsel %vm1638_vm2, %v1729_v55, %v1731_v53 }
  0xa5   : > { %2745 = vmatpush3.bf16.msra.mxu1 %v3388_v4  ;;  %2644 = vmatprep.mubr.msk.bf16.mxu0 %vm3082_vm0, %v3081_v41  ;;  %v2463_v4 = vld [vmem:[%s3263_s14 + $0x80] sm:$0xc] }
  0xa6   : > { %2746 = vmatprep.subr.bf16.mxu1 %v3400_v7  ;;  %2748 = vmatprep.mubr.msk.bf16.mxu1 %vm671_vm1, %v1728_v54 }
  0xa9   : > { %2747 = vmatpush3.bf16.msra.mxu1 %v3400_v7  ;;  %v2464_v7 = vcombine.low %v2463_v4, %v2344_v1 }
  0xaa   : > { %2756 = vmatprep.subr.bf16.mxu1 %v3417_v11 }
  0xab   : > { %v1910_v9 = vrot.slane %v2464_v7, 2 }
  0xac   : > { %2645 = vmatmul.mubr.msk.bf16.gmra.mrb[20].mxu0 %vm671_vm1, %v3013_v56  ;;  %2749 = vmatmul.mubr.msk.bf16.vlgmr.msra.gmra.mrb[12].mxu1 %vm671_vm1, %v1730_v47 }
  0xad   : > { %2757 = vmatpush3.bf16.msra.mxu1 %v3417_v11  ;;  %2656 = vmatprep.mubr.msk.bf16.mxu0 %vm3082_vm0, %v3081_v41  ;;  %v3019_v11 = vld [vmem:[%s3263_s14 + $0x90] sm:$0xff]   ;;  %v1912_v13 = vsel %vm1638_vm2, %v1910_v9, %v1911_v10 }
  0xae   : > { %2758 = vmatprep.subr.bf16.mxu1 %v3427_v14  ;;  %2752 = vmatprep.mubr.msk.bf16.mxu1 %vm671_vm1, %v1732_v50 }
  0xb1   : > { %2759 = vmatpush3.bf16.msra.mxu1 %v3427_v14  ;;  %v1913_v14 = vrot.slane %v3019_v11, 2 }
  0xb2   : > { %2760 = vmatprep.subr.bf16.mxu1 %v3442_v17 }
  0xb3   : > { %v1914_v16 = vsel %vm1638_vm2, %v1911_v10, %v1913_v14 }
  0xb4   : > { %2657 = vmatmul.mubr.msk.bf16.vlgmr.msra.gmra.mrb[0].mxu0 %vm671_vm1, %v3014_v61  ;;  %2753 = vmatmul.mubr.msk.bf16.gmra.mrb[16].mxu1 %vm671_vm1, %v1731_v53 }
  0xb5   : > { %2761 = vmatpush3.bf16.msra.mxu1 %v3442_v17  ;;  %2660 = vmatprep.mubr.msk.bf16.mxu0 %vm3082_vm0, %v3081_v41  ;;  %v1916_v17 = vsel %vm1638_vm2, %v1913_v14, %v1915_v15 }
  0xb6   : > { %2762 = vmatprep.subr.bf16.mxu1 %v3458_v20  ;;  %2764 = vmatprep.mubr.msk.bf16.mxu1 %vm671_vm1, %v1816_v62 }
  0xb9   : > { %2763 = vmatpush3.bf16.msra.mxu1 %v3458_v20 }
  0xba   : > { %2772 = vmatprep.subr.bf16.mxu1 %v3470_v21 }
  0xbc   : > { %2661 = vmatmul.mubr.msk.bf16.gmra.mrb[4].mxu0 %vm671_vm1, %v2360_v3  ;;  %2765 = vmatmul.mubr.msk.bf16.vlgmr.msra.gmra.mrb[12].mxu1 %vm671_vm1, %v1818_v5 }
  0xbd   : > { %2773 = vmatpush3.bf16.msra.mxu1 %v3470_v21  ;;  %2664 = vmatprep.mubr.msk.bf16.mxu0 %vm3082_vm0, %v3081_v41 }
  0xbe   : > { %2774 = vmatprep.subr.bf16.mxu1 %v3481_v24  ;;  %2768 = vmatprep.mubr.msk.bf16.mxu1 %vm671_vm1, %v1820_v6 }
  0xc1   : > { %2775 = vmatpush3.bf16.msra.mxu1 %v3481_v24 }
  0xc2   : > { %2776 = vmatprep.subr.bf16.mxu1 %v3494_v26 }
  0xc4   : > { %2665 = vmatmul.mubr.msk.bf16.gmra.mrb[8].mxu0 %vm671_vm1, %v3017_v8  ;;  %2769 = vmatmul.mubr.msk.bf16.gmra.mrb[16].mxu1 %vm671_vm1, %v1819_v2 }
  0xc5   : > { %2777 = vmatpush3.bf16.msra.mxu1 %v3494_v26  ;;  %2668 = vmatprep.mubr.msk.bf16.mxu0 %vm3082_vm0, %v3081_v41 }
  0xc6   : > { %2778 = vmatprep.subr.bf16.mxu1 %v3506_v29  ;;  %2780 = vmatprep.mubr.msk.bf16.mxu1 %vm671_vm1, %v1912_v13 }
  0xc9   : > { %2779 = vmatpush3.bf16.msra.mxu1 %v3506_v29 }
  0xcc   : > { %2669 = vmatmul.mubr.msk.bf16.gmra.mrb[12].mxu0 %vm671_vm1, %v3019_v11  ;;  %2781 = vmatmul.mubr.msk.bf16.vlgmr.msra.gmra.mrb[12].mxu1 %vm671_vm1, %v1914_v16 }
  0xcd   : > { %2672 = vmatprep.mubr.msk.bf16.mxu0 %vm3082_vm0, %v3081_v41  ;;  %2784 = vmatprep.mubr.msk.bf16.mxu1 %vm671_vm1, %v1916_v17 }
  0xd4   : > { %2673 = vmatmul.mubr.msk.bf16.gmra.mrb[24].mxu0 %vm671_vm1, %v3020_v12  ;;  %2785 = vmatmul.mubr.msk.bf16.gmra.mrb[16].mxu1 %vm671_vm1, %v1915_v15 }
 0x11f   : > { %v745_v18 = vpop.f32.mrb[0].mxu1 }
 0x120   : > { %v2586_v19 = vpop.f32.mrb[1].mxu1 }
 0x121   : > { %v748_v20 = vpop.f32.mrb[2].mxu1 }
 0x122   : > { %v2587_v21 = vpop.f32.mrb[3].mxu1 }
 0x127   : > { %v753_v22 = vpop.f32.mrb[4].mxu1 }
 0x128   : > { %v2590_v23 = vpop.f32.mrb[5].mxu1 }
 0x129   : > { %v756_v24 = vpop.f32.mrb[6].mxu1 }
 0x12a   : > { %v2591_v25 = vpop.f32.mrb[7].mxu1 }
 0x157   : > { %v890_v26 = vpop.f32.mrb[16].mxu0 }
 0x158   : > { %v891_v27 = vadd.f32 %v890_v26, %v753_v22  ;;  %v2618_v28 = vpop.f32.mrb[17].mxu0 }
 0x159   : > { %v893_v29 = vpop.f32.mrb[18].mxu0 }
 0x15a   : > { %v894_v30 = vadd.f32 %v893_v29, %v756_v24  ;;  %v2619_v41 = vpop.f32.mrb[19].mxu0 }
 0x15f   : > { %v2722_v31 = vpop.f32.mrb[8].mxu1 }
 0x160   : > { %v1615_v32 = vpop.f32.mrb[9].mxu1  ;;  %v2057_v35 = vrot.slane %v2722_v31, 4 }
 0x161   : > { %v2723_v33 = vpop.f32.mrb[10].mxu1  ;;  %v2054_v36 = vrot.slane %v1615_v32, 4 }
 0x162   : > { %v1618_v34 = vpop.f32.mrb[11].mxu1 }
 0x163   : > { %v2055_v37 = vrot.slane %v1618_v34, 4 }
 0x165   : > { %v3645_v38 = vsel %vm2053_vm3, %v2054_v36, %v2055_v37  ;;  %v3647_v39 = vsel %vm2053_vm3, %v2055_v37, %v2057_v35 }
 0x17f   : > { %v1047_v40 = vpop.f32.mrb[20].mxu0 }
 0x180   : > { %v1062_v42 = vadd.f32 %v1047_v40, %v891_v27  ;;  %v2646_v43 = vpop.f32.mrb[21].mxu0 }
 0x181   : > { %v1050_v44 = vpop.f32.mrb[22].mxu0 }
 0x182   : > { %v3649_v46 = vadd.f32 %v1050_v44, %v894_v30  ;;  %v2647_v48 = vpop.f32.mrb[23].mxu0 }
 0x187   : > { %v1182_v51 = vpop.f32.mrb[0].mxu0 }
 0x188   : > { %v2658_v45 = vpop.f32.mrb[1].mxu0 }
 0x189   : > { %v1185_v49 = vpop.f32.mrb[2].mxu0 }
 0x18a   : > { %v2659_v52 = vpop.f32.mrb[3].mxu0 }
 0x18f   : > { %v1190_v54 = vpop.f32.mrb[4].mxu0 }
 0x190   : > { %v2662_v55 = vpop.f32.mrb[5].mxu0 }
 0x191   : > { %v1193_v53 = vpop.f32.mrb[6].mxu0 }
 0x192   : > { %v2663_v56 = vpop.f32.mrb[7].mxu0 }
 0x197   : > { %v1198_v57 = vpop.f32.mrb[8].mxu0 }
 0x198   : > { %v2666_v47 = vpop.f32.mrb[9].mxu0 }
 0x199   : > { %v1201_v50 = vpop.f32.mrb[10].mxu0 }
 0x19a   : > { %v2667_v58 = vpop.f32.mrb[11].mxu0 }
 0x19f   : > { %v1206_v59 = vpop.f32.mrb[12].mxu0  ;;  %v2782_v61 = vpop.f32.mrb[12].mxu1 }
 0x1a0   : > { %v2796_v62 = vadd.f32 %v1206_v59, %v745_v18  ;;  %v2004_v63 = vadd.f32 %v2782_v61, %v1190_v54  ;;  %v2670_v0 = vpop.f32.mrb[13].mxu0  ;;  %v1963_v1 = vpop.f32.mrb[13].mxu1 }
 0x1a1   : > { %v2002_v2 = vadd.f32 %v1963_v1, %v1182_v51  ;;  %v1209_v3 = vpop.f32.mrb[14].mxu0  ;;  %v2783_v4 = vpop.f32.mrb[14].mxu1 }
 0x1a2   : > { %v2018_v5 = vadd.f32 %v3654_v60, %v2004_v63  ;;  %v2797_v6 = vadd.f32 %v1209_v3, %v748_v20  ;;  %v2005_v7 = vadd.f32 %v2783_v4, %v1193_v53  ;;  %v2671_v8 = vpop.f32.mrb[15].mxu0  ;;  %v1966_v9 = vpop.f32.mrb[15].mxu1 }
 0x1a3   : > { %v2016_v10 = vadd.f32 %v3654_v60, %v2002_v2  ;;  %v2003_v11 = vadd.f32 %v1966_v9, %v1185_v49 }
 0x1a4   : > { %v2026_v12 = vmul.f32 0.2, %v2018_v5  ;;  %v2062_v13 = vadd.f32 %v2797_v6, %v2054_v36  ;;  %v2019_v14 = vadd.f32 %v3654_v60, %v2005_v7 }
 0x1a5   : > { %v2024_v15 = vmul.f32 0.2, %v2016_v10  ;;  %v2017_v16 = vadd.f32 %v3654_v60, %v2003_v11 }
 0x1a6   : > { %v2034_v17 = vmax.f32 %v2018_v5, %v2026_v12  ;;  %v2065_v18 = vadd.f32 %v3654_v60, %v2062_v13  ;;  %v2027_v19 = vmul.f32 0.2, %v2019_v14 }
 0x1a7   : > { %v2032_v20 = vmax.f32 %v2016_v10, %v2024_v15  ;;  %v2025_v21 = vmul.f32 0.2, %v2017_v16  ;;  %v1214_v22 = vpop.f32.mrb[24].mxu0  ;;  %v2786_v23 = vpop.f32.mrb[16].mxu1 }
 0x1a8   : > { %2043 = vst.msk [vmem:[%s3663_s17 + $0x10] sm:$0xff] %vm2040_vm4, %v2034_v17  ;;  %v2068_v24 = vmul.f32 0.2, %v2065_v18  ;;  %v2035_v25 = vmax.f32 %v2019_v14, %v2027_v19  ;;  %v1229_v26 = vadd.f32 %v1214_v22, %v1062_v42  ;;  %v2008_v27 = vadd.f32 %v2796_v62, %v2786_v23  ;;  %v2674_v28 = vpop.f32.mrb[25].mxu0  ;;  %v1979_v29 = vpop.f32.mrb[17].mxu1 }
 0x1a9   : > { %2041 = vst.msk [vmem:[%s3663_s17] sm:$0xff] %vm2040_vm4, %v2032_v20  ;;  %v2033_v30 = vmax.f32 %v2017_v16, %v2025_v21  ;;  %v2006_v41 = vadd.f32 %v1979_v29, %v1198_v57  ;;  %v1217_v31 = vpop.f32.mrb[26].mxu0  ;;  %v2787_v32 = vpop.f32.mrb[18].mxu1 }
 0x1aa   : > { %v2071_v33 = vmax.f32 %v2065_v18, %v2068_v24  ;;  %2044 = vst.msk [vmem:[%s3663_s17 + $0x18] sm:$0xff] %vm2040_vm4, %v2035_v25  ;;  %v2063_v34 = vadd.f32 %v3645_v38, %v1229_v26  ;;  %v2022_v35 = vadd.f32 %v3654_v60, %v2008_v27  ;;  %v1230_v36 = vadd.f32 %v1217_v31, %v3649_v46  ;;  %v2675_v37 = vpop.f32.mrb[27].mxu0  ;;  %v1982_v40 = vpop.f32.mrb[19].mxu1 }
 0x1ab   : > { %2042 = vst.msk [vmem:[%s3663_s17 + $0x8] sm:$0xff] %vm2040_vm4, %v2033_v30  ;;  %v2020_v42 = vadd.f32 %v3654_v60, %v2006_v41  ;;  %v2009_v43 = vadd.f32 %v2797_v6, %v2787_v32  ;;  %v2007_v44 = vadd.f32 %v1982_v40, %v1201_v50 }
 0x1ac   : > { %2075 = vst.msk [vmem:[%s3663_s17 + $0x38] sm:$0xf0] %vm2074_vm5, %v2071_v33  ;;  %v2066_v48 = vadd.f32 %v3654_v60, %v2063_v34  ;;  %v2030_v51 = vmul.f32 0.2, %v2022_v35  ;;  %v2064_v38 = vadd.f32 %v3647_v39, %v1230_v36 }
 0x1ad   : > { %v2028_v45 = vmul.f32 0.2, %v2020_v42  ;;  %v2023_v46 = vadd.f32 %v3654_v60, %v2009_v43  ;;  %v2021_v49 = vadd.f32 %v3654_v60, %v2007_v44 }
 0x1ae   : > { %v2069_v52 = vmul.f32 0.2, %v2066_v48  ;;  %v2038_v54 = vmax.f32 %v2022_v35, %v2030_v51  ;;  %v2067_v55 = vadd.f32 %v3654_v60, %v2064_v38 }
 0x1af   : > { %v2036_v53 = vmax.f32 %v2020_v42, %v2028_v45  ;;  %v2031_v56 = vmul.f32 0.2, %v2023_v46  ;;  %v2029_v57 = vmul.f32 0.2, %v2021_v49 }
 0x1b0   : > { %v2072_v47 = vmax.f32 %v2066_v48, %v2069_v52  ;;  %2047 = vst.msk [vmem:[%s3663_s17 + $0x30] sm:$0xff] %vm2040_vm4, %v2038_v54  ;;  %v2070_v39 = vmul.f32 0.2, %v2067_v55 }
 0x1b1   : > { %2045 = vst.msk [vmem:[%s3663_s17 + $0x20] sm:$0xff] %vm2040_vm4, %v2036_v53  ;;  %v2039_v50 = vmax.f32 %v2023_v46, %v2031_v56  ;;  %v2037_v58 = vmax.f32 %v2021_v49, %v2029_v57 }
 0x1b2   : > { %2076 = vst.msk [vmem:[%s3663_s17 + $0x40] sm:$0xff] %vm2040_vm4, %v2072_v47  ;;  %v2073_v59 = vmax.f32 %v2067_v55, %v2070_v39 }
 0x1b3   : > { %2049 = vst.msk [vmem:[%s3663_s17 + $0x38] sm:$0xf] %vm2048_vm6, %v2039_v50 }
 0x1b4   : > { %2046 = vst.msk [vmem:[%s3663_s17 + $0x28] sm:$0xff] %vm2040_vm4, %v2037_v58  ;;  %2077 = vst.msk [vmem:[%s3663_s17 + $0x48] sm:$0xff] %vm2040_vm4, %v2073_v59 }
 0x1b5 PF: > { %s14_s19 = sadd.s32 1, %s3075_s19   ;;  %s3717_s15 = smov %s3063_s16 }
 0x1b6   : > { %p11_p11 = scmp.ge.s32.totalorder %s14_s19, 4   ;;  %s3718_s16 = smov %s3143_s23 }
 0x1b7   : > { %s3719_s17 = smov %s3071_s18  ;;  %s3720_s18 = smov %s3722_s20 }
 0x1b8   :  { %13 = sbr.rel (!%p11_p11) target bundleno = 3 (0x3), region = 185 }

// kernel: sub_discriminator_forward.7
= control target key start
LH: loop header
LB: loop body
LE: loop exit
PB: predicated region body
PF: predicated region fallthrough
CT: control target
= control target key end

     0   :  { %s1224_s14 = smov 0   ;;  %s1454_s0 = inlined_call_operand.vmem [shape: bf16[2,2,1024], index: 0, kind: input, shape index: {}]   ;;  %s1455_s1 = inlined_call_operand.vmem [shape: bf16[1024,1], index: 1, kind: input, shape index: {}]   ;;  %s1456_s2 = inlined_call_operand.<no memory space> [shape: f32[1,1], index: 2, kind: input, shape index: {}]   ;;  %s1457_s3 = inlined_call_operand.vmem [shape: f32[2,1,1], index: 3, kind: output, shape index: {}]  }
   0x1   :  { %v8_v0 = vstv %s1456_s2 }
   0x2   :  { %9 = vst [vmem:[#allocation2] sm:$0x1] %v8_v0 }
   0x3 LB: > { %s958_s15 = sadd.s32 4294967295, %s1198_s14   ;;  %p962_p0 = scmp.ge.s32.totalorder %s1198_s14, 1  ;;  %s1198_s14 = sphi %s1224_s14, %s15_s14  }
   0x4   : > { %p138_p1 = scmp.lt.s32.totalorder %s1198_s14, 3 }
   0x6   : > { %p139_p2 = pnand %p962_p0, %p138_p1 }
   0x7   : > { %v1127_v1 = vld [vmem:[%s1455_s1 + $0x40] sm:$0xff] (!%p139_p2)   ;;  %v1131_v5 = vld [vmem:[%s1455_s1 + $0x48] sm:$0xff] (!%p139_p2)   ;;  %v1135_v9 = vld [vmem:[%s1455_s1 + $0x50] sm:$0xff] (!%p139_p2)   ;;  %p159_p3 = scmp.lt.s32.totalorder (!%p139_p2), %s958_s15, 1  ;;  %v301_v29 = vlaneseq (!%p139_p2)  ;;  %v1200_v37 = vmov (!%p139_p2), 1966171168  }
   0x8   : > { %142 = sbr.rel (%p139_p2) target bundleno = 310 (0x136), region = 32  ;;  %v1128_v2 = vld [vmem:[%s1455_s1 + $0xc0] sm:$0xff] (!%p139_p2)   ;;  %1030 = vmatprep.subr.bf16.mxu0 (!%p139_p2), %v1127_v1  ;;  %v1132_v6 = vld [vmem:[%s1455_s1 + $0xc8] sm:$0xff] (!%p139_p2)   ;;  %v1136_v10 = vld [vmem:[%s1455_s1 + $0xd0] sm:$0xff] (!%p139_p2)   ;;  %v299_v38 = vunpack.c.l.s4 (!%p139_p2), %v1200_v37  ;;  %vm898_vm0 = vcmask (!%p139_p2), 1024   ;;  %vm909_vm1 = vcmask (!%p139_p2), 0  }
   0x9   : > { %v1129_v3 = vld [vmem:[%s1455_s1] sm:$0xff] (!%p139_p2)   ;;  %1052 = vmatprep.subr.bf16.mxu1 (!%p139_p2), %v1128_v2  ;;  %v1133_v7 = vld [vmem:[%s1455_s1 + $0x8] sm:$0xff] (!%p139_p2)   ;;  %v1137_v11 = vld [vmem:[%s1455_s1 + $0x10] sm:$0xff] (!%p139_p2)   ;;  %v302_v34 = vshrl.u32 (!%p139_p2), %v301_v29, 7 }
   0xa   : > { %v1130_v4 = vld [vmem:[%s1455_s1 + $0x80] sm:$0xff] (!%p139_p2)   ;;  %1031 = vmatpush3.bf16.msra.mxu0 (!%p139_p2), %v1129_v3  ;;  %v1134_v8 = vld [vmem:[%s1455_s1 + $0x88] sm:$0xff] (!%p139_p2)   ;;  %v1138_v12 = vld [vmem:[%s1455_s1 + $0x90] sm:$0xff] (!%p139_p2)   ;;  %v300_v41 = vunpack.c.0.s8 (!%p139_p2), %v299_v38 }
   0xb   : > { %1053 = vmatpush3.bf16.msra.mxu1 (!%p139_p2), %v1130_v4  ;;  %1032 = vmatprep.subr.bf16.mxu0 (!%p139_p2), %v1131_v5  ;;  %v1139_v13 = vld [vmem:[%s1455_s1 + $0x58] sm:$0xff] (!%p139_p2)   ;;  %v1143_v17 = vld [vmem:[%s1455_s1 + $0x60] sm:$0xff] (!%p139_p2)   ;;  %v1147_v21 = vld [vmem:[%s1455_s1 + $0x68] sm:$0xff] (!%p139_p2)  }
   0xc   : > { %1054 = vmatprep.subr.bf16.mxu1 (!%p139_p2), %v1132_v6  ;;  %v1140_v14 = vld [vmem:[%s1455_s1 + $0xd8] sm:$0xff] (!%p139_p2)   ;;  %v1144_v18 = vld [vmem:[%s1455_s1 + $0xe0] sm:$0xff] (!%p139_p2)   ;;  %v1148_v22 = vld [vmem:[%s1455_s1 + $0xe8] sm:$0xff] (!%p139_p2)   ;;  %v1344_v42 = vsub.s32 (!%p139_p2), %v300_v41, %v302_v34 }
   0xd   : > { %v1141_v15 = vld [vmem:[%s1455_s1 + $0x18] sm:$0xff] (!%p139_p2)   ;;  %v1145_v19 = vld [vmem:[%s1455_s1 + $0x20] sm:$0xff] (!%p139_p2)   ;;  %v1149_v23 = vld [vmem:[%s1455_s1 + $0x28] sm:$0xff] (!%p139_p2)  }
   0xe   : > { %1033 = vmatpush3.bf16.msra.mxu0 (!%p139_p2), %v1133_v7  ;;  %v1142_v16 = vld [vmem:[%s1455_s1 + $0x98] sm:$0xff] (!%p139_p2)   ;;  %v1146_v20 = vld [vmem:[%s1455_s1 + $0xa0] sm:$0xff] (!%p139_p2)   ;;  %v1150_v24 = vld [vmem:[%s1455_s1 + $0xa8] sm:$0xff] (!%p139_p2)  }
   0xf   : > { %1055 = vmatpush3.bf16.msra.mxu1 %v1134_v8  ;;  %1034 = vmatprep.subr.bf16.mxu0 %v1135_v9  ;;  %s1459_s15 = smov (!%p159_p3, %s958_s15), 1  ;;  %v1151_v25 = vld [vmem:[%s1455_s1 + $0x70] sm:$0xff]   ;;  %v1155_v30 = vld [vmem:[%s1455_s1 + $0x78] sm:$0xff]   ;;  %v1160_v36 = vld [vmem:[%s1455_s1 + $0x140] sm:$0xff]  }
  0x10   : > { %1056 = vmatprep.subr.bf16.mxu1 %v1136_v10  ;;  %v1152_v26 = vld [vmem:[%s1455_s1 + $0xf0] sm:$0xff]   ;;  %s963_s2 = sshll.u32 %s1459_s15, 3  ;;  %v1156_v31 = vld [vmem:[%s1455_s1 + $0xf8] sm:$0xff]   ;;  %v1161_v39 = vld [vmem:[%s1455_s1 + $0x1c0] sm:$0xff]   ;;  %s165_s19 = scalar_lea.vmem %s1457_s3, %s1459_s15 }
  0x11   : > { %v1153_v27 = vld [vmem:[%s1455_s1 + $0x30] sm:$0xff]   ;;  %s162_s26 = scalar_lea.vmem %s1454_s0, %s963_s2  ;;  %v1157_v32 = vld [vmem:[%s1455_s1 + $0x38] sm:$0xff]   ;;  %v1162_v49 = vld [vmem:[%s1455_s1 + $0x100] sm:$0xff]  }
  0x12   : > { %1035 = vmatpush3.bf16.msra.mxu0 %v1137_v11  ;;  %v1154_v28 = vld [vmem:[%s1455_s1 + $0xb0] sm:$0xff]   ;;  %v1158_v33 = vld [vmem:[%s1455_s1 + $0xb8] sm:$0xff]   ;;  %v167_v35 = vld [vmem:[%s162_s26] sm:$0xff] }
  0x13   : > { %1057 = vmatpush3.bf16.msra.mxu1 %v1138_v12  ;;  %1036 = vmatprep.subr.bf16.mxu0 %v1139_v13  ;;  %v297_v40 = vcombine.high %v167_v35, %v167_v35  ;;  %v304_v43 = vrot.slane %v167_v35, %v1344_v42  ;;  %v1164_v52 = vld [vmem:[%s1455_s1 + $0x148] sm:$0xff]   ;;  %v1163_v54 = vld [vmem:[%s1455_s1 + $0x180] sm:$0xff]   ;;  %v1168_v58 = vld [vmem:[%s1455_s1 + $0x150] sm:$0xff]  }
  0x14   : > { %1058 = vmatprep.subr.bf16.mxu1 %v1140_v14  ;;  %v1165_v55 = vld [vmem:[%s1455_s1 + $0x1c8] sm:$0xff]   ;;  %v1169_v60 = vld [vmem:[%s1455_s1 + $0x1d0] sm:$0xff]   ;;  %v1172_v62 = vld [vmem:[%s1455_s1 + $0x158] sm:$0xff]  }
  0x15   : > { %v1348_v44 = vrot.slane %v297_v40, %v1344_v42  ;;  %v312_v45 = vcombine.high %v304_v43, %v304_v43  ;;  %v320_v46 = vrot.slane %v304_v43, %v1344_v42  ;;  %v1166_v57 = vld [vmem:[%s1455_s1 + $0x108] sm:$0xff]   ;;  %v1170_v61 = vld [vmem:[%s1455_s1 + $0x110] sm:$0xff]   ;;  %v1173_v0 = vld [vmem:[%s1455_s1 + $0x1d8] sm:$0xff]  }
  0x16   : > { %1037 = vmatpush3.bf16.msra.mxu0 %v1141_v15  ;;  %v1167_v59 = vld [vmem:[%s1455_s1 + $0x188] sm:$0xff]   ;;  %v1171_v63 = vld [vmem:[%s1455_s1 + $0x190] sm:$0xff]   ;;  %v1174_v1 = vld [vmem:[%s1455_s1 + $0x118] sm:$0xff]  }
  0x17   : > { %1059 = vmatpush3.bf16.msra.mxu1 %v1142_v16  ;;  %1038 = vmatprep.subr.bf16.mxu0 %v1143_v17  ;;  %v313_v47 = vcombine.high %v1348_v44, %v1348_v44  ;;  %v334_v48 = vrot.slane %v312_v45, %v1344_v42  ;;  %v342_v51 = vcombine.high %v320_v46, %v320_v46  ;;  %v1176_v2 = vld [vmem:[%s1455_s1 + $0x160] sm:$0xff]   ;;  %v1175_v3 = vld [vmem:[%s1455_s1 + $0x198] sm:$0xff]   ;;  %v1180_v6 = vld [vmem:[%s1455_s1 + $0x168] sm:$0xff]  }
  0x18   : > { %1060 = vmatprep.subr.bf16.mxu1 %v1144_v18  ;;  %v1177_v4 = vld [vmem:[%s1455_s1 + $0x1e0] sm:$0xff]   ;;  %v1181_v8 = vld [vmem:[%s1455_s1 + $0x1e8] sm:$0xff]   ;;  %v1184_v10 = vld [vmem:[%s1455_s1 + $0x170] sm:$0xff]   ;;  %v327_v18 = vrot.slane %v1348_v44, %v1344_v42 }
  0x19   : > { %v341_v50 = vrot.slane %v313_v47, %v1344_v42  ;;  %770 = vmatprep.mubr.bf16.mxu0 %v334_v48  ;;  %v344_v53 = vcombine.high %v334_v48, %v334_v48  ;;  %v1178_v5 = vld [vmem:[%s1455_s1 + $0x120] sm:$0xff]   ;;  %v1182_v9 = vld [vmem:[%s1455_s1 + $0x128] sm:$0xff]   ;;  %v1185_v12 = vld [vmem:[%s1455_s1 + $0x1f0] sm:$0xff]  }
  0x1a   : > { %1039 = vmatpush3.bf16.msra.mxu0 %v1145_v19  ;;  %v1179_v7 = vld [vmem:[%s1455_s1 + $0x1a0] sm:$0xff]   ;;  %v1183_v11 = vld [vmem:[%s1455_s1 + $0x1a8] sm:$0xff]   ;;  %v1186_v13 = vld [vmem:[%s1455_s1 + $0x130] sm:$0xff]  }
  0x1b   : > { %1061 = vmatpush3.bf16.msra.mxu1 %v1146_v20  ;;  %1040 = vmatprep.subr.bf16.mxu0 %v1147_v21  ;;  %v345_v56 = vcombine.high %v341_v50, %v341_v50  ;;  %v1188_v14 = vld [vmem:[%s1455_s1 + $0x178] sm:$0xff]   ;;  %v1187_v15 = vld [vmem:[%s1455_s1 + $0x1b0] sm:$0xff]   ;;  %v343_v20 = vcombine.high %v327_v18, %v327_v18 }
  0x1c   : > { %1062 = vmatprep.subr.bf16.mxu1 %v1148_v22  ;;  %810 = vmatprep.mubr.bf16.mxu1 %v344_v53  ;;  %v1189_v16 = vld [vmem:[%s1455_s1 + $0x1f8] sm:$0xff]  }
  0x1d   : > { %v1190_v17 = vld [vmem:[%s1455_s1 + $0x138] sm:$0xff]  }
  0x1e   : > { %1041 = vmatpush3.bf16.msra.mxu0 %v1149_v23  ;;  %v1191_v19 = vld [vmem:[%s1455_s1 + $0x1b8] sm:$0xff]  }
  0x1f   : > { %1063 = vmatpush3.bf16.msra.mxu1 %v1150_v24  ;;  %1042 = vmatprep.subr.bf16.mxu0 %v1151_v25 }
  0x20   : > { %1064 = vmatprep.subr.bf16.mxu1 %v1152_v26 }
  0x22   : > { %1043 = vmatpush3.bf16.msra.mxu0 %v1153_v27 }
  0x23   : > { %1065 = vmatpush3.bf16.msra.mxu1 %v1154_v28  ;;  %1044 = vmatprep.subr.bf16.mxu0 %v1155_v30 }
  0x24   : > { %1066 = vmatprep.subr.bf16.mxu1 %v1156_v31 }
  0x26   : > { %1045 = vmatpush3.bf16.msra.mxu0 %v1157_v32 }
  0x27   : > { %1067 = vmatpush3.bf16.msra.mxu1 %v1158_v33  ;;  %1074 = vmatprep.subr.bf16.mxu0 %v1160_v36 }
  0x28   : > { %1096 = vmatprep.subr.bf16.mxu1 %v1161_v39 }
  0x29   : > { %771 = vmatmul.mubr.bf16.vlgmr.msra.gmra.mrb[0].mxu0 %v320_v46 }
  0x2a   : > { %1075 = vmatpush3.bf16.msra.mxu0 %v1162_v49  ;;  %811 = vmatmul.mubr.bf16.vlgmr.msra.gmra.mrb[0].mxu1 %v342_v51  ;;  %v907_v51 = vld [vmem:[#allocation2] sm:$0x1] }
  0x2b   : > { %1076 = vmatprep.subr.bf16.mxu0 %v1164_v52  ;;  %1097 = vmatpush3.bf16.msra.mxu1 %v1163_v54 }
  0x2c   : > { %850 = vmatprep.mubr.bf16.mxu0 %v341_v50  ;;  %1098 = vmatprep.subr.bf16.mxu1 %v1165_v55 }
  0x2d   : > { %890 = vmatprep.mubr.bf16.mxu1 %v345_v56 }
  0x2e   : > { %1077 = vmatpush3.bf16.msra.mxu0 %v1166_v57 }
  0x2f   : > { %1078 = vmatprep.subr.bf16.mxu0 %v1168_v58  ;;  %1099 = vmatpush3.bf16.msra.mxu1 %v1167_v59 }
  0x30   : > { %1100 = vmatprep.subr.bf16.mxu1 %v1169_v60 }
  0x32   : > { %1079 = vmatpush3.bf16.msra.mxu0 %v1170_v61 }
  0x33   : > { %1080 = vmatprep.subr.bf16.mxu0 %v1172_v62  ;;  %1101 = vmatpush3.bf16.msra.mxu1 %v1171_v63 }
  0x34   : > { %1102 = vmatprep.subr.bf16.mxu1 %v1173_v0 }
  0x36   : > { %1081 = vmatpush3.bf16.msra.mxu0 %v1174_v1 }
  0x37   : > { %1082 = vmatprep.subr.bf16.mxu0 %v1176_v2  ;;  %1103 = vmatpush3.bf16.msra.mxu1 %v1175_v3 }
  0x38   : > { %1104 = vmatprep.subr.bf16.mxu1 %v1177_v4 }
  0x3a   : > { %1083 = vmatpush3.bf16.msra.mxu0 %v1178_v5 }
  0x3b   : > { %1084 = vmatprep.subr.bf16.mxu0 %v1180_v6  ;;  %1105 = vmatpush3.bf16.msra.mxu1 %v1179_v7 }
  0x3c   : > { %1106 = vmatprep.subr.bf16.mxu1 %v1181_v8 }
  0x3e   : > { %1085 = vmatpush3.bf16.msra.mxu0 %v1182_v9 }
  0x3f   : > { %1086 = vmatprep.subr.bf16.mxu0 %v1184_v10  ;;  %1107 = vmatpush3.bf16.msra.mxu1 %v1183_v11 }
  0x40   : > { %1108 = vmatprep.subr.bf16.mxu1 %v1185_v12 }
  0x42   : > { %1087 = vmatpush3.bf16.msra.mxu0 %v1186_v13 }
  0x43   : > { %1088 = vmatprep.subr.bf16.mxu0 %v1188_v14  ;;  %1109 = vmatpush3.bf16.msra.mxu1 %v1187_v15 }
  0x44   : > { %1110 = vmatprep.subr.bf16.mxu1 %v1189_v16 }
  0x46   : > { %1089 = vmatpush3.bf16.msra.mxu0 %v1190_v17 }
  0x47   : > { %1111 = vmatpush3.bf16.msra.mxu1 %v1191_v19 }
  0x49   : > { %851 = vmatmul.mubr.bf16.vlgmr.msra.gmra.mrb[4].mxu0 %v327_v18 }
  0x4a   : > { %891 = vmatmul.mubr.bf16.vlgmr.msra.gmra.mrb[4].mxu1 %v343_v20 }
  0xfc   : > { %v1046_v21 = vpop.f32.mrb[0].mxu0 }
  0xfd   : > { %v1047_v22 = vpop.f32.mrb[1].mxu0  ;;  %v1068_v23 = vpop.f32.mrb[0].mxu1 }
  0xfe   : > { %v1048_v24 = vadd.f32 %v1047_v22, %v1046_v21  ;;  %v1049_v25 = vpop.f32.mrb[2].mxu0  ;;  %v1069_v26 = vpop.f32.mrb[1].mxu1 }
  0xff   : > { %v1050_v27 = vpop.f32.mrb[3].mxu0  ;;  %v1070_v28 = vadd.f32 %v1069_v26, %v1068_v23  ;;  %v1071_v29 = vpop.f32.mrb[2].mxu1 }
 0x100   : > { %v1072_v30 = vpop.f32.mrb[3].mxu1 }
 0x101   : > { %v813_v31 = vadd.f32 %v1070_v28, %v1048_v24 }
 0x11c   : > { %v1090_v32 = vpop.f32.mrb[4].mxu0 }
 0x11d   : > { %v1091_v33 = vpop.f32.mrb[5].mxu0  ;;  %v1112_v34 = vpop.f32.mrb[4].mxu1 }
 0x11e   : > { %v1092_v35 = vadd.f32 %v1091_v33, %v1090_v32  ;;  %v1093_v36 = vpop.f32.mrb[6].mxu0  ;;  %v1113_v37 = vpop.f32.mrb[5].mxu1 }
 0x11f   : > { %v1094_v38 = vpop.f32.mrb[7].mxu0  ;;  %v1114_v40 = vadd.f32 %v1113_v37, %v1112_v34  ;;  %v1115_v41 = vpop.f32.mrb[6].mxu1 }
 0x120   : > { %v853_v39 = vadd.f32 %v1092_v35, %v813_v31  ;;  %v1116_v42 = vpop.f32.mrb[7].mxu1 }
 0x122   : > { %v893_v43 = vadd.f32 %v1114_v40, %v853_v39 }
 0x124   : > { %v899_v44 = vsel %vm898_vm0, %v893_v43, 0.0 }
 0x125   : > { %v900_v45 = vrot.slane %v899_v44, 4 }
 0x127   : > { %v901_v46 = vadd.f32 %v900_v45, %v899_v44 }
 0x129   : > { %v902_v47 = vrot.slane %v901_v46, 2 }
 0x12b   : > { %v903_v48 = vadd.f32 %v902_v47, %v901_v46 }
 0x12d   : > { %v904_v49 = vrot.slane %v903_v48, 1 }
 0x12f   : > { %v905_v50 = vadd.f32 %v904_v49, %v903_v48 }
 0x131   : > { %v906_v52 = vmul.f32 0.5, %v905_v50 }
 0x133   : > { %v908_v53 = vadd.f32 %v907_v51, %v906_v52 }
 0x135   : > { %910 = vst.msk [vmem:[%s165_s19] sm:$0x1] %vm909_vm1, %v908_v53 }
 0x136 PF: > { %s15_s14 = sadd.s32 1, %s1198_s14  }
 0x137   : > { %p12_p4 = scmp.ge.s32.totalorder %s15_s14, 4  }
 0x139   :  { %14 = sbr.rel (!%p12_p4) target bundleno = 3 (0x3), region = 62 }

</bundles_post_ra>
